<compile_context>
chip_gen: v5e
topology: v5e:2x2
jax: 0.10.0
libtpu: 0.0.40
codegen_flags: <defaults>
</compile_context>

<pallas_src>
import functools
import math

import jax
import jax.numpy as jnp
from jax.experimental import pallas as pl
from jax.experimental.pallas import tpu as pltpu

# ---------------- small synthetic Longformer config ----------------
VOCAB = 256
HIDDEN = 128
N_HEADS = 4
HEAD_DIM = HIDDEN // N_HEADS
N_LAYERS = 2
INTERMEDIATE = 256
MAX_POS = 512
SEP_TOKEN_ID = 102
ATTN_WINDOW = 16                     # total window size -> one-sided = 8
ONE_SIDED_W = ATTN_WINDOW // 2
LN_EPS = 1e-5

_PARALLEL_1D = pltpu.CompilerParams(dimension_semantics=("parallel",))


def _row_tile(m, max_tile=256):
    """Largest row tile (multiple of 8, <= max_tile) dividing m."""
    for t in (max_tile, 128, 64, 32, 16, 8):
        if m % t == 0:
            return t
    return m


# ---------------- embedding LayerNorm kernel ----------------
def _ln_kernel(x_ref, g_ref, b_ref, o_ref, *, eps):
    x = x_ref[...]
    mean = jnp.mean(x, axis=-1, keepdims=True)
    var = jnp.mean(jnp.square(x - mean), axis=-1, keepdims=True)
    o_ref[...] = (x - mean) * jax.lax.rsqrt(var + eps) * g_ref[...] + b_ref[...]


def layernorm(x, gamma, beta, eps=LN_EPS):
    M, H = x.shape
    tm = _row_tile(M)
    return pl.pallas_call(
        functools.partial(_ln_kernel, eps=eps),
        out_shape=jax.ShapeDtypeStruct((M, H), jnp.float32),
        grid=(M // tm,),
        in_specs=[pl.BlockSpec((tm, H), lambda i: (i, 0)),
                  pl.BlockSpec((1, H), lambda i: (0, 0)),
                  pl.BlockSpec((1, H), lambda i: (0, 0))],
        out_specs=pl.BlockSpec((tm, H), lambda i: (i, 0)),
        compiler_params=_PARALLEL_1D,
    )(x, gamma.reshape(1, H), beta.reshape(1, H))


# ---------------- fused encoder layer kernel ----------------
def _encoder_layer_kernel(qend_ref, valid_ref, h_ref,
                          wqkv_ref, bqkv_ref, wao_ref, bao_ref, g1_ref, bt1_ref,
                          w1_ref, b1_ref, w2_ref, b2_ref, g2_ref, bt2_ref,
                          o_ref, *, n_heads, head_dim, scale, eps, window, seq_len):
    S = seq_len
    H = n_heads * head_dim
    b = pl.program_id(0)

    h = h_ref[...]                                                     # (S, H) f32 residual

    # ---- fused QKV projection (bf16 operands, f32 MXU accumulation) ----
    qkv = jnp.dot(h.astype(jnp.bfloat16), wqkv_ref[...],
                  preferred_element_type=jnp.float32) + bqkv_ref[...]  # (S, 3H) f32
    q_bf = (qkv[:, :H] * scale).astype(jnp.bfloat16)    # 128-lane-aligned register slices
    k_bf = qkv[:, H:2 * H].astype(jnp.bfloat16)
    v_bf = qkv[:, 2 * H:3 * H].astype(jnp.bfloat16)

    # ---- (local-window | global | valid) mask rebuilt in-kernel (O(S) DMA, not O(S^2)) ----
    qe = qend_ref[b] + 1                                 # first-SEP index (+1), SMEM scalar
    row = jax.lax.broadcasted_iota(jnp.int32, (S, S), 0)
    col = jax.lax.broadcasted_iota(jnp.int32, (S, S), 1)
    band = jnp.abs(row - col) <= window                  # sliding-window band
    glob_q = row > qe                                    # global query rows
    glob_k = col > qe                                    # global key columns
    valid_k = valid_ref[0] > 0.5                         # (1, S) valid keys
    allowed = (band | glob_q | glob_k) & valid_k
    bias = jnp.where(allowed, 0.0, -1e9)                 # additive f32 bias (S, S)

    # ---- per-head attention; results concatenated into one lane-dense (S, H) value ----
    # TODO(synk): HF uses separate query_global/key_global/value_global projections for
    #             global rows; local Q/K/V are reused here.
    # TODO(synk): dense (S,S) score formulation; at long S a key-tiled banded/flash-style
    #             inner loop would be required to fit VMEM (esp. v7x 64 MiB).
    outs = []
    for hd in range(n_heads):                            # static unroll over heads
        sl = slice(hd * head_dim, (hd + 1) * head_dim)
        s = jax.lax.dot_general(q_bf[:, sl], k_bf[:, sl],
                                dimension_numbers=(((1,), (1,)), ((), ())),
                                preferred_element_type=jnp.float32)      # (S, S)
        s = s + bias
        s = s - jnp.max(s, axis=-1, keepdims=True)
        p = jnp.exp(s)
        p = p / jnp.sum(p, axis=-1, keepdims=True)       # exact normalization
        outs.append(jnp.dot(p.astype(jnp.bfloat16), v_bf[:, sl],
                            preferred_element_type=jnp.float32))         # (S, dh)
    ctx = jnp.concatenate(outs, axis=-1)                 # (S, H) lane-dense

    # ---- attention output projection + residual + LayerNorm (f32 math) ----
    y = jnp.dot(ctx.astype(jnp.bfloat16), wao_ref[...],
                preferred_element_type=jnp.float32) + bao_ref[...] + h
    mean = jnp.mean(y, axis=-1, keepdims=True)
    var = jnp.mean(jnp.square(y - mean), axis=-1, keepdims=True)
    h1 = (y - mean) * jax.lax.rsqrt(var + eps) * g1_ref[...] + bt1_ref[...]

    # ---- FFN (intermediate never leaves VMEM) + residual + LayerNorm ----
    inter = jnp.dot(h1.astype(jnp.bfloat16), w1_ref[...],
                    preferred_element_type=jnp.float32) + b1_ref[...]
    # TODO(synk): HF Longformer uses erf-based GELU; tanh approximation used here.
    inter = jax.nn.gelu(inter, approximate=True)
    y2 = jnp.dot(inter.astype(jnp.bfloat16), w2_ref[...],
                 preferred_element_type=jnp.float32) + b2_ref[...] + h1
    mean2 = jnp.mean(y2, axis=-1, keepdims=True)
    var2 = jnp.mean(jnp.square(y2 - mean2), axis=-1, keepdims=True)
    o_ref[...] = (y2 - mean2) * jax.lax.rsqrt(var2 + eps) * g2_ref[...] + bt2_ref[...]


def encoder_layer(h, question_end, valid3, layer, seq_len):
    """One fused Longformer encoder layer.  h: (BC*S, H) f32 slab -> (BC*S, H) f32."""
    M, H = h.shape
    BC = M // seq_len
    H3 = 3 * H
    I = layer["inter_w"].shape[1]

    grid_spec = pltpu.PrefetchScalarGridSpec(
        num_scalar_prefetch=1,                           # question_end -> SMEM
        grid=(BC,),
        in_specs=[
            pl.BlockSpec((1, 1, seq_len), lambda b, qe: (b, 0, 0)),   # valid-key mask row
            pl.BlockSpec((seq_len, H), lambda b, qe: (b, 0)),          # activations
            pl.BlockSpec((H, H3), lambda b, qe: (0, 0)),               # W_qkv (bf16)
            pl.BlockSpec((1, H3), lambda b, qe: (0, 0)),               # b_qkv
            pl.BlockSpec((H, H), lambda b, qe: (0, 0)),                # W_attn_out (bf16)
            pl.BlockSpec((1, H), lambda b, qe: (0, 0)),                # b_attn_out
            pl.BlockSpec((1, H), lambda b, qe: (0, 0)),                # ln1 gamma
            pl.BlockSpec((1, H), lambda b, qe: (0, 0)),                # ln1 beta
            pl.BlockSpec((H, I), lambda b, qe: (0, 0)),                # W_inter (bf16)
            pl.BlockSpec((1, I), lambda b, qe: (0, 0)),                # b_inter
            pl.BlockSpec((I, H), lambda b, qe: (0, 0)),                # W_out (bf16)
            pl.BlockSpec((1, H), lambda b, qe: (0, 0)),                # b_out
            pl.BlockSpec((1, H), lambda b, qe: (0, 0)),                # ln2 gamma
            pl.BlockSpec((1, H), lambda b, qe: (0, 0)),                # ln2 beta
        ],
        out_specs=pl.BlockSpec((seq_len, H), lambda b, qe: (b, 0)),
    )
    kernel = functools.partial(
        _encoder_layer_kernel, n_heads=N_HEADS, head_dim=HEAD_DIM,
        scale=1.0 / math.sqrt(HEAD_DIM), eps=LN_EPS, window=ONE_SIDED_W,
        seq_len=seq_len)
    return pl.pallas_call(
        kernel,
        out_shape=jax.ShapeDtypeStruct((M, H), jnp.float32),
        grid_spec=grid_spec,
        compiler_params=_PARALLEL_1D,
    )(question_end, valid3, h,
      layer["qkv_w"], layer["qkv_b"].reshape(1, H3),
      layer["attn_out_w"], layer["attn_out_b"].reshape(1, H),
      layer["attn_ln_g"].reshape(1, H), layer["attn_ln_b"].reshape(1, H),
      layer["inter_w"], layer["inter_b"].reshape(1, I),
      layer["out_w"], layer["out_b"].reshape(1, H),
      layer["out_ln_g"].reshape(1, H), layer["out_ln_b"].reshape(1, H))


# ---------------- pooler + classifier kernel ----------------
def _pool_cls_kernel(x_ref, wp_ref, bp_ref, wc_ref, bc_ref, o_ref):
    pooled = jnp.tanh(
        jnp.dot(x_ref[...], wp_ref[...], preferred_element_type=jnp.float32) + bp_ref[...])
    # TODO(synk): N=1 classifier output is a masked 1-lane store; negligible at this size.
    o_ref[...] = jnp.dot(pooled, wc_ref[...],
                         preferred_element_type=jnp.float32) + bc_ref[...]


def pool_and_classify(cls_tokens, wp, bp, wc, bc):
    M, H = cls_tokens.shape
    return pl.pallas_call(
        _pool_cls_kernel,
        out_shape=jax.ShapeDtypeStruct((M, 1), jnp.float32),
        grid=(1,),
        in_specs=[pl.BlockSpec((M, H), lambda i: (0, 0)),
                  pl.BlockSpec((H, H), lambda i: (0, 0)),
                  pl.BlockSpec((1, H), lambda i: (0, 0)),
                  pl.BlockSpec((H, 1), lambda i: (0, 0)),
                  pl.BlockSpec((1, 1), lambda i: (0, 0))],
        out_specs=pl.BlockSpec((M, 1), lambda i: (0, 0)),
        compiler_params=pltpu.CompilerParams(dimension_semantics=("arbitrary",)),
    )(cls_tokens, wp, bp.reshape(1, H), wc, bc.reshape(1, 1))


# ---------------- deterministic parameter init ----------------
def init_params(key):
    def dense(k, fan_in, fan_out):
        w = jax.random.normal(k, (fan_in, fan_out), jnp.float32) * 0.02
        b = jnp.zeros((fan_out,), jnp.float32)
        return w, b

    keys = jax.random.split(key, 8 + N_LAYERS)
    wp, bp = dense(keys[3], HIDDEN, HIDDEN)
    wc, bc = dense(keys[4], HIDDEN, 1)
    params = {
        "word_emb": jax.random.normal(keys[0], (VOCAB, HIDDEN), jnp.float32) * 0.02,
        "pos_emb": jax.random.normal(keys[1], (MAX_POS, HIDDEN), jnp.float32) * 0.02,
        "type_emb": jax.random.normal(keys[2], (2, HIDDEN), jnp.float32) * 0.02,
        "emb_ln_g": jnp.ones((HIDDEN,), jnp.float32),
        "emb_ln_b": jnp.zeros((HIDDEN,), jnp.float32),
        "pooler": {"w": wp, "b": bp},
        "classifier": {"w": wc, "b": bc},
        "layers": [],
    }
    for l in range(N_LAYERS):
        lk = jax.random.split(keys[5 + l], 4)
        wqkv, bqkv = dense(lk[0], HIDDEN, 3 * HIDDEN)   # fused Q|K|V projection
        wao, bao = dense(lk[1], HIDDEN, HIDDEN)
        w1, b1 = dense(lk[2], HIDDEN, INTERMEDIATE)
        w2, b2 = dense(lk[3], INTERMEDIATE, HIDDEN)
        params["layers"].append({
            # matmul weights stored in bf16 (f32 MXU accumulation in-kernel)
            "qkv_w": wqkv.astype(jnp.bfloat16), "qkv_b": bqkv,
            "attn_out_w": wao.astype(jnp.bfloat16), "attn_out_b": bao,
            "attn_ln_g": jnp.ones((HIDDEN,), jnp.float32),
            "attn_ln_b": jnp.zeros((HIDDEN,), jnp.float32),
            "inter_w": w1.astype(jnp.bfloat16), "inter_b": b1,
            "out_w": w2.astype(jnp.bfloat16), "out_b": b2,
            "out_ln_g": jnp.ones((HIDDEN,), jnp.float32),
            "out_ln_b": jnp.zeros((HIDDEN,), jnp.float32),
        })
    return params


# ---------------- forward pass (mirrors LongformerForMultipleChoice.forward) ----------------
def longformer_for_multiple_choice(params, input_ids, attention_mask):
    B, C, S = input_ids.shape
    num_choices = C
    BC = B * C

    flat_ids = input_ids.reshape(BC, S)
    flat_attn = attention_mask.reshape(BC, S).astype(jnp.float32)

    # _compute_global_attention_mask(..., before_sep_token=False): global iff idx > first_sep+1.
    # Only the first-SEP index is needed; the mask itself is rebuilt inside the layer kernel.
    question_end = jnp.argmax(flat_ids == SEP_TOKEN_ID, axis=-1).astype(jnp.int32)  # (BC,)
    valid3 = flat_attn.reshape(BC, 1, S)                 # key-validity rows (O(S) per block)

    # --- embeddings (gathers stay plain JAX) ---
    # TODO(synk): RoBERTa-style position-id offset (padding_idx + 1) omitted; plain arange.
    ar = jnp.arange(S)
    h = (params["word_emb"][flat_ids]
         + params["pos_emb"][ar][None, :, :]
         + params["type_emb"][0][None, None, :])          # (BC, S, H)
    h = layernorm(h.reshape(BC * S, HIDDEN), params["emb_ln_g"], params["emb_ln_b"])

    # --- fused encoder layers: one pallas_call each ---
    for layer in params["layers"]:
        h = encoder_layer(h, question_end, valid3, layer, S)

    hidden_states = h.reshape(BC, S, HIDDEN)
    # pooled_output = dense+tanh on [CLS]; self.dropout -> identity in eval; then classifier.
    # TODO(synk): training-mode dropout not implemented (inference semantics).
    logits = pool_and_classify(hidden_states[:, 0, :],
                               params["pooler"]["w"], params["pooler"]["b"],
                               params["classifier"]["w"], params["classifier"]["b"])  # (BC, 1)
    reshaped_logits = logits.reshape(-1, num_choices)                                  # (B, C)
    return (reshaped_logits,)


if __name__ == "__main__":
    key = jax.random.PRNGKey(0)
    pkey, dkey = jax.random.split(key)
    params = init_params(pkey)

    B, C, S = 2, 2, 128
    input_ids = jax.random.randint(dkey, (B, C, S), 0, 100, dtype=jnp.int32)
    # exactly three separator tokens per row (the reference module asserts this)
    input_ids = input_ids.at[..., 20].set(SEP_TOKEN_ID)
    input_ids = input_ids.at[..., 70].set(SEP_TOKEN_ID)
    input_ids = input_ids.at[..., S - 1].set(SEP_TOKEN_ID)
    attention_mask = jnp.ones((B, C, S), jnp.int32)

    out = jax.jit(longformer_for_multiple_choice)(params, input_ids, attention_mask)
    (logits,) = jax.block_until_ready(out)
    assert logits.shape == (B, C) and logits.dtype == jnp.float32
    print("KERNEL_OK")
</pallas_src>

<mosaic_0001>
module attributes {stable_mosaic.version = 11 : i64} {
  func.func @_ln_kernel(%arg0: i32, %arg1: memref<256x128xf32, #tpu.memory_space<vmem>>, %arg2: memref<1x128xf32, #tpu.memory_space<vmem>>, %arg3: memref<1x128xf32, #tpu.memory_space<vmem>>, %arg4: memref<256x128xf32, #tpu.memory_space<vmem>>) attributes {dimension_semantics = [#tpu.dimension_semantics<parallel>], iteration_bounds = array<i64: 2>, scalar_prefetch = 0 : i64, scratch_operands = 0 : i64, tpu.core_type = #tpu.core_type<tc>, window_params = [{transform_indices = @transform_0, window_bounds = array<i64: 256, 128>}, {pipeline_mode = #tpu.pipeline_mode<synchronous>, transform_indices = @transform_1, window_bounds = array<i64: 1, 128>}, {pipeline_mode = #tpu.pipeline_mode<synchronous>, transform_indices = @transform_2, window_bounds = array<i64: 1, 128>}, {transform_indices = @transform_3, window_bounds = array<i64: 256, 128>}]} {
    %c0 = arith.constant 0 : index
    %c0_0 = arith.constant 0 : index
    %0 = vector.load %arg1[%c0, %c0_0] : memref<256x128xf32, #tpu.memory_space<vmem>>, vector<256x128xf32>
    %cst = arith.constant dense<0.000000e+00> : vector<256xf32>
    %1 = vector.multi_reduction <add>, %0, %cst [1] : vector<256x128xf32> to vector<256xf32>
    %2 = vector.shape_cast %1 : vector<256xf32> to vector<256x1xf32>
    %cst_1 = arith.constant 1.280000e+02 : f32
    %3 = vector.broadcast %cst_1 : f32 to vector<256x1xf32>
    %4 = arith.divf %2, %3 : vector<256x1xf32>
    %5 = vector.broadcast %4 : vector<256x1xf32> to vector<256x128xf32>
    %6 = arith.subf %0, %5 : vector<256x128xf32>
    %7 = arith.mulf %6, %6 : vector<256x128xf32>
    %cst_2 = arith.constant dense<0.000000e+00> : vector<256xf32>
    %8 = vector.multi_reduction <add>, %7, %cst_2 [1] : vector<256x128xf32> to vector<256xf32>
    %9 = vector.shape_cast %8 : vector<256xf32> to vector<256x1xf32>
    %cst_3 = arith.constant 1.280000e+02 : f32
    %10 = vector.broadcast %cst_3 : f32 to vector<256x1xf32>
    %11 = arith.divf %9, %10 : vector<256x1xf32>
    %12 = vector.broadcast %4 : vector<256x1xf32> to vector<256x128xf32>
    %13 = arith.subf %0, %12 : vector<256x128xf32>
    %cst_4 = arith.constant 9.99999974E-6 : f32
    %14 = vector.broadcast %cst_4 : f32 to vector<256x1xf32>
    %15 = arith.addf %11, %14 : vector<256x1xf32>
    %16 = math.rsqrt %15 : vector<256x1xf32>
    %17 = vector.broadcast %16 : vector<256x1xf32> to vector<256x128xf32>
    %18 = arith.mulf %13, %17 : vector<256x128xf32>
    %c0_5 = arith.constant 0 : index
    %c0_6 = arith.constant 0 : index
    %19 = vector.load %arg2[%c0_5, %c0_6] : memref<1x128xf32, #tpu.memory_space<vmem>>, vector<1x128xf32>
    %20 = vector.broadcast %19 : vector<1x128xf32> to vector<256x128xf32>
    %21 = arith.mulf %18, %20 : vector<256x128xf32>
    %c0_7 = arith.constant 0 : index
    %c0_8 = arith.constant 0 : index
    %22 = vector.load %arg3[%c0_7, %c0_8] : memref<1x128xf32, #tpu.memory_space<vmem>>, vector<1x128xf32>
    %23 = vector.broadcast %22 : vector<1x128xf32> to vector<256x128xf32>
    %24 = arith.addf %21, %23 : vector<256x128xf32>
    %c0_9 = arith.constant 0 : index
    %c0_10 = arith.constant 0 : index
    %25 = vector.load %arg4[%c0_9, %c0_10] : memref<256x128xf32, #tpu.memory_space<vmem>>, vector<256x128xf32>
    tpu.vector_store %arg4[%c0_9, %c0_10], %24 {strides = array<i32>} : memref<256x128xf32, #tpu.memory_space<vmem>>, vector<256x128xf32>,
    return
  }
  func.func @transform_0(%arg0: i32) -> (i32, i32) {
    %c0_i32 = arith.constant 0 : i32
    %c0_i32_0 = arith.constant 0 : i32
    return %arg0, %c0_i32 : i32, i32
  }
  func.func @transform_1(%arg0: i32) -> (i32, i32) {
    %c0_i32 = arith.constant 0 : i32
    %c0_i32_0 = arith.constant 0 : i32
    %c0_i32_1 = arith.constant 0 : i32
    return %c0_i32, %c0_i32_0 : i32, i32
  }
  func.func @transform_2(%arg0: i32) -> (i32, i32) {
    %c0_i32 = arith.constant 0 : i32
    %c0_i32_0 = arith.constant 0 : i32
    %c0_i32_1 = arith.constant 0 : i32
    return %c0_i32, %c0_i32_0 : i32, i32
  }
  func.func @transform_3(%arg0: i32) -> (i32, i32) {
    %c0_i32 = arith.constant 0 : i32
    %c0_i32_0 = arith.constant 0 : i32
    return %arg0, %c0_i32 : i32, i32
  }
}

module attributes {stable_mosaic.version = 11 : i64} {
  func.func @_encoder_layer_kernel(%arg0: i32, %arg1: memref<4xi32, #tpu.memory_space<smem>>, %arg2: memref<1x1x128xf32, #tpu.memory_space<vmem>>, %arg3: memref<128x128xf32, #tpu.memory_space<vmem>>, %arg4: memref<128x384xbf16, #tpu.memory_space<vmem>>, %arg5: memref<1x384xf32, #tpu.memory_space<vmem>>, %arg6: memref<128x128xbf16, #tpu.memory_space<vmem>>, %arg7: memref<1x128xf32, #tpu.memory_space<vmem>>, %arg8: memref<1x128xf32, #tpu.memory_space<vmem>>, %arg9: memref<1x128xf32, #tpu.memory_space<vmem>>, %arg10: memref<128x256xbf16, #tpu.memory_space<vmem>>, %arg11: memref<1x256xf32, #tpu.memory_space<vmem>>, %arg12: memref<256x128xbf16, #tpu.memory_space<vmem>>, %arg13: memref<1x128xf32, #tpu.memory_space<vmem>>, %arg14: memref<1x128xf32, #tpu.memory_space<vmem>>, %arg15: memref<1x128xf32, #tpu.memory_space<vmem>>, %arg16: memref<128x128xf32, #tpu.memory_space<vmem>>) attributes {dimension_semantics = [#tpu.dimension_semantics<parallel>], iteration_bounds = array<i64: 4>, scalar_prefetch = 1 : i64, scratch_operands = 0 : i64, tpu.core_type = #tpu.core_type<tc>, window_params = [{transform_indices = @transform_0, window_bounds = array<i64: 1, 1, 128>}, {transform_indices = @transform_1, window_bounds = array<i64: 128, 128>}, {pipeline_mode = #tpu.pipeline_mode<synchronous>, transform_indices = @transform_2, window_bounds = array<i64: 128, 384>}, {pipeline_mode = #tpu.pipeline_mode<synchronous>, transform_indices = @transform_3, window_bounds = array<i64: 1, 384>}, {pipeline_mode = #tpu.pipeline_mode<synchronous>, transform_indices = @transform_4, window_bounds = array<i64: 128, 128>}, {pipeline_mode = #tpu.pipeline_mode<synchronous>, transform_indices = @transform_5, window_bounds = array<i64: 1, 128>}, {pipeline_mode = #tpu.pipeline_mode<synchronous>, transform_indices = @transform_6, window_bounds = array<i64: 1, 128>}, {pipeline_mode = #tpu.pipeline_mode<synchronous>, transform_indices = @transform_7, window_bounds = array<i64: 1, 128>}, {pipeline_mode = #tpu.pipeline_mode<synchronous>, transform_indices = @transform_8, window_bounds = array<i64: 128, 256>}, {pipeline_mode = #tpu.pipeline_mode<synchronous>, transform_indices = @transform_9, window_bounds = array<i64: 1, 256>}, {pipeline_mode = #tpu.pipeline_mode<synchronous>, transform_indices = @transform_10, window_bounds = array<i64: 256, 128>}, {pipeline_mode = #tpu.pipeline_mode<synchronous>, transform_indices = @transform_11, window_bounds = array<i64: 1, 128>}, {pipeline_mode = #tpu.pipeline_mode<synchronous>, transform_indices = @transform_12, window_bounds = array<i64: 1, 128>}, {pipeline_mode = #tpu.pipeline_mode<synchronous>, transform_indices = @transform_13, window_bounds = array<i64: 1, 128>}, {transform_indices = @transform_14, window_bounds = array<i64: 128, 128>}]} {
    %c0 = arith.constant 0 : index
    %c0_0 = arith.constant 0 : index
    %0 = vector.load %arg3[%c0, %c0_0] : memref<128x128xf32, #tpu.memory_space<vmem>>, vector<128x128xf32>
    %1 = arith.truncf %0 : vector<128x128xf32> to vector<128x128xbf16>
    %c0_1 = arith.constant 0 : index
    %c0_2 = arith.constant 0 : index
    %2 = vector.load %arg4[%c0_1, %c0_2] : memref<128x384xbf16, #tpu.memory_space<vmem>>, vector<128x384xbf16>
    %cst = arith.constant dense<0.000000e+00> : vector<128x384xf32>
    %3 = tpu.matmul %1, %2, %cst {dimension_numbers = #tpu.dot_dimension_numbers<[1], [0], [0], [1], [0, 0, 1, 1], [], []>} : vector<128x128xbf16>, vector<128x384xbf16>, vector<128x384xf32> -> vector<128x384xf32>
    %c0_3 = arith.constant 0 : index
    %c0_4 = arith.constant 0 : index
    %4 = vector.load %arg5[%c0_3, %c0_4] : memref<1x384xf32, #tpu.memory_space<vmem>>, vector<1x384xf32>
    %5 = vector.broadcast %4 : vector<1x384xf32> to vector<128x384xf32>
    %6 = arith.addf %3, %5 : vector<128x384xf32>
    %7 = vector.extract_strided_slice %6 {offsets = [0, 0], sizes = [128, 128], strides = [1, 1]} : vector<128x384xf32> to vector<128x128xf32>
    %cst_5 = arith.constant 0.176776692 : f32
    %8 = vector.broadcast %cst_5 : f32 to vector<128x128xf32>
    %9 = arith.mulf %7, %8 : vector<128x128xf32>
    %10 = arith.truncf %9 : vector<128x128xf32> to vector<128x128xbf16>
    %11 = vector.extract_strided_slice %6 {offsets = [0, 128], sizes = [128, 128], strides = [1, 1]} : vector<128x384xf32> to vector<128x128xf32>
    %12 = arith.truncf %11 : vector<128x128xf32> to vector<128x128xbf16>
    %13 = vector.extract_strided_slice %6 {offsets = [0, 256], sizes = [128, 128], strides = [1, 1]} : vector<128x384xf32> to vector<128x128xf32>
    %14 = arith.truncf %13 : vector<128x128xf32> to vector<128x128xbf16>
    %15 = arith.index_cast %arg0 : i32 to index
    %16 = memref.load %arg1[%15] : memref<4xi32, #tpu.memory_space<smem>>
    %c1_i32 = arith.constant 1 : i32
    %17 = arith.addi %16, %c1_i32 : i32
    %18 = tpu.iota {dimensions = array<i32: 0>} : vector<128x128xi32>
    %19 = tpu.iota {dimensions = array<i32: 1>} : vector<128x128xi32>
    %20 = arith.subi %18, %19 : vector<128x128xi32>
    %21 = math.absi %20 : vector<128x128xi32>
    %c8_i32 = arith.constant 8 : i32
    %22 = vector.broadcast %c8_i32 : i32 to vector<128x128xi32>
    %23 = arith.cmpi sle, %21, %22 : vector<128x128xi32>
    %24 = vector.broadcast %17 : i32 to vector<128x128xi32>
    %25 = arith.cmpi sgt, %18, %24 : vector<128x128xi32>
    %26 = vector.broadcast %17 : i32 to vector<128x128xi32>
    %27 = arith.cmpi sgt, %19, %26 : vector<128x128xi32>
    %c0_6 = arith.constant 0 : index
    %c0_7 = arith.constant 0 : index
    %c0_8 = arith.constant 0 : index
    %28 = vector.load %arg2[%c0_6, %c0_7, %c0_8] : memref<1x1x128xf32, #tpu.memory_space<vmem>>, vector<1x1x128xf32>
    %29 = vector.shape_cast %28 : vector<1x1x128xf32> to vector<1x128xf32>
    %cst_9 = arith.constant 5.000000e-01 : f32
    %30 = vector.broadcast %cst_9 : f32 to vector<1x128xf32>
    %31 = arith.cmpf ogt, %29, %30 : vector<1x128xf32>
    %32 = arith.ori %23, %25 : vector<128x128xi1>
    %33 = arith.ori %32, %27 : vector<128x128xi1>
    %34 = vector.broadcast %31 : vector<1x128xi1> to vector<128x128xi1>
    %35 = arith.andi %33, %34 : vector<128x128xi1>
    %cst_10 = arith.constant 0.000000e+00 : f32
    %cst_11 = arith.constant -1.000000e+09 : f32
    %36 = vector.broadcast %cst_10 : f32 to vector<128x128xf32>
    %37 = vector.broadcast %cst_11 : f32 to vector<128x128xf32>
    %38 = arith.select %35, %36, %37 : vector<128x128xi1>, vector<128x128xf32>
    %39 = vector.extract_strided_slice %10 {offsets = [0, 0], sizes = [128, 32], strides = [1, 1]} : vector<128x128xbf16> to vector<128x32xbf16>
    %40 = vector.extract_strided_slice %12 {offsets = [0, 0], sizes = [128, 32], strides = [1, 1]} : vector<128x128xbf16> to vector<128x32xbf16>
    %cst_12 = arith.constant dense<0.000000e+00> : vector<128x128xf32>
    %41 = tpu.matmul %39, %40, %cst_12 {dimension_numbers = #tpu.dot_dimension_numbers<[1], [1], [0], [0], [0, 0, 1, 0], [], []>} : vector<128x32xbf16>, vector<128x32xbf16>, vector<128x128xf32> -> vector<128x128xf32>
    %42 = arith.addf %41, %38 : vector<128x128xf32>
    %cst_13 = arith.constant dense<0xFF800000> : vector<128xf32>
    %43 = vector.multi_reduction <maximumf>, %42, %cst_13 [1] : vector<128x128xf32> to vector<128xf32>
    %44 = vector.shape_cast %43 : vector<128xf32> to vector<128x1xf32>
    %45 = vector.broadcast %44 : vector<128x1xf32> to vector<128x128xf32>
    %46 = arith.subf %42, %45 : vector<128x128xf32>
    %47 = math.exp %46 : vector<128x128xf32>
    %cst_14 = arith.constant dense<0.000000e+00> : vector<128xf32>
    %48 = vector.multi_reduction <add>, %47, %cst_14 [1] : vector<128x128xf32> to vector<128xf32>
    %49 = vector.shape_cast %48 : vector<128xf32> to vector<128x1xf32>
    %50 = vector.broadcast %49 : vector<128x1xf32> to vector<128x128xf32>
    %51 = arith.divf %47, %50 : vector<128x128xf32>
    %52 = arith.truncf %51 : vector<128x128xf32> to vector<128x128xbf16>
    %53 = vector.extract_strided_slice %14 {offsets = [0, 0], sizes = [128, 32], strides = [1, 1]} : vector<128x128xbf16> to vector<128x32xbf16>
    %cst_15 = arith.constant dense<0.000000e+00> : vector<128x32xf32>
    %54 = tpu.matmul %52, %53, %cst_15 {dimension_numbers = #tpu.dot_dimension_numbers<[1], [0], [0], [1], [0, 0, 1, 1], [], []>} : vector<128x128xbf16>, vector<128x32xbf16>, vector<128x32xf32> -> vector<128x32xf32>
    %55 = vector.extract_strided_slice %10 {offsets = [0, 32], sizes = [128, 32], strides = [1, 1]} : vector<128x128xbf16> to vector<128x32xbf16>
    %56 = vector.extract_strided_slice %12 {offsets = [0, 32], sizes = [128, 32], strides = [1, 1]} : vector<128x128xbf16> to vector<128x32xbf16>
    %cst_16 = arith.constant dense<0.000000e+00> : vector<128x128xf32>
    %57 = tpu.matmul %55, %56, %cst_16 {dimension_numbers = #tpu.dot_dimension_numbers<[1], [1], [0], [0], [0, 0, 1, 0], [], []>} : vector<128x32xbf16>, vector<128x32xbf16>, vector<128x128xf32> -> vector<128x128xf32>
    %58 = arith.addf %57, %38 : vector<128x128xf32>
    %cst_17 = arith.constant dense<0xFF800000> : vector<128xf32>
    %59 = vector.multi_reduction <maximumf>, %58, %cst_17 [1] : vector<128x128xf32> to vector<128xf32>
    %60 = vector.shape_cast %59 : vector<128xf32> to vector<128x1xf32>
    %61 = vector.broadcast %60 : vector<128x1xf32> to vector<128x128xf32>
    %62 = arith.subf %58, %61 : vector<128x128xf32>
    %63 = math.exp %62 : vector<128x128xf32>
    %cst_18 = arith.constant dense<0.000000e+00> : vector<128xf32>
    %64 = vector.multi_reduction <add>, %63, %cst_18 [1] : vector<128x128xf32> to vector<128xf32>
    %65 = vector.shape_cast %64 : vector<128xf32> to vector<128x1xf32>
    %66 = vector.broadcast %65 : vector<128x1xf32> to vector<128x128xf32>
    %67 = arith.divf %63, %66 : vector<128x128xf32>
    %68 = arith.truncf %67 : vector<128x128xf32> to vector<128x128xbf16>
    %69 = vector.extract_strided_slice %14 {offsets = [0, 32], sizes = [128, 32], strides = [1, 1]} : vector<128x128xbf16> to vector<128x32xbf16>
    %cst_19 = arith.constant dense<0.000000e+00> : vector<128x32xf32>
    %70 = tpu.matmul %68, %69, %cst_19 {dimension_numbers = #tpu.dot_dimension_numbers<[1], [0], [0], [1], [0, 0, 1, 1], [], []>} : vector<128x128xbf16>, vector<128x32xbf16>, vector<128x32xf32> -> vector<128x32xf32>
    %71 = vector.extract_strided_slice %10 {offsets = [0, 64], sizes = [128, 32], strides = [1, 1]} : vector<128x128xbf16> to vector<128x32xbf16>
    %72 = vector.extract_strided_slice %12 {offsets = [0, 64], sizes = [128, 32], strides = [1, 1]} : vector<128x128xbf16> to vector<128x32xbf16>
    %cst_20 = arith.constant dense<0.000000e+00> : vector<128x128xf32>
    %73 = tpu.matmul %71, %72, %cst_20 {dimension_numbers = #tpu.dot_dimension_numbers<[1], [1], [0], [0], [0, 0, 1, 0], [], []>} : vector<128x32xbf16>, vector<128x32xbf16>, vector<128x128xf32> -> vector<128x128xf32>
    %74 = arith.addf %73, %38 : vector<128x128xf32>
    %cst_21 = arith.constant dense<0xFF800000> : vector<128xf32>
    %75 = vector.multi_reduction <maximumf>, %74, %cst_21 [1] : vector<128x128xf32> to vector<128xf32>
    %76 = vector.shape_cast %75 : vector<128xf32> to vector<128x1xf32>
    %77 = vector.broadcast %76 : vector<128x1xf32> to vector<128x128xf32>
    %78 = arith.subf %74, %77 : vector<128x128xf32>
    %79 = math.exp %78 : vector<128x128xf32>
    %cst_22 = arith.constant dense<0.000000e+00> : vector<128xf32>
    %80 = vector.multi_reduction <add>, %79, %cst_22 [1] : vector<128x128xf32> to vector<128xf32>
    %81 = vector.shape_cast %80 : vector<128xf32> to vector<128x1xf32>
    %82 = vector.broadcast %81 : vector<128x1xf32> to vector<128x128xf32>
    %83 = arith.divf %79, %82 : vector<128x128xf32>
    %84 = arith.truncf %83 : vector<128x128xf32> to vector<128x128xbf16>
    %85 = vector.extract_strided_slice %14 {offsets = [0, 64], sizes = [128, 32], strides = [1, 1]} : vector<128x128xbf16> to vector<128x32xbf16>
    %cst_23 = arith.constant dense<0.000000e+00> : vector<128x32xf32>
    %86 = tpu.matmul %84, %85, %cst_23 {dimension_numbers = #tpu.dot_dimension_numbers<[1], [0], [0], [1], [0, 0, 1, 1], [], []>} : vector<128x128xbf16>, vector<128x32xbf16>, vector<128x32xf32> -> vector<128x32xf32>
    %87 = vector.extract_strided_slice %10 {offsets = [0, 96], sizes = [128, 32], strides = [1, 1]} : vector<128x128xbf16> to vector<128x32xbf16>
    %88 = vector.extract_strided_slice %12 {offsets = [0, 96], sizes = [128, 32], strides = [1, 1]} : vector<128x128xbf16> to vector<128x32xbf16>
    %cst_24 = arith.constant dense<0.000000e+00> : vector<128x128xf32>
    %89 = tpu.matmul %87, %88, %cst_24 {dimension_numbers = #tpu.dot_dimension_numbers<[1], [1], [0], [0], [0, 0, 1, 0], [], []>} : vector<128x32xbf16>, vector<128x32xbf16>, vector<128x128xf32> -> vector<128x128xf32>
    %90 = arith.addf %89, %38 : vector<128x128xf32>
    %cst_25 = arith.constant dense<0xFF800000> : vector<128xf32>
    %91 = vector.multi_reduction <maximumf>, %90, %cst_25 [1] : vector<128x128xf32> to vector<128xf32>
    %92 = vector.shape_cast %91 : vector<128xf32> to vector<128x1xf32>
    %93 = vector.broadcast %92 : vector<128x1xf32> to vector<128x128xf32>
    %94 = arith.subf %90, %93 : vector<128x128xf32>
    %95 = math.exp %94 : vector<128x128xf32>
    %cst_26 = arith.constant dense<0.000000e+00> : vector<128xf32>
    %96 = vector.multi_reduction <add>, %95, %cst_26 [1] : vector<128x128xf32> to vector<128xf32>
    %97 = vector.shape_cast %96 : vector<128xf32> to vector<128x1xf32>
    %98 = vector.broadcast %97 : vector<128x1xf32> to vector<128x128xf32>
    %99 = arith.divf %95, %98 : vector<128x128xf32>
    %100 = arith.truncf %99 : vector<128x128xf32> to vector<128x128xbf16>
    %101 = vector.extract_strided_slice %14 {offsets = [0, 96], sizes = [128, 32], strides = [1, 1]} : vector<128x128xbf16> to vector<128x32xbf16>
    %cst_27 = arith.constant dense<0.000000e+00> : vector<128x32xf32>
    %102 = tpu.matmul %100, %101, %cst_27 {dimension_numbers = #tpu.dot_dimension_numbers<[1], [0], [0], [1], [0, 0, 1, 1], [], []>} : vector<128x128xbf16>, vector<128x32xbf16>, vector<128x32xf32> -> vector<128x32xf32>
    %103 = tpu.concatenate %54, %70, %86, %102 in 1 : vector<128x32xf32>, vector<128x32xf32>, vector<128x32xf32>, vector<128x32xf32> -> vector<128x128xf32>
    %104 = arith.truncf %103 : vector<128x128xf32> to vector<128x128xbf16>
    %c0_28 = arith.constant 0 : index
    %c0_29 = arith.constant 0 : index
    %105 = vector.load %arg6[%c0_28, %c0_29] : memref<128x128xbf16, #tpu.memory_space<vmem>>, vector<128x128xbf16>
    %cst_30 = arith.constant dense<0.000000e+00> : vector<128x128xf32>
    %106 = tpu.matmul %104, %105, %cst_30 {dimension_numbers = #tpu.dot_dimension_numbers<[1], [0], [0], [1], [0, 0, 1, 1], [], []>} : vector<128x128xbf16>, vector<128x128xbf16>, vector<128x128xf32> -> vector<128x128xf32>
    %c0_31 = arith.constant 0 : index
    %c0_32 = arith.constant 0 : index
    %107 = vector.load %arg7[%c0_31, %c0_32] : memref<1x128xf32, #tpu.memory_space<vmem>>, vector<1x128xf32>
    %108 = vector.broadcast %107 : vector<1x128xf32> to vector<128x128xf32>
    %109 = arith.addf %106, %108 : vector<128x128xf32>
    %110 = arith.addf %109, %0 : vector<128x128xf32>
    %cst_33 = arith.constant dense<0.000000e+00> : vector<128xf32>
    %111 = vector.multi_reduction <add>, %110, %cst_33 [1] : vector<128x128xf32> to vector<128xf32>
    %112 = vector.shape_cast %111 : vector<128xf32> to vector<128x1xf32>
    %cst_34 = arith.constant 1.280000e+02 : f32
    %113 = vector.broadcast %cst_34 : f32 to vector<128x1xf32>
    %114 = arith.divf %112, %113 : vector<128x1xf32>
    %115 = vector.broadcast %114 : vector<128x1xf32> to vector<128x128xf32>
    %116 = arith.subf %110, %115 : vector<128x128xf32>
    %117 = arith.mulf %116, %116 : vector<128x128xf32>
    %cst_35 = arith.constant dense<0.000000e+00> : vector<128xf32>
    %118 = vector.multi_reduction <add>, %117, %cst_35 [1] : vector<128x128xf32> to vector<128xf32>
    %119 = vector.shape_cast %118 : vector<128xf32> to vector<128x1xf32>
    %cst_36 = arith.constant 1.280000e+02 : f32
    %120 = vector.broadcast %cst_36 : f32 to vector<128x1xf32>
    %121 = arith.divf %119, %120 : vector<128x1xf32>
    %122 = vector.broadcast %114 : vector<128x1xf32> to vector<128x128xf32>
    %123 = arith.subf %110, %122 : vector<128x128xf32>
    %cst_37 = arith.constant 9.99999974E-6 : f32
    %124 = vector.broadcast %cst_37 : f32 to vector<128x1xf32>
    %125 = arith.addf %121, %124 : vector<128x1xf32>
    %126 = math.rsqrt %125 : vector<128x1xf32>
    %127 = vector.broadcast %126 : vector<128x1xf32> to vector<128x128xf32>
    %128 = arith.mulf %123, %127 : vector<128x128xf32>
    %c0_38 = arith.constant 0 : index
    %c0_39 = arith.constant 0 : index
    %129 = vector.load %arg8[%c0_38, %c0_39] : memref<1x128xf32, #tpu.memory_space<vmem>>, vector<1x128xf32>
    %130 = vector.broadcast %129 : vector<1x128xf32> to vector<128x128xf32>
    %131 = arith.mulf %128, %130 : vector<128x128xf32>
    %c0_40 = arith.constant 0 : index
    %c0_41 = arith.constant 0 : index
    %132 = vector.load %arg9[%c0_40, %c0_41] : memref<1x128xf32, #tpu.memory_space<vmem>>, vector<1x128xf32>
    %133 = vector.broadcast %132 : vector<1x128xf32> to vector<128x128xf32>
    %134 = arith.addf %131, %133 : vector<128x128xf32>
    %135 = arith.truncf %134 : vector<128x128xf32> to vector<128x128xbf16>
    %c0_42 = arith.constant 0 : index
    %c0_43 = arith.constant 0 : index
    %136 = vector.load %arg10[%c0_42, %c0_43] : memref<128x256xbf16, #tpu.memory_space<vmem>>, vector<128x256xbf16>
    %cst_44 = arith.constant dense<0.000000e+00> : vector<128x256xf32>
    %137 = tpu.matmul %135, %136, %cst_44 {dimension_numbers = #tpu.dot_dimension_numbers<[1], [0], [0], [1], [0, 0, 1, 1], [], []>} : vector<128x128xbf16>, vector<128x256xbf16>, vector<128x256xf32> -> vector<128x256xf32>
    %c0_45 = arith.constant 0 : index
    %c0_46 = arith.constant 0 : index
    %138 = vector.load %arg11[%c0_45, %c0_46] : memref<1x256xf32, #tpu.memory_space<vmem>>, vector<1x256xf32>
    %139 = vector.broadcast %138 : vector<1x256xf32> to vector<128x256xf32>
    %140 = arith.addf %137, %139 : vector<128x256xf32>
    %141 = arith.mulf %140, %140 : vector<128x256xf32>
    %142 = arith.mulf %140, %141 : vector<128x256xf32>
    %cst_47 = arith.constant 4.471500e-02 : f32
    %143 = vector.broadcast %cst_47 : f32 to vector<128x256xf32>
    %144 = arith.mulf %143, %142 : vector<128x256xf32>
    %145 = arith.addf %140, %144 : vector<128x256xf32>
    %cst_48 = arith.constant 0.797884583 : f32
    %146 = vector.broadcast %cst_48 : f32 to vector<128x256xf32>
    %147 = arith.mulf %146, %145 : vector<128x256xf32>
    %148 = math.tanh %147 : vector<128x256xf32>
    %cst_49 = arith.constant 1.000000e+00 : f32
    %149 = vector.broadcast %cst_49 : f32 to vector<128x256xf32>
    %150 = arith.addf %149, %148 : vector<128x256xf32>
    %cst_50 = arith.constant 5.000000e-01 : f32
    %151 = vector.broadcast %cst_50 : f32 to vector<128x256xf32>
    %152 = arith.mulf %151, %150 : vector<128x256xf32>
    %153 = arith.mulf %140, %152 : vector<128x256xf32>
    %154 = arith.truncf %153 : vector<128x256xf32> to vector<128x256xbf16>
    %c0_51 = arith.constant 0 : index
    %c0_52 = arith.constant 0 : index
    %155 = vector.load %arg12[%c0_51, %c0_52] : memref<256x128xbf16, #tpu.memory_space<vmem>>, vector<256x128xbf16>
    %cst_53 = arith.constant dense<0.000000e+00> : vector<128x128xf32>
    %156 = tpu.matmul %154, %155, %cst_53 {dimension_numbers = #tpu.dot_dimension_numbers<[1], [0], [0], [1], [0, 0, 1, 1], [], []>} : vector<128x256xbf16>, vector<256x128xbf16>, vector<128x128xf32> -> vector<128x128xf32>
    %c0_54 = arith.constant 0 : index
    %c0_55 = arith.constant 0 : index
    %157 = vector.load %arg13[%c0_54, %c0_55] : memref<1x128xf32, #tpu.memory_space<vmem>>, vector<1x128xf32>
    %158 = vector.broadcast %157 : vector<1x128xf32> to vector<128x128xf32>
    %159 = arith.addf %156, %158 : vector<128x128xf32>
    %160 = arith.addf %159, %134 : vector<128x128xf32>
    %cst_56 = arith.constant dense<0.000000e+00> : vector<128xf32>
    %161 = vector.multi_reduction <add>, %160, %cst_56 [1] : vector<128x128xf32> to vector<128xf32>
    %162 = vector.shape_cast %161 : vector<128xf32> to vector<128x1xf32>
    %cst_57 = arith.constant 1.280000e+02 : f32
    %163 = vector.broadcast %cst_57 : f32 to vector<128x1xf32>
    %164 = arith.divf %162, %163 : vector<128x1xf32>
    %165 = vector.broadcast %164 : vector<128x1xf32> to vector<128x128xf32>
    %166 = arith.subf %160, %165 : vector<128x128xf32>
    %167 = arith.mulf %166, %166 : vector<128x128xf32>
    %cst_58 = arith.constant dense<0.000000e+00> : vector<128xf32>
    %168 = vector.multi_reduction <add>, %167, %cst_58 [1] : vector<128x128xf32> to vector<128xf32>
    %169 = vector.shape_cast %168 : vector<128xf32> to vector<128x1xf32>
    %cst_59 = arith.constant 1.280000e+02 : f32
    %170 = vector.broadcast %cst_59 : f32 to vector<128x1xf32>
    %171 = arith.divf %169, %170 : vector<128x1xf32>
    %172 = vector.broadcast %164 : vector<128x1xf32> to vector<128x128xf32>
    %173 = arith.subf %160, %172 : vector<128x128xf32>
    %cst_60 = arith.constant 9.99999974E-6 : f32
    %174 = vector.broadcast %cst_60 : f32 to vector<128x1xf32>
    %175 = arith.addf %171, %174 : vector<128x1xf32>
    %176 = math.rsqrt %175 : vector<128x1xf32>
    %177 = vector.broadcast %176 : vector<128x1xf32> to vector<128x128xf32>
    %178 = arith.mulf %173, %177 : vector<128x128xf32>
    %c0_61 = arith.constant 0 : index
    %c0_62 = arith.constant 0 : index
    %179 = vector.load %arg14[%c0_61, %c0_62] : memref<1x128xf32, #tpu.memory_space<vmem>>, vector<1x128xf32>
    %180 = vector.broadcast %179 : vector<1x128xf32> to vector<128x128xf32>
    %181 = arith.mulf %178, %180 : vector<128x128xf32>
    %c0_63 = arith.constant 0 : index
    %c0_64 = arith.constant 0 : index
    %182 = vector.load %arg15[%c0_63, %c0_64] : memref<1x128xf32, #tpu.memory_space<vmem>>, vector<1x128xf32>
    %183 = vector.broadcast %182 : vector<1x128xf32> to vector<128x128xf32>
    %184 = arith.addf %181, %183 : vector<128x128xf32>
    %c0_65 = arith.constant 0 : index
    %c0_66 = arith.constant 0 : index
    %185 = vector.load %arg16[%c0_65, %c0_66] : memref<128x128xf32, #tpu.memory_space<vmem>>, vector<128x128xf32>
    tpu.vector_store %arg16[%c0_65, %c0_66], %184 {strides = array<i32>} : memref<128x128xf32, #tpu.memory_space<vmem>>, vector<128x128xf32>,
    return
  }
  func.func @transform_0(%arg0: i32, %arg1: memref<4xi32, #tpu.memory_space<smem>>) -> (i32, i32, i32) {
    %c0_i32 = arith.constant 0 : i32
    %c0_i32_0 = arith.constant 0 : i32
    %c0_i32_1 = arith.constant 0 : i32
    return %arg0, %c0_i32, %c0_i32_0 : i32, i32, i32
  }
  func.func @transform_1(%arg0: i32, %arg1: memref<4xi32, #tpu.memory_space<smem>>) -> (i32, i32) {
    %c0_i32 = arith.constant 0 : i32
    %c0_i32_0 = arith.constant 0 : i32
    return %arg0, %c0_i32 : i32, i32
  }
  func.func @transform_2(%arg0: i32, %arg1: memref<4xi32, #tpu.memory_space<smem>>) -> (i32, i32) {
    %c0_i32 = arith.constant 0 : i32
    %c0_i32_0 = arith.constant 0 : i32
    %c0_i32_1 = arith.constant 0 : i32
    return %c0_i32, %c0_i32_0 : i32, i32
  }
  func.func @transform_3(%arg0: i32, %arg1: memref<4xi32, #tpu.memory_space<smem>>) -> (i32, i32) {
    %c0_i32 = arith.constant 0 : i32
    %c0_i32_0 = arith.constant 0 : i32
    %c0_i32_1 = arith.constant 0 : i32
    return %c0_i32, %c0_i32_0 : i32, i32
  }
  func.func @transform_4(%arg0: i32, %arg1: memref<4xi32, #tpu.memory_space<smem>>) -> (i32, i32) {
    %c0_i32 = arith.constant 0 : i32
    %c0_i32_0 = arith.constant 0 : i32
    %c0_i32_1 = arith.constant 0 : i32
    return %c0_i32, %c0_i32_0 : i32, i32
  }
  func.func @transform_5(%arg0: i32, %arg1: memref<4xi32, #tpu.memory_space<smem>>) -> (i32, i32) {
    %c0_i32 = arith.constant 0 : i32
    %c0_i32_0 = arith.constant 0 : i32
    %c0_i32_1 = arith.constant 0 : i32
    return %c0_i32, %c0_i32_0 : i32, i32
  }
  func.func @transform_6(%arg0: i32, %arg1: memref<4xi32, #tpu.memory_space<smem>>) -> (i32, i32) {
    %c0_i32 = arith.constant 0 : i32
    %c0_i32_0 = arith.constant 0 : i32
    %c0_i32_1 = arith.constant 0 : i32
    return %c0_i32, %c0_i32_0 : i32, i32
  }
  func.func @transform_7(%arg0: i32, %arg1: memref<4xi32, #tpu.memory_space<smem>>) -> (i32, i32) {
    %c0_i32 = arith.constant 0 : i32
    %c0_i32_0 = arith.constant 0 : i32
    %c0_i32_1 = arith.constant 0 : i32
    return %c0_i32, %c0_i32_0 : i32, i32
  }
  func.func @transform_8(%arg0: i32, %arg1: memref<4xi32, #tpu.memory_space<smem>>) -> (i32, i32) {
    %c0_i32 = arith.constant 0 : i32
    %c0_i32_0 = arith.constant 0 : i32
    %c0_i32_1 = arith.constant 0 : i32
    return %c0_i32, %c0_i32_0 : i32, i32
  }
  func.func @transform_9(%arg0: i32, %arg1: memref<4xi32, #tpu.memory_space<smem>>) -> (i32, i32) {
    %c0_i32 = arith.constant 0 : i32
    %c0_i32_0 = arith.constant 0 : i32
    %c0_i32_1 = arith.constant 0 : i32
    return %c0_i32, %c0_i32_0 : i32, i32
  }
  func.func @transform_10(%arg0: i32, %arg1: memref<4xi32, #tpu.memory_space<smem>>) -> (i32, i32) {
    %c0_i32 = arith.constant 0 : i32
    %c0_i32_0 = arith.constant 0 : i32
    %c0_i32_1 = arith.constant 0 : i32
    return %c0_i32, %c0_i32_0 : i32, i32
  }
  func.func @transform_11(%arg0: i32, %arg1: memref<4xi32, #tpu.memory_space<smem>>) -> (i32, i32) {
    %c0_i32 = arith.constant 0 : i32
    %c0_i32_0 = arith.constant 0 : i32
    %c0_i32_1 = arith.constant 0 : i32
    return %c0_i32, %c0_i32_0 : i32, i32
  }
  func.func @transform_12(%arg0: i32, %arg1: memref<4xi32, #tpu.memory_space<smem>>) -> (i32, i32) {
    %c0_i32 = arith.constant 0 : i32
    %c0_i32_0 = arith.constant 0 : i32
    %c0_i32_1 = arith.constant 0 : i32
    return %c0_i32, %c0_i32_0 : i32, i32
  }
  func.func @transform_13(%arg0: i32, %arg1: memref<4xi32, #tpu.memory_space<smem>>) -> (i32, i32) {
    %c0_i32 = arith.constant 0 : i32
    %c0_i32_0 = arith.constant 0 : i32
    %c0_i32_1 = arith.constant 0 : i32
    return %c0_i32, %c0_i32_0 : i32, i32
  }
  func.func @transform_14(%arg0: i32, %arg1: memref<4xi32, #tpu.memory_space<smem>>) -> (i32, i32) {
    %c0_i32 = arith.constant 0 : i32
    %c0_i32_0 = arith.constant 0 : i32
    return %arg0, %c0_i32 : i32, i32
  }
}

module attributes {stable_mosaic.version = 11 : i64} {
  func.func @_pool_cls_kernel(%arg0: i32, %arg1: memref<4x128xf32, #tpu.memory_space<vmem>>, %arg2: memref<128x128xf32, #tpu.memory_space<vmem>>, %arg3: memref<1x128xf32, #tpu.memory_space<vmem>>, %arg4: memref<128x1xf32, #tpu.memory_space<vmem>>, %arg5: memref<1x1xf32, #tpu.memory_space<vmem>>, %arg6: memref<4x1xf32, #tpu.memory_space<vmem>>) attributes {dimension_semantics = [#tpu.dimension_semantics<arbitrary>], iteration_bounds = array<i64: 1>, scalar_prefetch = 0 : i64, scratch_operands = 0 : i64, tpu.core_type = #tpu.core_type<tc>, window_params = [{pipeline_mode = #tpu.pipeline_mode<synchronous>, transform_indices = @transform_0, window_bounds = array<i64: 4, 128>}, {pipeline_mode = #tpu.pipeline_mode<synchronous>, transform_indices = @transform_1, window_bounds = array<i64: 128, 128>}, {pipeline_mode = #tpu.pipeline_mode<synchronous>, transform_indices = @transform_2, window_bounds = array<i64: 1, 128>}, {pipeline_mode = #tpu.pipeline_mode<synchronous>, transform_indices = @transform_3, window_bounds = array<i64: 128, 1>}, {pipeline_mode = #tpu.pipeline_mode<synchronous>, transform_indices = @transform_4, window_bounds = array<i64: 1, 1>}, {pipeline_mode = #tpu.pipeline_mode<synchronous>, transform_indices = @transform_5, window_bounds = array<i64: 4, 1>}]} {
    %c0 = arith.constant 0 : index
    %c0_0 = arith.constant 0 : index
    %0 = vector.load %arg1[%c0, %c0_0] : memref<4x128xf32, #tpu.memory_space<vmem>>, vector<4x128xf32>
    %c0_1 = arith.constant 0 : index
    %c0_2 = arith.constant 0 : index
    %1 = vector.load %arg2[%c0_1, %c0_2] : memref<128x128xf32, #tpu.memory_space<vmem>>, vector<128x128xf32>
    %cst = arith.constant dense<0.000000e+00> : vector<4x128xf32>
    %2 = tpu.matmul %0, %1, %cst {dimension_numbers = #tpu.dot_dimension_numbers<[1], [0], [0], [1], [0, 0, 1, 1], [], []>} : vector<4x128xf32>, vector<128x128xf32>, vector<4x128xf32> -> vector<4x128xf32>
    %c0_3 = arith.constant 0 : index
    %c0_4 = arith.constant 0 : index
    %3 = vector.load %arg3[%c0_3, %c0_4] : memref<1x128xf32, #tpu.memory_space<vmem>>, vector<1x128xf32>
    %4 = vector.broadcast %3 : vector<1x128xf32> to vector<4x128xf32>
    %5 = arith.addf %2, %4 : vector<4x128xf32>
    %6 = math.tanh %5 : vector<4x128xf32>
    %c0_5 = arith.constant 0 : index
    %c0_6 = arith.constant 0 : index
    %7 = vector.load %arg4[%c0_5, %c0_6] : memref<128x1xf32, #tpu.memory_space<vmem>>, vector<128x1xf32>
    %cst_7 = arith.constant dense<0.000000e+00> : vector<4x1xf32>
    %8 = tpu.matmul %6, %7, %cst_7 {dimension_numbers = #tpu.dot_dimension_numbers<[1], [0], [0], [1], [0, 0, 1, 1], [], []>} : vector<4x128xf32>, vector<128x1xf32>, vector<4x1xf32> -> vector<4x1xf32>
    %c0_8 = arith.constant 0 : index
    %c0_9 = arith.constant 0 : index
    %9 = vector.load %arg5[%c0_8, %c0_9] : memref<1x1xf32, #tpu.memory_space<vmem>>, vector<1x1xf32>
    %10 = vector.broadcast %9 : vector<1x1xf32> to vector<4x1xf32>
    %11 = arith.addf %8, %10 : vector<4x1xf32>
    %c0_10 = arith.constant 0 : index
    %c0_11 = arith.constant 0 : index
    %12 = vector.load %arg6[%c0_10, %c0_11] : memref<4x1xf32, #tpu.memory_space<vmem>>, vector<4x1xf32>
    tpu.vector_store %arg6[%c0_10, %c0_11], %11 {strides = array<i32>} : memref<4x1xf32, #tpu.memory_space<vmem>>, vector<4x1xf32>,
    return
  }
  func.func @transform_0(%arg0: i32) -> (i32, i32) {
    %c0_i32 = arith.constant 0 : i32
    %c0_i32_0 = arith.constant 0 : i32
    %c0_i32_1 = arith.constant 0 : i32
    return %c0_i32, %c0_i32_0 : i32, i32
  }
  func.func @transform_1(%arg0: i32) -> (i32, i32) {
    %c0_i32 = arith.constant 0 : i32
    %c0_i32_0 = arith.constant 0 : i32
    %c0_i32_1 = arith.constant 0 : i32
    return %c0_i32, %c0_i32_0 : i32, i32
  }
  func.func @transform_2(%arg0: i32) -> (i32, i32) {
    %c0_i32 = arith.constant 0 : i32
    %c0_i32_0 = arith.constant 0 : i32
    %c0_i32_1 = arith.constant 0 : i32
    return %c0_i32, %c0_i32_0 : i32, i32
  }
  func.func @transform_3(%arg0: i32) -> (i32, i32) {
    %c0_i32 = arith.constant 0 : i32
    %c0_i32_0 = arith.constant 0 : i32
    %c0_i32_1 = arith.constant 0 : i32
    return %c0_i32, %c0_i32_0 : i32, i32
  }
  func.func @transform_4(%arg0: i32) -> (i32, i32) {
    %c0_i32 = arith.constant 0 : i32
    %c0_i32_0 = arith.constant 0 : i32
    %c0_i32_1 = arith.constant 0 : i32
    return %c0_i32, %c0_i32_0 : i32, i32
  }
  func.func @transform_5(%arg0: i32) -> (i32, i32) {
    %c0_i32 = arith.constant 0 : i32
    %c0_i32_0 = arith.constant 0 : i32
    %c0_i32_1 = arith.constant 0 : i32
    return %c0_i32, %c0_i32_0 : i32, i32
  }
}

</mosaic_0001>

<bundles_post_ra>
// kernel: longformer_for_multiple_choice.4
= control target key start
LH: loop header
LB: loop body
LE: loop exit
PB: predicated region body
PF: predicated region fallthrough
CT: control target
= control target key end

     0   :  { %s1132_s12 = smov 0   ;;  %s2115_s0 = inlined_call_operand.vmem [shape: f32[512,128], index: 0, kind: input, shape index: {}]   ;;  %s2116_s1 = inlined_call_operand.vmem [shape: f32[1,128], index: 1, kind: input, shape index: {}]   ;;  %s2117_s2 = inlined_call_operand.vmem [shape: f32[1,128], index: 2, kind: input, shape index: {}]   ;;  %s2118_s3 = inlined_call_operand.vmem [shape: f32[512,128], index: 3, kind: output, shape index: {}]  }
   0x1 LB: > { %s1013_s13 = sadd.s32 4294967295, %s1109_s12   ;;  %p1017_p0 = scmp.ge.s32.totalorder %s1109_s12, 1  ;;  %s1109_s12 = sphi %s1132_s12, %s13_s12  }
   0x2   : > { %p138_p1 = scmp.lt.s32.totalorder %s1109_s12, 3 }
   0x4   : > { %p139_p2 = pnand %p1017_p0, %p138_p1 }
   0x5   : > { %s1018_s14 = sshll.u32 (!%p139_p2), %s1013_s13, 5 }
   0x6   : > { %142 = sbr.rel (%p139_p2) target bundleno = 386 (0x182), region = 32  ;;  %p163_p3 = scmp.lt.s32.totalorder (!%p139_p2), %s1018_s14, 63 }
   0xb   : > { %s2140_s14 = smov (!%p163_p3, %s1018_s14), 63  ;;  %v1111_v32 = vmov 128.0  }
   0xc   : > { %s1019_s15 = sshll.u32 %s2140_s14, 3  ;;  %1035 = vrcp.f32 %v1111_v32 }
   0xd   : > { %s1148_s18 = scalar_lea.vmem %s2115_s0, %s1019_s15  ;;  %s1539_s25 = scalar_lea.vmem %s2118_s3, %s1019_s15 }
   0xe   : > { %v1151_v0 = vld [vmem:[%s1148_s18 + $0x20] sm:$0xff]  ;;  %v1154_v1 = vld [vmem:[%s1148_s18 + $0x10] sm:$0xff]  ;;  %v1163_v3 = vld [vmem:[%s1148_s18 + $0x28] sm:$0xff] }
   0xf   : > { %v1157_v2 = vld [vmem:[%s1148_s18] sm:$0xff]  ;;  %214 = vadd.xlane.f32.xlu2 %v1151_v0  ;;  %210 = vadd.xlane.f32.xlu1 %v1154_v1  ;;  %v1166_v4 = vld [vmem:[%s1148_s18 + $0x18] sm:$0xff]  ;;  %v1169_v5 = vld [vmem:[%s1148_s18 + $0x8] sm:$0xff] }
  0x10   : > { %206 = vadd.xlane.f32.xlu0 %v1157_v2  ;;  %v1175_v6 = vld [vmem:[%s1148_s18 + $0x40] sm:$0xff]  ;;  %v1178_v7 = vld [vmem:[%s1148_s18 + $0x38] sm:$0xff]  ;;  %v1181_v8 = vld [vmem:[%s1148_s18 + $0x30] sm:$0xff] }
  0x11   : > { %v1187_v9 = vld [vmem:[%s1148_s18 + $0x58] sm:$0xff]  ;;  %v1190_v10 = vld [vmem:[%s1148_s18 + $0x50] sm:$0xff]  ;;  %v1193_v11 = vld [vmem:[%s1148_s18 + $0x48] sm:$0xff] }
  0x12   : > { %v1199_v12 = vld [vmem:[%s1148_s18 + $0x70] sm:$0xff]  ;;  %v1202_v13 = vld [vmem:[%s1148_s18 + $0x68] sm:$0xff]  ;;  %v1205_v14 = vld [vmem:[%s1148_s18 + $0x60] sm:$0xff]  ;;  %v1036_v33 = vpop.eup %1035 }
  0x13   : > { %v1211_v15 = vld [vmem:[%s1148_s18 + $0x88] sm:$0xff]  ;;  %v1214_v16 = vld [vmem:[%s1148_s18 + $0x80] sm:$0xff]  ;;  %v1217_v17 = vld [vmem:[%s1148_s18 + $0x78] sm:$0xff]  ;;  %v271_v34 = vmul.f32 128.0, %v1036_v33  ;;  %vm275_vm0 = vweird.f32 %v1036_v33 }
  0x14   : > { %v1223_v18 = vld [vmem:[%s1148_s18 + $0xa0] sm:$0xff]  ;;  %v1226_v19 = vld [vmem:[%s1148_s18 + $0x98] sm:$0xff]  ;;  %v1229_v20 = vld [vmem:[%s1148_s18 + $0x90] sm:$0xff] }
  0x15   : > { %v1235_v21 = vld [vmem:[%s1148_s18 + $0xb8] sm:$0xff]  ;;  %v1238_v22 = vld [vmem:[%s1148_s18 + $0xb0] sm:$0xff]  ;;  %v1241_v23 = vld [vmem:[%s1148_s18 + $0xa8] sm:$0xff]  ;;  %v272_v35 = vsub.f32 1.0, %v271_v34 }
  0x16   : > { %v1247_v24 = vld [vmem:[%s1148_s18 + $0xd0] sm:$0xff]  ;;  %v1250_v25 = vld [vmem:[%s1148_s18 + $0xc8] sm:$0xff]  ;;  %v1253_v26 = vld [vmem:[%s1148_s18 + $0xc0] sm:$0xff] }
  0x17   : > { %216 = vadd.xlane.f32.xlu2 %v1163_v3  ;;  %212 = vadd.xlane.f32.xlu1 %v1166_v4  ;;  %v1259_v27 = vld [vmem:[%s1148_s18 + $0xe8] sm:$0xff]  ;;  %v1262_v28 = vld [vmem:[%s1148_s18 + $0xe0] sm:$0xff]  ;;  %v1265_v29 = vld [vmem:[%s1148_s18 + $0xd8] sm:$0xff]  ;;  %v273_v36 = vmul.f32 %v1036_v33, %v272_v35 }
  0x18   : > { %208 = vadd.xlane.f32.xlu0 %v1169_v5  ;;  %v1271_v30 = vld [vmem:[%s1148_s18 + $0xf8] sm:$0xff]  ;;  %v1274_v31 = vld [vmem:[%s1148_s18 + $0xf0] sm:$0xff] }
  0x19   : > { %v274_v37 = vadd.f32 %v1036_v33, %v273_v36 }
  0x1b   : > { %v1278_v38 = vsel %vm275_vm0, %v1036_v33, %v274_v37 }
  0x1f   : > { %222 = vadd.xlane.f32.xlu2 %v1175_v6  ;;  %220 = vadd.xlane.f32.xlu1 %v1178_v7 }
  0x20   : > { %218 = vadd.xlane.f32.xlu0 %v1181_v8 }
  0x27   : > { %228 = vadd.xlane.f32.xlu2 %v1187_v9  ;;  %226 = vadd.xlane.f32.xlu1 %v1190_v10 }
  0x28   : > { %224 = vadd.xlane.f32.xlu0 %v1193_v11 }
  0x2f   : > { %234 = vadd.xlane.f32.xlu2 %v1199_v12  ;;  %232 = vadd.xlane.f32.xlu1 %v1202_v13 }
  0x30   : > { %230 = vadd.xlane.f32.xlu0 %v1205_v14 }
  0x37   : > { %240 = vadd.xlane.f32.xlu2 %v1211_v15  ;;  %238 = vadd.xlane.f32.xlu1 %v1214_v16 }
  0x38   : > { %236 = vadd.xlane.f32.xlu0 %v1217_v17 }
  0x3f   : > { %246 = vadd.xlane.f32.xlu2 %v1223_v18  ;;  %244 = vadd.xlane.f32.xlu1 %v1226_v19 }
  0x40   : > { %242 = vadd.xlane.f32.xlu0 %v1229_v20 }
  0x47   : > { %252 = vadd.xlane.f32.xlu2 %v1235_v21  ;;  %250 = vadd.xlane.f32.xlu1 %v1238_v22 }
  0x48   : > { %248 = vadd.xlane.f32.xlu0 %v1241_v23 }
  0x4f   : > { %258 = vadd.xlane.f32.xlu2 %v1247_v24  ;;  %256 = vadd.xlane.f32.xlu1 %v1250_v25 }
  0x50   : > { %254 = vadd.xlane.f32.xlu0 %v1253_v26 }
  0x57   : > { %264 = vadd.xlane.f32.xlu2 %v1259_v27  ;;  %262 = vadd.xlane.f32.xlu1 %v1262_v28 }
  0x58   : > { %260 = vadd.xlane.f32.xlu0 %v1265_v29 }
  0x5f   : > { %268 = vadd.xlane.f32.xlu1 %v1271_v30 }
  0x60   : > { %266 = vadd.xlane.f32.xlu0 %v1274_v31 }
  0x82   : > { %v215_v39 = vpop.xlane.xlu2 %214  ;;  %v211_v40 = vpop.xlane.xlu1 %210 }
  0x83   : > { %v279_v41 = vmul.f32 %v1278_v38, %v211_v40  ;;  %v207_v42 = vpop.xlane.xlu0 %206  ;;  %v281_v56 = vmul.f32 %v1278_v38, %v215_v39 }
  0x84   : > { %v277_v43 = vmul.f32 %v1278_v38, %v207_v42 }
  0x85   : > { %v1283_v44 = vsub.f32 %v1154_v1, %v279_v41  ;;  %v1312_v61 = vsub.f32 %v1151_v0, %v281_v56 }
  0x86   : > { %v1286_v45 = vsub.f32 %v1157_v2, %v277_v43 }
  0x87   : > { %v343_v46 = vmul.f32 %v1283_v44, %v1283_v44  ;;  %v345_v32 = vmul.f32 %v1312_v61, %v1312_v61 }
  0x88   : > { %v341_v47 = vmul.f32 %v1286_v45, %v1286_v45 }
  0x89   : > { %377 = vadd.xlane.f32.xlu1 %v343_v46 }
  0x8a   : > { %373 = vadd.xlane.f32.xlu2 %v341_v47  ;;  %v217_v48 = vpop.xlane.xlu2 %216  ;;  %v213_v49 = vpop.xlane.xlu1 %212 }
  0x8b   : > { %v282_v50 = vmul.f32 %v1278_v38, %v217_v48  ;;  %v280_v51 = vmul.f32 %v1278_v38, %v213_v49  ;;  %v209_v52 = vpop.xlane.xlu0 %208 }
  0x8c   : > { %v278_v53 = vmul.f32 %v1278_v38, %v209_v52 }
  0x8d   : > { %v1296_v54 = vsub.f32 %v1163_v3, %v282_v50  ;;  %v1299_v55 = vsub.f32 %v1166_v4, %v280_v51 }
  0x8e   : > { %v1303_v57 = vsub.f32 %v1169_v5, %v278_v53 }
  0x8f   : > { %v346_v58 = vmul.f32 %v1296_v54, %v1296_v54  ;;  %v344_v59 = vmul.f32 %v1299_v55, %v1299_v55 }
  0x90   : > { %v342_v60 = vmul.f32 %v1303_v57, %v1303_v57 }
  0x91   : > { %383 = vadd.xlane.f32.xlu1 %v346_v58 }
  0x92   : > { %379 = vadd.xlane.f32.xlu2 %v344_v59  ;;  %375 = vadd.xlane.f32.xlu0 %v342_v60  ;;  %v223_v62 = vpop.xlane.xlu2 %222  ;;  %v221_v63 = vpop.xlane.xlu1 %220 }
  0x93   : > { %v285_v1 = vmul.f32 %v1278_v38, %v223_v62  ;;  %v219_v2 = vpop.xlane.xlu0 %218  ;;  %v284_v0 = vmul.f32 %v1278_v38, %v221_v63 }
  0x94   : > { %v283_v3 = vmul.f32 %v1278_v38, %v219_v2 }
  0x95   : > { %v1317_v4 = vsub.f32 %v1175_v6, %v285_v1  ;;  %v1330_v6 = vsub.f32 %v1178_v7, %v284_v0 }
  0x96   : > { %v1320_v5 = vsub.f32 %v1181_v8, %v283_v3 }
  0x97   : > { %v349_v33 = vmul.f32 %v1317_v4, %v1317_v4  ;;  %v348_v42 = vmul.f32 %v1330_v6, %v1330_v6 }
  0x98   : > { %v347_v34 = vmul.f32 %v1320_v5, %v1320_v5 }
  0x99   : > { %389 = vadd.xlane.f32.xlu1 %v349_v33 }
  0x9a   : > { %381 = vadd.xlane.f32.xlu0 %v345_v32  ;;  %385 = vadd.xlane.f32.xlu2 %v347_v34  ;;  %v229_v35 = vpop.xlane.xlu2 %228  ;;  %v227_v8 = vpop.xlane.xlu1 %226 }
  0x9b   : > { %v288_v36 = vmul.f32 %v1278_v38, %v229_v35  ;;  %v225_v37 = vpop.xlane.xlu0 %224  ;;  %v287_v43 = vmul.f32 %v1278_v38, %v227_v8 }
  0x9c   : > { %v286_v39 = vmul.f32 %v1278_v38, %v225_v37 }
  0x9d   : > { %v1335_v40 = vsub.f32 %v1187_v9, %v288_v36  ;;  %v1348_v9 = vsub.f32 %v1190_v10, %v287_v43 }
  0x9e   : > { %v1338_v41 = vsub.f32 %v1193_v11, %v286_v39 }
  0x9f   : > { %v352_v7 = vmul.f32 %v1335_v40, %v1335_v40  ;;  %v351_v53 = vmul.f32 %v1348_v9, %v1348_v9 }
  0xa0   : > { %v350_v46 = vmul.f32 %v1338_v41, %v1338_v41 }
  0xa1   : > { %395 = vadd.xlane.f32.xlu1 %v352_v7 }
  0xa2   : > { %387 = vadd.xlane.f32.xlu0 %v348_v42  ;;  %391 = vadd.xlane.f32.xlu2 %v350_v46  ;;  %v235_v47 = vpop.xlane.xlu2 %234  ;;  %v233_v11 = vpop.xlane.xlu1 %232 }
  0xa3   : > { %v291_v48 = vmul.f32 %v1278_v38, %v235_v47  ;;  %v231_v49 = vpop.xlane.xlu0 %230  ;;  %v290_v56 = vmul.f32 %v1278_v38, %v233_v11 }
  0xa4   : > { %v289_v50 = vmul.f32 %v1278_v38, %v231_v49 }
  0xa5   : > { %v1353_v51 = vsub.f32 %v1199_v12, %v291_v48  ;;  %v1366_v12 = vsub.f32 %v1202_v13, %v290_v56 }
  0xa6   : > { %v1356_v52 = vsub.f32 %v1205_v14, %v289_v50 }
  0xa7   : > { %v355_v10 = vmul.f32 %v1353_v51, %v1353_v51  ;;  %v354_v3 = vmul.f32 %v1366_v12, %v1366_v12 }
  0xa8   : > { %v353_v58 = vmul.f32 %v1356_v52, %v1356_v52 }
  0xa9   : > { %401 = vadd.xlane.f32.xlu1 %v355_v10 }
  0xaa   : > { %393 = vadd.xlane.f32.xlu0 %v351_v53  ;;  %397 = vadd.xlane.f32.xlu2 %v353_v58  ;;  %v241_v59 = vpop.xlane.xlu2 %240  ;;  %v239_v14 = vpop.xlane.xlu1 %238 }
  0xab   : > { %v294_v60 = vmul.f32 %v1278_v38, %v241_v59  ;;  %v237_v62 = vpop.xlane.xlu0 %236  ;;  %v293_v32 = vmul.f32 %v1278_v38, %v239_v14 }
  0xac   : > { %v292_v63 = vmul.f32 %v1278_v38, %v237_v62 }
  0xad   : > { %v1371_v1 = vsub.f32 %v1211_v15, %v294_v60  ;;  %v1384_v15 = vsub.f32 %v1214_v16, %v293_v32 }
  0xae   : > { %v1374_v2 = vsub.f32 %v1217_v17, %v292_v63 }
  0xaf   : > { %v358_v13 = vmul.f32 %v1371_v1, %v1371_v1  ;;  %v357_v39 = vmul.f32 %v1384_v15, %v1384_v15 }
  0xb0   : > { %v356_v0 = vmul.f32 %v1374_v2, %v1374_v2 }
  0xb1   : > { %407 = vadd.xlane.f32.xlu1 %v358_v13 }
  0xb2   : > { %399 = vadd.xlane.f32.xlu0 %v354_v3  ;;  %403 = vadd.xlane.f32.xlu2 %v356_v0  ;;  %v247_v33 = vpop.xlane.xlu2 %246  ;;  %v245_v17 = vpop.xlane.xlu1 %244 }
  0xb3   : > { %v297_v34 = vmul.f32 %v1278_v38, %v247_v33  ;;  %v243_v35 = vpop.xlane.xlu0 %242  ;;  %v296_v42 = vmul.f32 %v1278_v38, %v245_v17 }
  0xb4   : > { %v295_v8 = vmul.f32 %v1278_v38, %v243_v35 }
  0xb5   : > { %v1389_v36 = vsub.f32 %v1223_v18, %v297_v34  ;;  %v1402_v18 = vsub.f32 %v1226_v19, %v296_v42 }
  0xb6   : > { %v1392_v37 = vsub.f32 %v1229_v20, %v295_v8 }
  0xb7   : > { %v361_v16 = vmul.f32 %v1389_v36, %v1389_v36  ;;  %v360_v50 = vmul.f32 %v1402_v18, %v1402_v18 }
  0xb8   : > { %v359_v43 = vmul.f32 %v1392_v37, %v1392_v37 }
  0xb9   : > { %413 = vadd.xlane.f32.xlu1 %v361_v16 }
  0xba   : > { %405 = vadd.xlane.f32.xlu0 %v357_v39  ;;  %409 = vadd.xlane.f32.xlu2 %v359_v43  ;;  %v253_v7 = vpop.xlane.xlu2 %252  ;;  %v251_v20 = vpop.xlane.xlu1 %250 }
  0xbb   : > { %v300_v46 = vmul.f32 %v1278_v38, %v253_v7  ;;  %v249_v47 = vpop.xlane.xlu0 %248  ;;  %v299_v53 = vmul.f32 %v1278_v38, %v251_v20 }
  0xbc   : > { %v298_v11 = vmul.f32 %v1278_v38, %v249_v47 }
  0xbd   : > { %v1407_v48 = vsub.f32 %v1235_v21, %v300_v46  ;;  %v1420_v21 = vsub.f32 %v1238_v22, %v299_v53 }
  0xbe   : > { %v1410_v49 = vsub.f32 %v1241_v23, %v298_v11 }
  0xbf   : > { %v364_v19 = vmul.f32 %v1407_v48, %v1407_v48  ;;  %v363_v63 = vmul.f32 %v1420_v21, %v1420_v21 }
  0xc0   : > { %v362_v56 = vmul.f32 %v1410_v49, %v1410_v49 }
  0xc1   : > { %419 = vadd.xlane.f32.xlu1 %v364_v19 }
  0xc2   : > { %411 = vadd.xlane.f32.xlu0 %v360_v50  ;;  %415 = vadd.xlane.f32.xlu2 %v362_v56  ;;  %v259_v10 = vpop.xlane.xlu2 %258  ;;  %v257_v23 = vpop.xlane.xlu1 %256 }
  0xc3   : > { %v303_v58 = vmul.f32 %v1278_v38, %v259_v10  ;;  %v255_v59 = vpop.xlane.xlu0 %254  ;;  %v302_v3 = vmul.f32 %v1278_v38, %v257_v23 }
  0xc4   : > { %v301_v14 = vmul.f32 %v1278_v38, %v255_v59 }
  0xc5   : > { %v1425_v60 = vsub.f32 %v1247_v24, %v303_v58  ;;  %v1438_v24 = vsub.f32 %v1250_v25, %v302_v3 }
  0xc6   : > { %v1428_v62 = vsub.f32 %v1253_v26, %v301_v14 }
  0xc7   : > { %v367_v22 = vmul.f32 %v1425_v60, %v1425_v60  ;;  %v366_v8 = vmul.f32 %v1438_v24, %v1438_v24 }
  0xc8   : > { %v365_v32 = vmul.f32 %v1428_v62, %v1428_v62 }
  0xc9   : > { %425 = vadd.xlane.f32.xlu1 %v367_v22 }
  0xca   : > { %417 = vadd.xlane.f32.xlu0 %v363_v63  ;;  %421 = vadd.xlane.f32.xlu2 %v365_v32  ;;  %v265_v13 = vpop.xlane.xlu2 %264  ;;  %v263_v26 = vpop.xlane.xlu1 %262 }
  0xcb   : > { %v306_v0 = vmul.f32 %v1278_v38, %v265_v13  ;;  %v261_v33 = vpop.xlane.xlu0 %260  ;;  %v305_v39 = vmul.f32 %v1278_v38, %v263_v26 }
  0xcc   : > { %v304_v17 = vmul.f32 %v1278_v38, %v261_v33 }
  0xcd   : > { %v1443_v34 = vsub.f32 %v1259_v27, %v306_v0  ;;  %v1456_v27 = vsub.f32 %v1262_v28, %v305_v39 }
  0xce   : > { %v1446_v35 = vsub.f32 %v1265_v29, %v304_v17 }
  0xcf   : > { %v370_v25 = vmul.f32 %v1443_v34, %v1443_v34  ;;  %v369_v20 = vmul.f32 %v1456_v27, %v1456_v27 }
  0xd0   : > { %v368_v42 = vmul.f32 %v1446_v35, %v1446_v35 }
  0xd1   : > { %431 = vadd.xlane.f32.xlu1 %v370_v25 }
  0xd2   : > { %423 = vadd.xlane.f32.xlu0 %v366_v8  ;;  %427 = vadd.xlane.f32.xlu2 %v368_v42  ;;  %v269_v29 = vpop.xlane.xlu1 %268 }
  0xd3   : > { %v267_v16 = vpop.xlane.xlu0 %266  ;;  %v308_v46 = vmul.f32 %v1278_v38, %v269_v29 }
  0xd4   : > { %v307_v43 = vmul.f32 %v1278_v38, %v267_v16 }
  0xd5   : > { %v1468_v28 = vsub.f32 %v1271_v30, %v308_v46 }
  0xd6   : > { %v1460_v7 = vsub.f32 %v1274_v31, %v307_v43 }
  0xd7   : > { %v372_v11 = vmul.f32 %v1468_v28, %v1468_v28 }
  0xd8   : > { %v371_v47 = vmul.f32 %v1460_v7, %v1460_v7 }
  0xda   : > { %429 = vadd.xlane.f32.xlu0 %v369_v20  ;;  %433 = vadd.xlane.f32.xlu2 %v371_v47 }
  0xe2   : > { %435 = vadd.xlane.f32.xlu0 %v372_v11 }
  0xfc   : > { %v378_v50 = vpop.xlane.xlu1 %377 }
  0xfd   : > { %v439_v31 = vmul.f32 %v378_v50, %v1278_v38  ;;  %v374_v53 = vpop.xlane.xlu2 %373 }
  0xfe   : > { %v437_v19 = vmul.f32 %v374_v53, %v1278_v38 }
  0xff   : > { %v471_v56 = vadd.f32 1e-05, %v439_v31 }
 0x100   : > { %v469_v10 = vadd.f32 1e-05, %v437_v19 }
 0x101   : > { %1037 = vrsqrt.f32 %v471_v56  ;;  %vm527_vm1 = vweird.f32 %v471_v56 }
 0x102   : > { %1039 = vrsqrt.f32 %v469_v10  ;;  %vm507_vm3 = vweird.f32 %v469_v10 }
 0x104   : > { %v384_v23 = vpop.xlane.xlu1 %383 }
 0x105   : > { %v442_v58 = vmul.f32 %v384_v23, %v1278_v38  ;;  %v380_v59 = vpop.xlane.xlu2 %379  ;;  %v376_v30 = vpop.xlane.xlu0 %375 }
 0x106   : > { %v440_v14 = vmul.f32 %v380_v59, %v1278_v38  ;;  %v438_v63 = vmul.f32 %v376_v30, %v1278_v38  ;;  %v1505_v59 = vld [vmem:[%s2116_s1] ss:$0 sm:$0xff] }
 0x107   : > { %v1038_v3 = vpop.eup %1037  ;;  %v1477_v22 = vadd.f32 1e-05, %v442_v58 }
 0x108   : > { %v1040_v32 = vpop.eup %1039  ;;  %v522_v13 = vmul.f32 %v1038_v3, %v471_v56  ;;  %v1479_v26 = vadd.f32 1e-05, %v440_v14  ;;  %v1481_v0 = vadd.f32 1e-05, %v438_v63  ;;  %vm528_vm2 = vweird.f32 %v1038_v3  ;;  %v1522_v56 = vld [vmem:[%s2117_s2] ss:$0 sm:$0xff] }
 0x109   : > { %v502_v33 = vmul.f32 %v1040_v32, %v469_v10  ;;  %1041 = vrsqrt.f32 %v1477_v22  ;;  %vm508_vm4 = vweird.f32 %v1040_v32  ;;  %vm557_vm5 = vweird.f32 %v1477_v22  ;;  %vm529_vm7 = vmor %vm527_vm1, %vm528_vm2 }
 0x10a   : > { %v523_v17 = vmul.f32 %v1038_v3, %v522_v13  ;;  %1043 = vrsqrt.f32 %v1479_v26  ;;  %vm537_vm6 = vweird.f32 %v1479_v26  ;;  %vm509_vm8 = vmor %vm507_vm3, %vm508_vm4  ;;  %vm517_vm9 = vweird.f32 %v1481_v0 }
 0x10b   : > { %v503_v8 = vmul.f32 %v1040_v32, %v502_v33  ;;  %1045 = vrsqrt.f32 %v1481_v0 }
 0x10c   : > { %v524_v39 = vmul.f32 0.5, %v523_v17  ;;  %v390_v25 = vpop.xlane.xlu1 %389 }
 0x10d   : > { %v504_v42 = vmul.f32 0.5, %v503_v8  ;;  %v445_v16 = vmul.f32 %v390_v25, %v1278_v38  ;;  %v386_v29 = vpop.xlane.xlu2 %385  ;;  %v382_v43 = vpop.xlane.xlu0 %381 }
 0x10e   : > { %v525_v20 = vsub.f32 1.5, %v524_v39  ;;  %v443_v46 = vmul.f32 %v386_v29, %v1278_v38  ;;  %v441_v63 = vmul.f32 %v382_v43, %v1278_v38 }
 0x10f   : > { %v1488_v47 = vpop.eup %1041  ;;  %v505_v11 = vsub.f32 1.5, %v504_v42  ;;  %v1491_v50 = vadd.f32 1e-05, %v445_v16 }
 0x110   : > { %v1493_v31 = vpop.eup %1043  ;;  %v526_v53 = vmul.f32 %v1038_v3, %v525_v20  ;;  %v552_v19 = vmul.f32 %v1488_v47, %v1477_v22  ;;  %v1498_v23 = vadd.f32 1e-05, %v443_v46  ;;  %vm558_vm10 = vweird.f32 %v1488_v47 }
 0x111   : > { %v1500_v58 = vpop.eup %1045  ;;  %v506_v30 = vmul.f32 %v1040_v32, %v505_v11  ;;  %v532_v14 = vmul.f32 %v1493_v31, %v1479_v26  ;;  %1047 = vrsqrt.f32 %v1491_v50  ;;  %vm538_vm11 = vweird.f32 %v1493_v31  ;;  %vm1550_vm12 = vmor %vm557_vm5, %vm558_vm10 }
 0x112   : > { %v530_v13 = vsel %vm529_vm7, %v1038_v3, %v526_v53  ;;  %v553_v33 = vmul.f32 %v1488_v47, %v552_v19  ;;  %v512_v17 = vmul.f32 %v1500_v58, %v1481_v0  ;;  %1049 = vrsqrt.f32 %v1498_v23  ;;  %vm539_vm0 = vmor %vm537_vm6, %vm538_vm11 }
 0x113   : > { %v823_v8 = vmul.f32 %v530_v13, %v1283_v44  ;;  %v510_v39 = vsel %vm509_vm8, %v1040_v32, %v506_v30  ;;  %v533_v10 = vmul.f32 %v1493_v31, %v532_v14  ;;  %v1532_v20 = vadd.f32 1e-05, %v441_v63 }
 0x114   : > { %v821_v3 = vmul.f32 %v510_v39, %v1286_v45  ;;  %v554_v25 = vmul.f32 0.5, %v553_v33  ;;  %v513_v42 = vmul.f32 %v1500_v58, %v512_v17  ;;  %v396_v16 = vpop.xlane.xlu1 %395  ;;  %vm518_vm13 = vweird.f32 %v1500_v58 }
 0x115   : > { %v859_v29 = vmul.f32 %v1505_v59, %v823_v8  ;;  %v534_v43 = vmul.f32 0.5, %v533_v10  ;;  %v392_v44 = vpop.xlane.xlu2 %391  ;;  %v388_v32 = vpop.xlane.xlu0 %387  ;;  %v448_v53 = vmul.f32 %v396_v16, %v1278_v38  ;;  %1051 = vrsqrt.f32 %v1532_v20  ;;  %vm519_vm1 = vmor %vm517_vm9, %vm518_vm13 }
 0x116   : > { %v857_v45 = vmul.f32 %v1505_v59, %v821_v3  ;;  %v555_v46 = vsub.f32 1.5, %v554_v25  ;;  %v514_v11 = vmul.f32 0.5, %v513_v42  ;;  %vm587_vm14 = vweird.f32 %v1491_v50 }
 0x117   : > { %v1543_v19 = vpop.eup %1047  ;;  %v895_v30 = vadd.f32 %v1522_v56, %v859_v29  ;;  %v535_v63 = vsub.f32 1.5, %v534_v43  ;;  %v1564_v39 = vadd.f32 1e-05, %v448_v53  ;;  %v446_v16 = vmul.f32 %v392_v44, %v1278_v38 }
 0x118   : > { %v893_v13 = vadd.f32 %v1522_v56, %v857_v45  ;;  %v556_v33 = vmul.f32 %v1488_v47, %v555_v46  ;;  %v515_v17 = vsub.f32 1.5, %v514_v11  ;;  %v582_v8 = vmul.f32 %v1543_v19, %v1491_v50  ;;  %v1566_v10 = vpop.eup %1049 }
 0x119   : > { %927 = vst [vmem:[%s1539_s25 + $0x10] sm:$0xff] %v895_v30  ;;  %v536_v22 = vmul.f32 %v1493_v31, %v535_v63  ;;  %vm588_vm15 = vweird.f32 %v1543_v19  ;;  %v444_v26 = vmul.f32 %v388_v32, %v1278_v38  ;;  %1053 = vrsqrt.f32 %v1564_v39 }
 0x11a   : > { %925 = vst [vmem:[%s1539_s25] sm:$0xff] %v893_v13  ;;  %v560_v3 = vsel %vm1550_vm12, %v1488_v47, %v556_v33  ;;  %v516_v25 = vmul.f32 %v1500_v58, %v515_v17  ;;  %v583_v42 = vmul.f32 %v1543_v19, %v582_v8  ;;  %v562_v47 = vmul.f32 %v1566_v10, %v1498_v23  ;;  %vm1606_vm3 = vmor %vm587_vm14, %vm588_vm15 }
 0x11b   : > { %v826_v29 = vmul.f32 %v560_v3, %v1296_v54  ;;  %v540_v43 = vsel %vm539_vm0, %v1493_v31, %v536_v22  ;;  %v1591_v44 = vpop.eup %1051  ;;  %vm567_vm2 = vweird.f32 %v1498_v23  ;;  %v1610_v17 = vadd.f32 1e-05, %v446_v16 }
 0x11c   : > { %v824_v45 = vmul.f32 %v540_v43, %v1299_v55  ;;  %v520_v46 = vsel %vm519_vm1, %v1500_v58, %v516_v25  ;;  %v584_v11 = vmul.f32 0.5, %v583_v42  ;;  %v402_v54 = vpop.xlane.xlu1 %401  ;;  %v563_v53 = vmul.f32 %v1566_v10, %v562_v47 }
 0x11d   : > { %v862_v31 = vmul.f32 %v1505_v59, %v826_v29  ;;  %v822_v0 = vmul.f32 %v520_v46, %v1303_v57  ;;  %v398_v30 = vpop.xlane.xlu2 %397  ;;  %v394_v14 = vpop.xlane.xlu0 %393  ;;  %v542_v58 = vmul.f32 %v1591_v44, %v1532_v20  ;;  %v1615_v25 = vadd.f32 1e-05, %v444_v26 }
 0x11e   : > { %v860_v32 = vmul.f32 %v1505_v59, %v824_v45  ;;  %v585_v55 = vsub.f32 1.5, %v584_v11  ;;  %v564_v33 = vmul.f32 0.5, %v563_v53  ;;  %vm568_vm4 = vweird.f32 %v1566_v10 }
 0x11f   : > { %v898_v63 = vadd.f32 %v1522_v56, %v862_v31  ;;  %v858_v13 = vmul.f32 %v1505_v59, %v822_v0  ;;  %v543_v3 = vmul.f32 %v1591_v44, %v542_v58  ;;  %1055 = vrsqrt.f32 %v1610_v17  ;;  %v1621_v29 = vpop.eup %1053  ;;  %vm569_vm7 = vmor %vm567_vm2, %vm568_vm4 }
 0x120   : > { %v896_v8 = vadd.f32 %v1522_v56, %v860_v32  ;;  %v586_v22 = vmul.f32 %v1543_v19, %v585_v55  ;;  %v565_v50 = vsub.f32 1.5, %v564_v33  ;;  %vm547_vm5 = vweird.f32 %v1532_v20 }
 0x121   : > { %930 = vst [vmem:[%s1539_s25 + $0x28] sm:$0xff] %v898_v63  ;;  %v894_v42 = vadd.f32 %v1522_v56, %v858_v13  ;;  %v544_v43 = vmul.f32 0.5, %v543_v3  ;;  %1057 = vrsqrt.f32 %v1615_v25  ;;  %vm548_vm6 = vweird.f32 %v1591_v44 }
 0x122   : > { %928 = vst [vmem:[%s1539_s25 + $0x18] sm:$0xff] %v896_v8  ;;  %v590_v16 = vsel %vm1606_vm3, %v1543_v19, %v586_v22  ;;  %v566_v26 = vmul.f32 %v1566_v10, %v565_v50  ;;  %v612_v45 = vmul.f32 %v1621_v29, %v1564_v39  ;;  %v451_v19 = vmul.f32 %v402_v54, %v1278_v38  ;;  %vm549_vm9 = vmor %vm547_vm5, %vm548_vm6 }
 0x123   : > { %926 = vst [vmem:[%s1539_s25 + $0x8] sm:$0xff] %v894_v42  ;;  %v829_v47 = vmul.f32 %v590_v16, %v1317_v4  ;;  %v545_v46 = vsub.f32 1.5, %v544_v43  ;;  %v449_v11 = vmul.f32 %v398_v30, %v1278_v38  ;;  %v447_v31 = vmul.f32 %v394_v14, %v1278_v38 }
 0x124   : > { %v408_v0 = vpop.xlane.xlu1 %407  ;;  %v570_v53 = vsel %vm569_vm7, %v1566_v10, %v566_v26  ;;  %v613_v32 = vmul.f32 %v1621_v29, %v612_v45  ;;  %vm617_vm8 = vweird.f32 %v1564_v39  ;;  %v1647_v30 = vadd.f32 1e-05, %v451_v19 }
 0x125   : > { %v865_v4 = vmul.f32 %v1505_v59, %v829_v47  ;;  %v454_v55 = vmul.f32 %v408_v0, %v1278_v38  ;;  %v404_v58 = vpop.xlane.xlu2 %403  ;;  %v400_v63 = vpop.xlane.xlu0 %399  ;;  %v827_v23 = vmul.f32 %v570_v53, %v1320_v5  ;;  %v546_v54 = vmul.f32 %v1591_v44, %v545_v46 }
 0x126   : > { %v1649_v14 = vpop.eup %1055  ;;  %v614_v10 = vmul.f32 0.5, %v613_v32  ;;  %vm618_vm10 = vweird.f32 %v1621_v29  ;;  %v1657_v57 = vadd.f32 1e-05, %v449_v11  ;;  %v1665_v3 = vadd.f32 1e-05, %v447_v31 }
 0x127   : > { %v901_v13 = vadd.f32 %v1522_v56, %v865_v4  ;;  %v1659_v5 = vpop.eup %1057  ;;  %v863_v33 = vmul.f32 %v1505_v59, %v827_v23  ;;  %v550_v8 = vsel %vm549_vm9, %v1591_v44, %v546_v54  ;;  %v592_v22 = vmul.f32 %v1649_v14, %v1610_v17  ;;  %vm1676_vm11 = vmor %vm617_vm8, %vm618_vm10 }
 0x128   : > { %v825_v20 = vmul.f32 %v550_v8, %v1312_v61  ;;  %v615_v42 = vsub.f32 1.5, %v614_v10  ;;  %v572_v50 = vmul.f32 %v1659_v5, %v1615_v25  ;;  %v1671_v16 = vadd.f32 1e-05, %v454_v55 }
 0x129   : > { %933 = vst [vmem:[%s1539_s25 + $0x40] sm:$0xff] %v901_v13  ;;  %v899_v43 = vadd.f32 %v1522_v56, %v863_v33  ;;  %v593_v47 = vmul.f32 %v1649_v14, %v592_v22  ;;  %vm597_vm12 = vweird.f32 %v1610_v17  ;;  %1059 = vrsqrt.f32 %v1647_v30 }
 0x12a   : > { %v861_v61 = vmul.f32 %v1505_v59, %v825_v20  ;;  %v616_v26 = vmul.f32 %v1621_v29, %v615_v42  ;;  %v573_v45 = vmul.f32 %v1659_v5, %v572_v50  ;;  %1061 = vrsqrt.f32 %v1657_v57 }
 0x12b   : > { %931 = vst [vmem:[%s1539_s25 + $0x30] sm:$0xff] %v899_v43  ;;  %v594_v39 = vmul.f32 0.5, %v593_v47  ;;  %vm598_vm13 = vweird.f32 %v1649_v14  ;;  %vm577_vm14 = vweird.f32 %v1615_v25  ;;  %1063 = vrsqrt.f32 %v1665_v3 }
 0x12c   : > { %v897_v46 = vadd.f32 %v1522_v56, %v861_v61  ;;  %v620_v19 = vsel %vm1676_vm11, %v1621_v29, %v616_v26  ;;  %v574_v11 = vmul.f32 0.5, %v573_v45  ;;  %1065 = vrsqrt.f32 %v1671_v16  ;;  %v414_v31 = vpop.xlane.xlu1 %413  ;;  %vm599_vm3 = vmor %vm597_vm12, %vm598_vm13 }
 0x12d   : > { %v410_v0 = vpop.xlane.xlu2 %409  ;;  %v832_v4 = vmul.f32 %v620_v19, %v1335_v40  ;;  %v595_v53 = vsub.f32 1.5, %v594_v39  ;;  %vm578_vm15 = vweird.f32 %v1659_v5  ;;  %v452_v32 = vmul.f32 %v404_v58, %v1278_v38  ;;  %v406_v55 = vpop.xlane.xlu0 %405 }
 0x12e   : > { %929 = vst [vmem:[%s1539_s25 + $0x20] sm:$0xff] %v897_v46  ;;  %v575_v23 = vsub.f32 1.5, %v574_v11  ;;  %vm647_vm0 = vweird.f32 %v1647_v30  ;;  %vm627_vm1 = vweird.f32 %v1657_v57  ;;  %v450_v29 = vmul.f32 %v400_v63, %v1278_v38  ;;  %vm579_vm4 = vmor %vm577_vm14, %vm578_vm15 }
 0x12f   : > { %v1703_v54 = vpop.eup %1059  ;;  %v868_v13 = vmul.f32 %v1505_v59, %v832_v4  ;;  %v596_v40 = vmul.f32 %v1649_v14, %v595_v53  ;;  %vm677_vm2 = vweird.f32 %v1671_v16  ;;  %v457_v10 = vmul.f32 %v414_v31, %v1278_v38 }
 0x130   : > { %v455_v58 = vmul.f32 %v410_v0, %v1278_v38  ;;  %v1710_v33 = vpop.eup %1061  ;;  %v576_v63 = vmul.f32 %v1659_v5, %v575_v23  ;;  %v642_v8 = vmul.f32 %v1703_v54, %v1647_v30  ;;  %v1719_v22 = vadd.f32 1e-05, %v452_v32 }
 0x131   : > { %v453_v20 = vmul.f32 %v406_v55, %v1278_v38  ;;  %v1722_v42 = vpop.eup %1063  ;;  %v904_v50 = vadd.f32 %v1522_v56, %v868_v13  ;;  %v600_v43 = vsel %vm599_vm3, %v1649_v14, %v596_v40  ;;  %vm648_vm5 = vweird.f32 %v1703_v54 }
 0x132   : > { %v622_v17 = vmul.f32 %v1710_v33, %v1657_v57  ;;  %v1066_v44 = vpop.eup %1065  ;;  %v830_v47 = vmul.f32 %v600_v43, %v1338_v41  ;;  %v580_v61 = vsel %vm579_vm4, %v1659_v5, %v576_v63  ;;  %v643_v26 = vmul.f32 %v1703_v54, %v642_v8  ;;  %vm1755_vm8 = vmor %vm647_vm0, %vm648_vm5 }
 0x133   : > { %v602_v14 = vmul.f32 %v1722_v42, %v1665_v3  ;;  %936 = vst [vmem:[%s1539_s25 + $0x58] sm:$0xff] %v904_v50  ;;  %v828_v45 = vmul.f32 %v580_v61, %v1330_v6  ;;  %v672_v39 = vmul.f32 %v1066_v44, %v1671_v16  ;;  %v1742_v46 = vadd.f32 1e-05, %v450_v29 }
 0x134   : > { %v623_v25 = vmul.f32 %v1710_v33, %v622_v17  ;;  %v866_v19 = vmul.f32 %v1505_v59, %v830_v47  ;;  %v644_v11 = vmul.f32 0.5, %v643_v26  ;;  %vm628_vm6 = vweird.f32 %v1710_v33 }
 0x135   : > { %v603_v41 = vmul.f32 %v1722_v42, %v602_v14  ;;  %v864_v5 = vmul.f32 %v1505_v59, %v828_v45  ;;  %v673_v0 = vmul.f32 %v1066_v44, %v672_v39  ;;  %1067 = vrsqrt.f32 %v1719_v22  ;;  %v1765_v8 = vpop.xlane.xlu0 %411  ;;  %vm1773_vm10 = vmor %vm627_vm1, %vm628_vm6 }
 0x136   : > { %v624_v31 = vmul.f32 0.5, %v623_v25  ;;  %v902_v6 = vadd.f32 %v1522_v56, %v866_v19  ;;  %v645_v4 = vsub.f32 1.5, %v644_v11  ;;  %vm678_vm7 = vweird.f32 %v1066_v44 }
 0x137   : > { %v604_v53 = vmul.f32 0.5, %v603_v41  ;;  %v900_v32 = vadd.f32 %v1522_v56, %v864_v5  ;;  %v674_v29 = vmul.f32 0.5, %v673_v0  ;;  %1069 = vrsqrt.f32 %v1742_v46  ;;  %vm1787_vm12 = vmor %vm677_vm2, %vm678_vm7 }
 0x138   : > { %v625_v23 = vsub.f32 1.5, %v624_v31  ;;  %934 = vst [vmem:[%s1539_s25 + $0x48] sm:$0xff] %v902_v6  ;;  %v646_v13 = vmul.f32 %v1703_v54, %v645_v4  ;;  %vm608_vm9 = vweird.f32 %v1722_v42  ;;  %v1763_v63 = vadd.f32 1e-05, %v457_v10  ;;  %v416_v10 = vpop.xlane.xlu2 %415 }
 0x139   : > { %v605_v40 = vsub.f32 1.5, %v604_v53  ;;  %932 = vst [vmem:[%s1539_s25 + $0x38] sm:$0xff] %v900_v32  ;;  %vm607_vm11 = vweird.f32 %v1665_v3  ;;  %v675_v43 = vsub.f32 1.5, %v674_v29  ;;  %v1778_v17 = vadd.f32 1e-05, %v455_v58  ;;  %v420_v58 = vpop.xlane.xlu1 %419 }
 0x13a   : > { %v626_v30 = vmul.f32 %v1710_v33, %v625_v23  ;;  %v650_v47 = vsel %vm1755_vm8, %v1703_v54, %v646_v13  ;;  %1071 = vrsqrt.f32 %v1763_v63  ;;  %v1792_v3 = vadd.f32 1e-05, %v453_v20  ;;  %vm609_vm13 = vmor %vm607_vm11, %vm608_vm9 }
 0x13b   : > { %v606_v61 = vmul.f32 %v1722_v42, %v605_v40  ;;  %v1794_v26 = vpop.eup %1067  ;;  %v835_v14 = vmul.f32 %v650_v47, %v1353_v51  ;;  %v676_v16 = vmul.f32 %v1066_v44, %v675_v43  ;;  %1073 = vrsqrt.f32 %v1778_v17 }
 0x13c   : > { %v630_v54 = vsel %vm1773_vm10, %v1710_v33, %v626_v30  ;;  %v652_v25 = vmul.f32 %v1794_v26, %v1719_v22  ;;  %vm657_vm14 = vweird.f32 %v1719_v22  ;;  %vm637_vm15 = vweird.f32 %v1742_v46 }
 0x13d   : > { %v833_v45 = vmul.f32 %v630_v54, %v1356_v52  ;;  %v610_v20 = vsel %vm609_vm13, %v1722_v42, %v606_v61  ;;  %v1807_v39 = vpop.eup %1069  ;;  %v871_v51 = vmul.f32 %v1505_v59, %v835_v14  ;;  %v680_v33 = vsel %vm1787_vm12, %v1066_v44, %v676_v16  ;;  %v1841_v40 = vpop.xlane.xlu0 %417 }
 0x13e   : > { %v831_v19 = vmul.f32 %v610_v20, %v1348_v9  ;;  %v838_v52 = vmul.f32 %v680_v33, %v1371_v1  ;;  %v653_v42 = vmul.f32 %v1794_v26, %v652_v25  ;;  %v632_v41 = vmul.f32 %v1807_v39, %v1742_v46 }
 0x13f   : > { %v869_v11 = vmul.f32 %v1505_v59, %v833_v45  ;;  %v907_v9 = vadd.f32 %v1522_v56, %v871_v51  ;;  %vm707_vm0 = vweird.f32 %v1763_v63  ;;  %1075 = vrsqrt.f32 %v1792_v3 }
 0x140   : > { %v867_v5 = vmul.f32 %v1505_v59, %v831_v19  ;;  %v1824_v44 = vpop.eup %1071  ;;  %v874_v31 = vmul.f32 %v1505_v59, %v838_v52  ;;  %v654_v0 = vmul.f32 0.5, %v653_v42  ;;  %v633_v6 = vmul.f32 %v1807_v39, %v632_v41  ;;  %v422_v47 = vpop.xlane.xlu2 %421 }
 0x141   : > { %v905_v1 = vadd.f32 %v1522_v56, %v869_v11  ;;  %v1829_v4 = vpop.eup %1073  ;;  %939 = vst [vmem:[%s1539_s25 + $0x70] sm:$0xff] %v907_v9  ;;  %vm658_vm1 = vweird.f32 %v1794_v26  ;;  %v702_v32 = vmul.f32 %v1824_v44, %v1763_v63  ;;  %vm687_vm2 = vweird.f32 %v1778_v17  ;;  %v426_v54 = vpop.xlane.xlu1 %425 }
 0x142   : > { %v903_v53 = vadd.f32 %v1522_v56, %v867_v5  ;;  %v910_v55 = vadd.f32 %v1522_v56, %v874_v31  ;;  %v655_v23 = vsub.f32 1.5, %v654_v0  ;;  %v634_v29 = vmul.f32 0.5, %v633_v6  ;;  %vm659_vm5 = vmor %vm657_vm14, %vm658_vm1 }
 0x143   : > { %937 = vst [vmem:[%s1539_s25 + $0x60] sm:$0xff] %v905_v1  ;;  %v682_v13 = vmul.f32 %v1829_v4, %v1778_v17  ;;  %vm638_vm3 = vweird.f32 %v1807_v39  ;;  %v703_v30 = vmul.f32 %v1824_v44, %v702_v32  ;;  %v460_v50 = vmul.f32 %v420_v58, %v1278_v38 }
 0x144   : > { %935 = vst [vmem:[%s1539_s25 + $0x50] sm:$0xff] %v903_v53  ;;  %v458_v43 = vmul.f32 %v416_v10, %v1278_v38  ;;  %v656_v61 = vmul.f32 %v1794_v26, %v655_v23  ;;  %v635_v57 = vsub.f32 1.5, %v634_v29  ;;  %vm708_vm4 = vweird.f32 %v1824_v44  ;;  %vm639_vm6 = vmor %vm637_vm15, %vm638_vm3 }
 0x145   : > { %942 = vst [vmem:[%s1539_s25 + $0x88] sm:$0xff] %v910_v55  ;;  %v683_v14 = vmul.f32 %v1829_v4, %v682_v13  ;;  %v1076_v16 = vpop.eup %1075  ;;  %v704_v45 = vmul.f32 0.5, %v703_v30  ;;  %v1856_v58 = vadd.f32 1e-05, %v460_v50  ;;  %v456_v20 = vmul.f32 %v1765_v8, %v1278_v38  ;;  %vm1877_vm7 = vmor %vm707_vm0, %vm708_vm4  ;;  %v1901_v55 = vpop.xlane.xlu0 %423 }
 0x146   : > { %v1858_v10 = vadd.f32 1e-05, %v458_v43  ;;  %v660_v25 = vsel %vm659_vm5, %v1794_v26, %v656_v61  ;;  %v636_v51 = vmul.f32 %v1807_v39, %v635_v57  ;;  %v662_v33 = vmul.f32 %v1076_v16, %v1792_v3 }
 0x147   : > { %v684_v19 = vmul.f32 0.5, %v683_v14  ;;  %v836_v11 = vmul.f32 %v660_v25, %v1374_v2  ;;  %v705_v22 = vsub.f32 1.5, %v704_v45  ;;  %1077 = vrsqrt.f32 %v1856_v58 }
 0x148   : > { %v463_v52 = vmul.f32 %v426_v54, %v1278_v38  ;;  %v640_v8 = vsel %vm639_vm6, %v1807_v39, %v636_v51  ;;  %vm688_vm8 = vweird.f32 %v1829_v4  ;;  %v663_v46 = vmul.f32 %v1076_v16, %v662_v33  ;;  %v428_v29 = vpop.xlane.xlu2 %427 }
 0x149   : > { %v685_v2 = vsub.f32 1.5, %v684_v19  ;;  %v872_v42 = vmul.f32 %v1505_v59, %v836_v11  ;;  %v834_v41 = vmul.f32 %v640_v8, %v1366_v12  ;;  %v706_v9 = vmul.f32 %v1824_v44, %v705_v22  ;;  %vm689_vm10 = vmor %vm687_vm2, %vm688_vm8  ;;  %v432_v54 = vpop.xlane.xlu1 %431 }
 0x14a   : > { %1079 = vrsqrt.f32 %v1858_v10  ;;  %v664_v63 = vmul.f32 0.5, %v663_v46  ;;  %vm668_vm9 = vweird.f32 %v1076_v16  ;;  %v1887_v5 = vadd.f32 1e-05, %v456_v20 }
 0x14b   : > { %v686_v39 = vmul.f32 %v1829_v4, %v685_v2  ;;  %v908_v1 = vadd.f32 %v1522_v56, %v872_v42  ;;  %v870_v31 = vmul.f32 %v1505_v59, %v834_v41  ;;  %v710_v0 = vsel %vm1877_vm7, %v1824_v44, %v706_v9 }
 0x14c   : > { %v1896_v12 = vadd.f32 1e-05, %v463_v52  ;;  %v841_v6 = vmul.f32 %v710_v0, %v1389_v36  ;;  %v665_v32 = vsub.f32 1.5, %v664_v63  ;;  %1081 = vrsqrt.f32 %v1887_v5 }
 0x14d   : > { %v690_v53 = vsel %vm689_vm10, %v1829_v4, %v686_v39  ;;  %v1903_v23 = vpop.eup %1077  ;;  %940 = vst [vmem:[%s1539_s25 + $0x78] sm:$0xff] %v908_v1  ;;  %v906_v44 = vadd.f32 %v1522_v56, %v870_v31  ;;  %vm667_vm11 = vweird.f32 %v1792_v3  ;;  %vm737_vm13 = vweird.f32 %v1856_v58  ;;  %v1965_v39 = vpop.xlane.xlu0 %429 }
 0x14e   : > { %v839_v17 = vmul.f32 %v690_v53, %v1392_v37  ;;  %1083 = vrsqrt.f32 %v1896_v12  ;;  %v877_v36 = vmul.f32 %v1505_v59, %v841_v6  ;;  %v666_v13 = vmul.f32 %v1076_v16, %v665_v32  ;;  %vm669_vm12 = vmor %vm667_vm11, %vm668_vm9 }
 0x14f   : > { %v732_v4 = vmul.f32 %v1903_v23, %v1856_v58  ;;  %938 = vst [vmem:[%s1539_s25 + $0x68] sm:$0xff] %v906_v44  ;;  %v461_v37 = vmul.f32 %v422_v47, %v1278_v38  ;;  %v459_v43 = vmul.f32 %v1841_v40, %v1278_v38  ;;  %vm717_vm14 = vweird.f32 %v1858_v10 }
 0x150   : > { %v1913_v30 = vpop.eup %1079  ;;  %v875_v50 = vmul.f32 %v1505_v59, %v839_v17  ;;  %v913_v3 = vadd.f32 %v1522_v56, %v877_v36  ;;  %v670_v61 = vsel %vm669_vm12, %v1076_v16, %v666_v13  ;;  %vm738_vm15 = vweird.f32 %v1903_v23  ;;  %v434_v31 = vpop.xlane.xlu2 %433 }
 0x151   : > { %v733_v57 = vmul.f32 %v1903_v23, %v732_v4  ;;  %v712_v14 = vmul.f32 %v1913_v30, %v1858_v10  ;;  %v837_v20 = vmul.f32 %v670_v61, %v1384_v15  ;;  %v1929_v47 = vadd.f32 1e-05, %v461_v37  ;;  %vm1955_vm2 = vmor %vm737_vm13, %vm738_vm15 }
 0x152   : > { %v911_v45 = vadd.f32 %v1522_v56, %v875_v50  ;;  %v1931_v25 = vpop.eup %1081  ;;  %945 = vst [vmem:[%s1539_s25 + $0xa0] sm:$0xff] %v913_v3  ;;  %v1936_v51 = vadd.f32 1e-05, %v459_v43  ;;  %vm697_vm0 = vweird.f32 %v1887_v5  ;;  %v466_v11 = vmul.f32 %v432_v54, %v1278_v38 }
 0x153   : > { %v734_v40 = vmul.f32 0.5, %v733_v57  ;;  %v713_v16 = vmul.f32 %v1913_v30, %v712_v14  ;;  %v873_v33 = vmul.f32 %v1505_v59, %v837_v20  ;;  %v692_v15 = vmul.f32 %v1931_v25, %v1887_v5 }
 0x154   : > { %v1938_v19 = vpop.eup %1083  ;;  %943 = vst [vmem:[%s1539_s25 + $0x90] sm:$0xff] %v911_v45  ;;  %1085 = vrsqrt.f32 %v1929_v47  ;;  %vm767_vm1 = vweird.f32 %v1896_v12  ;;  %vm718_vm3 = vweird.f32 %v1913_v30  ;;  %vm698_vm4 = vweird.f32 %v1931_v25 }
 0x155   : > { %v735_v22 = vsub.f32 1.5, %v734_v40  ;;  %v714_v52 = vmul.f32 0.5, %v713_v16  ;;  %v762_v8 = vmul.f32 %v1938_v19, %v1896_v12  ;;  %v909_v26 = vadd.f32 %v1522_v56, %v873_v33  ;;  %vm719_vm7 = vmor %vm717_vm14, %vm718_vm3 }
 0x156   : > { %v693_v46 = vmul.f32 %v1931_v25, %v692_v15  ;;  %1087 = vrsqrt.f32 %v1936_v51  ;;  %vm768_vm5 = vweird.f32 %v1938_v19  ;;  %v1969_v63 = vadd.f32 1e-05, %v466_v11  ;;  %vm699_vm9 = vmor %vm697_vm0, %vm698_vm4 }
 0x157   : > { %v736_v42 = vmul.f32 %v1903_v23, %v735_v22  ;;  %v715_v41 = vsub.f32 1.5, %v714_v52  ;;  %v763_v9 = vmul.f32 %v1938_v19, %v762_v8  ;;  %941 = vst [vmem:[%s1539_s25 + $0x80] sm:$0xff] %v909_v26  ;;  %v464_v1 = vmul.f32 %v428_v29, %v1278_v38  ;;  %vm1998_vm8 = vmor %vm767_vm1, %vm768_vm5  ;;  %v436_v22 = vpop.xlane.xlu0 %435 }
 0x158   : > { %v694_v58 = vmul.f32 0.5, %v693_v46  ;;  %vm747_vm6 = vweird.f32 %v1929_v47  ;;  %1089 = vrsqrt.f32 %v1969_v63  ;;  %v467_v4 = vmul.f32 %v434_v31, %v1278_v38 }
 0x159   : > { %v740_v0 = vsel %vm1955_vm2, %v1903_v23, %v736_v42  ;;  %v716_v6 = vmul.f32 %v1913_v30, %v715_v41  ;;  %v764_v53 = vmul.f32 0.5, %v763_v9  ;;  %v462_v23 = vmul.f32 %v1901_v55, %v1278_v38 }
 0x15a   : > { %v1977_v32 = vpop.eup %1085  ;;  %v844_v44 = vmul.f32 %v740_v0, %v1407_v48  ;;  %v695_v17 = vsub.f32 1.5, %v694_v58  ;;  %vm727_vm10 = vweird.f32 %v1936_v51  ;;  %vm797_vm11 = vweird.f32 %v1969_v63 }
 0x15b   : > { %v720_v29 = vsel %vm719_vm7, %v1913_v30, %v716_v6  ;;  %v765_v36 = vsub.f32 1.5, %v764_v53  ;;  %v742_v13 = vmul.f32 %v1977_v32, %v1929_v47  ;;  %v2002_v30 = vadd.f32 1e-05, %v464_v1 }
 0x15c   : > { %v1088_v48 = vpop.eup %1087  ;;  %v880_v50 = vmul.f32 %v1505_v59, %v844_v44  ;;  %v842_v10 = vmul.f32 %v720_v29, %v1410_v49  ;;  %v696_v37 = vmul.f32 %v1931_v25, %v695_v17  ;;  %vm748_vm12 = vweird.f32 %v1977_v32 }
 0x15d   : > { %v766_v49 = vmul.f32 %v1938_v19, %v765_v36  ;;  %v743_v43 = vmul.f32 %v1977_v32, %v742_v13  ;;  %v722_v3 = vmul.f32 %v1088_v48, %v1936_v51  ;;  %1091 = vrsqrt.f32 %v2002_v30  ;;  %vm749_vm15 = vmor %vm747_vm6, %vm748_vm12 }
 0x15e   : > { %v916_v12 = vadd.f32 %v1522_v56, %v880_v50  ;;  %v878_v61 = vmul.f32 %v1505_v59, %v842_v10  ;;  %v700_v57 = vsel %vm699_vm9, %v1931_v25, %v696_v37  ;;  %v1090_v20 = vpop.eup %1089  ;;  %v2025_v25 = vadd.f32 1e-05, %v462_v23 }
 0x15f   : > { %v840_v5 = vmul.f32 %v700_v57, %v1402_v18  ;;  %v770_v14 = vsel %vm1998_vm8, %v1938_v19, %v766_v49  ;;  %v744_v54 = vmul.f32 0.5, %v743_v43  ;;  %v723_v45 = vmul.f32 %v1088_v48, %v722_v3 }
 0x160   : > { %948 = vst [vmem:[%s1539_s25 + $0xb8] sm:$0xff] %v916_v12  ;;  %v914_v40 = vadd.f32 %v1522_v56, %v878_v61  ;;  %v847_v16 = vmul.f32 %v770_v14, %v1425_v60  ;;  %v792_v11 = vmul.f32 %v1090_v20, %v1969_v63  ;;  %vm728_vm13 = vweird.f32 %v1088_v48 }
 0x161   : > { %v876_v33 = vmul.f32 %v1505_v59, %v840_v5  ;;  %v745_v15 = vsub.f32 1.5, %v744_v54  ;;  %v724_v18 = vmul.f32 0.5, %v723_v45  ;;  %vm798_vm14 = vweird.f32 %v1090_v20  ;;  %vm729_vm0 = vmor %vm727_vm10, %vm728_vm13 }
 0x162   : > { %946 = vst [vmem:[%s1539_s25 + $0xa8] sm:$0xff] %v914_v40  ;;  %v883_v19 = vmul.f32 %v1505_v59, %v847_v16  ;;  %1093 = vrsqrt.f32 %v2025_v25  ;;  %v793_v26 = vmul.f32 %v1090_v20, %v792_v11  ;;  %v2039_v42 = vadd.f32 1e-05, %v467_v4  ;;  %vm2060_vm1 = vmor %vm797_vm11, %vm798_vm14 }
 0x163   : > { %v912_v60 = vadd.f32 %v1522_v56, %v876_v33  ;;  %v746_v52 = vmul.f32 %v1977_v32, %v745_v15  ;;  %v725_v8 = vsub.f32 1.5, %v724_v18  ;;  %v1092_v2 = vpop.eup %1091  ;;  %v465_v41 = vmul.f32 %v1965_v39, %v1278_v38 }
 0x164   : > { %v919_v46 = vadd.f32 %v1522_v56, %v883_v19  ;;  %v468_v9 = vmul.f32 %v436_v22, %v1278_v38  ;;  %v794_v31 = vmul.f32 0.5, %v793_v26  ;;  %v772_v0 = vmul.f32 %v1092_v2, %v2002_v30 }
 0x165   : > { %944 = vst [vmem:[%s1539_s25 + $0x98] sm:$0xff] %v912_v60  ;;  %v750_v58 = vsel %vm749_vm15, %v1977_v32, %v746_v52  ;;  %v726_v1 = vmul.f32 %v1088_v48, %v725_v8  ;;  %1095 = vrsqrt.f32 %v2039_v42  ;;  %v2053_v38 = vadd.f32 1e-05, %v465_v41 }
 0x166   : > { %951 = vst [vmem:[%s1539_s25 + $0xd0] sm:$0xff] %v919_v46  ;;  %v845_v6 = vmul.f32 %v750_v58, %v1428_v62  ;;  %v795_v39 = vsub.f32 1.5, %v794_v31  ;;  %v773_v53 = vmul.f32 %v1092_v2, %v772_v0  ;;  %v2064_v51 = vadd.f32 1e-05, %v468_v9 }
 0x167   : > { %v730_v47 = vsel %vm729_vm0, %v1088_v48, %v726_v1  ;;  %vm777_vm2 = vweird.f32 %v2002_v30  ;;  %vm778_vm3 = vweird.f32 %v1092_v2  ;;  %1097 = vrsqrt.f32 %v2053_v38 }
 0x168   : > { %v1094_v44 = vpop.eup %1093  ;;  %v881_v32 = vmul.f32 %v1505_v59, %v845_v6  ;;  %v843_v17 = vmul.f32 %v730_v47, %v1420_v21  ;;  %v796_v23 = vmul.f32 %v1090_v20, %v795_v39  ;;  %v774_v29 = vmul.f32 0.5, %v773_v53  ;;  %vm779_vm4 = vmor %vm777_vm2, %vm778_vm3  ;;  %v1102_v39 = vld [vmem:[%s2117_s2] ss:$0 sm:$0xff] }
 0x169   : > { %v752_v36 = vmul.f32 %v1094_v44, %v2025_v25  ;;  %1099 = vrsqrt.f32 %v2064_v51  ;;  %vm758_vm5 = vweird.f32 %v1094_v44  ;;  %vm757_vm6 = vweird.f32 %v2025_v25 }
 0x16a   : > { %v917_v13 = vadd.f32 %v1522_v56, %v881_v32  ;;  %v879_v21 = vmul.f32 %v1505_v59, %v843_v17  ;;  %v800_v63 = vsel %vm2060_vm1, %v1090_v20, %v796_v23  ;;  %v775_v4 = vsub.f32 1.5, %v774_v29  ;;  %vm759_vm7 = vmor %vm757_vm6, %vm758_vm5 }
 0x16b   : > { %v753_v48 = vmul.f32 %v1094_v44, %v752_v36  ;;  %v1096_v50 = vpop.eup %1095  ;;  %v850_v37 = vmul.f32 %v800_v63, %v1443_v34  ;;  %vm807_vm8 = vweird.f32 %v2039_v42  ;;  %vm787_vm13 = vweird.f32 %v2053_v38 }
 0x16c   : > { %949 = vst [vmem:[%s1539_s25 + $0xc0] sm:$0xff] %v917_v13  ;;  %v915_v10 = vadd.f32 %v1522_v56, %v879_v21  ;;  %v776_v55 = vmul.f32 %v1092_v2, %v775_v4  ;;  %v802_v43 = vmul.f32 %v1096_v50, %v2039_v42  ;;  %vm808_vm9 = vweird.f32 %v1096_v50 }
 0x16d   : > { %v754_v49 = vmul.f32 0.5, %v753_v48  ;;  %v886_v3 = vmul.f32 %v1505_v59, %v850_v37  ;;  %v1098_v5 = vpop.eup %1097  ;;  %vm809_vm10 = vmor %vm807_vm8, %vm808_vm9  ;;  %vm817_vm15 = vweird.f32 %v2064_v51 }
 0x16e   : > { %947 = vst [vmem:[%s1539_s25 + $0xb0] sm:$0xff] %v915_v10  ;;  %v780_v12 = vsel %vm779_vm4, %v1092_v2, %v776_v55  ;;  %v803_v57 = vmul.f32 %v1096_v50, %v802_v43  ;;  %v782_v40 = vmul.f32 %v1098_v5, %v2053_v38  ;;  %vm788_vm11 = vweird.f32 %v1098_v5 }
 0x16f   : > { %v755_v61 = vsub.f32 1.5, %v754_v49  ;;  %v922_v14 = vadd.f32 %v1522_v56, %v886_v3  ;;  %v848_v34 = vmul.f32 %v780_v12, %v1446_v35  ;;  %v1100_v54 = vpop.eup %1099  ;;  %vm789_vm14 = vmor %vm787_vm13, %vm788_vm11 }
 0x170   : > { %v804_v20 = vmul.f32 0.5, %v803_v57  ;;  %v812_v16 = vmul.f32 %v1100_v54, %v2064_v51  ;;  %v783_v35 = vmul.f32 %v1098_v5, %v782_v40  ;;  %vm818_vm12 = vweird.f32 %v1100_v54 }
 0x171   : > { %v756_v45 = vmul.f32 %v1094_v44, %v755_v61  ;;  %954 = vst [vmem:[%s1539_s25 + $0xe8] sm:$0xff] %v922_v14  ;;  %v884_v30 = vmul.f32 %v1505_v59, %v848_v34  ;;  %vm819_vm0 = vmor %vm817_vm15, %vm818_vm12 }
 0x172   : > { %v805_v15 = vsub.f32 1.5, %v804_v20  ;;  %v813_v11 = vmul.f32 %v1100_v54, %v812_v16  ;;  %v784_v19 = vmul.f32 0.5, %v783_v35 }
 0x173   : > { %v760_v33 = vsel %vm759_vm7, %v1094_v44, %v756_v45  ;;  %v920_v18 = vadd.f32 %v1522_v56, %v884_v30 }
 0x174   : > { %v846_v25 = vmul.f32 %v760_v33, %v1438_v24  ;;  %v806_v22 = vmul.f32 %v1096_v50, %v805_v15  ;;  %v814_v52 = vmul.f32 0.5, %v813_v11  ;;  %v785_v26 = vsub.f32 1.5, %v784_v19 }
 0x175   : > { %952 = vst [vmem:[%s1539_s25 + $0xd8] sm:$0xff] %v920_v18 }
 0x176   : > { %v882_v60 = vmul.f32 %v1505_v59, %v846_v25  ;;  %v810_v8 = vsel %vm809_vm10, %v1096_v50, %v806_v22  ;;  %v815_v42 = vsub.f32 1.5, %v814_v52  ;;  %v786_v24 = vmul.f32 %v1098_v5, %v785_v26  ;;  %v1101_v59 = vld [vmem:[%s2116_s1] ss:$0 sm:$0xff] }
 0x177   : > { %v851_v46 = vmul.f32 %v810_v8, %v1460_v7 }
 0x178   : > { %v918_v2 = vadd.f32 %v1522_v56, %v882_v60  ;;  %v816_v9 = vmul.f32 %v1100_v54, %v815_v42  ;;  %v790_v58 = vsel %vm789_vm14, %v1098_v5, %v786_v24 }
 0x179   : > { %v887_v41 = vmul.f32 %v1101_v59, %v851_v46  ;;  %v849_v1 = vmul.f32 %v790_v58, %v1456_v27 }
 0x17a   : > { %950 = vst [vmem:[%s1539_s25 + $0xc8] sm:$0xff] %v918_v2  ;;  %v820_v31 = vsel %vm819_vm0, %v1100_v54, %v816_v9 }
 0x17b   : > { %v923_v7 = vadd.f32 %v1522_v56, %v887_v41  ;;  %v852_v0 = vmul.f32 %v820_v31, %v1468_v28  ;;  %v885_v6 = vmul.f32 %v1101_v59, %v849_v1 }
 0x17d   : > { %955 = vst [vmem:[%s1539_s25 + $0xf0] sm:$0xff] %v923_v7  ;;  %v888_v47 = vmul.f32 %v1101_v59, %v852_v0  ;;  %v921_v53 = vadd.f32 %v1102_v39, %v885_v6 }
 0x17f   : > { %v924_v38 = vadd.f32 %v1102_v39, %v888_v47  ;;  %953 = vst [vmem:[%s1539_s25 + $0xe0] sm:$0xff] %v921_v53 }
 0x181   : > { %956 = vst [vmem:[%s1539_s25 + $0xf8] sm:$0xff] %v924_v38 }
 0x182 PF: > { %s13_s12 = sadd.s32 1, %s1109_s12  }
 0x183   : > { %p10_p4 = scmp.ge.s32.totalorder %s13_s12, 4  }
 0x185   :  { %12 = sbr.rel (!%p10_p4) target bundleno = 1 (0x1), region = 62 }

// kernel: longformer_for_multiple_choice.7
= control target key start
LH: loop header
LB: loop body
LE: loop exit
PB: predicated region body
PF: predicated region fallthrough
CT: control target
= control target key end

     0   :  { %vm104_vm0 = vcmask 3072   ;;  %s252_s1 = inlined_call_operand.vmem [shape: f32[128,128], index: 1, kind: input, shape index: {}]   ;;  %s253_s3 = inlined_call_operand.vmem [shape: f32[128,1], index: 3, kind: input, shape index: {}]   ;;  %s254_s2 = inlined_call_operand.vmem [shape: f32[1,128], index: 2, kind: input, shape index: {}]   ;;  %s255_s0 = inlined_call_operand.vmem [shape: f32[4,128], index: 0, kind: input, shape index: {}]   ;;  %s256_s4 = inlined_call_operand.<no memory space> [shape: f32[1,1], index: 4, kind: input, shape index: {}]   ;;  %s257_s5 = inlined_call_operand.vmem [shape: f32[4,1], index: 5, kind: output, shape index: {}]  }
   0x1   :  { %v38_v0 = vld [vmem:[%s252_s1 + $0x78] sm:$0xff]  ;;  %v37_v1 = vld [vmem:[%s252_s1 + $0x70] sm:$0xff]  ;;  %v36_v2 = vld [vmem:[%s252_s1 + $0x68] sm:$0xff]  ;;  %v10_v33 = vstv %s256_s4 }
   0x2   :  { %43 = vmatpush.msra.mxu0 %v38_v0  ;;  %v35_v3 = vld [vmem:[%s252_s1 + $0x60] sm:$0xff]  ;;  %v79_v4 = vld [vmem:[%s253_s3 + $0x78] sm:$0xff]  ;;  %v78_v6 = vld [vmem:[%s253_s3 + $0x70] sm:$0xff]  ;;  %11 = vst [vmem:[#allocation2] sm:$0x1] %v10_v33 }
   0x3   :  { %v34_v5 = vld [vmem:[%s252_s1 + $0x58] sm:$0xff]  ;;  %84 = vmatpush.msra.mxu1 %v79_v4  ;;  %v77_v7 = vld [vmem:[%s253_s3 + $0x68] sm:$0xff]  ;;  %v33_v8 = vld [vmem:[%s252_s1 + $0x50] sm:$0xff] }
   0x4   :  { %44 = vmatpush.msra.mxu0 %v37_v1  ;;  %v76_v9 = vld [vmem:[%s253_s3 + $0x60] sm:$0xff]  ;;  %v32_v10 = vld [vmem:[%s252_s1 + $0x48] sm:$0xff]  ;;  %v75_v11 = vld [vmem:[%s253_s3 + $0x58] sm:$0xff] }
   0x5   :  { %85 = vmatpush.msra.mxu1 %v78_v6  ;;  %v31_v12 = vld [vmem:[%s252_s1 + $0x40] sm:$0xff]  ;;  %v74_v13 = vld [vmem:[%s253_s3 + $0x50] sm:$0xff]  ;;  %v30_v14 = vld [vmem:[%s252_s1 + $0x38] sm:$0xff] }
   0x6   :  { %45 = vmatpush.msra.mxu0 %v36_v2  ;;  %v73_v15 = vld [vmem:[%s253_s3 + $0x48] sm:$0xff]  ;;  %v29_v16 = vld [vmem:[%s252_s1 + $0x30] sm:$0xff]  ;;  %v72_v17 = vld [vmem:[%s253_s3 + $0x40] sm:$0xff] }
   0x7   :  { %86 = vmatpush.msra.mxu1 %v77_v7  ;;  %v28_v18 = vld [vmem:[%s252_s1 + $0x28] sm:$0xff]  ;;  %v71_v19 = vld [vmem:[%s253_s3 + $0x38] sm:$0xff]  ;;  %v27_v20 = vld [vmem:[%s252_s1 + $0x20] sm:$0xff] }
   0x8   :  { %46 = vmatpush.msra.mxu0 %v35_v3  ;;  %v70_v21 = vld [vmem:[%s253_s3 + $0x30] sm:$0xff]  ;;  %v26_v22 = vld [vmem:[%s252_s1 + $0x18] sm:$0xff]  ;;  %v69_v23 = vld [vmem:[%s253_s3 + $0x28] sm:$0xff] }
   0x9   :  { %87 = vmatpush.msra.mxu1 %v76_v9  ;;  %v25_v24 = vld [vmem:[%s252_s1 + $0x10] sm:$0xff]  ;;  %v24_v25 = vld [vmem:[%s252_s1 + $0x8] sm:$0xff]  ;;  %v23_v26 = vld [vmem:[%s252_s1] sm:$0xff] }
   0xa   :  { %47 = vmatpush.msra.mxu0 %v34_v5  ;;  %v22_v27 = vld [vmem:[%s255_s0] sm:$0xf]  ;;  %v67_v29 = vld [vmem:[%s253_s3 + $0x18] sm:$0xff]  ;;  %v66_v30 = vld [vmem:[%s253_s3 + $0x10] sm:$0xff] }
   0xb   :  { %88 = vmatpush.msra.mxu1 %v75_v11  ;;  %v68_v28 = vld [vmem:[%s253_s3 + $0x20] sm:$0xff]  ;;  %v65_v31 = vld [vmem:[%s253_s3 + $0x8] sm:$0xff] }
   0xc   :  { %48 = vmatpush.msra.mxu0 %v33_v8  ;;  %v64_v32 = vld [vmem:[%s253_s3] sm:$0xff] }
   0xd   :  { %89 = vmatpush.msra.mxu1 %v74_v13  ;;  %v110_v34 = vld [vmem:[%s254_s2] ss:$0 sm:$0xff] }
   0xe   :  { %49 = vmatpush.msra.mxu0 %v32_v10  ;;  %v111_v38 = vld [vmem:[#allocation2] ss:$0 sm:$0xff] }
   0xf   :  { %90 = vmatpush.msra.mxu1 %v73_v15 }
  0x10   :  { %50 = vmatpush.msra.mxu0 %v31_v12 }
  0x11   :  { %91 = vmatpush.msra.mxu1 %v72_v17 }
  0x12   :  { %51 = vmatpush.msra.mxu0 %v30_v14 }
  0x13   :  { %92 = vmatpush.msra.mxu1 %v71_v19 }
  0x14   :  { %52 = vmatpush.msra.mxu0 %v29_v16 }
  0x15   :  { %93 = vmatpush.msra.mxu1 %v70_v21 }
  0x16   :  { %53 = vmatpush.msra.mxu0 %v28_v18 }
  0x17   :  { %94 = vmatpush.msra.mxu1 %v69_v23 }
  0x18   :  { %54 = vmatpush.msra.mxu0 %v27_v20 }
  0x19   :  { %95 = vmatpush.msra.mxu1 %v68_v28 }
  0x1a   :  { %55 = vmatpush.msra.mxu0 %v26_v22 }
  0x1b   :  { %96 = vmatpush.msra.mxu1 %v67_v29 }
  0x1c   :  { %56 = vmatpush.msra.mxu0 %v25_v24 }
  0x1d   :  { %97 = vmatpush.msra.mxu1 %v66_v30 }
  0x1e   :  { %57 = vmatpush.msra.mxu0 %v24_v25 }
  0x1f   :  { %98 = vmatpush.msra.mxu1 %v65_v31 }
  0x20   :  { %58 = vmatpush.msra.mxu0 %v23_v26 }
  0x21   :  { %59 = vmatmul.f32.vlgmr.msra.gmra.mxu0 %v22_v27  ;;  %99 = vmatpush.msra.mxu1 %v64_v32 }
  0x9e   :  { %v60_v35 = vpop.f32.mrf.mxu0 }
  0x9f   :  { %v61_v36 = vadd.f32 %v110_v34, %v60_v35 }
  0xa1   :  { %112 = vtanh.f32 %v61_v36 }
  0xa7   :  { %v113_v37 = vpop.eup %112 }
  0xa8   :  { %100 = vmatmul.f32.vlgmr.msra.gmra.mxu1 %v113_v37 }
 0x125   :  { %v101_v39 = vpop.f32.mrf.mxu1 }
 0x126   :  { %v102_v40 = vadd.f32 %v111_v38, %v101_v39 }
 0x128   :  { %105 = vst.msk [vmem:[%s257_s5] sm:$0xf] %vm104_vm0, %v102_v40 }

// kernel: longformer_for_multiple_choice.5
= control target key start
LH: loop header
LB: loop body
LE: loop exit
PB: predicated region body
PF: predicated region fallthrough
CT: control target
= control target key end

     0   :  { %s6291_s21 = smov [#allocation3]   ;;  %s9957_s0 = inlined_call_operand.vmem [shape: s32[4], index: 0, kind: input, shape index: {}]   ;;  %s9958_s1 = inlined_call_operand.vmem [shape: f32[4,1,128], index: 1, kind: input, shape index: {}]   ;;  %s9959_s2 = inlined_call_operand.vmem [shape: f32[512,128], index: 2, kind: input, shape index: {}]   ;;  %s9960_s3 = inlined_call_operand.vmem [shape: bf16[128,384], index: 3, kind: input, shape index: {}]   ;;  %s9961_s4 = inlined_call_operand.vmem [shape: f32[1,384], index: 4, kind: input, shape index: {}]   ;;  %s9962_s5 = inlined_call_operand.vmem [shape: bf16[128,128], index: 5, kind: input, shape index: {}]   ;;  %s9963_s6 = inlined_call_operand.vmem [shape: f32[1,128], index: 6, kind: input, shape index: {}]   ;;  %s9964_s7 = inlined_call_operand.vmem [shape: f32[1,128], index: 7, kind: input, shape index: {}]   ;;  %s9965_s8 = inlined_call_operand.vmem [shape: f32[1,128], index: 8, kind: input, shape index: {}]   ;;  %s9966_s9 = inlined_call_operand.vmem [shape: bf16[128,256], index: 9, kind: input, shape index: {}]   ;;  %s9967_s10 = inlined_call_operand.vmem [shape: f32[1,256], index: 10, kind: input, shape index: {}]   ;;  %s9968_s11 = inlined_call_operand.vmem [shape: bf16[256,128], index: 11, kind: input, shape index: {}]   ;;  %s9969_s12 = inlined_call_operand.vmem [shape: f32[1,128], index: 12, kind: input, shape index: {}]   ;;  %s9970_s13 = inlined_call_operand.vmem [shape: f32[1,128], index: 13, kind: input, shape index: {}]   ;;  %s9971_s14 = inlined_call_operand.vmem [shape: f32[1,128], index: 14, kind: input, shape index: {}]   ;;  %s9972_s15 = inlined_call_operand.vmem [shape: f32[512,128], index: 15, kind: output, shape index: {}]  }
   0x1   :  { %s21_s20 = sshll.u32 %s9957_s0, 4  ;;  %s22_s20 = int_to_ptr.vmem [resolvable:$true] %s21_s20 }
   0x2   :  { %24 = dma.vmem_to_smem %s22_s20, 16, %s6291_s21, [#allocation2] }
   0x3   :  { %6285 = dma.done.wait [#allocation2], 16 }
   0x4   :  { %6286 = vsyncadd [#allocation2], 4294967280 }
   0x5   :  { %27 = sfence }
   0x6   :  { %s6381_s22 = smov 0  }
   0x7 LB: > { %s6387_s23 = sadd.s32 4294967295, %s6289_s22   ;;  %p5359_p0 = scmp.ge.s32.totalorder %s6289_s22, 1  ;;  %s6289_s22 = sphi %s6381_s22, %s33_s22  }
   0x8   : > { %p430_p1 = scmp.lt.s32.totalorder %s6289_s22, 5 }
   0xa   : > { %p431_p2 = pnand %p5359_p0, %p430_p1 }
   0xc   : > { %434 = sbr.rel (%p431_p2) target bundleno = 2621 (0xa3d), region = 76 }
  0x11   : > { %v5450_v0 = vld [vmem:[%s9960_s3 + $0xa8] sm:$0xf]  ;;  %v5676_v1 = vld [vmem:[%s9960_s3 + $0xb0] sm:$0xf0]  ;;  %v5675_v2 = vld [vmem:[%s9960_s3 + $0xac] sm:$0xf] }
  0x12   : > { %v5451_v3 = vor.u32 %v5676_v1, %v5450_v0  ;;  %v5452_v4 = vld [vmem:[%s9960_s3 + $0xb4] sm:$0xf0]  ;;  %v5458_v5 = vld [vmem:[%s9960_s3 + $0xb0] sm:$0xf]  ;;  %v5677_v6 = vld [vmem:[%s9960_s3 + $0xb8] sm:$0xf0] }
  0x13   : > { %v5455_v7 = vor.u32 %v5675_v2, %v5452_v4  ;;  %v5459_v8 = vor.u32 %v5677_v6, %v5458_v5  ;;  %v5438_v9 = vld [vmem:[%s9960_s3 + $0x90] sm:$0xf]  ;;  %v5673_v10 = vld [vmem:[%s9960_s3 + $0x98] sm:$0xf0]  ;;  %v5672_v11 = vld [vmem:[%s9960_s3 + $0x94] sm:$0xf] }
  0x14   : > { %686 = vmatpush.bf16.msra.mxu0 %v5451_v3  ;;  %v5439_v12 = vor.u32 %v5673_v10, %v5438_v9  ;;  %v5440_v13 = vld [vmem:[%s9960_s3 + $0x9c] sm:$0xf0]  ;;  %v5446_v14 = vld [vmem:[%s9960_s3 + $0x98] sm:$0xf]  ;;  %v5674_v15 = vld [vmem:[%s9960_s3 + $0xa0] sm:$0xf0] }
  0x15   : > { %735 = vmatpush.bf16.msra.mxu1 %v5455_v7  ;;  %784 = vmatpush.bf16.msra.mxu2 %v5459_v8  ;;  %v5443_v16 = vor.u32 %v5672_v11, %v5440_v13  ;;  %v5447_v17 = vor.u32 %v5674_v15, %v5446_v14  ;;  %v5426_v18 = vld [vmem:[%s9960_s3 + $0x78] sm:$0xf]  ;;  %v5670_v19 = vld [vmem:[%s9960_s3 + $0x80] sm:$0xf0]  ;;  %v5669_v20 = vld [vmem:[%s9960_s3 + $0x7c] sm:$0xf] }
  0x16   : > { %v5428_v21 = vld [vmem:[%s9960_s3 + $0x84] sm:$0xf0]  ;;  %v5434_v22 = vld [vmem:[%s9960_s3 + $0x80] sm:$0xf]  ;;  %v5671_v23 = vld [vmem:[%s9960_s3 + $0x88] sm:$0xf0]  ;;  %v5427_v24 = vor.u32 %v5670_v19, %v5426_v18 }
  0x17   : > { %v5431_v25 = vor.u32 %v5669_v20, %v5428_v21  ;;  %v5435_v26 = vor.u32 %v5671_v23, %v5434_v22  ;;  %v5414_v27 = vld [vmem:[%s9960_s3 + $0x60] sm:$0xf]  ;;  %v5667_v28 = vld [vmem:[%s9960_s3 + $0x68] sm:$0xf0]  ;;  %v5666_v29 = vld [vmem:[%s9960_s3 + $0x64] sm:$0xf] }
  0x18   : > { %687 = vmatpush.bf16.msra.mxu0 %v5439_v12  ;;  %v5416_v30 = vld [vmem:[%s9960_s3 + $0x6c] sm:$0xf0]  ;;  %v5422_v31 = vld [vmem:[%s9960_s3 + $0x68] sm:$0xf]  ;;  %v5668_v32 = vld [vmem:[%s9960_s3 + $0x70] sm:$0xf0]  ;;  %v5415_v33 = vor.u32 %v5667_v28, %v5414_v27 }
  0x19   : > { %736 = vmatpush.bf16.msra.mxu1 %v5443_v16  ;;  %785 = vmatpush.bf16.msra.mxu2 %v5447_v17  ;;  %v5419_v34 = vor.u32 %v5666_v29, %v5416_v30  ;;  %v5423_v35 = vor.u32 %v5668_v32, %v5422_v31  ;;  %v5402_v36 = vld [vmem:[%s9960_s3 + $0x48] sm:$0xf]  ;;  %v5664_v37 = vld [vmem:[%s9960_s3 + $0x50] sm:$0xf0]  ;;  %v5663_v38 = vld [vmem:[%s9960_s3 + $0x4c] sm:$0xf] }
  0x1a   : > { %v5404_v39 = vld [vmem:[%s9960_s3 + $0x54] sm:$0xf0]  ;;  %v5410_v40 = vld [vmem:[%s9960_s3 + $0x50] sm:$0xf]  ;;  %v5665_v41 = vld [vmem:[%s9960_s3 + $0x58] sm:$0xf0]  ;;  %v5403_v44 = vor.u32 %v5664_v37, %v5402_v36 }
  0x1b   : > { %v5390_v42 = vld [vmem:[%s9960_s3 + $0x30] sm:$0xf]  ;;  %v5661_v43 = vld [vmem:[%s9960_s3 + $0x38] sm:$0xf0]  ;;  %v5660_v45 = vld [vmem:[%s9960_s3 + $0x34] sm:$0xf]  ;;  %v5407_v49 = vor.u32 %v5663_v38, %v5404_v39  ;;  %v5411_v50 = vor.u32 %v5665_v41, %v5410_v40 }
  0x1c   : > { %688 = vmatpush.bf16.msra.mxu0 %v5427_v24  ;;  %v5392_v46 = vld [vmem:[%s9960_s3 + $0x3c] sm:$0xf0]  ;;  %v5398_v47 = vld [vmem:[%s9960_s3 + $0x38] sm:$0xf]  ;;  %v5662_v48 = vld [vmem:[%s9960_s3 + $0x40] sm:$0xf0]  ;;  %v5391_v51 = vor.u32 %v5661_v43, %v5390_v42 }
  0x1d   : > { %737 = vmatpush.bf16.msra.mxu1 %v5431_v25  ;;  %786 = vmatpush.bf16.msra.mxu2 %v5435_v26  ;;  %s5360_s25 = sshll.u32 %s6387_s23, 4  ;;  %v5378_v52 = vld [vmem:[%s9960_s3 + $0x18] sm:$0xf]  ;;  %v5395_v53 = vor.u32 %v5660_v45, %v5392_v46  ;;  %v5399_v54 = vor.u32 %v5662_v48, %v5398_v47  ;;  %v5658_v55 = vld [vmem:[%s9960_s3 + $0x20] sm:$0xf0]  ;;  %s6292_s16 = smov 96  }
  0x1e   : > { %p483_p3 = scmp.lt.s32.totalorder %s5360_s25, 63  ;;  %v5657_v56 = vld [vmem:[%s9960_s3 + $0x1c] sm:$0xf]  ;;  %v5380_v57 = vld [vmem:[%s9960_s3 + $0x24] sm:$0xf0]  ;;  %v5379_v60 = vor.u32 %v5658_v55, %v5378_v52  ;;  %s6293_s17 = smov 32  }
  0x1f   : > { %v5386_v58 = vld [vmem:[%s9960_s3 + $0x20] sm:$0xf]  ;;  %v5659_v59 = vld [vmem:[%s9960_s3 + $0x28] sm:$0xf0]  ;;  %v5383_v61 = vor.u32 %v5657_v56, %v5380_v57  ;;  %v5654_v1 = vld [vmem:[%s9960_s3 + $0x4] sm:$0xf] }
  0x20   : > { %689 = vmatpush.bf16.msra.mxu0 %v5415_v33  ;;  %s10172_s25 = smov (!%p483_p3, %s5360_s25), 63  ;;  %v5387_v62 = vor.u32 %v5659_v59, %v5386_v58  ;;  %v5366_v63 = vld [vmem:[%s9960_s3] sm:$0xf]  ;;  %v5655_v0 = vld [vmem:[%s9960_s3 + $0x8] sm:$0xf0]  ;;  %s6294_s18 = smov 64  }
  0x21   : > { %738 = vmatpush.bf16.msra.mxu1 %v5419_v34  ;;  %787 = vmatpush.bf16.msra.mxu2 %v5423_v35  ;;  %s5361_s24 = sshll.u32 %s10172_s25, 3  ;;  %v5368_v2 = vld [vmem:[%s9960_s3 + $0xc] sm:$0xf0]  ;;  %v5374_v3 = vld [vmem:[%s9960_s3 + $0x8] sm:$0xf]  ;;  %v5367_v5 = vor.u32 %v5655_v0, %v5366_v63  ;;  %vm1165_vm0 = vcmask 261120  }
  0x22   : > { %s6535_s19 = scalar_lea.vmem %s9959_s2, %s5361_s24  ;;  %v5656_v4 = vld [vmem:[%s9960_s3 + $0x10] sm:$0xf0]  ;;  %v5371_v8 = vor.u32 %v5654_v1, %v5368_v2  ;;  %v550_v32 = vld [vmem:[%s9961_s4] sm:$0x7]  ;;  %p479_p4 = scmp.lt.s32.totalorder %s6387_s23, 3 }
  0x23   : > { %v494_v6 = vld [vmem:[%s6535_s19] sm:$0xff]  ;;  %v495_v7 = vld [vmem:[%s6535_s19 + $0x8] sm:$0xff]  ;;  %v5375_v9 = vor.u32 %v5656_v4, %v5374_v3  ;;  %v496_v11 = vld [vmem:[%s6535_s19 + $0x10] sm:$0xff]  ;;  %v6565_v33 = vperm.slane %v550_v32, 0  ;;  %v6567_v36 = vperm.slane %v550_v32, 1  ;;  %v6570_v38 = vperm.slane %v550_v32, 2  ;;  %s9848_s21 = scalar_lea.vmem %s9972_s15, %s5361_s24 }
  0x24   : > { %690 = vmatpush.bf16.msra.mxu0 %v5403_v44  ;;  %v510_v10 = vpack.c.bf16 %v495_v7, %v494_v6  ;;  %v497_v12 = vld [vmem:[%s6535_s19 + $0x18] sm:$0xff]  ;;  %v498_v14 = vld [vmem:[%s6535_s19 + $0x20] sm:$0xff]  ;;  %v499_v15 = vld [vmem:[%s6535_s19 + $0x28] sm:$0xff]  ;;  %s897_s20 = sld [smem:[#allocation3 + %s6387_s23]]  ;;  %s10174_s23 = smov (!%p479_p4, %s6387_s23), 3 }
  0x25   : > { %739 = vmatpush.bf16.msra.mxu1 %v5407_v49  ;;  %788 = vmatpush.bf16.msra.mxu2 %v5411_v50  ;;  %v511_v13 = vpack.c.bf16 %v497_v12, %v496_v11  ;;  %v512_v16 = vpack.c.bf16 %v499_v15, %v498_v14  ;;  %v500_v17 = vld [vmem:[%s6535_s19 + $0x30] sm:$0xff]  ;;  %v501_v18 = vld [vmem:[%s6535_s19 + $0x38] sm:$0xff]  ;;  %v502_v20 = vld [vmem:[%s6535_s19 + $0x40] sm:$0xff]  ;;  %s481_s26 = scalar_lea.vmem %s9958_s1, %s10174_s23 }
  0x26   : > { %v513_v19 = vpack.c.bf16 %v501_v18, %v500_v17  ;;  %v503_v21 = vld [vmem:[%s6535_s19 + $0x48] sm:$0xff]  ;;  %v504_v23 = vld [vmem:[%s6535_s19 + $0x50] sm:$0xff]  ;;  %v505_v24 = vld [vmem:[%s6535_s19 + $0x58] sm:$0xff] }
  0x27   : > { %v514_v22 = vpack.c.bf16 %v503_v21, %v502_v20  ;;  %v515_v25 = vpack.c.bf16 %v505_v24, %v504_v23  ;;  %v506_v26 = vld [vmem:[%s6535_s19 + $0x60] sm:$0xff]  ;;  %v507_v27 = vld [vmem:[%s6535_s19 + $0x68] sm:$0xff]  ;;  %v508_v29 = vld [vmem:[%s6535_s19 + $0x70] sm:$0xff] }
  0x28   : > { %691 = vmatpush.bf16.msra.mxu0 %v5391_v51  ;;  %v516_v28 = vpack.c.bf16 %v507_v27, %v506_v26  ;;  %v509_v30 = vld [vmem:[%s6535_s19 + $0x78] sm:$0xff] }
  0x29   : > { %740 = vmatpush.bf16.msra.mxu1 %v5395_v53  ;;  %789 = vmatpush.bf16.msra.mxu2 %v5399_v54  ;;  %v517_v31 = vpack.c.bf16 %v509_v30, %v508_v29 }
  0x2a   : > { %s898_s27 = sadd.s32 1, %s897_s20 }
  0x2c   : > { %692 = vmatpush.bf16.msra.mxu0 %v5379_v60 }
  0x2d   : > { %741 = vmatpush.bf16.msra.mxu1 %v5383_v61  ;;  %790 = vmatpush.bf16.msra.mxu2 %v5387_v62 }
  0x30   : > { %693 = vmatpush.bf16.msra.mxu0 %v5367_v5 }
  0x31   : > { %742 = vmatpush.bf16.msra.mxu1 %v5371_v8  ;;  %791 = vmatpush.bf16.msra.mxu2 %v5375_v9 }
  0x33   : > { %694 = vmatmul.bf16.vlgmr.msra.gmra.mxu0 %v510_v10 }
  0x34   : > { %743 = vmatmul.bf16.vlgmr.msra.gmra.mxu1 %v510_v10  ;;  %792 = vmatmul.bf16.vlgmr.msra.gmra.mxu2 %v510_v10 }
  0x43   : > { %699 = vmatmul.bf16.gmra.mxu0 %v511_v13 }
  0x44   : > { %748 = vmatmul.bf16.gmra.mxu1 %v511_v13  ;;  %797 = vmatmul.bf16.gmra.mxu2 %v511_v13 }
  0x53   : > { %704 = vmatmul.bf16.gmra.mxu0 %v512_v16 }
  0x54   : > { %753 = vmatmul.bf16.gmra.mxu1 %v512_v16  ;;  %802 = vmatmul.bf16.gmra.mxu2 %v512_v16 }
  0x63   : > { %709 = vmatmul.bf16.gmra.mxu0 %v513_v19 }
  0x64   : > { %758 = vmatmul.bf16.gmra.mxu1 %v513_v19  ;;  %807 = vmatmul.bf16.gmra.mxu2 %v513_v19 }
  0x73   : > { %714 = vmatmul.bf16.gmra.mxu0 %v514_v22 }
  0x74   : > { %763 = vmatmul.bf16.gmra.mxu1 %v514_v22  ;;  %812 = vmatmul.bf16.gmra.mxu2 %v514_v22 }
  0x83   : > { %719 = vmatmul.bf16.gmra.mxu0 %v515_v25 }
  0x84   : > { %768 = vmatmul.bf16.gmra.mxu1 %v515_v25  ;;  %817 = vmatmul.bf16.gmra.mxu2 %v515_v25 }
  0x93   : > { %724 = vmatmul.bf16.gmra.mxu0 %v516_v28 }
  0x94   : > { %773 = vmatmul.bf16.gmra.mxu1 %v516_v28  ;;  %822 = vmatmul.bf16.gmra.mxu2 %v516_v28 }
  0xa3   : > { %729 = vmatmul.bf16.gmra.mxu0 %v517_v31 }
  0xa4   : > { %778 = vmatmul.bf16.gmra.mxu1 %v517_v31  ;;  %827 = vmatmul.bf16.gmra.mxu2 %v517_v31 }
  0xb0   : > { %v695_v34 = vpop.f32.mrf.mxu0 }
  0xb1   : > { %v744_v35 = vpop.f32.mrf.mxu1  ;;  %v696_v37 = vadd.f32 %v695_v34, %v6565_v33 }
  0xb2   : > { %v745_v39 = vadd.f32 %v744_v35, %v6567_v36 }
  0xb3   : > { %v833_v40 = vmul.f32 0.17677669, %v696_v37 }
  0xb4   : > { %v865_v46 = vpack.c.bf16 %v745_v39, %v745_v39 }
  0xb5   : > { %v849_v48 = vpack.c.bf16 %v833_v40, %v833_v40 }
  0xb6   : > { %v1141_v52 = vunpack.c.l.b16 %v865_v46 }
  0xb7   : > { %v793_v41 = vpop.f32.mrf.mxu2  ;;  %v1101_v55 = vunpack.c.l.b16 %v849_v48 }
  0xb8   : > { %v794_v42 = vadd.f32 %v793_v41, %v6570_v38  ;;  %v697_v43 = vpop.f32.mrf.mxu0 }
  0xb9   : > { %v698_v44 = vadd.f32 %v697_v43, %v6565_v33  ;;  %v746_v45 = vpop.f32.mrf.mxu1 }
  0xba   : > { %v747_v47 = vadd.f32 %v746_v45, %v6567_v36  ;;  %v881_v53 = vpack.c.bf16 %v794_v42, %v794_v42 }
  0xbb   : > { %v834_v49 = vmul.f32 0.17677669, %v698_v44 }
  0xbc   : > { %v866_v50 = vpack.c.bf16 %v747_v47, %v747_v47  ;;  %v1639_v63 = vunpack.c.l.b16 %v881_v53 }
  0xbd   : > { %v850_v51 = vpack.c.bf16 %v834_v49, %v834_v49 }
  0xbe   : > { %v1142_v54 = vunpack.c.l.b16 %v866_v50 }
  0xbf   : > { %v1102_v56 = vunpack.c.l.b16 %v850_v51  ;;  %v795_v57 = vpop.f32.mrf.mxu2 }
  0xc0   : > { %v6576_v58 = vpack.c.b16 %v1142_v54, %v1141_v52  ;;  %v796_v59 = vadd.f32 %v795_v57, %v6570_v38  ;;  %v700_v60 = vpop.f32.mrf.mxu0 }
  0xc1   : > { %v6579_v61 = vpack.c.b16 %v1102_v56, %v1101_v55  ;;  %v749_v62 = vpop.f32.mrf.mxu1  ;;  %v701_v19 = vadd.f32 %v700_v60, %v6565_v33 }
  0xc2   : > { %v882_v0 = vpack.c.bf16 %v796_v59, %v796_v59  ;;  %1736 = vrot.lane.b32.xlu1 %v6576_v58, %s6292_s16  ;;  %v750_v3 = vadd.f32 %v749_v62, %v6567_v36 }
  0xc3   : > { %1720 = vrot.lane.b32.xlu2 %v6579_v61, %s6292_s16  ;;  %v835_v25 = vmul.f32 0.17677669, %v701_v19 }
  0xc4   : > { %v1640_v1 = vunpack.c.l.b16 %v882_v0  ;;  %v867_v8 = vpack.c.bf16 %v750_v3, %v750_v3 }
  0xc5   : > { %v851_v32 = vpack.c.bf16 %v835_v25, %v835_v25 }
  0xc6   : > { %v6585_v2 = vpack.c.b16 %v1640_v1, %v1639_v63  ;;  %v1143_v11 = vunpack.c.l.b16 %v867_v8 }
  0xc7   : > { %v798_v4 = vpop.f32.mrf.mxu2  ;;  %v1103_v44 = vunpack.c.l.b16 %v851_v32 }
  0xc8   : > { %10008 = vst [vmem:[#allocation5_spill] sm:$0xff] %v6585_v2  ;;  %v799_v5 = vadd.f32 %v798_v4, %v6570_v38  ;;  %v702_v6 = vpop.f32.mrf.mxu0 }
  0xc9   : > { %v751_v7 = vpop.f32.mrf.mxu1  ;;  %v703_v15 = vadd.f32 %v702_v6, %v6565_v33 }
  0xca   : > { %v752_v9 = vadd.f32 %v751_v7, %v6567_v36  ;;  %v883_v12 = vpack.c.bf16 %v799_v5, %v799_v5 }
  0xcb   : > { %v836_v23 = vmul.f32 0.17677669, %v703_v15 }
  0xcc   : > { %v868_v10 = vpack.c.bf16 %v752_v9, %v752_v9  ;;  %v1641_v21 = vunpack.c.l.b16 %v883_v12 }
  0xcd   : > { %v852_v29 = vpack.c.bf16 %v836_v23, %v836_v23 }
  0xce   : > { %v1144_v13 = vunpack.c.l.b16 %v868_v10 }
  0xcf   : > { %v800_v14 = vpop.f32.mrf.mxu2  ;;  %v1104_v41 = vunpack.c.l.b16 %v852_v29 }
  0xd0   : > { %v6591_v16 = vpack.c.b16 %v1144_v13, %v1143_v11  ;;  %v801_v17 = vadd.f32 %v800_v14, %v6570_v38  ;;  %v705_v18 = vpop.f32.mrf.mxu0 }
  0xd1   : > { %v754_v20 = vpop.f32.mrf.mxu1  ;;  %v706_v37 = vadd.f32 %v705_v18, %v6565_v33  ;;  %v6608_v50 = vpack.c.b16 %v1104_v41, %v1103_v44 }
  0xd2   : > { %v884_v22 = vpack.c.bf16 %v801_v17, %v801_v17  ;;  %1738 = vrot.lane.b32.xlu0 %v6591_v16, %s6292_s16  ;;  %2862 = vrot.lane.b32.xlu2 %v6591_v16, %s6293_s17  ;;  %v755_v27 = vadd.f32 %v754_v20, %v6567_v36 }
  0xd3   : > { %v837_v45 = vmul.f32 0.17677669, %v706_v37 }
  0xd4   : > { %v1642_v24 = vunpack.c.l.b16 %v884_v22  ;;  %v869_v39 = vpack.c.bf16 %v755_v27, %v755_v27 }
  0xd5   : > { %v853_v56 = vpack.c.bf16 %v837_v45, %v837_v45 }
  0xd6   : > { %v6599_v26 = vpack.c.b16 %v1642_v24, %v1641_v21  ;;  %v1145_v46 = vunpack.c.l.b16 %v869_v39 }
  0xd7   : > { %v803_v28 = vpop.f32.mrf.mxu2  ;;  %v1105_v63 = vunpack.c.l.b16 %v853_v56 }
  0xd8   : > { %v804_v30 = vadd.f32 %v803_v28, %v6570_v38  ;;  %v707_v31 = vpop.f32.mrf.mxu0 }
  0xd9   : > { %v708_v34 = vadd.f32 %v707_v31, %v6565_v33  ;;  %v756_v35 = vpop.f32.mrf.mxu1 }
  0xda   : > { %v757_v40 = vadd.f32 %v756_v35, %v6567_v36  ;;  %2300 = vrot.lane.b32.xlu0 %v6591_v16, %s6294_s18  ;;  %v885_v47 = vpack.c.bf16 %v804_v30, %v804_v30 }
  0xdb   : > { %v838_v42 = vmul.f32 0.17677669, %v708_v34 }
  0xdc   : > { %v870_v43 = vpack.c.bf16 %v757_v40, %v757_v40  ;;  %v1643_v57 = vunpack.c.l.b16 %v885_v47 }
  0xdd   : > { %v854_v51 = vpack.c.bf16 %v838_v42, %v838_v42 }
  0xde   : > { %v1146_v48 = vunpack.c.l.b16 %v870_v43 }
  0xdf   : > { %v805_v49 = vpop.f32.mrf.mxu2  ;;  %v1106_v60 = vunpack.c.l.b16 %v854_v51 }
  0xe0   : > { %v6610_v52 = vpack.c.b16 %v1146_v48, %v1145_v46  ;;  %v806_v53 = vadd.f32 %v805_v49, %v6570_v38  ;;  %v710_v54 = vpop.f32.mrf.mxu0 }
  0xe1   : > { %v759_v55 = vpop.f32.mrf.mxu1  ;;  %v6622_v4 = vpack.c.b16 %v1106_v60, %v1105_v63  ;;  %v711_v11 = vadd.f32 %v710_v54, %v6565_v33 }
  0xe2   : > { %v886_v59 = vpack.c.bf16 %v806_v53, %v806_v53  ;;  %2302 = vrot.lane.b32.xlu1 %v6610_v52, %s6294_s18  ;;  %1722 = vrot.lane.b32.xlu0 %v6608_v50, %s6292_s16  ;;  %v760_v1 = vadd.f32 %v759_v55, %v6567_v36 }
  0xe3   : > { %1740 = vrot.lane.b32.xlu2 %v6610_v52, %s6292_s16  ;;  %v839_v18 = vmul.f32 0.17677669, %v711_v11 }
  0xe4   : > { %v1644_v62 = vunpack.c.l.b16 %v886_v59  ;;  %v871_v9 = vpack.c.bf16 %v760_v1, %v760_v1 }
  0xe5   : > { %v855_v28 = vpack.c.bf16 %v839_v18, %v839_v18 }
  0xe6   : > { %v6619_v0 = vpack.c.b16 %v1644_v62, %v1643_v57  ;;  %v1147_v14 = vunpack.c.l.b16 %v871_v9 }
  0xe7   : > { %v808_v3 = vpop.f32.mrf.mxu2  ;;  %v1107_v34 = vunpack.c.l.b16 %v855_v28 }
  0xe8   : > { %v809_v5 = vadd.f32 %v808_v3, %v6570_v38  ;;  %v712_v6 = vpop.f32.mrf.mxu0 }
  0xe9   : > { %v713_v7 = vadd.f32 %v712_v6, %v6565_v33  ;;  %v761_v8 = vpop.f32.mrf.mxu1 }
  0xea   : > { %v762_v10 = vadd.f32 %v761_v8, %v6567_v36  ;;  %1724 = vrot.lane.b32.xlu1 %v6622_v4, %s6292_s16  ;;  %v887_v15 = vpack.c.bf16 %v809_v5, %v809_v5 }
  0xeb   : > { %2864 = vrot.lane.b32.xlu2 %v6610_v52, %s6293_s17  ;;  %v840_v13 = vmul.f32 0.17677669, %v713_v7 }
  0xec   : > { %v872_v12 = vpack.c.bf16 %v762_v10, %v762_v10  ;;  %v1645_v25 = vunpack.c.l.b16 %v887_v15 }
  0xed   : > { %v856_v23 = vpack.c.bf16 %v840_v13, %v840_v13 }
  0xee   : > { %v1148_v17 = vunpack.c.l.b16 %v872_v12 }
  0xef   : > { %v810_v19 = vpop.f32.mrf.mxu2  ;;  %v1108_v30 = vunpack.c.l.b16 %v856_v23 }
  0xf0   : > { %v6632_v20 = vpack.c.b16 %v1148_v17, %v1147_v14  ;;  %v811_v21 = vadd.f32 %v810_v19, %v6570_v38  ;;  %v715_v22 = vpop.f32.mrf.mxu0 }
  0xf1   : > { %v764_v24 = vpop.f32.mrf.mxu1  ;;  %v6645_v40 = vpack.c.b16 %v1108_v30, %v1107_v34  ;;  %v716_v43 = vadd.f32 %v715_v22, %v6565_v33 }
  0xf2   : > { %v888_v27 = vpack.c.bf16 %v811_v21, %v811_v21  ;;  %2304 = vrot.lane.b32.xlu1 %v6632_v20, %s6294_s18  ;;  %2866 = vrot.lane.b32.xlu0 %v6632_v20, %s6293_s17  ;;  %v765_v32 = vadd.f32 %v764_v24, %v6567_v36 }
  0xf3   : > { %1742 = vrot.lane.b32.xlu2 %v6632_v20, %s6292_s16  ;;  %v841_v48 = vmul.f32 0.17677669, %v716_v43 }
  0xf4   : > { %v1646_v29 = vunpack.c.l.b16 %v888_v27  ;;  %v873_v44 = vpack.c.bf16 %v765_v32, %v765_v32 }
  0xf5   : > { %v857_v62 = vpack.c.bf16 %v841_v48, %v841_v48 }
  0xf6   : > { %v6641_v31 = vpack.c.b16 %v1646_v29, %v1645_v25  ;;  %v1149_v49 = vunpack.c.l.b16 %v873_v44 }
  0xf7   : > { %v813_v35 = vpop.f32.mrf.mxu2  ;;  %v1109_v7 = vunpack.c.l.b16 %v857_v62 }
  0xf8   : > { %v814_v37 = vadd.f32 %v813_v35, %v6570_v38  ;;  %v717_v39 = vpop.f32.mrf.mxu0 }
  0xf9   : > { %v718_v41 = vadd.f32 %v717_v39, %v6565_v33  ;;  %v766_v42 = vpop.f32.mrf.mxu1 }
  0xfa   : > { %v767_v45 = vadd.f32 %v766_v42, %v6567_v36  ;;  %v889_v51 = vpack.c.bf16 %v814_v37, %v814_v37 }
  0xfb   : > { %1726 = vrot.lane.b32.xlu2 %v6645_v40, %s6292_s16  ;;  %v842_v46 = vmul.f32 0.17677669, %v718_v41 }
  0xfc   : > { %v874_v47 = vpack.c.bf16 %v767_v45, %v767_v45  ;;  %v1647_v63 = vunpack.c.l.b16 %v889_v51 }
  0xfd   : > { %v858_v55 = vpack.c.bf16 %v842_v46, %v842_v46 }
  0xfe   : > { %v1150_v53 = vunpack.c.l.b16 %v874_v47 }
  0xff   : > { %v815_v54 = vpop.f32.mrf.mxu2  ;;  %v1110_v5 = vunpack.c.l.b16 %v858_v55 }
 0x100   : > { %v6652_v56 = vpack.c.b16 %v1150_v53, %v1149_v49  ;;  %v816_v57 = vadd.f32 %v815_v54, %v6570_v38  ;;  %v720_v59 = vpop.f32.mrf.mxu0 }
 0x101   : > { %v769_v60 = vpop.f32.mrf.mxu1  ;;  %v721_v3 = vadd.f32 %v720_v59, %v6565_v33  ;;  %v6667_v12 = vpack.c.b16 %v1110_v5, %v1109_v7 }
 0x102   : > { %v890_v1 = vpack.c.bf16 %v816_v57, %v816_v57  ;;  %1744 = vrot.lane.b32.xlu1 %v6652_v56, %s6292_s16  ;;  %2868 = vrot.lane.b32.xlu0 %v6652_v56, %s6293_s17  ;;  %v770_v9 = vadd.f32 %v769_v60, %v6567_v36 }
 0x103   : > { %2306 = vrot.lane.b32.xlu2 %v6652_v56, %s6294_s18  ;;  %v843_v10 = vmul.f32 0.17677669, %v721_v3 }
 0x104   : > { %v1648_v6 = vunpack.c.l.b16 %v890_v1  ;;  %v875_v17 = vpack.c.bf16 %v770_v9, %v770_v9 }
 0x105   : > { %v859_v19 = vpack.c.bf16 %v843_v10, %v843_v10 }
 0x106   : > { %v6662_v8 = vpack.c.b16 %v1648_v6, %v1647_v63  ;;  %v1151_v24 = vunpack.c.l.b16 %v875_v17 }
 0x107   : > { %v6665_v11 = vpop.f32.mrf.mxu2  ;;  %v1111_v27 = vunpack.c.l.b16 %v859_v19 }
 0x108   : > { %v722_v13 = vpop.f32.mrf.mxu0 }
 0x109   : > { %v723_v14 = vadd.f32 %v722_v13, %v6565_v33  ;;  %v771_v15 = vpop.f32.mrf.mxu1 }
 0x10a   : > { %v772_v18 = vadd.f32 %v771_v15, %v6567_v36  ;;  %1728 = vrot.lane.b32.xlu1 %v6667_v12, %s6292_s16 }
 0x10b   : > { %v844_v21 = vmul.f32 0.17677669, %v723_v14 }
 0x10c   : > { %v876_v22 = vpack.c.bf16 %v772_v18, %v772_v18 }
 0x10d   : > { %v860_v23 = vpack.c.bf16 %v844_v21, %v844_v21  ;;  %v819_v21 = vadd.f32 %v6665_v11, %v6570_v38 }
 0x10e   : > { %v1152_v25 = vunpack.c.l.b16 %v876_v22 }
 0x10f   : > { %v1112_v28 = vunpack.c.l.b16 %v860_v23  ;;  %v820_v29 = vpop.f32.mrf.mxu2 }
 0x110   : > { %v6673_v30 = vpack.c.b16 %v1152_v25, %v1151_v24  ;;  %v725_v32 = vpop.f32.mrf.mxu0 }
 0x111   : > { %v6675_v34 = vpack.c.b16 %v1112_v28, %v1111_v27  ;;  %v726_v35 = vadd.f32 %v725_v32, %v6565_v33  ;;  %v774_v37 = vpop.f32.mrf.mxu1 }
 0x112   : > { %1746 = vrot.lane.b32.xlu1 %v6673_v30, %s6292_s16  ;;  %2308 = vrot.lane.b32.xlu2 %v6673_v30, %s6294_s18  ;;  %v775_v41 = vadd.f32 %v774_v37, %v6567_v36 }
 0x113   : > { %1730 = vrot.lane.b32.xlu0 %v6675_v34, %s6292_s16  ;;  %v845_v39 = vmul.f32 0.17677669, %v726_v35 }
 0x114   : > { %v877_v47 = vpack.c.bf16 %v775_v41, %v775_v41 }
 0x115   : > { %v861_v44 = vpack.c.bf16 %v845_v39, %v845_v39 }
 0x116   : > { %v1153_v55 = vunpack.c.l.b16 %v877_v47 }
 0x117   : > { %v823_v42 = vpop.f32.mrf.mxu2  ;;  %v1113_v53 = vunpack.c.l.b16 %v861_v44 }
 0x118   : > { %v727_v43 = vpop.f32.mrf.mxu0  ;;  %v824_v13 = vadd.f32 %v823_v42, %v6570_v38 }
 0x119   : > { %v728_v45 = vadd.f32 %v727_v43, %v6565_v33  ;;  %v776_v46 = vpop.f32.mrf.mxu1 }
 0x11a   : > { %v777_v48 = vadd.f32 %v776_v46, %v6567_v36  ;;  %2870 = vrot.lane.b32.xlu1 %v6673_v30, %s6293_s17  ;;  %v893_v23 = vpack.c.bf16 %v824_v13, %v824_v13 }
 0x11b   : > { %v846_v49 = vmul.f32 0.17677669, %v728_v45 }
 0x11c   : > { %v878_v51 = vpack.c.bf16 %v777_v48, %v777_v48  ;;  %v1651_v37 = vunpack.c.l.b16 %v893_v23 }
 0x11d   : > { %v862_v54 = vpack.c.bf16 %v846_v49, %v846_v49  ;;  %v6719_v41 = vpop.permute.xlu2 %1720  ;;  %v1206_v49 = vsel %vm1165_vm0, %v6673_v30, 0 }
 0x11e   : > { %v1154_v57 = vunpack.c.l.b16 %v878_v51 }
 0x11f   : > { %v1114_v59 = vunpack.c.l.b16 %v862_v54  ;;  %v825_v60 = vpop.f32.mrf.mxu2 }
 0x120   : > { %v1163_v62 = vpack.c.b16 %v1154_v57, %v1153_v55  ;;  %v826_v14 = vadd.f32 %v825_v60, %v6570_v38 }
 0x121   : > { %v6689_v63 = vpack.c.b16 %v1114_v59, %v1113_v53  ;;  %v779_v1 = vpop.f32.mrf.mxu1  ;;  %v1203_v53 = vsel %vm1165_vm0, %v6652_v56, 0  ;;  %v1200_v56 = vsel %vm1165_vm0, %v6632_v20, 0  ;;  %v1197_v59 = vsel %vm1165_vm0, %v6610_v52, 0  ;;  %v730_v20 = vpop.f32.mrf.mxu0 }
 0x122   : > { %2872 = vrot.lane.b32.xlu1 %v1163_v62, %s6293_s17  ;;  %1748 = vrot.lane.b32.xlu0 %v1163_v62, %s6292_s16  ;;  %v780_v3 = vadd.f32 %v779_v1, %v6567_v36  ;;  %v894_v24 = vpack.c.bf16 %v826_v14, %v826_v14  ;;  %v1209_v46 = vsel %vm1165_vm0, %v1163_v62, 0  ;;  %v1194_v1 = vsel %vm1165_vm0, %v6591_v16, 0 }
 0x123   : > { %1732 = vrot.lane.b32.xlu2 %v6689_v63, %s6292_s16  ;;  %v1191_v16 = vsel %vm1165_vm0, %v6576_v58, 0 }
 0x124   : > { %v879_v7 = vpack.c.bf16 %v780_v3, %v780_v3 }
 0x126   : > { %v1155_v17 = vunpack.c.l.b16 %v879_v7 }
 0x127   : > { %v828_v5 = vpop.f32.mrf.mxu2 }
 0x128   : > { %v829_v9 = vadd.f32 %v828_v5, %v6570_v38  ;;  %v731_v5 = vadd.f32 %v730_v20, %v6565_v33 }
 0x129   : > { %v781_v6 = vpop.f32.mrf.mxu1  ;;  %v732_v52 = vpop.f32.mrf.mxu0 }
 0x12a   : > { %v782_v10 = vadd.f32 %v781_v6, %v6567_v36  ;;  %2860 = vrot.lane.b32.xlu1 %v6576_v58, %s6293_s17  ;;  %2310 = vrot.lane.b32.xlu0 %v1163_v62, %s6294_s18  ;;  %v895_v18 = vpack.c.bf16 %v829_v9, %v829_v9  ;;  %v821_v36 = vadd.f32 %v820_v29, %v6570_v38  ;;  %v847_v9 = vmul.f32 0.17677669, %v731_v5 }
 0x12b   : > { %2282 = vrot.lane.b32.xlu2 %v6579_v61, %s6294_s18  ;;  %v891_v29 = vpack.c.bf16 %v819_v21, %v819_v21  ;;  %v733_v6 = vadd.f32 %v732_v52, %v6565_v33 }
 0x12c   : > { %v880_v15 = vpack.c.bf16 %v782_v10, %v782_v10  ;;  %v1653_v28 = vunpack.c.l.b16 %v895_v18  ;;  %v892_v35 = vpack.c.bf16 %v821_v36, %v821_v36  ;;  %v6736_v48 = vpop.permute.xlu2 %2862  ;;  %v863_v14 = vpack.c.bf16 %v847_v9, %v847_v9 }
 0x12d   : > { %v1649_v43 = vunpack.c.l.b16 %v891_v29  ;;  %v848_v10 = vmul.f32 0.17677669, %v733_v6 }
 0x12e   : > { %v1156_v19 = vunpack.c.l.b16 %v880_v15  ;;  %v1650_v44 = vunpack.c.l.b16 %v892_v35 }
 0x12f   : > { %v830_v22 = vpop.f32.mrf.mxu2  ;;  %v864_v15 = vpack.c.bf16 %v848_v10, %v848_v10 }
 0x130   : > { %v6708_v25 = vpack.c.b16 %v1156_v19, %v1155_v17  ;;  %v831_v27 = vadd.f32 %v830_v22, %v6570_v38  ;;  %v1652_v38 = vunpack.c.l.b16 %v894_v24  ;;  %v6733_v47 = vpack.c.b16 %v1650_v44, %v1649_v43 }
 0x131   : > { %v1115_v17 = vunpack.c.l.b16 %v863_v14 }
 0x132   : > { %v896_v32 = vpack.c.bf16 %v831_v27, %v831_v27  ;;  %2284 = vrot.lane.b32.xlu1 %v6608_v50, %s6294_s18  ;;  %1750 = vrot.lane.b32.xlu0 %v6708_v25, %s6292_s16  ;;  %v1212_v11 = vsel %vm1165_vm0, %v6708_v25, 0  ;;  %v6723_v45 = vpack.c.b16 %v1652_v38, %v1651_v37 }
 0x133   : > { %1214 = vmatpush.bf16.xpose.msra.mxu3 %v1212_v11  ;;  %2846 = vrot.lane.b32.xlu2 %v6608_v50, %s6293_s17 }
 0x134   : > { %v1654_v39 = vunpack.c.l.b16 %v896_v32  ;;  %v6762_v54 = vpop.permute.xlu1 %1736 }
 0x136   : > { %v6721_v42 = vpack.c.b16 %v1654_v39, %v1653_v28 }
 0x138   : > { %1671 = vmatpush.bf16.msrb.mxu0 %v6721_v42 }
 0x13a   : > { %2848 = vrot.lane.b32.xlu1 %v6622_v4, %s6293_s17  ;;  %2298 = vrot.lane.b32.xlu0 %v6576_v58, %s6294_s18  ;;  %v1116_v58 = vunpack.c.l.b16 %v864_v15 }
 0x13b   : > { %1215 = vmatpush.bf16.xpose.msra.mxu3 %v1209_v46  ;;  %2290 = vrot.lane.b32.xlu2 %v6667_v12, %s6294_s18 }
 0x13c   : > { %1672 = vmatpush.bf16.msrb.mxu0 %v6723_v45  ;;  %v6828_v21 = vpack.c.b16 %v1116_v58, %v1115_v17  ;;  %v899_v58 = vlaneseq }
 0x13d   : > { %v6748_v51 = vpop.permute.xlu2 %1740 }
 0x13e   : > { %v1783_v10 = vsel %vm1165_vm0, %v6748_v51, 0  ;;  %v6942_v51 = vand.u32 127, %v899_v58 }
 0x140   : > { %1673 = vmatpush.bf16.msrb.mxu0 %v6733_v47 }
 0x142   : > { %2288 = vrot.lane.b32.xlu1 %v6645_v40, %s6294_s18  ;;  %2844 = vrot.lane.b32.xlu0 %v6579_v61, %s6293_s17 }
 0x143   : > { %1216 = vmatpush.bf16.xpose.msra.mxu3 %v1206_v49  ;;  %2219 = vrot.lane.b32.xlu2 %v6733_v47, %s6292_s16 }
 0x144   : > { %1674 = vmatpush.bf16.msrb.mxu0 %v6662_v8  ;;  %v6786_v60 = vpop.permute.xlu0 %1738 }
 0x145   : > { %v6760_v30 = vpop.permute.xlu2 %2864 }
 0x148   : > { %1675 = vmatpush.bf16.msrb.mxu0 %v6641_v31 }
 0x14a   : > { %2850 = vrot.lane.b32.xlu1 %v6645_v40, %s6293_s17  ;;  %2286 = vrot.lane.b32.xlu0 %v6622_v4, %s6294_s18 }
 0x14b   : > { %1217 = vmatpush.bf16.xpose.msra.mxu3 %v1203_v53  ;;  %2217 = vrot.lane.b32.xlu2 %v6662_v8, %s6292_s16 }
 0x14c   : > { %1676 = vmatpush.bf16.msrb.mxu0 %v6619_v0  ;;  %v6802_v7 = vpop.permute.xlu0 %2300 }
 0x14d   : > { %v6776_v57 = vpop.permute.xlu2 %1742 }
 0x14e   : > { %v1786_v5 = vsel %vm1165_vm0, %v6776_v57, 0  ;;  %v1780_v57 = vsel %vm1165_vm0, %v6786_v60, 0 }
 0x150   : > { %1677 = vmatpush.bf16.msrb.mxu0 %v6599_v26 }
 0x152   : > { %2292 = vrot.lane.b32.xlu1 %v6675_v34, %s6294_s18  ;;  %2852 = vrot.lane.b32.xlu0 %v6667_v12, %s6293_s17 }
 0x153   : > { %1218 = vmatpush.bf16.xpose.msra.mxu3 %v1200_v56  ;;  %2211 = vrot.lane.b32.xlu2 %v6599_v26, %s6292_s16 }
 0x154   : > { %1678 = vmatpush.bf16.msrb.mxu0 %v6585_v2  ;;  %v6774_v55 = vpop.permute.xlu1 %2302 }
 0x155   : > { %v6796_v3 = vpop.permute.xlu2 %1726 }
 0x15a   : > { %2854 = vrot.lane.b32.xlu1 %v6675_v34, %s6293_s17  ;;  %2221 = vrot.lane.b32.xlu0 %v6723_v45, %s6292_s16 }
 0x15b   : > { %1219 = vmatpush.bf16.xpose.msra.mxu3 %v1197_v59  ;;  %3345 = vrot.lane.b32.xlu2 %v6723_v45, %s6293_s17 }
 0x15c   : > { %v6788_v62 = vpop.permute.xlu1 %1724 }
 0x15d   : > { %v6814_v33 = vpop.permute.xlu2 %2306 }
 0x162   : > { %2294 = vrot.lane.b32.xlu1 %v6689_v63, %s6294_s18  ;;  %2215 = vrot.lane.b32.xlu0 %v6641_v31, %s6292_s16 }
 0x163   : > { %1220 = vmatpush.bf16.xpose.msra.mxu3 %v1194_v1  ;;  %3341 = vrot.lane.b32.xlu2 %v6662_v8, %s6293_s17 }
 0x164   : > { %v6812_v13 = vpop.permute.xlu1 %2304 }
 0x16a   : > { %2856 = vrot.lane.b32.xlu1 %v6689_v63, %s6293_s17  ;;  %2781 = vrot.lane.b32.xlu0 %v6733_v47, %s6294_s18 }
 0x16b   : > { %1221 = vmatpush.bf16.xpose.msra.mxu3 %v1191_v16  ;;  %2779 = vrot.lane.b32.xlu2 %v6662_v8, %s6294_s18  ;;  %v6824_v8 = vpop.permute.xlu0 %1722 }
 0x16c   : > { %v6826_v19 = vpop.permute.xlu2 %2308 }
 0x172   : > { %2213 = vrot.lane.b32.xlu1 %v6619_v0, %s6292_s16  ;;  %3339 = vrot.lane.b32.xlu0 %v6641_v31, %s6293_s17 }
 0x173   : > { %5460 = vmatmul.msk.bf16.vlgmr.msra.gmra.mxu3 %vm1165_vm0, %v6579_v61  ;;  %2874 = vrot.lane.b32.xlu2 %v6708_v25, %s6293_s17  ;;  %v6836_v61 = vpop.permute.xlu0 %2866 }
 0x174   : > { %v1745_v18 = vpop.permute.xlu1 %1744 }
 0x175   : > { %v1789_v20 = vsel %vm1165_vm0, %v1745_v18, 0  ;;  %v6940_v18 = vshrl.u32 %v899_v58, 7  ;;  %v6295_v58 = vmov 0  }
 0x177   : > { %v918_v60 = vsub.s32 %v6940_v18, %v6942_v51 }
 0x179   : > { %vm934_vm1 = vcmp.lt.s32.totalorder %v918_v60, 0 }
 0x17a   : > { %2209 = vrot.lane.b32.xlu1 %v6585_v2, %s6292_s16  ;;  %2777 = vrot.lane.b32.xlu0 %v6641_v31, %s6294_s18 }
 0x17b   : > { %2296 = vrot.lane.b32.xlu2 %v6828_v21, %s6294_s18  ;;  %v6850_v31 = vpop.permute.xlu0 %2868 }
 0x17c   : > { %v6838_v36 = vpop.permute.xlu1 %1728 }
 0x17d   : > { %v6840_v22 = vpop.permute.xlu2 %1732 }
 0x182   : > { %3343 = vrot.lane.b32.xlu1 %v6733_v47, %s6293_s17  ;;  %2312 = vrot.lane.b32.xlu0 %v6708_v25, %s6294_s18 }
 0x183   : > { %5461 = vmatmul.msk.bf16.gmra.mxu3 %vm1165_vm0, %v6608_v50  ;;  %2223 = vrot.lane.b32.xlu2 %v6721_v42, %s6292_s16 }
 0x184   : > { %v1747_v23 = vpop.permute.xlu1 %1746 }
 0x185   : > { %v6852_v24 = vpop.permute.xlu2 %2282  ;;  %v6858_v27 = vpop.permute.xlu0 %1730  ;;  %v1792_v49 = vsel %vm1165_vm0, %v1747_v23, 0 }
 0x18a   : > { %2783 = vrot.lane.b32.xlu1 %v6723_v45, %s6294_s18  ;;  %2858 = vrot.lane.b32.xlu0 %v6828_v21, %s6293_s17 }
 0x18c   : > { %v6860_v25 = vpop.permute.xlu1 %2870 }
 0x18d   : > { %v6862_v28 = vpop.permute.xlu2 %2846 }
 0x192   : > { %3337 = vrot.lane.b32.xlu1 %v6619_v0, %s6293_s17  ;;  %3347 = vrot.lane.b32.xlu0 %v6721_v42, %s6293_s17 }
 0x193   : > { %5462 = vmatmul.msk.bf16.gmra.mxu3 %vm1165_vm0, %v6622_v4 }
 0x194   : > { %v6870_v50 = vpop.permute.xlu1 %2872  ;;  %v1749_v32 = vpop.permute.xlu0 %1748 }
 0x195   : > { %v6872_v11 = vpop.permute.xlu2 %2290 }
 0x19a   : > { %1734 = vrot.lane.b32.xlu1 %v6828_v21, %s6292_s16 }
 0x19c   : > { %v6876_v29 = vpop.permute.xlu1 %2860  ;;  %v6878_v35 = vpop.permute.xlu0 %2310 }
 0x19d   : > { %v6880_v37 = vpop.permute.xlu2 %2219 }
 0x1a2   : > { %2785 = vrot.lane.b32.xlu1 %v6721_v42, %s6294_s18  ;;  %v1795_v42 = vsel %vm1165_vm0, %v1749_v32, 0  ;;  %v1777_v32 = vsel %vm1165_vm0, %v6762_v54, 0 }
 0x1a3   : > { %5463 = vmatmul.msk.bf16.gmra.mxu3 %vm1165_vm0, %v6645_v40 }
 0x1a4   : > { %v6886_v4 = vpop.permute.xlu1 %2284  ;;  %v1751_v38 = vpop.permute.xlu0 %1750 }
 0x1a5   : > { %v1798_v39 = vsel %vm1165_vm0, %v1751_v38, 0  ;;  %v6889_v43 = vpop.permute.xlu2 %2217 }
 0x1a6   : > { %1800 = vmatpush.bf16.xpose.msrb.mxu1 %v1798_v39 }
 0x1aa   : > { %3335 = vrot.lane.b32.xlu1 %v6599_v26, %s6293_s17 }
 0x1ac   : > { %v6893_v44 = vpop.permute.xlu1 %2848  ;;  %v6895_v45 = vpop.permute.xlu0 %2298 }
 0x1ad   : > { %v6898_v46 = vpop.permute.xlu2 %2211 }
 0x1ae   : > { %1801 = vmatpush.bf16.xpose.msrb.mxu1 %v1795_v42  ;;  %v935_v42 = vsub.s32 0, %v918_v60 }
 0x1b3   : > { %5464 = vmatmul.msk.bf16.gmra.mxu3 %vm1165_vm0, %v6667_v12 }
 0x1b4   : > { %v6902_v40 = vpop.permute.xlu1 %2288  ;;  %v6904_v47 = vpop.permute.xlu0 %2844 }
 0x1b5   : > { %v6907_v53 = vpop.permute.xlu2 %3345 }
 0x1b6   : > { %1802 = vmatpush.bf16.xpose.msrb.mxu1 %v1792_v49  ;;  %v1016_v49 = vld [vmem:[%s481_s26] sm:$0x1] }
 0x1b7   : > { %vm1017_vm2 = vcmp.gt.f32.partialorder %v1016_v49, 0.5  ;;  %v2916_v49 = vsel %vm1165_vm0, %v6860_v25, 0  ;;  %v2357_v25 = vsel %vm1165_vm0, %v6878_v35, 0 }
 0x1bc   : > { %v6909_v56 = vpop.permute.xlu1 %2850  ;;  %v6911_v59 = vpop.permute.xlu0 %2286 }
 0x1bd   : > { %v6914_v1 = vpop.permute.xlu2 %3341 }
 0x1be   : > { %1803 = vmatpush.bf16.xpose.msrb.mxu1 %v1789_v20  ;;  %v901_v20 = vadd.s32 8, %v6940_v18 }
 0x1c3   : > { %5465 = vmatmul.msk.bf16.gmra.mxu3 %vm1165_vm0, %v6675_v34 }
 0x1c4   : > { %v6918_v12 = vpop.permute.xlu1 %2292  ;;  %v6920_v52 = vpop.permute.xlu0 %2852 }
 0x1c5   : > { %v6924_v6 = vpop.permute.xlu2 %2779 }
 0x1c6   : > { %1804 = vmatpush.bf16.xpose.msrb.mxu1 %v1786_v5 }
 0x1cc   : > { %v6926_v16 = vpop.permute.xlu1 %2854  ;;  %v2222_v9 = vpop.permute.xlu0 %2221 }
 0x1cd   : > { %v2875_v34 = vpop.permute.xlu2 %2874 }
 0x1ce   : > { %1805 = vmatpush.bf16.xpose.msrb.mxu1 %v1783_v10  ;;  %v2922_v39 = vsel %vm1165_vm0, %v2875_v34, 0  ;;  %v936_v10 = vsel %vm934_vm1, %v935_v42, %v918_v60  ;;  %v6964_v34 = vstv %s898_s27 }
 0x1cf   : > { %vm982_vm3 = vcmp.le.s32.totalorder %v936_v10, 8  ;;  %vm999_vm4 = vcmp.gt.s32.totalorder %v6940_v18, %v6964_v34  ;;  %vm6976_vm6 = vcmp.gt.s32.totalorder %v6942_v51, %v6964_v34  ;;  %vm1000_vm11 = vcmp.gt.s32.totalorder %v901_v20, %v6964_v34 }
 0x1d0   : > { %vm1018_vm7 = vmor %vm982_vm3, %vm999_vm4 }
 0x1d1   : > { %vm1034_vm8 = vmor %vm1018_vm7, %vm6976_vm6 }
 0x1d3   : > { %5466 = vmatmul.msk.bf16.gmra.mxu3 %vm1165_vm0, %v6689_v63 }
 0x1d4   : > { %v6932_v14 = vpop.permute.xlu1 %2294  ;;  %v2216_v15 = vpop.permute.xlu0 %2215 }
 0x1d5   : > { %v6936_v17 = vpop.permute.xlu2 %2296 }
 0x1d6   : > { %1806 = vmatpush.bf16.xpose.msrb.mxu1 %v1780_v57  ;;  %v919_v57 = vsub.s32 %v901_v20, %v6942_v51 }
 0x1d8   : > { %vm937_vm5 = vcmp.lt.s32.totalorder %v919_v57, 0 }
 0x1dc   : > { %v6945_v23 = vpop.permute.xlu1 %2856  ;;  %v6947_v63 = vpop.permute.xlu0 %2781 }
 0x1dd   : > { %v2224_v38 = vpop.permute.xlu2 %2223 }
 0x1de   : > { %1807 = vmatpush.bf16.xpose.msrb.mxu1 %v1777_v32  ;;  %2233 = vmatpush.bf16.msrb.mxu2 %v2224_v38  ;;  %v938_v32 = vsub.s32 0, %v919_v57 }
 0x1e2   : > { %2234 = vmatpush.bf16.msrb.mxu2 %v2222_v9  ;;  %v2919_v9 = vsel %vm1165_vm0, %v6870_v50, 0 }
 0x1e3   : > { %5467 = vmatmul.msk.bf16.gmra.mxu3 %vm1165_vm0, %v6828_v21  ;;  %v1050_v21 = vsel %vm1017_vm2, 1, %v6295_v58  ;;  %v9973_v58 = vmov -1e+09  }
 0x1e4   : > { %v2214_v54 = vpop.permute.xlu1 %2213  ;;  %v6960_v5 = vpop.permute.xlu0 %3339  ;;  %v1051_v38 = vperm.slane %v1050_v21, 0 }
 0x1e5   : > { %5468 = vmatmul.msk.bf16.vlgmr.msrb.gmra.mxu1 %vm1165_vm0, %v6719_v41  ;;  %v902_v41 = vadd.s32 16, %v6940_v18 }
 0x1e6   : > { %2924 = vmatpush.bf16.xpose.msra.mxu1 %v2922_v39  ;;  %2235 = vmatpush.bf16.msrb.mxu2 %v6880_v37  ;;  %v939_v39 = vsel %vm937_vm5, %v938_v32, %v919_v57  ;;  %vm6987_vm9 = vcmp.eq.s32.totalorder %v1051_v38, 1 }
 0x1e7   : > { %v920_v42 = vsub.s32 %v902_v41, %v6942_v51  ;;  %vm983_vm10 = vcmp.le.s32.totalorder %v939_v39, 8  ;;  %vm1053_vm12 = vmand %vm1034_vm8, %vm6987_vm9  ;;  %v2913_v39 = vsel %vm1165_vm0, %v6850_v31, 0  ;;  %vm1001_vm2 = vcmp.gt.s32.totalorder %v902_v41, %v6964_v34 }
 0x1e8   : > { %vm6995_vm14 = vmor %vm983_vm10, %vm1000_vm11  ;;  %v7002_v21 = vsel %vm1053_vm12, 0.0, %v9973_v58  ;;  %v904_v31 = vadd.s32 32, %v6940_v18 }
 0x1e9   : > { %v941_v10 = vsub.s32 0, %v920_v42  ;;  %vm940_vm13 = vcmp.lt.s32.totalorder %v920_v42, 0  ;;  %vm1035_vm15 = vmor %vm6995_vm14, %vm6976_vm6 }
 0x1ea   : > { %2236 = vmatpush.bf16.msrb.mxu2 %v6889_v43  ;;  %vm1054_vm3 = vmand %vm1035_vm15, %vm6987_vm9 }
 0x1eb   : > { %v942_v32 = vsel %vm940_vm13, %v941_v10, %v920_v42  ;;  %v7032_v41 = vsel %vm1054_vm3, 0.0, %v9973_v58 }
 0x1ec   : > { %v2210_v50 = vpop.permute.xlu1 %2209  ;;  %v6980_v60 = vpop.permute.xlu0 %2777  ;;  %vm984_vm1 = vcmp.le.s32.totalorder %v942_v32, 8 }
 0x1ed   : > { %vm7023_vm5 = vmor %vm984_vm1, %vm1001_vm2  ;;  %vm1003_vm1 = vcmp.gt.s32.totalorder %v904_v31, %v6964_v34 }
 0x1ee   : > { %2925 = vmatpush.bf16.xpose.msra.mxu1 %v2919_v9  ;;  %2237 = vmatpush.bf16.msrb.mxu2 %v2216_v15  ;;  %v903_v15 = vadd.s32 24, %v6940_v18  ;;  %vm1036_vm7 = vmor %vm7023_vm5, %vm6976_vm6 }
 0x1ef   : > { %vm1055_vm11 = vmand %vm1036_vm7, %vm6987_vm9 }
 0x1f0   : > { %vm1002_vm10 = vcmp.gt.s32.totalorder %v903_v15, %v6964_v34 }
 0x1f2   : > { %2238 = vmatpush.bf16.msrb.mxu2 %v2214_v54  ;;  %v921_v54 = vsub.s32 %v903_v15, %v6942_v51  ;;  %v2354_v15 = vsel %vm1165_vm0, %v6826_v19, 0 }
 0x1f4   : > { %v6999_v57 = vpop.permute.xlu1 %3343  ;;  %v2313_v9 = vpop.permute.xlu0 %2312  ;;  %vm943_vm4 = vcmp.lt.s32.totalorder %v921_v54, 0 }
 0x1f5   : > { %5469 = vmatmul.msk.bf16.gmra.mxu1 %vm1165_vm0, %v6824_v8  ;;  %v2360_v20 = vsel %vm1165_vm0, %v2313_v9, 0  ;;  %v944_v8 = vsub.s32 0, %v921_v54 }
 0x1f6   : > { %2926 = vmatpush.bf16.xpose.msra.mxu1 %v2916_v49  ;;  %v1223_v38 = vpop.f32.mrf.mxu3  ;;  %2362 = vmatpush.bf16.xpose.msrb.mxu3 %v2360_v20  ;;  %v922_v20 = vsub.s32 %v904_v31, %v6942_v51 }
 0x1f7   : > { %2239 = vmatpush.bf16.msrb.mxu2 %v6898_v46  ;;  %v7016_v49 = vadd.f32 %v1223_v38, %v7002_v21  ;;  %v945_v9 = vsel %vm943_vm4, %v944_v8, %v921_v54  ;;  %v7058_v46 = vsel %vm1055_vm11, 0.0, %v9973_v58 }
 0x1f8   : > { %vm985_vm8 = vcmp.le.s32.totalorder %v945_v9, 8  ;;  %v947_v35 = vsub.s32 0, %v922_v20  ;;  %vm946_vm12 = vcmp.lt.s32.totalorder %v922_v20, 0 }
 0x1f9   : > { %1263 = vmax.xlane.f32.xlu1 %v7016_v49  ;;  %vm7051_vm13 = vmor %vm985_vm8, %vm1002_vm10 }
 0x1fa   : > { %vm1037_vm14 = vmor %vm7051_vm13, %vm6976_vm6 }
 0x1fb   : > { %2240 = vmatpush.bf16.msrb.mxu2 %v2210_v50  ;;  %v2910_v50 = vsel %vm1165_vm0, %v6836_v61, 0  ;;  %v905_v61 = vadd.s32 40, %v6940_v18  ;;  %vm1056_vm2 = vmand %vm1037_vm14, %vm6987_vm9 }
 0x1fc   : > { %v7027_v42 = vpop.permute.xlu1 %2783  ;;  %v7029_v10 = vpop.permute.xlu0 %2858 }
 0x1fd   : > { %v923_v9 = vsub.s32 %v905_v61, %v6942_v51  ;;  %vm1004_vm8 = vcmp.gt.s32.totalorder %v905_v61, %v6964_v34 }
 0x1fe   : > { %2927 = vmatpush.bf16.xpose.msra.mxu1 %v2913_v39  ;;  %v1225_v32 = vpop.f32.mrf.mxu3  ;;  %2363 = vmatpush.bf16.xpose.msrb.mxu3 %v2357_v25  ;;  %v948_v25 = vsel %vm946_vm12, %v947_v35, %v922_v20  ;;  %v10021_v35 = vmov -1e+09  }
 0x1ff   : > { %v7044_v38 = vadd.f32 %v1225_v32, %v7032_v41  ;;  %vm986_vm15 = vcmp.le.s32.totalorder %v948_v25, 8  ;;  %vm949_vm3 = vcmp.lt.s32.totalorder %v923_v9, 0  ;;  %v7087_v54 = vsel %vm1056_vm2, 0.0, %v10021_v35 }
 0x200   : > { %vm7080_vm4 = vmor %vm986_vm15, %vm1003_vm1  ;;  %v2904_v25 = vsel %vm1165_vm0, %v6736_v48, 0 }
 0x201   : > { %1265 = vmax.xlane.f32.xlu2 %v7044_v38  ;;  %vm1038_vm5 = vmor %vm7080_vm4, %vm6976_vm6 }
 0x202   : > { %vm1057_vm10 = vmand %vm1038_vm5, %vm6987_vm9 }
 0x204   : > { %v7055_v39 = vpop.permute.xlu1 %3337  ;;  %v3348_v8 = vpop.permute.xlu0 %3347 }
 0x205   : > { %5470 = vmatmul.msk.bf16.gmra.mxu1 %vm1165_vm0, %v6788_v62  ;;  %3357 = vmatpush.bf16.msra.mxu2 %v3348_v8  ;;  %v906_v62 = vadd.s32 48, %v6940_v18 }
 0x206   : > { %2928 = vmatpush.bf16.xpose.msra.mxu1 %v2910_v50  ;;  %v1228_v32 = vpop.f32.mrf.mxu3  ;;  %2364 = vmatpush.bf16.xpose.msrb.mxu3 %v2354_v15  ;;  %v2907_v50 = vsel %vm1165_vm0, %v6760_v30, 0  ;;  %v950_v30 = vsub.s32 0, %v923_v9 }
 0x207   : > { %v7072_v58 = vadd.f32 %v1228_v32, %v7058_v46  ;;  %v924_v8 = vsub.s32 %v906_v62, %v6942_v51  ;;  %vm1005_vm15 = vcmp.gt.s32.totalorder %v906_v62, %v6964_v34 }
 0x208   : > { %v951_v31 = vsel %vm949_vm3, %v950_v30, %v923_v9 }
 0x209   : > { %1267 = vmax.xlane.f32.xlu1 %v7072_v58  ;;  %3358 = vmatpush.bf16.msra.mxu2 %v6907_v53  ;;  %v2351_v53 = vsel %vm1165_vm0, %v6814_v33, 0  ;;  %vm987_vm7 = vcmp.le.s32.totalorder %v951_v31, 8  ;;  %v953_v48 = vsub.s32 0, %v924_v8  ;;  %v907_v33 = vadd.s32 56, %v6940_v18 }
 0x20a   : > { %vm952_vm11 = vcmp.lt.s32.totalorder %v924_v8, 0  ;;  %vm7108_vm12 = vmor %vm987_vm7, %vm1004_vm8 }
 0x20b   : > { %v954_v61 = vsel %vm952_vm11, %v953_v48, %v924_v8  ;;  %v925_v30 = vsub.s32 %v907_v33, %v6942_v51  ;;  %vm1039_vm13 = vmor %vm7108_vm12, %vm6976_vm6  ;;  %vm1006_vm7 = vcmp.gt.s32.totalorder %v907_v33, %v6964_v34 }
 0x20c   : > { %v7084_v20 = vpop.permute.xlu1 %1734  ;;  %vm988_vm14 = vcmp.le.s32.totalorder %v954_v61, 8  ;;  %vm1058_vm1 = vmand %vm1039_vm13, %vm6987_vm9 }
 0x20d   : > { %3359 = vmatpush.bf16.msra.mxu2 %v6999_v57  ;;  %vm955_vm2 = vcmp.lt.s32.totalorder %v925_v30, 0  ;;  %vm7137_vm3 = vmor %vm988_vm14, %vm1005_vm15  ;;  %v7142_v62 = vsel %vm1058_vm1, 0.0, %v10021_v35 }
 0x20e   : > { %2929 = vmatpush.bf16.xpose.msra.mxu1 %v2907_v50  ;;  %v1230_v15 = vpop.f32.mrf.mxu3  ;;  %2365 = vmatpush.bf16.xpose.msrb.mxu3 %v2351_v53  ;;  %v7113_v50 = vsel %vm1057_vm10, 0.0, %v10021_v35  ;;  %v2901_v53 = vsel %vm1165_vm0, %v6876_v29, 0  ;;  %v908_v29 = vadd.s32 64, %v6940_v18  ;;  %vm1040_vm4 = vmor %vm7137_vm3, %vm6976_vm6 }
 0x20f   : > { %v7100_v32 = vadd.f32 %v1230_v15, %v7087_v54  ;;  %vm1059_vm8 = vmand %vm1040_vm4, %vm6987_vm9 }
 0x210   : > { %v926_v15 = vsub.s32 %v908_v29, %v6942_v51  ;;  %v7166_v57 = vsel %vm1059_vm8, 0.0, %v10021_v35  ;;  %vm1007_vm14 = vcmp.gt.s32.totalorder %v908_v29, %v6964_v34 }
 0x211   : > { %1269 = vmax.xlane.f32.xlu1 %v7100_v32  ;;  %3360 = vmatpush.bf16.msra.mxu2 %v6914_v1  ;;  %v2348_v1 = vsel %vm1165_vm0, %v6812_v13, 0  ;;  %v956_v13 = vsub.s32 0, %v925_v30 }
 0x212   : > { %vm958_vm10 = vcmp.lt.s32.totalorder %v926_v15, 0 }
 0x213   : > { %v957_v8 = vsel %vm955_vm2, %v956_v13, %v925_v30  ;;  %v2339_v30 = vsel %vm1165_vm0, %v6895_v45, 0 }
 0x214   : > { %v2786_v9 = vpop.permute.xlu1 %2785  ;;  %vm989_vm5 = vcmp.le.s32.totalorder %v957_v8, 8 }
 0x215   : > { %5471 = vmatmul.msk.bf16.gmra.mxu1 %vm1165_vm0, %v6796_v3  ;;  %2795 = vmatpush.bf16.msra.mxu0 %v2786_v9  ;;  %vm7161_vm11 = vmor %vm989_vm5, %vm1006_vm7 }
 0x216   : > { %2930 = vmatpush.bf16.xpose.msra.mxu1 %v2904_v25  ;;  %v1233_v19 = vpop.f32.mrf.mxu3  ;;  %3361 = vmatpush.bf16.msra.mxu2 %v6960_v5  ;;  %vm1041_vm12 = vmor %vm7161_vm11, %vm6976_vm6  ;;  %v911_v5 = vadd.s32 88, %v6940_v18 }
 0x217   : > { %2366 = vmatpush.bf16.xpose.msrb.mxu3 %v2348_v1  ;;  %v7128_v3 = vadd.f32 %v1233_v19, %v7113_v50  ;;  %vm1060_vm15 = vmand %vm1041_vm12, %vm6987_vm9 }
 0x218   : > { %v929_v8 = vsub.s32 %v911_v5, %v6942_v51 }
 0x219   : > { %1271 = vmax.xlane.f32.xlu1 %v7128_v3  ;;  %2796 = vmatpush.bf16.msra.mxu0 %v7027_v42  ;;  %v2345_v42 = vsel %vm1165_vm0, %v6774_v55, 0  ;;  %v959_v55 = vsub.s32 0, %v926_v15 }
 0x21a   : > { %3362 = vmatpush.bf16.msra.mxu2 %v7055_v39 }
 0x21b   : > { %v960_v33 = vsel %vm958_vm10, %v959_v55, %v926_v15 }
 0x21c   : > { %v3336_v31 = vpop.permute.xlu1 %3335  ;;  %vm990_vm13 = vcmp.le.s32.totalorder %v960_v33, 8 }
 0x21d   : > { %2797 = vmatpush.bf16.msra.mxu0 %v6947_v63  ;;  %v909_v63 = vadd.s32 72, %v6940_v18  ;;  %vm1026_vm2 = vmor %vm990_vm13, %vm1007_vm14 }
 0x21e   : > { %2931 = vmatpush.bf16.xpose.msra.mxu1 %v2901_v53  ;;  %v1235_v25 = vpop.f32.mrf.mxu3  ;;  %3363 = vmatpush.bf16.msra.mxu2 %v3336_v31  ;;  %vm1042_vm3 = vmor %vm1026_vm2, %vm6976_vm6 }
 0x21f   : > { %2367 = vmatpush.bf16.xpose.msrb.mxu3 %v2345_v42  ;;  %v7153_v39 = vadd.f32 %v1235_v25, %v7142_v62  ;;  %v927_v9 = vsub.s32 %v909_v63, %v6942_v51  ;;  %vm1008_vm5 = vcmp.gt.s32.totalorder %v909_v63, %v6964_v34  ;;  %vm1061_vm7 = vmand %vm1042_vm3, %vm6987_vm9 }
 0x220   : > { %v7203_v31 = vsel %vm1061_vm7, 0.0, %v10021_v35 }
 0x221   : > { %1273 = vmax.xlane.f32.xlu0 %v7153_v39  ;;  %2798 = vmatpush.bf16.msra.mxu0 %v6924_v6  ;;  %v2342_v6 = vsel %vm1165_vm0, %v6802_v7, 0  ;;  %v962_v7 = vsub.s32 0, %v927_v9  ;;  %vm961_vm1 = vcmp.lt.s32.totalorder %v927_v9, 0 }
 0x223   : > { %v963_v19 = vsel %vm961_vm1, %v962_v7, %v927_v9 }
 0x224   : > { %vm991_vm4 = vcmp.le.s32.totalorder %v963_v19, 8 }
 0x225   : > { %5472 = vmatmul.msk.bf16.gmra.mxu1 %vm1165_vm0, %v6838_v36  ;;  %2799 = vmatpush.bf16.msra.mxu0 %v6980_v60  ;;  %v910_v36 = vadd.s32 80, %v6940_v18  ;;  %v7187_v60 = vsel %vm1060_vm15, 0.0, %v10021_v35  ;;  %vm1027_vm10 = vmor %vm991_vm4, %vm1008_vm5  ;;  %vm967_vm15 = vcmp.lt.s32.totalorder %v929_v8, 0  ;;  %vm1010_vm4 = vcmp.gt.s32.totalorder %v911_v5, %v6964_v34 }
 0x226   : > { %v1238_v1 = vpop.f32.mrf.mxu3  ;;  %vm1043_vm11 = vmor %vm1027_vm10, %vm6976_vm6 }
 0x227   : > { %2368 = vmatpush.bf16.xpose.msrb.mxu3 %v2342_v6  ;;  %v7179_v61 = vadd.f32 %v1238_v1, %v7166_v57  ;;  %v928_v53 = vsub.s32 %v910_v36, %v6942_v51  ;;  %vm1009_vm13 = vcmp.gt.s32.totalorder %v910_v36, %v6964_v34  ;;  %vm1062_vm14 = vmand %vm1043_vm11, %vm6987_vm9  ;;  %v913_v1 = vadd.s32 104, %v6940_v18 }
 0x228   : > { %v7221_v55 = vsel %vm1062_vm14, 0.0, %v10021_v35 }
 0x229   : > { %1275 = vmax.xlane.f32.xlu0 %v7179_v61  ;;  %v965_v45 = vsub.s32 0, %v928_v53  ;;  %vm964_vm8 = vcmp.lt.s32.totalorder %v928_v53, 0 }
 0x22b   : > { %v966_v42 = vsel %vm964_vm8, %v965_v45, %v928_v53 }
 0x22c   : > { %vm992_vm12 = vcmp.le.s32.totalorder %v966_v42, 8 }
 0x22d   : > { %vm1028_vm1 = vmor %vm992_vm12, %vm1009_vm13 }
 0x22e   : > { %v1240_v13 = vpop.f32.mrf.mxu3  ;;  %vm1044_vm2 = vmor %vm1028_vm1, %vm6976_vm6 }
 0x22f   : > { %2369 = vmatpush.bf16.xpose.msrb.mxu3 %v2339_v30  ;;  %v7195_v29 = vadd.f32 %v1240_v13, %v7187_v60  ;;  %vm1063_vm5 = vmand %vm1044_vm2, %vm6987_vm9  ;;  %v931_v30 = vsub.s32 %v913_v1, %v6942_v51 }
 0x230   : > { %v7235_v7 = vsel %vm1063_vm5, 0.0, %v10021_v35 }
 0x231   : > { %1277 = vmax.xlane.f32.xlu0 %v7195_v29  ;;  %10028 = vst [vmem:[#allocation6_spill] sm:$0xff] %v7235_v7  ;;  %vm973_vm14 = vcmp.lt.s32.totalorder %v931_v30, 0 }
 0x235   : > { %5473 = vmatmul.msk.bf16.gmra.mxu1 %vm1165_vm0, %v6858_v27  ;;  %v968_v27 = vsub.s32 0, %v929_v8 }
 0x236   : > { %5476 = vmatmul.msk.bf16.vlgmr.msrb.gmra.mxu3 %vm1165_vm0, %v6852_v24  ;;  %v1243_v15 = vpop.f32.mrf.mxu3  ;;  %v912_v24 = vadd.s32 96, %v6940_v18 }
 0x237   : > { %v7213_v25 = vadd.f32 %v1243_v15, %v7203_v31  ;;  %v969_v63 = vsel %vm967_vm15, %v968_v27, %v929_v8 }
 0x238   : > { %v930_v48 = vsub.s32 %v912_v24, %v6942_v51  ;;  %vm993_vm3 = vcmp.le.s32.totalorder %v969_v63, 8  ;;  %vm1011_vm12 = vcmp.gt.s32.totalorder %v912_v24, %v6964_v34  ;;  %v915_v24 = vadd.s32 120, %v6940_v18 }
 0x239   : > { %1279 = vmax.xlane.f32.xlu0 %v7213_v25  ;;  %vm1029_vm8 = vmor %vm993_vm3, %vm1010_vm4  ;;  %vm1012_vm3 = vcmp.gt.s32.totalorder %v913_v1, %v6964_v34 }
 0x23a   : > { %v971_v9 = vsub.s32 0, %v930_v48  ;;  %vm970_vm7 = vcmp.lt.s32.totalorder %v930_v48, 0  ;;  %vm1045_vm10 = vmor %vm1029_vm8, %vm6976_vm6 }
 0x23b   : > { %vm1064_vm13 = vmand %vm1045_vm10, %vm6987_vm9 }
 0x23c   : > { %v972_v36 = vsel %vm970_vm7, %v971_v9, %v930_v48  ;;  %v7253_v13 = vsel %vm1064_vm13, 0.0, %v10021_v35  ;;  %v933_v9 = vsub.s32 %v915_v24, %v6942_v51 }
 0x23d   : > { %vm994_vm11 = vcmp.le.s32.totalorder %v972_v36, 8  ;;  %10029 = vst [vmem:[#allocation7_spill] sm:$0xff] %v7253_v13 }
 0x23e   : > { %v1245_v6 = vpop.f32.mrf.mxu3  ;;  %vm1030_vm15 = vmor %vm994_vm11, %vm1011_vm12 }
 0x23f   : > { %v7227_v33 = vadd.f32 %v1245_v6, %v7221_v55  ;;  %vm1046_vm1 = vmor %vm1030_vm15, %vm6976_vm6 }
 0x240   : > { %vm1065_vm4 = vmand %vm1046_vm1, %vm6987_vm9 }
 0x241   : > { %1281 = vmax.xlane.f32.xlu1 %v7227_v33  ;;  %v7266_v27 = vsel %vm1065_vm4, 0.0, %v10021_v35 }
 0x242   : > { %10030 = vst [vmem:[#allocation8_spill] sm:$0xff] %v7266_v27 }
 0x245   : > { %5474 = vmatmul.msk.bf16.gmra.mxu1 %vm1165_vm0, %v6840_v22  ;;  %v974_v22 = vsub.s32 0, %v931_v30 }
 0x246   : > { %5477 = vmatmul.msk.bf16.gmra.mxu3 %vm1165_vm0, %v6886_v4  ;;  %v1248_v19 = vpop.f32.mrf.mxu3  ;;  %v914_v4 = vadd.s32 112, %v6940_v18  ;;  %v980_v18 = vsub.s32 0, %v933_v9 }
 0x247   : > { %v7245_v53 = vadd.f32 %v1248_v19, %v7235_v7  ;;  %v975_v45 = vsel %vm973_vm14, %v974_v22, %v931_v30  ;;  %vm979_vm14 = vcmp.lt.s32.totalorder %v933_v9, 0 }
 0x248   : > { %v932_v5 = vsub.s32 %v914_v4, %v6942_v51  ;;  %vm995_vm2 = vcmp.le.s32.totalorder %v975_v45, 8  ;;  %vm1013_vm11 = vcmp.gt.s32.totalorder %v914_v4, %v6964_v34  ;;  %v981_v36 = vsel %vm979_vm14, %v980_v18, %v933_v9 }
 0x249   : > { %1283 = vmax.xlane.f32.xlu2 %v7245_v53  ;;  %vm1031_vm7 = vmor %vm995_vm2, %vm1012_vm3  ;;  %vm997_vm2 = vcmp.le.s32.totalorder %v981_v36, 8  ;;  %vm1014_vm3 = vcmp.gt.s32.totalorder %v915_v24, %v6964_v34 }
 0x24a   : > { %v977_v15 = vsub.s32 0, %v932_v5  ;;  %vm976_vm5 = vcmp.lt.s32.totalorder %v932_v5, 0  ;;  %vm1047_vm8 = vmor %vm1031_vm7, %vm6976_vm6 }
 0x24b   : > { %vm1066_vm12 = vmand %vm1047_vm8, %vm6987_vm9 }
 0x24c   : > { %v978_v63 = vsel %vm976_vm5, %v977_v15, %v932_v5  ;;  %vm1033_vm4 = vmor %vm997_vm2, %vm1014_vm3 }
 0x24d   : > { %vm996_vm10 = vcmp.le.s32.totalorder %v978_v63, 8  ;;  %vm1049_vm5 = vmor %vm1033_vm4, %vm6976_vm6 }
 0x24e   : > { %v1250_v42 = vpop.f32.mrf.mxu3  ;;  %vm1032_vm13 = vmor %vm996_vm10, %vm1013_vm11 }
 0x24f   : > { %v7259_v8 = vadd.f32 %v1250_v42, %v7253_v13  ;;  %vm1048_vm15 = vmor %vm1032_vm13, %vm6976_vm6 }
 0x250   : > { %vm1067_vm1 = vmand %vm1048_vm15, %vm6987_vm9 }
 0x251   : > { %1285 = vmax.xlane.f32.xlu0 %v7259_v8  ;;  %v7296_v30 = vsel %vm1067_vm1, 0.0, %v10021_v35  ;;  %vm1068_vm7 = vmand %vm1049_vm5, %vm6987_vm9 }
 0x252   : > { %10032 = vst [vmem:[#allocation10_spill] sm:$0xff] %v7296_v30  ;;  %v7320_v42 = vsel %vm1068_vm7, 0.0, %v10021_v35 }
 0x253   : > { %10033 = vst [vmem:[#allocation11_spill] sm:$0xff] %v7320_v42 }
 0x255   : > { %5475 = vmatmul.msk.bf16.gmra.mxu1 %vm1165_vm0, %v7084_v20 }
 0x256   : > { %5478 = vmatmul.msk.bf16.gmra.mxu3 %vm1165_vm0, %v6911_v59  ;;  %v1253_v48 = vpop.f32.mrf.mxu3  ;;  %v7284_v59 = vsel %vm1066_vm12, 0.0, %v10021_v35 }
 0x257   : > { %v7276_v6 = vadd.f32 %v1253_v48, %v7266_v27  ;;  %10031 = vst [vmem:[#allocation9_spill] sm:$0xff] %v7284_v59 }
 0x259   : > { %1287 = vmax.xlane.f32.xlu0 %v7276_v6 }
 0x25e   : > { %v1255_v20 = vpop.f32.mrf.mxu3 }
 0x25f   : > { %v7289_v1 = vadd.f32 %v1255_v20, %v7284_v59 }
 0x261   : > { %1289 = vmax.xlane.f32.xlu2 %v7289_v1 }
 0x262   : > { %v1809_v51 = vpop.f32.mrf.mxu1 }
 0x263   : > { %v7303_v22 = vadd.f32 %v1809_v51, %v7002_v21 }
 0x265   : > { %5484 = vmatmul.msk.bf16.vlgmr.msra.gmra.mxu1 %vm1165_vm0, %v6904_v47 }
 0x266   : > { %5479 = vmatmul.msk.bf16.gmra.mxu3 %vm1165_vm0, %v6902_v40  ;;  %v1258_v19 = vpop.f32.mrf.mxu3 }
 0x267   : > { %v7306_v4 = vadd.f32 %v1258_v19, %v7296_v30 }
 0x269   : > { %1849 = vmax.xlane.f32.xlu2 %v7303_v22  ;;  %1291 = vmax.xlane.f32.xlu1 %v7306_v4 }
 0x26a   : > { %v1811_v34 = vpop.f32.mrf.mxu1 }
 0x26b   : > { %v7313_v40 = vadd.f32 %v1811_v34, %v7032_v41 }
 0x26c   : > { %v1264_v47 = vpop.xlane.xlu1 %1263 }
 0x26d   : > { %1851 = vmax.xlane.f32.xlu0 %v7313_v40  ;;  %v1295_v45 = vsub.f32 %v7016_v49, %v1264_v47 }
 0x26e   : > { %v1260_v5 = vpop.f32.mrf.mxu3 }
 0x26f   : > { %v7323_v37 = vadd.f32 %v1260_v5, %v7320_v42  ;;  %v1311_v24 = vmul.f32 1.442695, %v1295_v45 }
 0x271   : > { %5867 = vpow2.f32 %v1311_v24 }
 0x272   : > { %v1814_v15 = vpop.f32.mrf.mxu1 }
 0x273   : > { %v7326_v63 = vadd.f32 %v1814_v15, %v7058_v46 }
 0x274   : > { %v1266_v18 = vpop.xlane.xlu2 %1265 }
 0x275   : > { %5485 = vmatmul.msk.bf16.gmra.mxu1 %vm1165_vm0, %v6862_v28  ;;  %1293 = vmax.xlane.f32.xlu0 %v7323_v37  ;;  %v1296_v36 = vsub.f32 %v7044_v38, %v1266_v18 }
 0x276   : > { %5480 = vmatmul.msk.bf16.gmra.mxu3 %vm1165_vm0, %v6872_v11  ;;  %1853 = vmax.xlane.f32.xlu2 %v7326_v63 }
 0x277   : > { %v7334_v43 = vpop.eup %5867 }
 0x27a   : > { %v1816_v49 = vpop.f32.mrf.mxu1 }
 0x27b   : > { %v7338_v35 = vadd.f32 %v1816_v49, %v7087_v54 }
 0x27d   : > { %1343 = vadd.xlane.f32.xlu0 %v7334_v43 }
 0x282   : > { %v1819_v28 = vpop.f32.mrf.mxu1 }
 0x283   : > { %v7346_v11 = vadd.f32 %v1819_v28, %v7113_v50 }
 0x285   : > { %5486 = vmatmul.msk.bf16.gmra.mxu1 %vm1165_vm0, %v6893_v44  ;;  %1855 = vmax.xlane.f32.xlu0 %v7338_v35 }
 0x286   : > { %5481 = vmatmul.msk.bf16.gmra.mxu3 %vm1165_vm0, %v6918_v12  ;;  %v1268_v12 = vpop.xlane.xlu1 %1267 }
 0x28a   : > { %v1821_v48 = vpop.f32.mrf.mxu1 }
 0x28d   : > { %1857 = vmax.xlane.f32.xlu0 %v7346_v11 }
 0x28e   : > { %v1270_v19 = vpop.xlane.xlu1 %1269 }
 0x28f   : > { %v1298_v34 = vsub.f32 %v7100_v32, %v1270_v19 }
 0x291   : > { %v1317_v5 = vmul.f32 1.442695, %v1298_v34 }
 0x292   : > { %v7353_v9 = vpop.f32.mrf.mxu1 }
 0x295   : > { %5487 = vmatmul.msk.bf16.gmra.mxu1 %vm1165_vm0, %v6909_v56 }
 0x296   : > { %5482 = vmatmul.msk.bf16.gmra.mxu3 %vm1165_vm0, %v6932_v14  ;;  %v1313_v14 = vmul.f32 1.442695, %v1296_v36 }
 0x298   : > { %5869 = vpow2.f32 %v1313_v14 }
 0x29a   : > { %v1826_v44 = vpop.f32.mrf.mxu1 }
 0x29b   : > { %v7397_v19 = vadd.f32 %v1826_v44, %v7187_v60 }
 0x29e   : > { %v7375_v15 = vpop.eup %5869 }
 0x2a2   : > { %v7359_v20 = vpop.f32.mrf.mxu1 }
 0x2a5   : > { %5488 = vmatmul.msk.bf16.gmra.mxu1 %vm1165_vm0, %v6920_v52  ;;  %v1297_v52 = vsub.f32 %v7072_v58, %v1268_v12 }
 0x2a6   : > { %5483 = vmatmul.msk.bf16.gmra.mxu3 %vm1165_vm0, %v6936_v17  ;;  %v1274_v17 = vpop.xlane.xlu0 %1273 }
 0x2a7   : > { %v1315_v38 = vmul.f32 1.442695, %v1297_v52  ;;  %v1300_v18 = vsub.f32 %v7153_v39, %v1274_v17  ;;  %v7400_v52 = vadd.f32 %v1821_v48, %v7142_v62 }
 0x2a9   : > { %5871 = vpow2.f32 %v1315_v38  ;;  %v1272_v38 = vpop.xlane.xlu1 %1271 }
 0x2aa   : > { %v7370_v47 = vpop.f32.mrf.mxu1  ;;  %5873 = vpow2.f32 %v1317_v5 }
 0x2ae   : > { %v1276_v24 = vpop.xlane.xlu0 %1275 }
 0x2af   : > { %v7386_v28 = vpop.eup %5871  ;;  %v1301_v39 = vsub.f32 %v7179_v61, %v1276_v24 }
 0x2b0   : > { %v7388_v12 = vpop.eup %5873 }
 0x2b2   : > { %v7381_v58 = vpop.f32.mrf.mxu1 }
 0x2b5   : > { %5489 = vmatmul.msk.bf16.gmra.mxu1 %vm1165_vm0, %v6926_v16 }
 0x2b6   : > { %v1278_v36 = vpop.xlane.xlu0 %1277 }
 0x2b9   : > { %v2371_v56 = vpop.f32.mrf.mxu3 }
 0x2ba   : > { %v7365_v51 = vadd.f32 %v2371_v56, %v7002_v21  ;;  %v7394_v56 = vpop.f32.mrf.mxu1 }
 0x2bc   : > { %2411 = vmax.xlane.f32.xlu2 %v7365_v51 }
 0x2be   : > { %v1280_v17 = vpop.xlane.xlu0 %1279 }
 0x2c1   : > { %v2373_v45 = vpop.f32.mrf.mxu3 }
 0x2c2   : > { %v7373_v16 = vadd.f32 %v2373_v45, %v7032_v41  ;;  %v1323_v45 = vmul.f32 1.442695, %v1301_v39  ;;  %v1282_v39 = vpop.xlane.xlu1 %1281 }
 0x2c4   : > { %1345 = vadd.xlane.f32.xlu2 %v7375_v15  ;;  %2413 = vmax.xlane.f32.xlu1 %v7373_v16 }
 0x2c5   : > { %5490 = vmatmul.msk.bf16.gmra.mxu1 %vm1165_vm0, %v6945_v23  ;;  %v1321_v23 = vmul.f32 1.442695, %v1300_v18 }
 0x2c6   : > { %v7421_v24 = vpop.xlane.xlu0 %1285 }
 0x2c7   : > { %5875 = vpow2.f32 %v1321_v23  ;;  %v7425_v23 = vadd.f32 %v7353_v9, %v7166_v57 }
 0x2c8   : > { %5877 = vpow2.f32 %v1323_v45 }
 0x2c9   : > { %v2376_v32 = vpop.f32.mrf.mxu3 }
 0x2ca   : > { %v7384_v49 = vadd.f32 %v2376_v32, %v7058_v46  ;;  %v7415_v32 = vpop.f32.mrf.mxu1 }
 0x2cc   : > { %10034 = vst [vmem:[#allocation12_spill] sm:$0xff] %v7384_v49  ;;  %2415 = vmax.xlane.f32.xlu0 %v7384_v49  ;;  %1347 = vadd.xlane.f32.xlu2 %v7386_v28 }
 0x2cd   : > { %1349 = vadd.xlane.f32.xlu1 %v7388_v12  ;;  %v7413_v5 = vpop.eup %5875 }
 0x2d1   : > { %v2378_v14 = vpop.f32.mrf.mxu3 }
 0x2d2   : > { %v7411_v48 = vadd.f32 %v2378_v14, %v7087_v54  ;;  %v7437_v45 = vpop.f32.mrf.mxu1 }
 0x2d4   : > { %1863 = vmax.xlane.f32.xlu0 %v7397_v19  ;;  %1859 = vmax.xlane.f32.xlu2 %v7400_v52 }
 0x2d5   : > { %5491 = vmatmul.msk.bf16.gmra.mxu1 %vm1165_vm0, %v7029_v10  ;;  %v1299_v10 = vsub.f32 %v7128_v3, %v1272_v38  ;;  %v1302_v3 = vsub.f32 %v7195_v29, %v1278_v36  ;;  %v1304_v38 = vsub.f32 %v7227_v33, %v1282_v39 }
 0x2d7   : > { %v1319_v61 = vmul.f32 1.442695, %v1299_v10  ;;  %v1325_v9 = vmul.f32 1.442695, %v1302_v3  ;;  %v7441_v10 = vadd.f32 %v7359_v20, %v7203_v31 }
 0x2d9   : > { %v2381_v34 = vpop.f32.mrf.mxu3  ;;  %5879 = vpow2.f32 %v1319_v61  ;;  %v7447_v61 = vadd.f32 %v7370_v47, %v7221_v55 }
 0x2da   : > { %v7408_v44 = vadd.f32 %v2381_v34, %v7113_v50  ;;  %v7430_v34 = vpop.eup %5877  ;;  %5881 = vpow2.f32 %v1325_v9  ;;  %v7453_v20 = vpop.f32.mrf.mxu1 }
 0x2dc   : > { %10035 = vst [vmem:[#allocation13_spill] sm:$0xff] %v7408_v44  ;;  %1353 = vadd.xlane.f32.xlu0 %v7413_v5  ;;  %2417 = vmax.xlane.f32.xlu2 %v7411_v48 }
 0x2dd   : > { %2419 = vmax.xlane.f32.xlu1 %v7408_v44 }
 0x2df   : > { %v7443_v49 = vpop.eup %5879 }
 0x2e0   : > { %v7458_v3 = vpop.eup %5881 }
 0x2e1   : > { %v2383_v18 = vpop.f32.mrf.mxu3 }
 0x2e2   : > { %v7428_v14 = vadd.f32 %v2383_v18, %v7142_v62  ;;  %v1329_v18 = vmul.f32 1.442695, %v1304_v38  ;;  %v1303_v38 = vsub.f32 %v7213_v25, %v1280_v17 }
 0x2e4   : > { %10036 = vst [vmem:[#allocation14_spill] sm:$0xff] %v7428_v14  ;;  %2421 = vmax.xlane.f32.xlu0 %v7428_v14  ;;  %1861 = vmax.xlane.f32.xlu2 %v7425_v23  ;;  %v1288_v14 = vpop.xlane.xlu0 %1287  ;;  %5883 = vpow2.f32 %v1329_v18  ;;  %v7468_v18 = vadd.f32 %v7381_v58, %v7235_v7 }
 0x2e5   : > { %1355 = vadd.xlane.f32.xlu1 %v7430_v34  ;;  %v1307_v33 = vsub.f32 %v7276_v6, %v1288_v14  ;;  %v1327_v14 = vmul.f32 1.442695, %v1303_v38  ;;  %v7482_v38 = vadd.f32 %v7394_v56, %v7253_v13 }
 0x2e7   : > { %v1335_v36 = vmul.f32 1.442695, %v1307_v33  ;;  %v1846_v33 = vpop.f32.mrf.mxu1 }
 0x2e9   : > { %v2386_v29 = vpop.f32.mrf.mxu3  ;;  %5885 = vpow2.f32 %v1335_v36 }
 0x2ea   : > { %v7456_v39 = vadd.f32 %v2386_v29, %v7166_v57  ;;  %v7460_v47 = vpop.eup %5883  ;;  %v1284_v29 = vpop.xlane.xlu2 %1283  ;;  %5887 = vpow2.f32 %v1327_v14 }
 0x2eb   : > { %v1305_v25 = vsub.f32 %v7245_v53, %v1284_v29  ;;  %v1306_v53 = vsub.f32 %v7259_v8, %v7421_v24 }
 0x2ec   : > { %1865 = vmax.xlane.f32.xlu0 %v7441_v10  ;;  %1351 = vadd.xlane.f32.xlu2 %v7443_v49  ;;  %10037 = vst [vmem:[#allocation15_spill] sm:$0xff] %v7456_v39  ;;  %v1852_v9 = vpop.xlane.xlu0 %1851 }
 0x2ed   : > { %1867 = vmax.xlane.f32.xlu1 %v7447_v61  ;;  %v1882_v17 = vsub.f32 %v7313_v40, %v1852_v9  ;;  %v1331_v58 = vmul.f32 1.442695, %v1305_v25  ;;  %v1333_v14 = vmul.f32 1.442695, %v1306_v53  ;;  %v7497_v9 = vadd.f32 %v7415_v32, %v7266_v27  ;;  %v1292_v32 = vpop.xlane.xlu1 %1291 }
 0x2ef   : > { %v7473_v2 = vpop.eup %5885  ;;  %v1899_v36 = vmul.f32 1.442695, %v1882_v17  ;;  %v2933_v7 = vpop.f32.mrf.mxu1  ;;  %5889 = vpow2.f32 %v1331_v58  ;;  %v7509_v17 = vadd.f32 %v7437_v45, %v7284_v59 }
 0x2f1   : > { %v2388_v6 = vpop.f32.mrf.mxu3  ;;  %5891 = vpow2.f32 %v1899_v36 }
 0x2f2   : > { %v7471_v44 = vadd.f32 %v2388_v6, %v7187_v60  ;;  %v7484_v6 = vpop.eup %5887  ;;  %v1290_v56 = vpop.xlane.xlu2 %1289  ;;  %5893 = vpow2.f32 %v1333_v14 }
 0x2f3   : > { %v1308_v8 = vsub.f32 %v7289_v1, %v1290_v56  ;;  %v1309_v1 = vsub.f32 %v7306_v4, %v1292_v32 }
 0x2f4   : > { %1357 = vadd.xlane.f32.xlu0 %v7458_v3  ;;  %2423 = vmax.xlane.f32.xlu2 %v7456_v39  ;;  %10038 = vst [vmem:[#allocation16_spill] sm:$0xff] %v7471_v44  ;;  %v1294_v39 = vpop.xlane.xlu0 %1293 }
 0x2f5   : > { %1361 = vadd.xlane.f32.xlu1 %v7460_v47  ;;  %v1310_v40 = vsub.f32 %v7323_v37, %v1294_v39  ;;  %v1337_v24 = vmul.f32 1.442695, %v1308_v8  ;;  %v1339_v14 = vmul.f32 1.442695, %v1309_v1 }
 0x2f7   : > { %v1341_v29 = vmul.f32 1.442695, %v1310_v40  ;;  %v2935_v37 = vpop.f32.mrf.mxu1 }
 0x2f9   : > { %5895 = vpow2.f32 %v1341_v29  ;;  %v7524_v29 = vadd.f32 %v7453_v20, %v7296_v30 }
 0x2fa   : > { %v1850_v39 = vpop.xlane.xlu2 %1849  ;;  %5897 = vpow2.f32 %v1337_v24 }
 0x2fb   : > { %v1881_v53 = vsub.f32 %v7303_v22, %v1850_v39 }
 0x2fc   : > { %2425 = vmax.xlane.f32.xlu0 %v7471_v44  ;;  %1869 = vmax.xlane.f32.xlu2 %v7468_v18  ;;  %v7487_v44 = vadd.f32 %v1846_v33, %v7320_v42  ;;  %v7499_v33 = vpop.eup %5889  ;;  %v7520_v40 = vpop.xlane.xlu0 %1343 }
 0x2fd   : > { %1367 = vadd.xlane.f32.xlu1 %v7473_v2  ;;  %v7501_v25 = vpop.eup %5891  ;;  %v1897_v56 = vmul.f32 1.442695, %v1881_v53  ;;  %v7542_v53 = vadd.f32 %v2933_v7, %v7002_v21  ;;  %vm1380_vm9 = vweird.f32 %v7520_v40 }
 0x2fe   : > { %v7511_v58 = vpop.eup %5893 }
 0x2ff   : > { %v7513_v36 = vpop.eup %5895  ;;  %v2938_v45 = vpop.f32.mrf.mxu1  ;;  %5899 = vpow2.f32 %v1897_v56  ;;  %v7546_v56 = vadd.f32 %v2935_v37, %v7032_v41 }
 0x300   : > { %10039 = vst [vmem:[#allocation17_spill] sm:$0xff] %v7513_v36  ;;  %v7526_v8 = vpop.eup %5897  ;;  %v7529_v22 = vadd.f32 %v2938_v45, %v7058_v46  ;;  %5901 = vpow2.f32 %v1339_v14 }
 0x301   : > { %5903 = vrcp.f32 %v7520_v40 }
 0x302   : > { %v1854_v39 = vpop.xlane.xlu2 %1853 }
 0x303   : > { %v1883_v46 = vsub.f32 %v7326_v63, %v1854_v39 }
 0x304   : > { %1871 = vmax.xlane.f32.xlu0 %v7482_v38  ;;  %1359 = vadd.xlane.f32.xlu2 %v7484_v6  ;;  %v1856_v4 = vpop.xlane.xlu0 %1855 }
 0x305   : > { %1879 = vmax.xlane.f32.xlu1 %v7487_v44  ;;  %v7534_v24 = vpop.eup %5899  ;;  %v1901_v20 = vmul.f32 1.442695, %v1883_v46  ;;  %v1884_v37 = vsub.f32 %v7338_v35, %v1856_v4 }
 0x306   : > { %v7536_v32 = vpop.eup %5901 }
 0x307   : > { %5905 = vpow2.f32 %v1901_v20  ;;  %v2940_v14 = vpop.f32.mrf.mxu1  ;;  %v5904_v63 = vpop.eup %5903 }
 0x308   : > { %v7553_v46 = vadd.f32 %v2940_v14, %v7087_v54  ;;  %v1376_v41 = vmul.f32 %v5904_v63, %v7520_v40  ;;  %vm1381_vm6 = vweird.f32 %v5904_v63 }
 0x309   : > { %vm1382_vm8 = vmor %vm1380_vm9, %vm1381_vm6 }
 0x30a   : > { %10040 = vst [vmem:[#allocation18_spill] sm:$0xff] %v7553_v46 }
 0x30c   : > { %1363 = vadd.xlane.f32.xlu0 %v7499_v33  ;;  %1873 = vmax.xlane.f32.xlu2 %v7497_v9  ;;  %v1858_v1 = vpop.xlane.xlu0 %1857 }
 0x30d   : > { %1931 = vadd.xlane.f32.xlu1 %v7501_v25  ;;  %v1885_v45 = vsub.f32 %v7346_v11, %v1858_v1  ;;  %v7555_v42 = vpop.eup %5905  ;;  %v1377_v11 = vsub.f32 1.0, %v1376_v41 }
 0x30e   : > { %10041 = vst [vmem:[#allocation19_spill] sm:$0xff] %v7555_v42 }
 0x30f   : > { %v1905_v21 = vmul.f32 1.442695, %v1885_v45  ;;  %v1378_v45 = vmul.f32 %v5904_v63, %v1377_v11  ;;  %v2943_v35 = vpop.f32.mrf.mxu1 }
 0x311   : > { %v1379_v41 = vadd.f32 %v5904_v63, %v1378_v45 }
 0x314   : > { %1875 = vmax.xlane.f32.xlu0 %v7509_v17  ;;  %1365 = vadd.xlane.f32.xlu2 %v7511_v58 }
 0x315   : > { %1373 = vadd.xlane.f32.xlu1 %v7513_v36 }
 0x31c   : > { %1369 = vadd.xlane.f32.xlu0 %v7526_v8  ;;  %1877 = vmax.xlane.f32.xlu2 %v7524_v29 }
 0x31d   : > { %2977 = vmax.xlane.f32.xlu1 %v7529_v22 }
 0x324   : > { %1929 = vadd.xlane.f32.xlu0 %v7534_v24  ;;  %1371 = vadd.xlane.f32.xlu2 %v7536_v32 }
 0x32c   : > { %2973 = vmax.xlane.f32.xlu0 %v7542_v53  ;;  %2975 = vmax.xlane.f32.xlu2 %v7546_v56 }
 0x32f   : > { %v2412_v30 = vpop.xlane.xlu2 %2411 }
 0x330   : > { %v2443_v39 = vsub.f32 %v7365_v51, %v2412_v30  ;;  %v1903_v51 = vmul.f32 1.442695, %v1884_v37  ;;  %v1386_v37 = vand.u32 2147483648, %v7520_v40 }
 0x332   : > { %v2459_v7 = vmul.f32 1.442695, %v2443_v39 }
 0x334   : > { %5907 = vpow2.f32 %v2459_v7  ;;  %2979 = vmax.xlane.f32.xlu0 %v7553_v46  ;;  %1933 = vadd.xlane.f32.xlu2 %v7555_v42 }
 0x335   : > { %5909 = vpow2.f32 %v1905_v21 }
 0x337   : > { %v1346_v20 = vpop.xlane.xlu2 %1345  ;;  %v2414_v30 = vpop.xlane.xlu1 %2413 }
 0x338   : > { %5911 = vrcp.f32 %v1346_v20  ;;  %v2444_v4 = vsub.f32 %v7373_v16, %v2414_v30  ;;  %v1384_v30 = vand.u32 2147483647, %v7520_v40  ;;  %v1401_v45 = vand.u32 2147483648, %v1346_v20 }
 0x339   : > { %5913 = vpow2.f32 %v1903_v51  ;;  %v1399_v27 = vand.u32 2147483647, %v1346_v20  ;;  %vm1395_vm11 = vweird.f32 %v1346_v20 }
 0x33a   : > { %v7561_v1 = vpop.eup %5907  ;;  %v2461_v59 = vmul.f32 1.442695, %v2444_v4  ;;  %v1383_v4 = vsel %vm1382_vm8, %v5904_v63, %v1379_v41  ;;  %vm1385_vm12 = vcmp.eq.f32.partialorder %v1384_v30, 8.507059e+37 }
 0x33b   : > { %10042 = vst [vmem:[#allocation20_spill] sm:$0xff] %v7561_v1  ;;  %v7563_v54 = vpop.eup %5909  ;;  %2491 = vadd.xlane.f32.xlu1 %v7561_v1  ;;  %v7582_v1 = vadd.f32 %v2943_v35, %v7113_v50  ;;  %v1402_v50 = vor.u32 1.1754944e-38, %v1401_v45  ;;  %vm1400_vm14 = vcmp.eq.f32.partialorder %v1399_v27, 8.507059e+37 }
 0x33c   : > { %10043 = vst [vmem:[#allocation21_spill] sm:$0xff] %v7563_v54  ;;  %1937 = vadd.xlane.f32.xlu2 %v7563_v54  ;;  %v2945_v54 = vpop.f32.mrf.mxu1 }
 0x33d   : > { %10046 = vst [vmem:[#allocation24_spill] sm:$0xff] %v7582_v1 }
 0x33e   : > { %v5912_v14 = vpop.eup %5911 }
 0x33f   : > { %v1391_v39 = vmul.f32 %v5912_v14, %v1346_v20  ;;  %v7568_v21 = vpop.xlane.xlu0 %2415  ;;  %v7570_v7 = vpop.xlane.xlu2 %1347  ;;  %vm1396_vm10 = vweird.f32 %v5912_v14 }
 0x340   : > { %10044 = vst [vmem:[#allocation22_spill] sm:$0xff] %v7568_v21  ;;  %5915 = vrcp.f32 %v7570_v7  ;;  %v7574_v11 = vpop.xlane.xlu1 %1349  ;;  %v7579_v51 = vpop.eup %5913  ;;  %vm1397_vm13 = vmor %vm1395_vm11, %vm1396_vm10  ;;  %vm1410_vm2 = vweird.f32 %v7570_v7 }
 0x341   : > { %v1392_v16 = vsub.f32 1.0, %v1391_v39  ;;  %5917 = vrcp.f32 %v7574_v11  ;;  %10045 = vst [vmem:[#allocation23_spill] sm:$0xff] %v7579_v51  ;;  %v1387_v39 = vor.u32 1.1754944e-38, %v1386_v37  ;;  %vm1425_vm4 = vweird.f32 %v7574_v11 }
 0x342   : > { %5919 = vpow2.f32 %v2461_v59 }
 0x343   : > { %v1393_v13 = vmul.f32 %v5912_v14, %v1392_v16  ;;  %1935 = vadd.xlane.f32.xlu1 %v7579_v51  ;;  %v1388_v42 = vsel %vm1385_vm12, %v1387_v39, %v1383_v4 }
 0x344   : > { %2981 = vmax.xlane.f32.xlu2 %v7582_v1 }
 0x345   : > { %v1394_v40 = vadd.f32 %v5912_v14, %v1393_v13  ;;  %v1389_v13 = vmul.f32 %v7334_v43, %v1388_v42  ;;  %v1416_v42 = vand.u32 2147483648, %v7570_v7 }
 0x346   : > { %v5916_v21 = vpop.eup %5915 }
 0x347   : > { %v5918_v35 = vpop.eup %5917  ;;  %v1406_v16 = vmul.f32 %v5916_v21, %v7570_v7  ;;  %v1864_v46 = vpop.xlane.xlu0 %1863  ;;  %v1398_v63 = vsel %vm1397_vm13, %v5912_v14, %v1394_v40  ;;  %vm1411_vm15 = vweird.f32 %v5916_v21 }
 0x348   : > { %v1860_v51 = vpop.xlane.xlu2 %1859  ;;  %v1421_v59 = vmul.f32 %v5918_v35, %v7574_v11  ;;  %v1403_v37 = vsel %vm1400_vm14, %v1402_v50, %v1398_v63  ;;  %v7591_v4 = vpop.eup %5919  ;;  %v1888_v27 = vsub.f32 %v7397_v19, %v1864_v46  ;;  %vm1426_vm1 = vweird.f32 %v5918_v35  ;;  %vm7602_vm3 = vmor %vm1410_vm2, %vm1411_vm15 }
 0x349   : > { %v1886_v41 = vsub.f32 %v7400_v52, %v1860_v51  ;;  %v1407_v20 = vsub.f32 1.0, %v1406_v16  ;;  %v1404_v30 = vmul.f32 %v7375_v15, %v1403_v37  ;;  %10047 = vst [vmem:[#allocation25_spill] sm:$0xff] %v7591_v4  ;;  %v1431_v15 = vand.u32 2147483648, %v7574_v11  ;;  %v2948_v46 = vpop.f32.mrf.mxu1  ;;  %vm1427_vm5 = vmor %vm1425_vm4, %vm1426_vm1 }
 0x34a   : > { %v1422_v45 = vsub.f32 1.0, %v1421_v59  ;;  %v1414_v19 = vand.u32 2147483647, %v7570_v7  ;;  %v7613_v63 = vadd.f32 %v2945_v54, %v7142_v62  ;;  %v1417_v37 = vor.u32 1.1754944e-38, %v1416_v42 }
 0x34b   : > { %v1907_v39 = vmul.f32 1.442695, %v1886_v41  ;;  %2493 = vadd.xlane.f32.xlu1 %v7591_v4  ;;  %v1615_v1 = vpack.c.bf16 %v1404_v30, %v1389_v13  ;;  %v1408_v36 = vmul.f32 %v5916_v21, %v1407_v20  ;;  %v1432_v7 = vor.u32 1.1754944e-38, %v1431_v15  ;;  %v2391_v15 = vpop.f32.mrf.mxu3 }
 0x34c   : > { %v1423_v14 = vmul.f32 %v5918_v35, %v1422_v45  ;;  %vm1415_vm7 = vcmp.eq.f32.partialorder %v1414_v19, 8.507059e+37 }
 0x34d   : > { %5921 = vpow2.f32 %v1907_v39  ;;  %1679 = vmatmul.bf16.vlgmr.msrb.gmra.mxu0 %v1615_v1  ;;  %v1409_v52 = vadd.f32 %v5916_v21, %v1408_v36  ;;  %v1429_v36 = vand.u32 2147483647, %v7574_v11  ;;  %v1911_v1 = vmul.f32 1.442695, %v1888_v27 }
 0x34e   : > { %v1424_v43 = vadd.f32 %v5918_v35, %v1423_v14  ;;  %v7633_v14 = vadd.f32 %v2948_v46, %v7166_v57 }
 0x34f   : > { %v7598_v51 = vpop.xlane.xlu0 %1353  ;;  %v1413_v59 = vsel %vm7602_vm3, %v5916_v21, %v1409_v52  ;;  %vm1430_vm6 = vcmp.eq.f32.partialorder %v1429_v36, 8.507059e+37  ;;  %v7645_v36 = vadd.f32 %v2391_v15, %v7203_v31 }
 0x350   : > { %v7600_v40 = vpop.xlane.xlu2 %2417  ;;  %v7609_v16 = vpop.xlane.xlu1 %2419  ;;  %5923 = vrcp.f32 %v7598_v51  ;;  %v1428_v41 = vsel %vm1427_vm5, %v5918_v35, %v1424_v43  ;;  %v1418_v11 = vsel %vm1415_vm7, %v1417_v37, %v1413_v59  ;;  %10052 = vst [vmem:[#allocation28_spill] sm:$0xff] %v7633_v14  ;;  %vm1455_vm8 = vweird.f32 %v7598_v51 }
 0x351   : > { %5925 = vpow2.f32 %v1911_v1  ;;  %v1433_v13 = vsel %vm1430_vm6, %v1432_v7, %v1428_v41  ;;  %v1419_v21 = vmul.f32 %v7386_v28, %v1418_v11  ;;  %v7635_v52 = vpop.f32.mrf.mxu1  ;;  %10053 = vst [vmem:[#allocation29_spill] sm:$0xff] %v7645_v36 }
 0x352   : > { %v1434_v35 = vmul.f32 %v7388_v12, %v1433_v13 }
 0x353   : > { %v7617_v20 = vpop.eup %5921  ;;  %2983 = vmax.xlane.f32.xlu1 %v7613_v63  ;;  %v2393_v37 = vpop.f32.mrf.mxu3 }
 0x354   : > { %1939 = vadd.xlane.f32.xlu0 %v7617_v20  ;;  %v1616_v28 = vpack.c.bf16 %v1434_v35, %v1419_v21 }
 0x356   : > { %v7621_v30 = vpop.eup %5923 }
 0x357   : > { %v7623_v62 = vpop.xlane.xlu0 %2421  ;;  %v7630_v27 = vpop.eup %5925  ;;  %v1451_v42 = vmul.f32 %v7621_v30, %v7598_v51  ;;  %vm1456_vm9 = vweird.f32 %v7621_v30 }
 0x358   : > { %10050 = vst [vmem:[#allocation26_spill] sm:$0xff] %v7623_v62  ;;  %v1862_v54 = vpop.xlane.xlu2 %1861  ;;  %v7628_v39 = vpop.xlane.xlu1 %1355  ;;  %vm7668_vm10 = vmor %vm1455_vm8, %vm1456_vm9 }
 0x359   : > { %v1887_v45 = vsub.f32 %v7425_v23, %v1862_v54  ;;  %10051 = vst [vmem:[#allocation27_spill] sm:$0xff] %v7630_v27  ;;  %v1452_v12 = vsub.f32 1.0, %v1451_v42  ;;  %v7651_v41 = vpop.f32.mrf.mxu1  ;;  %vm1470_vm5 = vweird.f32 %v7628_v39 }
 0x35b   : > { %v1909_v43 = vmul.f32 1.442695, %v1887_v45  ;;  %1943 = vadd.xlane.f32.xlu1 %v7630_v27  ;;  %v1453_v1 = vmul.f32 %v7621_v30, %v1452_v12  ;;  %v1461_v45 = vand.u32 2147483648, %v7598_v51  ;;  %v7676_v12 = vadd.f32 %v2393_v37, %v7221_v55 }
 0x35c   : > { %2985 = vmax.xlane.f32.xlu0 %v7633_v14 }
 0x35d   : > { %5927 = vpow2.f32 %v1909_v43  ;;  %1684 = vmatmul.bf16.gmra.mxu0 %v1616_v28  ;;  %v1454_v7 = vadd.f32 %v7621_v30, %v1453_v1  ;;  %v1459_v28 = vand.u32 2147483647, %v7598_v51  ;;  %10057 = vst [vmem:[#allocation31_spill] sm:$0xff] %v7676_v12  ;;  %v1462_v51 = vor.u32 1.1754944e-38, %v1461_v45 }
 0x35f   : > { %v1866_v23 = vpop.xlane.xlu0 %1865  ;;  %vm1460_vm13 = vcmp.eq.f32.partialorder %v1459_v28, 8.507059e+37  ;;  %v7697_v28 = vadd.f32 %v7635_v52, %v7187_v60 }
 0x360   : > { %v1352_v50 = vpop.xlane.xlu2 %1351  ;;  %v1889_v57 = vsub.f32 %v7441_v10, %v1866_v23  ;;  %v7642_v19 = vpop.xlane.xlu1 %1867 }
 0x361   : > { %5929 = vrcp.f32 %v1352_v50  ;;  %v1446_v23 = vand.u32 2147483648, %v1352_v50  ;;  %vm1440_vm12 = vweird.f32 %v1352_v50 }
 0x362   : > { %5931 = vrcp.f32 %v7628_v39  ;;  %v1913_v46 = vmul.f32 1.442695, %v1889_v57  ;;  %v1458_v57 = vsel %vm7668_vm10, %v7621_v30, %v1454_v7 }
 0x363   : > { %v7649_v59 = vpop.eup %5927  ;;  %v1447_v14 = vor.u32 1.1754944e-38, %v1446_v23  ;;  %v1463_v43 = vsel %vm1460_vm13, %v1462_v51, %v1458_v57 }
 0x364   : > { %5933 = vpow2.f32 %v1913_v46  ;;  %2427 = vmax.xlane.f32.xlu0 %v7645_v36  ;;  %1941 = vadd.xlane.f32.xlu2 %v7649_v59  ;;  %v2955_v36 = vpop.f32.mrf.mxu1  ;;  %v1464_v57 = vmul.f32 %v7413_v5, %v1463_v43 }
 0x365   : > { %v7691_v45 = vadd.f32 %v2955_v36, %v7221_v55 }
 0x367   : > { %v5930_v10 = vpop.eup %5929  ;;  %v7657_v13 = vpop.xlane.xlu0 %1357 }
 0x368   : > { %v1436_v11 = vmul.f32 %v5930_v10, %v1352_v50  ;;  %v7659_v54 = vpop.xlane.xlu2 %2423  ;;  %v7661_v21 = vpop.eup %5931  ;;  %5935 = vrcp.f32 %v7657_v13  ;;  %vm1441_vm11 = vweird.f32 %v5930_v10  ;;  %v1491_v52 = vand.u32 2147483648, %v7657_v13 }
 0x369   : > { %v7664_v35 = vpop.xlane.xlu1 %1361  ;;  %v1466_v46 = vmul.f32 %v7661_v21, %v7628_v39  ;;  %vm1442_vm14 = vmor %vm1440_vm12, %vm1441_vm11  ;;  %vm1471_vm2 = vweird.f32 %v7661_v21  ;;  %vm1485_vm3 = vweird.f32 %v7657_v13 }
 0x36a   : > { %v1437_v42 = vsub.f32 1.0, %v1436_v11  ;;  %v7673_v15 = vpop.eup %5933  ;;  %v1444_v11 = vand.u32 2147483647, %v1352_v50  ;;  %5937 = vrcp.f32 %v7664_v35  ;;  %vm7735_vm7 = vmor %vm1470_vm5, %vm1471_vm2  ;;  %vm1515_vm13 = vweird.f32 %v7664_v35 }
 0x36b   : > { %10056 = vst [vmem:[#allocation30_spill] sm:$0xff] %v7673_v15  ;;  %v1467_v30 = vsub.f32 1.0, %v1466_v46 }
 0x36c   : > { %v1438_v1 = vmul.f32 %v5930_v10, %v1437_v42  ;;  %1945 = vadd.xlane.f32.xlu0 %v7673_v15  ;;  %2429 = vmax.xlane.f32.xlu2 %v7676_v12  ;;  %vm1445_vm15 = vcmp.eq.f32.partialorder %v1444_v11, 8.507059e+37 }
 0x36e   : > { %v1439_v4 = vadd.f32 %v5930_v10, %v1438_v1  ;;  %v5936_v37 = vpop.eup %5935  ;;  %v1474_v1 = vand.u32 2147483647, %v7628_v39 }
 0x36f   : > { %v1481_v7 = vmul.f32 %v5936_v37, %v7657_v13  ;;  %v7686_v62 = vpop.xlane.xlu0 %2425  ;;  %vm1486_vm1 = vweird.f32 %v5936_v37 }
 0x370   : > { %v7688_v42 = vpop.xlane.xlu2 %1869  ;;  %v1443_v27 = vsel %vm1442_vm14, %v5930_v10, %v1439_v4  ;;  %v1468_v4 = vmul.f32 %v7661_v21, %v1467_v30  ;;  %vm7725_vm4 = vmor %vm1485_vm3, %vm1486_vm1  ;;  %vm1475_vm9 = vcmp.eq.f32.partialorder %v1474_v1, 8.507059e+37 }
 0x371   : > { %v1448_v15 = vsel %vm1445_vm15, %v1447_v14, %v1443_v27  ;;  %v1482_v12 = vsub.f32 1.0, %v1481_v7  ;;  %v7693_v50 = vpop.xlane.xlu1 %1367  ;;  %v1890_v27 = vsub.f32 %v7447_v61, %v7642_v19  ;;  %v7718_v61 = vpop.eup %5937  ;;  %v7722_v19 = vadd.f32 %v7651_v41, %v7203_v31 }
 0x372   : > { %v1449_v23 = vmul.f32 %v7443_v49, %v1448_v15  ;;  %v1469_v14 = vadd.f32 %v7661_v21, %v1468_v4  ;;  %v1492_v41 = vor.u32 1.1754944e-38, %v1491_v52  ;;  %v1511_v11 = vmul.f32 %v7718_v61, %v7664_v35 }
 0x373   : > { %v1483_v10 = vmul.f32 %v5936_v37, %v1482_v12  ;;  %v1915_v15 = vmul.f32 1.442695, %v1890_v27  ;;  %v1476_v12 = vand.u32 2147483648, %v7628_v39  ;;  %vm1516_vm10 = vweird.f32 %v7718_v61 }
 0x374   : > { %2991 = vmax.xlane.f32.xlu0 %v7691_v45  ;;  %2987 = vmax.xlane.f32.xlu2 %v7697_v28  ;;  %v1617_v55 = vpack.c.bf16 %v1464_v57, %v1449_v23  ;;  %v1473_v39 = vsel %vm7735_vm7, %v7661_v21, %v1469_v14  ;;  %v1521_v31 = vand.u32 2147483648, %v7664_v35  ;;  %vm7782_vm14 = vmor %vm1515_vm13, %vm1516_vm10 }
 0x375   : > { %2775 = vrot.lane.b32.xlu1 %v6619_v0, %s6294_s18  ;;  %v1484_v60 = vadd.f32 %v5936_v37, %v1483_v10  ;;  %v1489_v0 = vand.u32 2147483647, %v7657_v13  ;;  %v1512_v10 = vsub.f32 1.0, %v1511_v11 }
 0x376   : > { %1689 = vmatmul.bf16.gmra.mxu0 %v1617_v55 }
 0x377   : > { %v1872_v49 = vpop.xlane.xlu0 %1871  ;;  %v1488_v13 = vsel %vm7725_vm4, %v5936_v37, %v1484_v60  ;;  %vm1490_vm6 = vcmp.eq.f32.partialorder %v1489_v0, 8.507059e+37  ;;  %v1477_v37 = vor.u32 1.1754944e-38, %v1476_v12  ;;  %v1513_v0 = vmul.f32 %v7718_v61, %v1512_v10 }
 0x378   : > { %v7709_v5 = vpop.xlane.xlu2 %1359  ;;  %v1892_v36 = vsub.f32 %v7482_v38, %v1872_v49  ;;  %v1493_v43 = vsel %vm1490_vm6, %v1492_v41, %v1488_v13 }
 0x379   : > { %5939 = vrcp.f32 %v7709_v5  ;;  %v1880_v51 = vpop.xlane.xlu1 %1879  ;;  %v1478_v4 = vsel %vm1475_vm9, %v1477_v37, %v1473_v39  ;;  %v1494_v27 = vmul.f32 %v7458_v3, %v1493_v43  ;;  %vm1500_vm11 = vweird.f32 %v7709_v5 }
 0x37a   : > { %v1919_v38 = vmul.f32 1.442695, %v1892_v36  ;;  %v1479_v14 = vmul.f32 %v7430_v34, %v1478_v4  ;;  %v1896_v3 = vsub.f32 %v7487_v44, %v1880_v51  ;;  %v1506_v34 = vand.u32 2147483648, %v7709_v5 }
 0x37b   : > { %v1504_v1 = vand.u32 2147483647, %v7709_v5  ;;  %v1514_v44 = vadd.f32 %v7718_v61, %v1513_v0  ;;  %v1519_v39 = vand.u32 2147483647, %v7664_v35  ;;  %v1891_v4 = vsub.f32 %v7468_v18, %v7688_v42 }
 0x37c   : > { %5941 = vpow2.f32 %v1919_v38  ;;  %2989 = vmax.xlane.f32.xlu2 %v7722_v19  ;;  %v1927_v41 = vmul.f32 1.442695, %v1896_v3  ;;  %v1507_v37 = vor.u32 1.1754944e-38, %v1506_v34 }
 0x37d   : > { %5943 = vpow2.f32 %v1915_v15  ;;  %vm1505_vm15 = vcmp.eq.f32.partialorder %v1504_v1, 8.507059e+37  ;;  %vm1520_vm1 = vcmp.eq.f32.partialorder %v1519_v39, 8.507059e+37  ;;  %v1917_v18 = vmul.f32 1.442695, %v1891_v4 }
 0x37f   : > { %v5940_v30 = vpop.eup %5939  ;;  %v7746_v23 = vpop.xlane.xlu0 %1363 }
 0x380   : > { %v1496_v7 = vmul.f32 %v5940_v30, %v7709_v5  ;;  %v1874_v57 = vpop.xlane.xlu2 %1873  ;;  %5945 = vrcp.f32 %v7746_v23  ;;  %vm1501_vm8 = vweird.f32 %v5940_v30  ;;  %vm1530_vm7 = vweird.f32 %v7746_v23 }
 0x381   : > { %v1893_v55 = vsub.f32 %v7497_v9, %v1874_v57  ;;  %v1618_v9 = vpack.c.bf16 %v1494_v27, %v1479_v14  ;;  %v7760_v15 = vpop.xlane.xlu1 %1931  ;;  %vm1502_vm12 = vmor %vm1500_vm11, %vm1501_vm8  ;;  %v1534_v4 = vand.u32 2147483647, %v7746_v23 }
 0x382   : > { %v1497_v60 = vsub.f32 1.0, %v1496_v7  ;;  %v7750_v49 = vpop.eup %5941  ;;  %v1522_v7 = vor.u32 1.1754944e-38, %v1521_v31  ;;  %vm1981_vm11 = vweird.f32 %v7760_v15 }
 0x383   : > { %v1921_v21 = vmul.f32 1.442695, %v1893_v55  ;;  %v7753_v52 = vpop.eup %5943  ;;  %1951 = vadd.xlane.f32.xlu0 %v7750_v49  ;;  %vm1535_vm8 = vcmp.eq.f32.partialorder %v1534_v4, 8.507059e+37 }
 0x384   : > { %v1498_v36 = vmul.f32 %v5940_v30, %v1497_v60  ;;  %1947 = vadd.xlane.f32.xlu2 %v7753_v52 }
 0x385   : > { %5947 = vpow2.f32 %v1921_v21 }
 0x386   : > { %1694 = vmatmul.bf16.gmra.mxu0 %v1618_v9  ;;  %v1499_v12 = vadd.f32 %v5940_v30, %v1498_v36  ;;  %v7772_v13 = vpop.eup %5945 }
 0x387   : > { %v7763_v46 = vpop.xlane.xlu0 %1875  ;;  %v1526_v43 = vmul.f32 %v7772_v13, %v7746_v23  ;;  %vm1531_vm3 = vweird.f32 %v7772_v13 }
 0x388   : > { %v7765_v38 = vpop.xlane.xlu2 %1365  ;;  %v1503_v51 = vsel %vm1502_vm12, %v5940_v30, %v1499_v12  ;;  %v1518_v30 = vsel %vm7782_vm14, %v7718_v61, %v1514_v44  ;;  %vm7846_vm6 = vmor %vm1530_vm7, %vm1531_vm3 }
 0x389   : > { %5949 = vrcp.f32 %v7765_v38  ;;  %v1508_v35 = vsel %vm1505_vm15, %v1507_v37, %v1503_v51  ;;  %v1523_v60 = vsel %vm1520_vm1, %v1522_v7, %v1518_v30  ;;  %v1527_v14 = vsub.f32 1.0, %v1526_v43 }
 0x38a   : > { %5951 = vrcp.f32 %v7760_v15  ;;  %v1509_v36 = vmul.f32 %v7484_v6, %v1508_v35  ;;  %v1524_v42 = vmul.f32 %v7460_v47, %v1523_v60  ;;  %v1894_v51 = vsub.f32 %v7509_v17, %v7763_v46  ;;  %v7842_v60 = vpop.xlane.xlu1 %1373 }
 0x38b   : > { %v7775_v11 = vpop.eup %5947  ;;  %5953 = vrcp.f32 %v7693_v50  ;;  %v1528_v44 = vmul.f32 %v7772_v13, %v1527_v14  ;;  %v1551_v39 = vand.u32 2147483648, %v7765_v38  ;;  %vm1545_vm4 = vweird.f32 %v7765_v38 }
 0x38c   : > { %1953 = vadd.xlane.f32.xlu2 %v7775_v11  ;;  %5955 = vpow2.f32 %v1927_v41  ;;  %v1619_v6 = vpack.c.bf16 %v1524_v42, %v1509_v36  ;;  %v1549_v30 = vand.u32 2147483647, %v7765_v38  ;;  %v1536_v7 = vand.u32 2147483648, %v7746_v23 }
 0x38d   : > { %v1529_v43 = vadd.f32 %v7772_v13, %v1528_v44  ;;  %v1552_v36 = vor.u32 1.1754944e-38, %v1551_v39 }
 0x38e   : > { %vm1550_vm9 = vcmp.eq.f32.partialorder %v1549_v30, 8.507059e+37  ;;  %v1537_v42 = vor.u32 1.1754944e-38, %v1536_v7 }
 0x38f   : > { %v5950_v57 = vpop.eup %5949  ;;  %v7796_v55 = vpop.xlane.xlu0 %1369  ;;  %v1533_v23 = vsel %vm7846_vm6, %v7772_v13, %v1529_v43  ;;  %vm1560_vm6 = vweird.f32 %v7693_v50 }
 0x390   : > { %v1541_v10 = vmul.f32 %v5950_v57, %v7765_v38  ;;  %v1878_v27 = vpop.xlane.xlu2 %1877  ;;  %v7798_v21 = vpop.eup %5951  ;;  %5957 = vrcp.f32 %v7796_v55  ;;  %vm1546_vm2 = vweird.f32 %v5950_v57 }
 0x391   : > { %v1895_v0 = vsub.f32 %v7524_v29, %v1878_v27  ;;  %v7803_v9 = vpop.eup %5953  ;;  %v1977_v12 = vmul.f32 %v7798_v21, %v7760_v15  ;;  %vm7829_vm5 = vmor %vm1545_vm4, %vm1546_vm2  ;;  %vm1982_vm10 = vweird.f32 %v7798_v21 }
 0x392   : > { %v1542_v61 = vsub.f32 1.0, %v1541_v10  ;;  %v7806_v3 = vpop.eup %5955  ;;  %v1556_v29 = vmul.f32 %v7803_v9, %v7693_v50  ;;  %vm7874_vm12 = vmor %vm1981_vm11, %vm1982_vm10  ;;  %vm1561_vm14 = vweird.f32 %v7803_v9 }
 0x393   : > { %v1925_v1 = vmul.f32 1.442695, %v1895_v0  ;;  %v1978_v41 = vsub.f32 1.0, %v1977_v12  ;;  %v1923_v0 = vmul.f32 1.442695, %v1894_v51 }
 0x394   : > { %v1543_v34 = vmul.f32 %v5950_v57, %v1542_v61  ;;  %1959 = vadd.xlane.f32.xlu2 %v7806_v3  ;;  %v1557_v35 = vsub.f32 1.0, %v1556_v29 }
 0x395   : > { %5959 = vpow2.f32 %v1925_v1  ;;  %v1979_v38 = vmul.f32 %v7798_v21, %v1978_v41  ;;  %v1987_v1 = vand.u32 2147483648, %v7760_v15 }
 0x396   : > { %5961 = vpow2.f32 %v1917_v18  ;;  %1699 = vmatmul.bf16.gmra.mxu0 %v1619_v6  ;;  %v1544_v31 = vadd.f32 %v5950_v57, %v1543_v34  ;;  %v7814_v47 = vpop.eup %5957  ;;  %v1558_v18 = vmul.f32 %v7803_v9, %v1557_v35  ;;  %v1985_v35 = vand.u32 2147483647, %v7760_v15 }
 0x397   : > { %v7819_v37 = vpop.xlane.xlu0 %1929  ;;  %v1571_v46 = vmul.f32 %v7814_v47, %v7796_v55  ;;  %v1980_v41 = vadd.f32 %v7798_v21, %v1979_v38  ;;  %vm1576_vm3 = vweird.f32 %v7814_v47 }
 0x398   : > { %v7821_v5 = vpop.xlane.xlu2 %1371  ;;  %5963 = vrcp.f32 %v7819_v37  ;;  %v1548_v10 = vsel %vm7829_vm5, %v5950_v57, %v1544_v31  ;;  %v2446_v57 = vsub.f32 %v7411_v48, %v7600_v40  ;;  %v1538_v31 = vsel %vm1535_vm8, %v1537_v42, %v1533_v23  ;;  %v2978_v23 = vpop.xlane.xlu1 %2977 }
 0x399   : > { %v1553_v12 = vsel %vm1550_vm9, %v1552_v36, %v1548_v10  ;;  %5965 = vrcp.f32 %v7842_v60  ;;  %v1572_v44 = vsub.f32 1.0, %v1571_v46  ;;  %v1972_v17 = vand.u32 2147483648, %v7819_v37  ;;  %vm7923_vm9 = vmor %vm1560_vm6, %vm1561_vm14 }
 0x39a   : > { %5967 = vpow2.f32 %v1923_v0  ;;  %v1554_v43 = vmul.f32 %v7511_v58, %v1553_v12  ;;  %v1539_v4 = vmul.f32 %v7499_v33, %v1538_v31  ;;  %v1970_v58 = vand.u32 2147483647, %v7819_v37 }
 0x39b   : > { %v7839_v27 = vpop.eup %5959  ;;  %5969 = vrcp.f32 %v7821_v5  ;;  %v1573_v7 = vmul.f32 %v7814_v47, %v1572_v44  ;;  %v1984_v10 = vsel %vm7874_vm12, %v7798_v21, %v1980_v41  ;;  %v1988_v36 = vor.u32 1.1754944e-38, %v1987_v1 }
 0x39c   : > { %v7850_v61 = vpop.eup %5961  ;;  %1957 = vadd.xlane.f32.xlu0 %v7839_v27  ;;  %v1620_v14 = vpack.c.bf16 %v1554_v43, %v1539_v4  ;;  %vm1966_vm15 = vweird.f32 %v7819_v37  ;;  %vm1986_vm1 = vcmp.eq.f32.partialorder %v1985_v35, 8.507059e+37  ;;  %v1973_v42 = vor.u32 1.1754944e-38, %v1972_v17 }
 0x39d   : > { %v1989_v21 = vsel %vm1986_vm1, %v1988_v36, %v1984_v10  ;;  %v1574_v12 = vadd.f32 %v7814_v47, %v1573_v7  ;;  %v1581_v44 = vand.u32 2147483648, %v7796_v55  ;;  %vm1971_vm4 = vcmp.eq.f32.partialorder %v1970_v58, 8.507059e+37 }
 0x39e   : > { %v5964_v34 = vpop.eup %5963  ;;  %vm1575_vm5 = vweird.f32 %v7796_v55  ;;  %v1579_v31 = vand.u32 2147483647, %v7796_v55  ;;  %v1566_v41 = vand.u32 2147483648, %v7693_v50  ;;  %v1564_v55 = vand.u32 2147483647, %v7693_v50 }
 0x39f   : > { %v1962_v6 = vmul.f32 %v5964_v34, %v7819_v37  ;;  %1949 = vadd.xlane.f32.xlu1 %v7850_v61  ;;  %v2974_v13 = vpop.xlane.xlu0 %2973  ;;  %vm1967_vm13 = vweird.f32 %v5964_v34  ;;  %v7882_v15 = vpop.eup %5965  ;;  %vm7906_vm7 = vmor %vm1575_vm5, %vm1576_vm3  ;;  %v1582_v7 = vor.u32 1.1754944e-38, %v1581_v44  ;;  %v2465_v50 = vmul.f32 1.442695, %v2446_v57 }
 0x3a0   : > { %v2976_v29 = vpop.xlane.xlu2 %2975  ;;  %v3005_v51 = vsub.f32 %v7542_v53, %v2974_v13  ;;  %v7886_v0 = vpop.eup %5967  ;;  %vm1968_vm2 = vmor %vm1966_vm15, %vm1967_vm13  ;;  %v1559_v13 = vadd.f32 %v7803_v9, %v1558_v18  ;;  %v1578_v43 = vsel %vm7906_vm7, %v7814_v47, %v1574_v12  ;;  %vm1580_vm8 = vcmp.eq.f32.partialorder %v1579_v31, 8.507059e+37 }
 0x3a1   : > { %v3006_v39 = vsub.f32 %v7546_v56, %v2976_v29  ;;  %v1963_v30 = vsub.f32 1.0, %v1962_v6  ;;  %v7891_v1 = vpop.eup %5969  ;;  %v1567_v17 = vor.u32 1.1754944e-38, %v1566_v41  ;;  %vm1565_vm10 = vcmp.eq.f32.partialorder %v1564_v55, 8.507059e+37 }
 0x3a2   : > { %v3021_v38 = vmul.f32 1.442695, %v3005_v51  ;;  %v1586_v18 = vmul.f32 %v7891_v1, %v7821_v5  ;;  %v1563_v47 = vsel %vm7923_vm9, %v7803_v9, %v1559_v13  ;;  %v3007_v57 = vsub.f32 %v7529_v22, %v2978_v23 }
 0x3a3   : > { %v3023_v46 = vmul.f32 1.442695, %v3006_v39  ;;  %v1964_v56 = vmul.f32 %v5964_v34, %v1963_v30  ;;  %v1990_v39 = vmul.f32 %v7501_v25, %v1989_v21  ;;  %v1601_v25 = vmul.f32 %v7882_v15, %v7842_v60 }
 0x3a4   : > { %v1587_v53 = vsub.f32 1.0, %v1586_v18  ;;  %v3025_v36 = vmul.f32 1.442695, %v3007_v57  ;;  %vm1591_vm11 = vweird.f32 %v7891_v1  ;;  %vm1606_vm12 = vweird.f32 %v7882_v15 }
 0x3a5   : > { %5971 = vpow2.f32 %v3023_v46  ;;  %v1965_v33 = vadd.f32 %v5964_v34, %v1964_v56  ;;  %v1583_v46 = vsel %vm1580_vm8, %v1582_v7, %v1578_v43  ;;  %v1602_v40 = vsub.f32 1.0, %v1601_v25  ;;  %v10074_v7 = vld [vmem:[#allocation5_spill] sm:$0xff] }
 0x3a6   : > { %1704 = vmatmul.bf16.gmra.mxu0 %v1620_v14  ;;  %5973 = vpow2.f32 %v3021_v38  ;;  %v1584_v9 = vmul.f32 %v7526_v8, %v1583_v46  ;;  %v1588_v58 = vmul.f32 %v7891_v1, %v1587_v53  ;;  %v1596_v8 = vand.u32 2147483648, %v7821_v5 }
 0x3a7   : > { %1955 = vadd.xlane.f32.xlu1 %v7886_v0  ;;  %v1969_v6 = vsel %vm1968_vm2, %v5964_v34, %v1965_v33  ;;  %v1603_v14 = vmul.f32 %v7882_v15, %v1602_v40  ;;  %v1611_v44 = vand.u32 2147483648, %v7842_v60  ;;  %vm1590_vm13 = vweird.f32 %v7821_v5  ;;  %v2980_v25 = vpop.xlane.xlu0 %2979  ;;  %v2958_v40 = vpop.f32.mrf.mxu1 }
 0x3a8   : > { %v7895_v37 = vpop.xlane.xlu2 %1933  ;;  %v1974_v29 = vsel %vm1971_vm4, %v1973_v42, %v1969_v6  ;;  %v1589_v22 = vadd.f32 %v7891_v1, %v1588_v58  ;;  %v1594_v6 = vand.u32 2147483647, %v7821_v5  ;;  %vm1605_vm14 = vweird.f32 %v7842_v60  ;;  %vm1592_vm15 = vmor %vm1590_vm13, %vm1591_vm11 }
 0x3a9   : > { %5975 = vrcp.f32 %v7895_v37  ;;  %v1975_v51 = vmul.f32 %v7534_v24, %v1974_v29  ;;  %v1609_v13 = vand.u32 2147483647, %v7842_v60  ;;  %vm1607_vm1 = vmor %vm1605_vm14, %vm1606_vm12  ;;  %v1597_v41 = vor.u32 1.1754944e-38, %v1596_v8 }
 0x3aa   : > { %5977 = vpow2.f32 %v2465_v50  ;;  %v1593_v29 = vsel %vm1592_vm15, %v7891_v1, %v1589_v22  ;;  %vm1595_vm2 = vcmp.eq.f32.partialorder %v1594_v6, 8.507059e+37  ;;  %vm1996_vm5 = vweird.f32 %v7895_v37 }
 0x3ab   : > { %v7917_v24 = vpop.eup %5971  ;;  %v2201_v30 = vpack.c.bf16 %v1990_v39, %v1975_v51  ;;  %v1612_v39 = vor.u32 1.1754944e-38, %v1611_v44  ;;  %v1598_v18 = vsel %vm1595_vm2, %v1597_v41, %v1593_v29  ;;  %vm1610_vm3 = vcmp.eq.f32.partialorder %v1609_v13, 8.507059e+37  ;;  %v10079_v29 = vld [vmem:[#allocation19_spill] sm:$0xff] }
 0x3ac   : > { %3055 = vadd.xlane.f32.xlu0 %v7917_v24  ;;  %2773 = vrot.lane.b32.xlu2 %v6599_v26, %s6294_s18  ;;  %v7936_v4 = vpop.eup %5973  ;;  %v1568_v26 = vsel %vm1565_vm10, %v1567_v17, %v1563_v47  ;;  %v1599_v50 = vmul.f32 %v7536_v32, %v1598_v18  ;;  %v2000_v47 = vand.u32 2147483647, %v7895_v37  ;;  %v10075_v17 = vld [vmem:[#allocation17_spill] sm:$0xff]  ;;  %v10080_v41 = vld [vmem:[#allocation23_spill] sm:$0xff] }
 0x3ad   : > { %2241 = vmatmul.bf16.vlgmr.msrb.gmra.mxu2 %v2201_v30  ;;  %v1569_v38 = vmul.f32 %v7473_v2, %v1568_v26  ;;  %v1604_v2 = vadd.f32 %v7882_v15, %v1603_v14 }
 0x3ae   : > { %v7938_v56 = vpop.xlane.xlu1 %2491  ;;  %vm2001_vm9 = vcmp.eq.f32.partialorder %v2000_v47, 8.507059e+37 }
 0x3af   : > { %v7940_v48 = vpop.eup %5975  ;;  %3053 = vadd.xlane.f32.xlu1 %v7936_v4  ;;  %v1621_v33 = vpack.c.bf16 %v1584_v9, %v1569_v38  ;;  %v1608_v51 = vsel %vm1607_vm1, %v7882_v15, %v1604_v2  ;;  %v2002_v15 = vand.u32 2147483648, %v7895_v37  ;;  %v8016_v47 = vpop.f32.mrf.mxu1 }
 0x3b0   : > { %v1992_v10 = vmul.f32 %v7940_v48, %v7895_v37  ;;  %v7950_v42 = vpop.eup %5977  ;;  %v7957_v23 = vpop.xlane.xlu2 %1937  ;;  %v1613_v43 = vsel %vm1610_vm3, %v1612_v39, %v1608_v51  ;;  %vm1997_vm4 = vweird.f32 %v7940_v48  ;;  %v10076_v37 = vld [vmem:[#allocation6_spill] sm:$0xff] }
 0x3b1   : > { %v1614_v46 = vmul.f32 %v10075_v17, %v1613_v43  ;;  %vm1998_vm7 = vmor %vm1996_vm5, %vm1997_vm4  ;;  %v2003_v32 = vor.u32 1.1754944e-38, %v2002_v15  ;;  %v7996_v14 = vadd.f32 %v2958_v40, %v10076_v37  ;;  %v2396_v39 = vpop.f32.mrf.mxu3  ;;  %v2032_v17 = vand.u32 2147483648, %v7957_v23 }
 0x3b2   : > { %v1993_v21 = vsub.f32 1.0, %v1992_v10  ;;  %vm2026_vm13 = vweird.f32 %v7957_v23 }
 0x3b3   : > { %v1622_v10 = vpack.c.bf16 %v1614_v46, %v1599_v50 }
 0x3b4   : > { %v1994_v31 = vmul.f32 %v7940_v48, %v1993_v21 }
 0x3b6   : > { %1709 = vmatmul.bf16.gmra.mxu0 %v1621_v33  ;;  %v7952_v12 = vpop.xlane.xlu1 %1935  ;;  %v1995_v1 = vadd.f32 %v7940_v48, %v1994_v31 }
 0x3b7   : > { %2497 = vadd.xlane.f32.xlu1 %v7950_v42  ;;  %5979 = vrcp.f32 %v7952_v12  ;;  %v2017_v53 = vand.u32 2147483648, %v7952_v12  ;;  %v2015_v9 = vand.u32 2147483647, %v7952_v12  ;;  %vm2011_vm8 = vweird.f32 %v7952_v12 }
 0x3b8   : > { %5981 = vpow2.f32 %v3025_v36  ;;  %v1999_v26 = vsel %vm1998_vm7, %v7940_v48, %v1995_v1  ;;  %v10077_v48 = vld [vmem:[#allocation18_spill] sm:$0xff]  ;;  %v8008_v1 = vadd.f32 %v2396_v39, %v10076_v37 }
 0x3b9   : > { %5983 = vrcp.f32 %v7957_v23  ;;  %v2004_v36 = vsel %vm2001_vm9, %v2003_v32, %v1999_v26  ;;  %v2018_v33 = vor.u32 1.1754944e-38, %v2017_v53  ;;  %v3008_v21 = vsub.f32 %v10077_v48, %v2980_v25 }
 0x3ba   : > { %vm2016_vm11 = vcmp.eq.f32.partialorder %v2015_v9, 8.507059e+37  ;;  %v2005_v31 = vmul.f32 %v10079_v29, %v2004_v36  ;;  %v2030_v53 = vand.u32 2147483647, %v7957_v23  ;;  %v10084_v29 = vld [vmem:[#allocation21_spill] sm:$0xff] }
 0x3bb   : > { %v3027_v18 = vmul.f32 1.442695, %v3008_v21 }
 0x3bc   : > { %vm2031_vm1 = vcmp.eq.f32.partialorder %v2030_v53, 8.507059e+37 }
 0x3bd   : > { %v5980_v34 = vpop.eup %5979 }
 0x3be   : > { %v7972_v5 = vpop.eup %5981  ;;  %v2007_v55 = vmul.f32 %v5980_v34, %v7952_v12  ;;  %v7975_v60 = vpop.xlane.xlu1 %2493  ;;  %vm2012_vm6 = vweird.f32 %v5980_v34  ;;  %v10078_v12 = vld [vmem:[#allocation13_spill] sm:$0xff] }
 0x3bf   : > { %3057 = vadd.xlane.f32.xlu1 %v7972_v5  ;;  %v7981_v30 = vpop.eup %5983  ;;  %vm2013_vm10 = vmor %vm2011_vm8, %vm2012_vm6  ;;  %v2447_v13 = vsub.f32 %v10078_v12, %v7609_v16  ;;  %v2982_v16 = vpop.xlane.xlu2 %2981 }
 0x3c0   : > { %v2008_v35 = vsub.f32 1.0, %v2007_v55  ;;  %3333 = vrot.lane.b32.xlu0 %v10074_v7, %s6293_s17  ;;  %v2022_v58 = vmul.f32 %v7981_v30, %v7957_v23  ;;  %vm2027_vm12 = vweird.f32 %v7981_v30 }
 0x3c1   : > { %vm8021_vm14 = vmor %vm2026_vm13, %vm2027_vm12 }
 0x3c2   : > { %v2009_v57 = vmul.f32 %v5980_v34, %v2008_v35  ;;  %v2023_v2 = vsub.f32 1.0, %v2022_v58 }
 0x3c4   : > { %v2010_v38 = vadd.f32 %v5980_v34, %v2009_v57  ;;  %v2024_v43 = vmul.f32 %v7981_v30, %v2023_v2  ;;  %v10083_v2 = vld [vmem:[#allocation24_spill] sm:$0xff] }
 0x3c6   : > { %1714 = vmatmul.bf16.gmra.mxu0 %v1622_v10  ;;  %v7999_v22 = vpop.xlane.xlu1 %2983  ;;  %v2014_v8 = vsel %vm2013_vm10, %v5980_v34, %v2010_v38  ;;  %v2467_v34 = vmul.f32 1.442695, %v2447_v13  ;;  %v2025_v50 = vadd.f32 %v7981_v30, %v2024_v43  ;;  %v2033_v38 = vor.u32 1.1754944e-38, %v2032_v17 }
 0x3c7   : > { %v1940_v44 = vpop.xlane.xlu0 %1939  ;;  %2993 = vmax.xlane.f32.xlu1 %v7996_v14  ;;  %v2019_v6 = vsel %vm2016_vm11, %v2018_v33, %v2014_v8  ;;  %v3010_v40 = vsub.f32 %v7613_v63, %v7999_v22 }
 0x3c8   : > { %5985 = vrcp.f32 %v1940_v44  ;;  %v2020_v51 = vmul.f32 %v10080_v41, %v2019_v6  ;;  %v2047_v26 = vand.u32 2147483648, %v1940_v44  ;;  %v2029_v57 = vsel %vm8021_vm14, %v7981_v30, %v2025_v50  ;;  %v10085_v41 = vld [vmem:[#allocation22_spill] sm:$0xff] }
 0x3c9   : > { %5987 = vpow2.f32 %v3027_v18  ;;  %v2045_v58 = vand.u32 2147483647, %v1940_v44  ;;  %vm2041_vm2 = vweird.f32 %v1940_v44  ;;  %v2034_v48 = vsel %vm2031_vm1, %v2033_v38, %v2029_v57  ;;  %v2963_v18 = vpop.f32.mrf.mxu1 }
 0x3ca   : > { %v2202_v55 = vpack.c.bf16 %v2020_v51, %v2005_v31  ;;  %v2048_v30 = vor.u32 1.1754944e-38, %v2047_v26  ;;  %v3009_v6 = vsub.f32 %v10083_v2, %v2982_v16  ;;  %v2035_v31 = vmul.f32 %v10084_v29, %v2034_v48  ;;  %v10086_v51 = vld [vmem:[#allocation12_spill] sm:$0xff] }
 0x3cb   : > { %vm2046_vm4 = vcmp.eq.f32.partialorder %v2045_v58, 8.507059e+37  ;;  %v2445_v39 = vsub.f32 %v10086_v51, %v10085_v41  ;;  %v3031_v48 = vmul.f32 1.442695, %v3010_v40  ;;  %v10089_v51 = vld [vmem:[#allocation27_spill] sm:$0xff] }
 0x3cc   : > { %2246 = vmatmul.bf16.gmra.mxu2 %v2202_v55  ;;  %v10092_v40 = vld [vmem:[#allocation7_spill] sm:$0xff] }
 0x3cd   : > { %v2463_v16 = vmul.f32 1.442695, %v2445_v39 }
 0x3ce   : > { %v5986_v25 = vpop.eup %5985  ;;  %v8010_v15 = vpop.xlane.xlu1 %1943 }
 0x3cf   : > { %v2037_v35 = vmul.f32 %v5986_v25, %v1940_v44  ;;  %2431 = vmax.xlane.f32.xlu1 %v8008_v1  ;;  %5989 = vrcp.f32 %v8010_v15  ;;  %vm2042_vm15 = vweird.f32 %v5986_v25  ;;  %v8028_v32 = vpop.eup %5987  ;;  %v8030_v10 = vpop.xlane.xlu0 %2985  ;;  %v2077_v26 = vand.u32 2147483648, %v8010_v15 }
 0x3d0   : > { %5991 = vpow2.f32 %v2467_v34  ;;  %vm2043_vm3 = vmor %vm2041_vm2, %vm2042_vm15  ;;  %v3029_v34 = vmul.f32 1.442695, %v3009_v6  ;;  %vm2071_vm7 = vweird.f32 %v8010_v15 }
 0x3d1   : > { %v2038_v46 = vsub.f32 1.0, %v2037_v35  ;;  %v10087_v35 = vld [vmem:[#allocation8_spill] sm:$0xff] }
 0x3d2   : > { %v8043_v50 = vadd.f32 %v2963_v18, %v10087_v35  ;;  %v10090_v18 = vld [vmem:[#allocation26_spill] sm:$0xff] }
 0x3d3   : > { %v2039_v9 = vmul.f32 %v5986_v25, %v2038_v46 }
 0x3d5   : > { %v5990_v37 = vpop.eup %5989  ;;  %3059 = vadd.xlane.f32.xlu2 %v8028_v32  ;;  %v2040_v23 = vadd.f32 %v5986_v25, %v2039_v9  ;;  %v2075_v9 = vand.u32 2147483647, %v8010_v15 }
 0x3d6   : > { %v8033_v36 = vpop.eup %5991  ;;  %v2067_v33 = vmul.f32 %v5990_v37, %v8010_v15  ;;  %vm2072_vm5 = vweird.f32 %v5990_v37 }
 0x3d7   : > { %v1942_v21 = vpop.xlane.xlu2 %1941  ;;  %2499 = vadd.xlane.f32.xlu1 %v8033_v36  ;;  %v2044_v8 = vsel %vm2043_vm3, %v5986_v25, %v2040_v23  ;;  %v8045_v17 = vpop.xlane.xlu0 %2427  ;;  %vm2073_vm6 = vmor %vm2071_vm7, %vm2072_vm5  ;;  %vm2076_vm10 = vcmp.eq.f32.partialorder %v2075_v9, 8.507059e+37 }
 0x3d8   : > { %v2068_v12 = vsub.f32 1.0, %v2067_v33  ;;  %5993 = vrcp.f32 %v1942_v21  ;;  %v2049_v13 = vsel %vm2046_vm4, %v2048_v30, %v2044_v8  ;;  %v2062_v58 = vand.u32 2147483648, %v1942_v21 }
 0x3d9   : > { %v2050_v44 = vmul.f32 %v7617_v20, %v2049_v13  ;;  %5995 = vpow2.f32 %v3029_v34  ;;  %v2060_v23 = vand.u32 2147483647, %v1942_v21  ;;  %v2078_v30 = vor.u32 1.1754944e-38, %v2077_v26  ;;  %v10088_v13 = vld [vmem:[#allocation15_spill] sm:$0xff] }
 0x3da   : > { %v2069_v43 = vmul.f32 %v5990_v37, %v2068_v12  ;;  %5997 = vpow2.f32 %v2463_v16  ;;  %vm2056_vm8 = vweird.f32 %v1942_v21  ;;  %v2063_v22 = vor.u32 1.1754944e-38, %v2062_v58  ;;  %v8074_v16 = vpop.f32.mrf.mxu1 }
 0x3db   : > { %v2203_v55 = vpack.c.bf16 %v2050_v44, %v2035_v31  ;;  %vm2061_vm12 = vcmp.eq.f32.partialorder %v2060_v23, 8.507059e+37  ;;  %5999 = vpow2.f32 %v3031_v48  ;;  %v2398_v44 = vpop.f32.mrf.mxu3 }
 0x3dc   : > { %v2070_v20 = vadd.f32 %v5990_v37, %v2069_v43  ;;  %v8081_v26 = vadd.f32 %v2398_v44, %v10092_v40  ;;  %v10094_v44 = vld [vmem:[#allocation9_spill] sm:$0xff] }
 0x3dd   : > { %2251 = vmatmul.bf16.gmra.mxu2 %v2203_v55  ;;  %v10091_v55 = vld [vmem:[#allocation14_spill] sm:$0xff] }
 0x3de   : > { %v5994_v25 = vpop.eup %5993  ;;  %v2074_v33 = vsel %vm2073_vm6, %v5990_v37, %v2070_v20  ;;  %v2449_v37 = vsub.f32 %v10088_v13, %v7659_v54  ;;  %v2448_v43 = vsub.f32 %v10091_v55, %v10090_v18 }
 0x3df   : > { %v2052_v46 = vmul.f32 %v5994_v25, %v1942_v21  ;;  %v8047_v53 = vpop.xlane.xlu2 %2429  ;;  %2997 = vmax.xlane.f32.xlu1 %v8043_v50  ;;  %vm2057_vm9 = vweird.f32 %v5994_v25  ;;  %v8055_v63 = vpop.eup %5995  ;;  %v2079_v2 = vsel %vm2076_vm10, %v2078_v30, %v2074_v33  ;;  %v10093_v30 = vld [vmem:[#allocation28_spill] sm:$0xff] }
 0x3e0   : > { %vm2058_vm11 = vmor %vm2056_vm8, %vm2057_vm9  ;;  %v8058_v12 = vpop.eup %5997  ;;  %v8062_v29 = vpop.xlane.xlu0 %1945  ;;  %v2080_v39 = vmul.f32 %v10089_v51, %v2079_v2  ;;  %v2471_v54 = vmul.f32 1.442695, %v2449_v37 }
 0x3e1   : > { %v2053_v57 = vsub.f32 1.0, %v2052_v46  ;;  %6001 = vrcp.f32 %v8062_v29  ;;  %vm2086_vm14 = vweird.f32 %v8062_v29  ;;  %v2090_v55 = vand.u32 2147483647, %v8062_v29 }
 0x3e2   : > { %6003 = vpow2.f32 %v2471_v54  ;;  %v2968_v23 = vpop.f32.mrf.mxu1 }
 0x3e3   : > { %v2054_v38 = vmul.f32 %v5994_v25, %v2053_v57  ;;  %vm2091_vm3 = vcmp.eq.f32.partialorder %v2090_v55, 8.507059e+37 }
 0x3e5   : > { %v2055_v8 = vadd.f32 %v5994_v25, %v2054_v38 }
 0x3e7   : > { %v2988_v6 = vpop.xlane.xlu2 %2987  ;;  %3061 = vadd.xlane.f32.xlu1 %v8055_v63  ;;  %v2059_v15 = vsel %vm2058_vm11, %v5994_v25, %v2055_v8  ;;  %v2776_v21 = vpop.permute.xlu1 %2775  ;;  %v3011_v8 = vsub.f32 %v10093_v30, %v8030_v10 }
 0x3e8   : > { %v2064_v31 = vsel %vm2061_vm12, %v2063_v22, %v2059_v15  ;;  %2800 = vmatpush.bf16.msra.mxu0 %v2776_v21  ;;  %v8072_v25 = vpop.eup %5999  ;;  %v3012_v46 = vsub.f32 %v7697_v28, %v2988_v6  ;;  %v2992_v22 = vpop.xlane.xlu0 %2991 }
 0x3e9   : > { %v2065_v41 = vmul.f32 %v7649_v59, %v2064_v31  ;;  %v2469_v59 = vmul.f32 1.442695, %v2448_v43  ;;  %v6002_v57 = vpop.eup %6001  ;;  %v3033_v37 = vmul.f32 1.442695, %v3011_v8 }
 0x3ea   : > { %2495 = vadd.xlane.f32.xlu0 %v8058_v12  ;;  %v3035_v9 = vmul.f32 1.442695, %v3012_v46  ;;  %v2082_v58 = vmul.f32 %v6002_v57, %v8062_v29  ;;  %v8087_v38 = vpop.eup %6003  ;;  %vm2087_vm13 = vweird.f32 %v6002_v57  ;;  %v2970_v18 = vpop.f32.mrf.mxu1 }
 0x3eb   : > { %v2204_v34 = vpack.c.bf16 %v2080_v39, %v2065_v41  ;;  %6005 = vpow2.f32 %v2469_v59  ;;  %v2092_v39 = vand.u32 2147483648, %v8062_v29  ;;  %vm8107_vm15 = vmor %vm2086_vm14, %vm2087_vm13 }
 0x3ec   : > { %6007 = vpow2.f32 %v3035_v9  ;;  %v2083_v33 = vsub.f32 1.0, %v2082_v58  ;;  %v10097_v58 = vld [vmem:[#allocation11_spill] sm:$0xff] }
 0x3ed   : > { %2771 = vrot.lane.b32.xlu2 %v10074_v7, %s6294_s18  ;;  %2256 = vmatmul.bf16.gmra.mxu2 %v2204_v34  ;;  %v8084_v7 = vpop.f32.mrf.mxu3  ;;  %v2093_v29 = vor.u32 1.1754944e-38, %v2092_v39 }
 0x3ee   : > { %v2084_v2 = vmul.f32 %v6002_v57, %v2083_v33  ;;  %v8116_v33 = vadd.f32 %v2970_v18, %v10097_v58  ;;  %v10099_v18 = vld [vmem:[#allocation30_spill] sm:$0xff] }
 0x3ef   : > { %v8077_v20 = vpop.xlane.xlu2 %2989  ;;  %3063 = vadd.xlane.f32.xlu1 %v8072_v25 }
 0x3f0   : > { %v2085_v51 = vadd.f32 %v6002_v57, %v2084_v2 }
 0x3f1   : > { %v8090_v48 = vpop.eup %6005 }
 0x3f2   : > { %2433 = vmax.xlane.f32.xlu0 %v8081_v26  ;;  %v8095_v6 = vpop.eup %6007  ;;  %v2089_v9 = vsel %vm8107_vm15, %v6002_v57, %v2085_v51 }
 0x3f5   : > { %v2403_v15 = vpop.f32.mrf.mxu3 }
 0x3f6   : > { %v8101_v41 = vadd.f32 %v2403_v15, %v10094_v44  ;;  %v8111_v34 = vpop.xlane.xlu0 %1951  ;;  %v2094_v15 = vsel %vm2091_vm3, %v2093_v29, %v2089_v9  ;;  %v10100_v9 = vld [vmem:[#allocation10_spill] sm:$0xff] }
 0x3f7   : > { %v1948_v28 = vpop.xlane.xlu2 %1947  ;;  %2503 = vadd.xlane.f32.xlu1 %v8087_v38  ;;  %v2095_v55 = vmul.f32 %v10099_v18, %v2094_v15  ;;  %v8166_v18 = vadd.f32 %v8074_v16, %v10094_v44  ;;  %vm2131_vm6 = vweird.f32 %v8111_v34 }
 0x3f8   : > { %6009 = vrcp.f32 %v1948_v28  ;;  %v2107_v59 = vand.u32 2147483648, %v1948_v28  ;;  %v2105_v46 = vand.u32 2147483647, %v1948_v28  ;;  %vm2101_vm2 = vweird.f32 %v1948_v28 }
 0x3f9   : > { %6011 = vpow2.f32 %v3033_v37 }
 0x3fa   : > { %2501 = vadd.xlane.f32.xlu0 %v8090_v48  ;;  %6013 = vrcp.f32 %v8111_v34  ;;  %v2108_v8 = vor.u32 1.1754944e-38, %v2107_v59  ;;  %vm2106_vm5 = vcmp.eq.f32.partialorder %v2105_v46, 8.507059e+37 }
 0x3fe   : > { %v6010_v13 = vpop.eup %6009 }
 0x3ff   : > { %v2097_v21 = vmul.f32 %v6010_v13, %v1948_v28  ;;  %v8097_v31 = vpop.xlane.xlu2 %1953  ;;  %3067 = vadd.xlane.f32.xlu1 %v8095_v6  ;;  %vm2102_vm1 = vweird.f32 %v6010_v13  ;;  %v8124_v51 = vpop.eup %6011  ;;  %v3014_v28 = vsub.f32 %v7691_v45, %v2992_v22  ;;  %v8139_v45 = vadd.f32 %v2968_v23, %v10100_v9 }
 0x400   : > { %vm2103_vm4 = vmor %vm2101_vm2, %vm2102_vm1  ;;  %vm2146_vm3 = vweird.f32 %v8097_v31 }
 0x401   : > { %v2098_v10 = vsub.f32 1.0, %v2097_v21  ;;  %v10098_v21 = vld [vmem:[#allocation31_spill] sm:$0xff] }
 0x402   : > { %2437 = vmax.xlane.f32.xlu0 %v8101_v41  ;;  %v2452_v57 = vsub.f32 %v10098_v21, %v8047_v53  ;;  %v3039_v53 = vmul.f32 1.442695, %v3014_v28 }
 0x403   : > { %v2099_v54 = vmul.f32 %v6010_v13, %v2098_v10  ;;  %v2406_v10 = vpop.f32.mrf.mxu3 }
 0x404   : > { %v2477_v59 = vmul.f32 1.442695, %v2452_v57  ;;  %v8133_v29 = vadd.f32 %v2406_v10, %v10100_v9 }
 0x405   : > { %v2100_v30 = vadd.f32 %v6010_v13, %v2099_v54  ;;  %v8130_v54 = vpop.eup %6013 }
 0x406   : > { %v2127_v46 = vmul.f32 %v8130_v54, %v8111_v34  ;;  %6015 = vpow2.f32 %v2477_v59  ;;  %vm2132_vm7 = vweird.f32 %v8130_v54  ;;  %v2135_v59 = vand.u32 2147483647, %v8111_v34 }
 0x407   : > { %v8119_v2 = vpop.xlane.xlu2 %1959  ;;  %3003 = vmax.xlane.f32.xlu1 %v8116_v33  ;;  %v2104_v37 = vsel %vm2103_vm4, %v6010_v13, %v2100_v30  ;;  %6017 = vpow2.f32 %v3039_v53  ;;  %vm8171_vm9 = vmor %vm2131_vm6, %vm2132_vm7 }
 0x408   : > { %v2109_v39 = vsel %vm2106_vm5, %v2108_v8, %v2104_v37  ;;  %v2128_v15 = vsub.f32 1.0, %v2127_v46  ;;  %v8146_v37 = vadd.f32 %v8016_v47, %v10092_v40  ;;  %v10105_v46 = vld [vmem:[#allocation16_spill] sm:$0xff]  ;;  %vm2136_vm11 = vcmp.eq.f32.partialorder %v2135_v59, 8.507059e+37 }
 0x409   : > { %v2110_v43 = vmul.f32 %v7753_v52, %v2109_v39  ;;  %v10101_v52 = vld [vmem:[#allocation29_spill] sm:$0xff]  ;;  %v2450_v16 = vsub.f32 %v10105_v46, %v7686_v62 }
 0x40a   : > { %3065 = vadd.xlane.f32.xlu0 %v8124_v51  ;;  %v2451_v22 = vsub.f32 %v10101_v52, %v8045_v17  ;;  %v2129_v23 = vmul.f32 %v8130_v54, %v2128_v15 }
 0x40b   : > { %v2205_v13 = vpack.c.bf16 %v2110_v43, %v2095_v55  ;;  %v2137_v55 = vand.u32 2147483648, %v8111_v34 }
 0x40c   : > { %v8148_v21 = vpop.eup %6015  ;;  %v2475_v57 = vmul.f32 1.442695, %v2451_v22  ;;  %v2130_v40 = vadd.f32 %v8130_v54, %v2129_v23 }
 0x40d   : > { %2261 = vmatmul.bf16.gmra.mxu2 %v2205_v13  ;;  %10102 = vst [vmem:[#allocation5_spill] sm:$0xff] %v8148_v21  ;;  %v8154_v17 = vpop.eup %6017  ;;  %v2138_v22 = vor.u32 1.1754944e-38, %v2137_v55 }
 0x40e   : > { %v2134_v34 = vsel %vm8171_vm9, %v8130_v54, %v2130_v40  ;;  %v2473_v54 = vmul.f32 1.442695, %v2450_v16 }
 0x40f   : > { %v2774_v30 = vpop.permute.xlu2 %2773  ;;  %2439 = vmax.xlane.f32.xlu1 %v8133_v29  ;;  %v8185_v23 = vpop.xlane.xlu0 %1957  ;;  %v2139_v13 = vsel %vm2136_vm11, %v2138_v22, %v2134_v34 }
 0x410   : > { %2801 = vmatpush.bf16.msra.mxu0 %v2774_v30 }
 0x412   : > { %3001 = vmax.xlane.f32.xlu0 %v8139_v45  ;;  %v1950_v8 = vpop.xlane.xlu1 %1949 }
 0x413   : > { %6019 = vrcp.f32 %v1950_v8  ;;  %v2122_v53 = vand.u32 2147483648, %v1950_v8  ;;  %v2120_v30 = vand.u32 2147483647, %v1950_v8  ;;  %vm2116_vm10 = vweird.f32 %v1950_v8 }
 0x414   : > { %6021 = vrcp.f32 %v8097_v31 }
 0x415   : > { %6023 = vpow2.f32 %v2475_v57  ;;  %vm2121_vm13 = vcmp.eq.f32.partialorder %v2120_v30, 8.507059e+37 }
 0x416   : > { %2995 = vmax.xlane.f32.xlu2 %v8146_v37 }
 0x417   : > { %2509 = vadd.xlane.f32.xlu1 %v8148_v21  ;;  %v3013_v21 = vsub.f32 %v7722_v19, %v8077_v20 }
 0x419   : > { %v6020_v39 = vpop.eup %6019 }
 0x41a   : > { %v2112_v10 = vmul.f32 %v6020_v39, %v1950_v8  ;;  %3071 = vadd.xlane.f32.xlu0 %v8154_v17  ;;  %v8157_v47 = vpop.xlane.xlu1 %1955  ;;  %v8162_v28 = vpop.eup %6021  ;;  %vm2117_vm8 = vweird.f32 %v6020_v39  ;;  %v8193_v8 = vadd.f32 %v8084_v7, %v10087_v35 }
 0x41b   : > { %6025 = vrcp.f32 %v8157_v47  ;;  %v2142_v44 = vmul.f32 %v8162_v28, %v8097_v31  ;;  %v8183_v52 = vpop.eup %6023  ;;  %vm2118_vm12 = vmor %vm2116_vm10, %vm2117_vm8  ;;  %vm2147_vm15 = vweird.f32 %v8162_v28  ;;  %vm2161_vm1 = vweird.f32 %v8157_v47 }
 0x41c   : > { %v2113_v43 = vsub.f32 1.0, %v2112_v10  ;;  %v2123_v10 = vor.u32 1.1754944e-38, %v2122_v53  ;;  %6027 = vrcp.f32 %v8185_v23  ;;  %v2140_v53 = vmul.f32 %v7750_v49, %v2139_v13  ;;  %vm2148_vm4 = vmor %vm2146_vm3, %vm2147_vm15 }
 0x41d   : > { %v2143_v40 = vsub.f32 1.0, %v2142_v44  ;;  %6029 = vrcp.f32 %v8119_v2  ;;  %v2167_v49 = vand.u32 2147483648, %v8157_v47  ;;  %v2165_v34 = vand.u32 2147483647, %v8157_v47 }
 0x41e   : > { %v2114_v9 = vmul.f32 %v6020_v39, %v2113_v43  ;;  %2999 = vmax.xlane.f32.xlu2 %v8166_v18  ;;  %6031 = vpow2.f32 %v2473_v54  ;;  %vm2176_vm8 = vweird.f32 %v8185_v23  ;;  %vm2191_vm10 = vweird.f32 %v8119_v2 }
 0x41f   : > { %v2144_v35 = vmul.f32 %v8162_v28, %v2143_v40  ;;  %v8206_v30 = vpop.xlane.xlu0 %3055  ;;  %6033 = vrcp.f32 %v7975_v60  ;;  %v2168_v13 = vor.u32 1.1754944e-38, %v2167_v49  ;;  %vm2166_vm5 = vcmp.eq.f32.partialorder %v2165_v34, 8.507059e+37 }
 0x420   : > { %v2115_v15 = vadd.f32 %v6020_v39, %v2114_v9  ;;  %6035 = vrcp.f32 %v7938_v56  ;;  %vm2528_vm3 = vweird.f32 %v7938_v56 }
 0x421   : > { %v6026_v57 = vpop.eup %6025  ;;  %v2145_v20 = vadd.f32 %v8162_v28, %v2144_v35 }
 0x422   : > { %v2157_v62 = vmul.f32 %v6026_v57, %v8157_v47  ;;  %2507 = vadd.xlane.f32.xlu0 %v8183_v52  ;;  %v8189_v43 = vpop.xlane.xlu1 %3053  ;;  %v2119_v46 = vsel %vm2118_vm12, %v6020_v39, %v2115_v15  ;;  %vm2162_vm14 = vweird.f32 %v6026_v57  ;;  %v8203_v44 = vpop.eup %6027 }
 0x423   : > { %v2124_v59 = vsel %vm2121_vm13, %v2123_v10, %v2119_v46  ;;  %v8214_v22 = vpop.eup %6029  ;;  %vm8218_vm2 = vmor %vm2161_vm1, %vm2162_vm14  ;;  %v2172_v46 = vmul.f32 %v8203_v44, %v8185_v23  ;;  %v2149_v40 = vsel %vm2148_vm4, %v8162_v28, %v2145_v20  ;;  %v8245_v28 = vpop.f32.mrf.mxu0  ;;  %vm2177_vm6 = vweird.f32 %v8203_v44 }
 0x424   : > { %v2158_v55 = vsub.f32 1.0, %v2157_v62  ;;  %v2125_v9 = vmul.f32 %v7850_v61, %v2124_v59  ;;  %v3037_v61 = vmul.f32 1.442695, %v3013_v21  ;;  %v2152_v21 = vand.u32 2147483648, %v8097_v31  ;;  %v8222_v10 = vpop.eup %6031  ;;  %vm8275_vm11 = vmor %vm2176_vm8, %vm2177_vm6 }
 0x425   : > { %v2150_v62 = vand.u32 2147483647, %v8097_v31  ;;  %v2187_v54 = vmul.f32 %v8214_v22, %v8119_v2  ;;  %v2173_v59 = vsub.f32 1.0, %v2172_v46  ;;  %vm2192_vm9 = vweird.f32 %v8214_v22 }
 0x426   : > { %v2159_v39 = vmul.f32 %v6026_v57, %v2158_v55  ;;  %2435 = vmax.xlane.f32.xlu2 %v8193_v8  ;;  %v2206_v7 = vpack.c.bf16 %v2140_v53, %v2125_v9  ;;  %6037 = vpow2.f32 %v3037_v61  ;;  %v2153_v31 = vor.u32 1.1754944e-38, %v2152_v21  ;;  %v8235_v9 = vpop.eup %6033  ;;  %vm8288_vm12 = vmor %vm2191_vm10, %vm2192_vm9 }
 0x427   : > { %vm2151_vm7 = vcmp.eq.f32.partialorder %v2150_v62, 8.507059e+37  ;;  %v2188_v35 = vsub.f32 1.0, %v2187_v54  ;;  %6039 = vrcp.f32 %v8189_v43  ;;  %v2174_v49 = vmul.f32 %v8203_v44, %v2173_v59  ;;  %v2408_v62 = vpop.f32.mrf.mxu3 }
 0x428   : > { %v2160_v16 = vadd.f32 %v6026_v57, %v2159_v39  ;;  %2266 = vmatmul.bf16.gmra.mxu2 %v2206_v7  ;;  %v2154_v39 = vsel %vm2151_vm7, %v2153_v31, %v2149_v40  ;;  %v2539_v34 = vmul.f32 %v8235_v9, %v7975_v60  ;;  %6041 = vrcp.f32 %v8206_v30 }
 0x429   : > { %v2155_v20 = vmul.f32 %v7775_v11, %v2154_v39  ;;  %v2175_v46 = vadd.f32 %v8203_v44, %v2174_v49  ;;  %v2180_v31 = vand.u32 2147483647, %v8185_v23  ;;  %vm2544_vm15 = vweird.f32 %v8235_v9 }
 0x42a   : > { %v8208_v19 = vpop.xlane.xlu1 %2497  ;;  %v2164_v47 = vsel %vm8218_vm2, %v6026_v57, %v2160_v16  ;;  %v8240_v16 = vpop.eup %6035  ;;  %vm2543_vm2 = vweird.f32 %v7975_v60  ;;  %vm3090_vm10 = vweird.f32 %v8189_v43 }
 0x42b   : > { %v2169_v55 = vsel %vm2166_vm5, %v2168_v13, %v2164_v47  ;;  %v2524_v15 = vmul.f32 %v8240_v16, %v7938_v56  ;;  %v2540_v47 = vsub.f32 1.0, %v2539_v34  ;;  %v2182_v13 = vand.u32 2147483648, %v8185_v23  ;;  %vm8319_vm4 = vmor %vm2543_vm2, %vm2544_vm15 }
 0x42c   : > { %v2170_v7 = vmul.f32 %v7886_v0, %v2169_v55  ;;  %v8243_v61 = vpop.eup %6037  ;;  %v2189_v0 = vmul.f32 %v8214_v22, %v2188_v35  ;;  %v2197_v35 = vand.u32 2147483648, %v8119_v2  ;;  %v2195_v23 = vand.u32 2147483647, %v8119_v2  ;;  %v8293_v2 = vpop.f32.mrf.mxu0 }
 0x42d   : > { %v8258_v11 = vpop.eup %6039  ;;  %v2525_v39 = vsub.f32 1.0, %v2524_v15  ;;  %vm2181_vm13 = vcmp.eq.f32.partialorder %v2180_v31, 8.507059e+37  ;;  %vm2529_vm1 = vweird.f32 %v8240_v16 }
 0x42e   : > { %2505 = vadd.xlane.f32.xlu2 %v8222_v10  ;;  %v2207_v21 = vpack.c.bf16 %v2170_v7, %v2155_v20  ;;  %v2190_v40 = vadd.f32 %v8214_v22, %v2189_v0  ;;  %v8266_v59 = vpop.eup %6041  ;;  %v2541_v20 = vmul.f32 %v8235_v9, %v2540_v47  ;;  %v2183_v0 = vor.u32 1.1754944e-38, %v2182_v13  ;;  %vm8325_vm5 = vmor %vm2528_vm3, %vm2529_vm1 }
 0x42f   : > { %v2526_v15 = vmul.f32 %v8240_v16, %v2525_v39  ;;  %vm2196_vm14 = vcmp.eq.f32.partialorder %v2195_v23, 8.507059e+37  ;;  %v2547_v39 = vand.u32 2147483647, %v7975_v60  ;;  %vm3091_vm6 = vweird.f32 %v8258_v11 }
 0x430   : > { %v2542_v31 = vadd.f32 %v8235_v9, %v2541_v20  ;;  %vm3106_vm8 = vweird.f32 %v8266_v59 }
 0x431   : > { %v2527_v34 = vadd.f32 %v8240_v16, %v2526_v15  ;;  %vm2548_vm7 = vcmp.eq.f32.partialorder %v2547_v39, 8.507059e+37 }
 0x432   : > { %v3334_v57 = vpop.permute.xlu0 %3333  ;;  %v8237_v53 = vpop.xlane.xlu1 %3057 }
 0x433   : > { %3364 = vmatpush.bf16.msra.mxu2 %v3334_v57  ;;  %v8269_v57 = vadd.f32 %v2408_v62, %v10097_v58  ;;  %v2179_v58 = vsel %vm8275_vm11, %v8203_v44, %v2175_v46  ;;  %v2194_v44 = vsel %vm8288_vm12, %v8214_v22, %v2190_v40  ;;  %v2198_v62 = vor.u32 1.1754944e-38, %v2197_v35  ;;  %vm8355_vm11 = vmor %vm3090_vm10, %vm3091_vm6 }
 0x434   : > { %v2184_v46 = vsel %vm2181_vm13, %v2183_v0, %v2179_v58  ;;  %v2549_v22 = vand.u32 2147483648, %v7975_v60  ;;  %v2531_v0 = vsel %vm8325_vm5, %v8240_v16, %v2527_v34  ;;  %v8338_v15 = vpop.f32.mrf.mxu0  ;;  %vm3105_vm12 = vweird.f32 %v8206_v30 }
 0x435   : > { %vm8367_vm13 = vmor %vm3105_vm12, %vm3106_vm8  ;;  %vm3120_vm5 = vweird.f32 %v8237_v53  ;;  %vm2573_vm10 = vweird.f32 %v8208_v19 }
 0x436   : > { %3069 = vadd.xlane.f32.xlu2 %v8243_v61 }
 0x438   : > { %2271 = vmatmul.bf16.gmra.mxu2 %v2207_v21  ;;  %v3101_v21 = vmul.f32 %v8266_v59, %v8206_v30 }
 0x43a   : > { %v2994_v54 = vpop.xlane.xlu1 %2993 }
 0x43b   : > { %v3015_v55 = vsub.f32 %v7996_v14, %v2994_v54  ;;  %v3086_v14 = vmul.f32 %v8258_v11, %v8189_v43  ;;  %v2199_v54 = vsel %vm2196_vm14, %v2198_v62, %v2194_v44 }
 0x43d   : > { %v3041_v49 = vmul.f32 1.442695, %v3015_v55  ;;  %v3087_v47 = vsub.f32 1.0, %v3086_v14  ;;  %v3102_v55 = vsub.f32 1.0, %v3101_v21  ;;  %v2200_v14 = vmul.f32 %v7806_v3, %v2199_v54 }
 0x43e   : > { %2441 = vmax.xlane.f32.xlu2 %v8269_v57  ;;  %v2546_v3 = vsel %vm8319_vm4, %v8235_v9, %v2542_v31  ;;  %v2550_v21 = vor.u32 1.1754944e-38, %v2549_v22  ;;  %v3094_v54 = vand.u32 2147483647, %v8189_v43  ;;  %v3109_v22 = vand.u32 2147483647, %v8206_v30 }
 0x43f   : > { %6043 = vpow2.f32 %v3041_v49  ;;  %v2185_v49 = vmul.f32 %v7839_v27, %v2184_v46  ;;  %v3088_v35 = vmul.f32 %v8258_v11, %v3087_v47  ;;  %v2532_v27 = vand.u32 2147483647, %v7938_v56 }
 0x440   : > { %6045 = vrcp.f32 %v8237_v53  ;;  %v2551_v46 = vsel %vm2548_vm7, %v2550_v21, %v2546_v3  ;;  %v3096_v47 = vand.u32 2147483648, %v8189_v43  ;;  %vm3095_vm14 = vcmp.eq.f32.partialorder %v3094_v54, 8.507059e+37 }
 0x441   : > { %v2208_v20 = vpack.c.bf16 %v2200_v14, %v2185_v49  ;;  %v3089_v62 = vadd.f32 %v8258_v11, %v3088_v35  ;;  %vm2533_vm9 = vcmp.eq.f32.partialorder %v2532_v27, 8.507059e+37  ;;  %v10120_v14 = vld [vmem:[#allocation25_spill] sm:$0xff]  ;;  %vm3110_vm15 = vcmp.eq.f32.partialorder %v3109_v22, 8.507059e+37 }
 0x442   : > { %v2432_v13 = vpop.xlane.xlu1 %2431  ;;  %v3097_v35 = vor.u32 1.1754944e-38, %v3096_v47  ;;  %v2552_v27 = vmul.f32 %v10120_v14, %v2551_v46 }
 0x443   : > { %v2453_v7 = vsub.f32 %v8008_v1, %v2432_v13  ;;  %v2534_v1 = vand.u32 2147483648, %v7938_v56  ;;  %v3103_v56 = vmul.f32 %v8266_v59, %v3102_v55  ;;  %v3093_v43 = vsel %vm8355_vm11, %v8258_v11, %v3089_v62 }
 0x444   : > { %v3098_v60 = vsel %vm3095_vm14, %v3097_v35, %v3093_v43 }
 0x445   : > { %v8309_v40 = vpop.eup %6043  ;;  %v2479_v23 = vmul.f32 1.442695, %v2453_v7  ;;  %v2535_v9 = vor.u32 1.1754944e-38, %v2534_v1  ;;  %v3104_v16 = vadd.f32 %v8266_v59, %v3103_v56  ;;  %v3111_v7 = vand.u32 2147483648, %v8206_v30 }
 0x446   : > { %3073 = vadd.xlane.f32.xlu2 %v8309_v40  ;;  %v8350_v31 = vpop.eup %6045 }
 0x447   : > { %6047 = vpow2.f32 %v2479_v23  ;;  %v2536_v55 = vsel %vm2533_vm9, %v2535_v9, %v2531_v0  ;;  %v8371_v23 = vpop.f32.mrf.mxu2  ;;  %v3108_v30 = vsel %vm8367_vm13, %v8266_v59, %v3104_v16  ;;  %v3116_v11 = vmul.f32 %v8350_v31, %v8237_v53  ;;  %v8386_v59 = vpop.f32.mrf.mxu0 }
 0x448   : > { %v8336_v44 = vpop.xlane.xlu2 %3059  ;;  %2276 = vmatmul.bf16.gmra.mxu2 %v2208_v20  ;;  %v3112_v58 = vor.u32 1.1754944e-38, %v3111_v7  ;;  %v10121_v20 = vld [vmem:[#allocation20_spill] sm:$0xff]  ;;  %v3099_v16 = vmul.f32 %v7936_v4, %v3098_v60  ;;  %vm3121_vm2 = vweird.f32 %v8350_v31  ;;  %v3124_v60 = vand.u32 2147483647, %v8237_v53 }
 0x449   : > { %6049 = vrcp.f32 %v8336_v44  ;;  %v2537_v0 = vmul.f32 %v10121_v20, %v2536_v55  ;;  %v3117_v54 = vsub.f32 1.0, %v3116_v11  ;;  %v3141_v4 = vand.u32 2147483648, %v8336_v44  ;;  %vm3122_vm7 = vmor %vm3120_vm5, %vm3121_vm2 }
 0x44a   : > { %v8344_v13 = vpop.xlane.xlu1 %2499  ;;  %6051 = vrcp.f32 %v8208_v19  ;;  %v3113_v21 = vsel %vm3110_vm15, %v3112_v58, %v3108_v30  ;;  %vm3135_vm3 = vweird.f32 %v8336_v44  ;;  %v3139_v11 = vand.u32 2147483647, %v8336_v44 }
 0x44b   : > { %v2763_v46 = vpack.c.bf16 %v2552_v27, %v2537_v0  ;;  %v3114_v7 = vmul.f32 %v7917_v24, %v3113_v21  ;;  %v3118_v22 = vmul.f32 %v8350_v31, %v3117_v54  ;;  %v3126_v58 = vand.u32 2147483648, %v8237_v53 }
 0x44c   : > { %v3142_v20 = vor.u32 1.1754944e-38, %v3141_v4  ;;  %vm3140_vm6 = vcmp.eq.f32.partialorder %v3139_v11, 8.507059e+37  ;;  %vm3125_vm9 = vcmp.eq.f32.partialorder %v3124_v60, 8.507059e+37 }
 0x44d   : > { %v8359_v34 = vpop.eup %6047  ;;  %v3325_v43 = vpack.c.bf16 %v3114_v7, %v3099_v16  ;;  %v3119_v30 = vadd.f32 %v8350_v31, %v3118_v22  ;;  %v3127_v21 = vor.u32 1.1754944e-38, %v3126_v58  ;;  %v2577_v22 = vand.u32 2147483647, %v8208_v19 }
 0x44e   : > { %2511 = vadd.xlane.f32.xlu1 %v8359_v34 }
 0x44f   : > { %v6050_v1 = vpop.eup %6049  ;;  %v8393_v39 = vpop.f32.mrf.mxu2  ;;  %v3123_v0 = vsel %vm3122_vm7, %v8350_v31, %v3119_v30  ;;  %vm2578_vm12 = vcmp.eq.f32.partialorder %v2577_v22, 8.507059e+37 }
 0x450   : > { %v3131_v3 = vmul.f32 %v6050_v1, %v8336_v44  ;;  %v2772_v56 = vpop.permute.xlu2 %2771  ;;  %v8384_v47 = vpop.eup %6051  ;;  %vm3136_vm1 = vweird.f32 %v6050_v1  ;;  %v3128_v54 = vsel %vm3125_vm9, %v3127_v21, %v3123_v0 }
 0x451   : > { %2802 = vmatpush.bf16.msra.mxu0 %v2772_v56  ;;  %v2569_v55 = vmul.f32 %v8384_v47, %v8208_v19  ;;  %v8399_v24 = vpop.f32.mrf.mxu0  ;;  %vm3137_vm4 = vmor %vm3135_vm3, %vm3136_vm1  ;;  %vm2574_vm8 = vweird.f32 %v8384_v47  ;;  %v3129_v11 = vmul.f32 %v7972_v5, %v3128_v54 }
 0x452   : > { %v3132_v62 = vsub.f32 1.0, %v3131_v3  ;;  %v8382_v9 = vpop.xlane.xlu1 %2997  ;;  %10122 = vst [vmem:[#allocation17_spill] sm:$0xff] %v8399_v24  ;;  %vm8433_vm11 = vmor %vm2573_vm10, %vm2574_vm8 }
 0x453   : > { %v2570_v14 = vsub.f32 1.0, %v2569_v55 }
 0x454   : > { %2803 = vmatmul.bf16.vlgmr.msra.gmra.mxu0 %v2763_v46  ;;  %v3133_v49 = vmul.f32 %v6050_v1, %v3132_v62 }
 0x455   : > { %v2571_v44 = vmul.f32 %v8384_v47, %v2570_v14 }
 0x456   : > { %v3134_v35 = vadd.f32 %v6050_v1, %v3133_v49 }
 0x457   : > { %v8413_v62 = vpop.f32.mrf.mxu2  ;;  %v2572_v49 = vadd.f32 %v8384_v47, %v2571_v44 }
 0x458   : > { %3365 = vmatmul.bf16.vlgmr.msra.gmra.mxu2 %v3325_v43  ;;  %v3138_v56 = vsel %vm3137_vm4, %v6050_v1, %v3134_v35  ;;  %v2579_v43 = vand.u32 2147483648, %v8208_v19 }
 0x459   : > { %v3143_v46 = vsel %vm3140_vm6, %v3142_v20, %v3138_v56  ;;  %v8429_v14 = vpop.f32.mrf.mxu0  ;;  %v2576_v44 = vsel %vm8433_vm11, %v8384_v47, %v2572_v49  ;;  %vm2588_vm11 = vweird.f32 %v8344_v13 }
 0x45a   : > { %v8397_v27 = vpop.xlane.xlu1 %3061  ;;  %v3144_v31 = vmul.f32 %v8028_v32, %v3143_v46  ;;  %v2580_v19 = vor.u32 1.1754944e-38, %v2579_v43 }
 0x45b   : > { %6053 = vrcp.f32 %v8397_v27  ;;  %vm3150_vm14 = vweird.f32 %v8397_v27  ;;  %v3154_v43 = vand.u32 2147483647, %v8397_v27 }
 0x45c   : > { %6055 = vrcp.f32 %v8344_v13  ;;  %v3326_v20 = vpack.c.bf16 %v3144_v31, %v3129_v11  ;;  %v3156_v11 = vand.u32 2147483648, %v8397_v27 }
 0x45d   : > { %v2496_v3 = vpop.xlane.xlu0 %2495  ;;  %vm3155_vm9 = vcmp.eq.f32.partialorder %v3154_v43, 8.507059e+37 }
 0x45e   : > { %6057 = vrcp.f32 %v2496_v3  ;;  %v2564_v54 = vand.u32 2147483648, %v2496_v3  ;;  %vm2558_vm15 = vweird.f32 %v2496_v3 }
 0x460   : > { %v2565_v58 = vor.u32 1.1754944e-38, %v2564_v54 }
 0x461   : > { %v8415_v16 = vpop.eup %6053 }
 0x462   : > { %v3146_v53 = vmul.f32 %v8415_v16, %v8397_v27  ;;  %v8419_v1 = vpop.xlane.xlu1 %3063  ;;  %v8421_v7 = vpop.eup %6055  ;;  %vm3151_vm1 = vweird.f32 %v8415_v16 }
 0x463   : > { %6059 = vrcp.f32 %v8419_v1  ;;  %v2584_v60 = vmul.f32 %v8421_v7, %v8344_v13  ;;  %vm8463_vm5 = vmor %vm3150_vm14, %vm3151_vm1  ;;  %vm3165_vm7 = vweird.f32 %v8419_v1  ;;  %vm2589_vm10 = vweird.f32 %v8421_v7 }
 0x464   : > { %v6058_v55 = vpop.eup %6057  ;;  %v3147_v35 = vsub.f32 1.0, %v3146_v53  ;;  %v2562_v53 = vand.u32 2147483647, %v2496_v3 }
 0x465   : > { %v2554_v4 = vmul.f32 %v6058_v55, %v2496_v3  ;;  %v2434_v30 = vpop.xlane.xlu0 %2433  ;;  %vm2559_vm13 = vweird.f32 %v6058_v55  ;;  %v2585_v47 = vsub.f32 1.0, %v2584_v60  ;;  %v3171_v3 = vand.u32 2147483648, %v8419_v1 }
 0x466   : > { %v2454_v32 = vsub.f32 %v8081_v26, %v2434_v30  ;;  %v3148_v0 = vmul.f32 %v8415_v16, %v3147_v35  ;;  %v8444_v26 = vpop.f32.mrf.mxu2  ;;  %v2581_v30 = vsel %vm2578_vm12, %v2580_v19, %v2576_v44  ;;  %vm2560_vm2 = vmor %vm2558_vm15, %vm2559_vm13  ;;  %vm2563_vm3 = vcmp.eq.f32.partialorder %v2562_v53, 8.507059e+37 }
 0x467   : > { %v2555_v56 = vsub.f32 1.0, %v2554_v4  ;;  %v3169_v19 = vand.u32 2147483647, %v8419_v1  ;;  %v2586_v54 = vmul.f32 %v8421_v7, %v2585_v47  ;;  %vm8496_vm12 = vmor %vm2588_vm11, %vm2589_vm10 }
 0x468   : > { %v2481_v5 = vmul.f32 1.442695, %v2454_v32  ;;  %3370 = vmatmul.bf16.gmra.mxu2 %v3326_v20  ;;  %v3149_v22 = vadd.f32 %v8415_v16, %v3148_v0  ;;  %v8459_v20 = vpop.f32.mrf.mxu0 }
 0x469   : > { %v6060_v21 = vpop.eup %6059  ;;  %v2556_v46 = vmul.f32 %v6058_v55, %v2555_v56  ;;  %10125 = vst [vmem:[#allocation6_spill] sm:$0xff] %v8459_v20  ;;  %vm3170_vm8 = vcmp.eq.f32.partialorder %v3169_v19, 8.507059e+37  ;;  %v2587_v43 = vadd.f32 %v8421_v7, %v2586_v54 }
 0x46a   : > { %v3161_v4 = vmul.f32 %v6060_v21, %v8419_v1  ;;  %6061 = vpow2.f32 %v2481_v5  ;;  %v8447_v31 = vpop.xlane.xlu1 %2503  ;;  %vm3166_vm4 = vweird.f32 %v6060_v21  ;;  %v2582_v5 = vmul.f32 %v7950_v42, %v2581_v30 }
 0x46b   : > { %v2557_v49 = vadd.f32 %v6058_v55, %v2556_v46  ;;  %v3153_v27 = vsel %vm8463_vm5, %v8415_v16, %v3149_v22  ;;  %vm3167_vm6 = vmor %vm3165_vm7, %vm3166_vm4  ;;  %v3172_v42 = vor.u32 1.1754944e-38, %v3171_v3  ;;  %v2592_v3 = vand.u32 2147483647, %v8344_v13 }
 0x46c   : > { %v3162_v35 = vsub.f32 1.0, %v3161_v4  ;;  %v3157_v4 = vor.u32 1.1754944e-38, %v3156_v11 }
 0x46d   : > { %v8455_v32 = vpop.xlane.xlu0 %2501  ;;  %v2561_v60 = vsel %vm2560_vm2, %v6058_v55, %v2557_v49  ;;  %vm2593_vm15 = vcmp.eq.f32.partialorder %v2592_v3, 8.507059e+37 }
 0x46e   : > { %v3163_v56 = vmul.f32 %v6060_v21, %v3162_v35  ;;  %6063 = vrcp.f32 %v8455_v32  ;;  %v2566_v0 = vsel %vm2563_vm3, %v2565_v58, %v2561_v60  ;;  %v8482_v58 = vpop.f32.mrf.mxu2  ;;  %v2594_v60 = vand.u32 2147483648, %v8344_v13 }
 0x46f   : > { %v2567_v53 = vmul.f32 %v8058_v12, %v2566_v0  ;;  %v3158_v12 = vsel %vm3155_vm9, %v3157_v4, %v3153_v27  ;;  %v2591_v13 = vsel %vm8496_vm12, %v8421_v7, %v2587_v43  ;;  %vm2603_vm14 = vweird.f32 %v8455_v32 }
 0x470   : > { %v8469_v55 = vpop.eup %6061  ;;  %v3164_v46 = vadd.f32 %v6060_v21, %v3163_v56  ;;  %v3159_v11 = vmul.f32 %v8055_v63, %v3158_v12  ;;  %v8494_v0 = vpop.f32.mrf.mxu0  ;;  %v2609_v63 = vand.u32 2147483648, %v8455_v32  ;;  %v2595_v27 = vor.u32 1.1754944e-38, %v2594_v60 }
 0x471   : > { %2513 = vadd.xlane.f32.xlu2 %v8469_v55  ;;  %v2764_v49 = vpack.c.bf16 %v2582_v5, %v2567_v53  ;;  %10128 = vst [vmem:[#allocation18_spill] sm:$0xff] %v8494_v0  ;;  %vm2618_vm12 = vweird.f32 %v8447_v31 }
 0x472   : > { %v8479_v30 = vpop.xlane.xlu1 %3067  ;;  %v3168_v35 = vsel %vm3167_vm6, %v6060_v21, %v3164_v46  ;;  %v2610_v4 = vor.u32 1.1754944e-38, %v2609_v63 }
 0x473   : > { %6065 = vrcp.f32 %v8479_v30  ;;  %2808 = vmatmul.bf16.gmra.mxu0 %v2764_v49  ;;  %v3173_v16 = vsel %vm3170_vm8, %v3172_v42, %v3168_v35  ;;  %v2596_v49 = vsel %vm2593_vm15, %v2595_v27, %v2591_v13  ;;  %vm3195_vm4 = vweird.f32 %v8479_v30 }
 0x474   : > { %v6064_v1 = vpop.eup %6063  ;;  %v3174_v21 = vmul.f32 %v8072_v25, %v3173_v16  ;;  %v2607_v25 = vand.u32 2147483647, %v8455_v32 }
 0x475   : > { %v2599_v47 = vmul.f32 %v6064_v1, %v8455_v32  ;;  %v8485_v22 = vpop.xlane.xlu0 %2437  ;;  %vm2604_vm13 = vweird.f32 %v6064_v1 }
 0x476   : > { %v3327_v44 = vpack.c.bf16 %v3174_v21, %v3159_v11  ;;  %vm2605_vm1 = vmor %vm2603_vm14, %vm2604_vm13  ;;  %v8507_v12 = vpop.f32.mrf.mxu2  ;;  %vm2608_vm2 = vcmp.eq.f32.partialorder %v2607_v25, 8.507059e+37  ;;  %v2597_v11 = vmul.f32 %v8033_v36, %v2596_v49  ;;  %v3199_v36 = vand.u32 2147483647, %v8479_v30 }
 0x477   : > { %v2600_v56 = vsub.f32 1.0, %v2599_v47 }
 0x478   : > { %3375 = vmatmul.bf16.gmra.mxu2 %v3327_v44  ;;  %v8511_v60 = vpop.f32.mrf.mxu0  ;;  %vm3200_vm9 = vcmp.eq.f32.partialorder %v3199_v36, 8.507059e+37 }
 0x479   : > { %v6066_v19 = vpop.eup %6065  ;;  %v2601_v46 = vmul.f32 %v6064_v1, %v2600_v56  ;;  %10131 = vst [vmem:[#allocation13_spill] sm:$0xff] %v8511_v60 }
 0x47a   : > { %v3191_v53 = vmul.f32 %v6066_v19, %v8479_v30  ;;  %vm3196_vm3 = vweird.f32 %v6066_v19 }
 0x47b   : > { %v2602_v54 = vadd.f32 %v6064_v1, %v2601_v46  ;;  %vm8518_vm5 = vmor %vm3195_vm4, %vm3196_vm3 }
 0x47c   : > { %v3192_v16 = vsub.f32 1.0, %v3191_v53 }
 0x47d   : > { %v3066_v42 = vpop.xlane.xlu0 %3065  ;;  %v2606_v35 = vsel %vm2605_vm1, %v6064_v1, %v2602_v54  ;;  %v3201_v1 = vand.u32 2147483648, %v8479_v30  ;;  %v3004_v30 = vpop.xlane.xlu1 %3003 }
 0x47e   : > { %6067 = vrcp.f32 %v3066_v42  ;;  %v2611_v47 = vsel %vm2608_vm2, %v2610_v4, %v2606_v35  ;;  %v3193_v43 = vmul.f32 %v6066_v19, %v3192_v16  ;;  %v8514_v5 = vpop.f32.mrf.mxu2  ;;  %v3186_v63 = vand.u32 2147483648, %v3066_v42 }
 0x47f   : > { %v2612_v7 = vmul.f32 %v8090_v48, %v2611_v47  ;;  %v3184_v53 = vand.u32 2147483647, %v3066_v42  ;;  %v3202_v4 = vor.u32 1.1754944e-38, %v3201_v1  ;;  %vm3180_vm6 = vweird.f32 %v3066_v42 }
 0x480   : > { %v3194_v3 = vadd.f32 %v6066_v19, %v3193_v43  ;;  %v8525_v16 = vpop.f32.mrf.mxu0  ;;  %v3017_v47 = vsub.f32 %v8043_v50, %v8382_v9 }
 0x481   : > { %v2765_v21 = vpack.c.bf16 %v2612_v7, %v2597_v11  ;;  %10134 = vst [vmem:[#allocation19_spill] sm:$0xff] %v8525_v16  ;;  %v3187_v11 = vor.u32 1.1754944e-38, %v3186_v63  ;;  %vm3185_vm10 = vcmp.eq.f32.partialorder %v3184_v53, 8.507059e+37 }
 0x482   : > { %v3198_v54 = vsel %vm8518_vm5, %v6066_v19, %v3194_v3 }
 0x483   : > { %2813 = vmatmul.bf16.gmra.mxu0 %v2765_v21  ;;  %v3203_v43 = vsel %vm3200_vm9, %v3202_v4, %v3198_v54 }
 0x484   : > { %v6068_v32 = vpop.eup %6067  ;;  %v3204_v21 = vmul.f32 %v8095_v6, %v3203_v43 }
 0x485   : > { %v3176_v56 = vmul.f32 %v6068_v32, %v3066_v42  ;;  %vm3181_vm7 = vweird.f32 %v6068_v32  ;;  %v3002_v13 = vpop.xlane.xlu0 %3001  ;;  %v3045_v42 = vmul.f32 1.442695, %v3017_v47  ;;  %v2440_v6 = vpop.xlane.xlu1 %2439 }
 0x486   : > { %vm3182_vm8 = vmor %vm3180_vm6, %vm3181_vm7  ;;  %v8531_v3 = vpop.f32.mrf.mxu2  ;;  %v3019_v50 = vsub.f32 %v8139_v45, %v3002_v13 }
 0x487   : > { %v3177_v44 = vsub.f32 1.0, %v3176_v56 }
 0x488   : > { %v3049_v48 = vmul.f32 1.442695, %v3019_v50 }
 0x489   : > { %v3178_v46 = vmul.f32 %v6068_v32, %v3177_v44  ;;  %v2996_v25 = vpop.xlane.xlu2 %2995 }
 0x48a   : > { %v3016_v27 = vsub.f32 %v8146_v37, %v2996_v25 }
 0x48b   : > { %v3179_v49 = vadd.f32 %v6068_v32, %v3178_v46 }
 0x48c   : > { %v3043_v35 = vmul.f32 1.442695, %v3016_v27 }
 0x48d   : > { %v3183_v7 = vsel %vm3182_vm8, %v6068_v32, %v3179_v49  ;;  %v8538_v9 = vpop.xlane.xlu0 %3071  ;;  %v8563_v49 = vpop.xlane.xlu1 %2509 }
 0x48e   : > { %6069 = vpow2.f32 %v3043_v35  ;;  %v3188_v37 = vsel %vm3185_vm10, %v3187_v11, %v3183_v7  ;;  %v3231_v24 = vand.u32 2147483648, %v8538_v9  ;;  %vm3225_vm5 = vweird.f32 %v8538_v9 }
 0x48f   : > { %v3189_v19 = vmul.f32 %v8124_v51, %v3188_v37  ;;  %6071 = vrcp.f32 %v8447_v31  ;;  %v8541_v51 = vpop.f32.mrf.mxu0 }
 0x490   : > { %6073 = vpow2.f32 %v3045_v42  ;;  %10135 = vst [vmem:[#allocation23_spill] sm:$0xff] %v8541_v51  ;;  %v8547_v25 = vpop.f32.mrf.mxu2 }
 0x491   : > { %v3000_v56 = vpop.xlane.xlu2 %2999  ;;  %v3328_v44 = vpack.c.bf16 %v3204_v21, %v3189_v19 }
 0x492   : > { %v3018_v1 = vsub.f32 %v8166_v18, %v3000_v56  ;;  %v2456_v18 = vsub.f32 %v8101_v41, %v8485_v22  ;;  %v3020_v41 = vsub.f32 %v8116_v33, %v3004_v30 }
 0x493   : > { %3380 = vmatmul.bf16.gmra.mxu2 %v3328_v44 }
 0x494   : > { %v8534_v36 = vpop.eup %6069  ;;  %v3047_v32 = vmul.f32 1.442695, %v3018_v1  ;;  %v2485_v13 = vmul.f32 1.442695, %v2456_v18  ;;  %v3051_v43 = vmul.f32 1.442695, %v3020_v41 }
 0x495   : > { %3075 = vadd.xlane.f32.xlu0 %v8534_v36  ;;  %v8545_v63 = vpop.eup %6071  ;;  %v8560_v22 = vpop.xlane.xlu0 %2507  ;;  %v2624_v18 = vand.u32 2147483648, %v8447_v31 }
 0x496   : > { %6075 = vpow2.f32 %v3047_v32  ;;  %v8550_v53 = vpop.eup %6073  ;;  %v2614_v4 = vmul.f32 %v8545_v63, %v8447_v31  ;;  %vm2619_vm11 = vweird.f32 %v8545_v63 }
 0x497   : > { %6077 = vpow2.f32 %v3049_v48  ;;  %v8565_v35 = vpop.f32.mrf.mxu0  ;;  %vm8603_vm13 = vmor %vm2618_vm12, %vm2619_vm11  ;;  %vm2648_vm12 = vweird.f32 %v8560_v22 }
 0x498   : > { %6079 = vrcp.f32 %v8538_v9  ;;  %10136 = vst [vmem:[#allocation24_spill] sm:$0xff] %v8565_v35  ;;  %v2615_v47 = vsub.f32 1.0, %v2614_v4 }
 0x499   : > { %v2436_v46 = vpop.xlane.xlu2 %2435 }
 0x49a   : > { %v2455_v45 = vsub.f32 %v8193_v8, %v2436_v46  ;;  %v2457_v8 = vsub.f32 %v8133_v29, %v2440_v6  ;;  %v8575_v29 = vpop.f32.mrf.mxu2  ;;  %v2616_v21 = vmul.f32 %v8545_v63, %v2615_v47 }
 0x49c   : > { %v8552_v27 = vpop.eup %6075  ;;  %v2483_v54 = vmul.f32 1.442695, %v2455_v45  ;;  %v2487_v33 = vmul.f32 1.442695, %v2457_v8  ;;  %v2617_v50 = vadd.f32 %v8545_v63, %v2616_v21  ;;  %v2622_v45 = vand.u32 2147483647, %v8447_v31 }
 0x49d   : > { %3079 = vadd.xlane.f32.xlu1 %v8552_v27  ;;  %3077 = vadd.xlane.f32.xlu0 %v8550_v53  ;;  %v8568_v7 = vpop.eup %6077 }
 0x49e   : > { %6081 = vpow2.f32 %v2483_v54  ;;  %v8570_v37 = vpop.eup %6079  ;;  %vm2623_vm15 = vcmp.eq.f32.partialorder %v2622_v45, 8.507059e+37 }
 0x49f   : > { %6083 = vpow2.f32 %v2485_v13  ;;  %v3221_v42 = vmul.f32 %v8570_v37, %v8538_v9  ;;  %v8595_v46 = vpop.f32.mrf.mxu0  ;;  %vm3226_vm4 = vweird.f32 %v8570_v37 }
 0x4a0   : > { %6085 = vrcp.f32 %v8560_v22  ;;  %10137 = vst [vmem:[#allocation21_spill] sm:$0xff] %v8595_v46  ;;  %vm8638_vm6 = vmor %vm3225_vm5, %vm3226_vm4 }
 0x4a1   : > { %v2506_v11 = vpop.xlane.xlu2 %2505  ;;  %v3222_v48 = vsub.f32 1.0, %v3221_v42  ;;  %v2621_v42 = vsel %vm8603_vm13, %v8545_v63, %v2617_v50 }
 0x4a2   : > { %6087 = vrcp.f32 %v2506_v11  ;;  %v2639_v47 = vand.u32 2147483648, %v2506_v11  ;;  %v2637_v31 = vand.u32 2147483647, %v2506_v11  ;;  %vm2633_vm1 = vweird.f32 %v2506_v11 }
 0x4a3   : > { %6089 = vrcp.f32 %v8563_v49  ;;  %v3223_v46 = vmul.f32 %v8570_v37, %v3222_v48 }
 0x4a4   : > { %v8573_v30 = vpop.eup %6081  ;;  %6091 = vpow2.f32 %v3051_v43  ;;  %v2640_v20 = vor.u32 1.1754944e-38, %v2639_v47  ;;  %vm2638_vm3 = vcmp.eq.f32.partialorder %v2637_v31, 8.507059e+37 }
 0x4a5   : > { %v8577_v19 = vpop.eup %6083  ;;  %2515 = vadd.xlane.f32.xlu2 %v8573_v30  ;;  %3081 = vadd.xlane.f32.xlu1 %v8568_v7  ;;  %6093 = vpow2.f32 %v2487_v33  ;;  %v3224_v48 = vadd.f32 %v8570_v37, %v3223_v46 }
 0x4a6   : > { %2517 = vadd.xlane.f32.xlu0 %v8577_v19  ;;  %v8585_v56 = vpop.eup %6085 }
 0x4a7   : > { %v2644_v13 = vmul.f32 %v8585_v56, %v8560_v22  ;;  %vm2649_vm8 = vweird.f32 %v8585_v56 }
 0x4a8   : > { %v6088_v1 = vpop.eup %6087 }
 0x4a9   : > { %v8587_v44 = vpop.eup %6089  ;;  %v2629_v32 = vmul.f32 %v6088_v1, %v2506_v11  ;;  %v8591_v6 = vpop.xlane.xlu2 %3069  ;;  %vm2634_vm14 = vweird.f32 %v6088_v1  ;;  %v2645_v51 = vsub.f32 1.0, %v2644_v13 }
 0x4aa   : > { %6095 = vrcp.f32 %v8591_v6  ;;  %v8601_v4 = vpop.eup %6091  ;;  %v2659_v8 = vmul.f32 %v8587_v44, %v8563_v49  ;;  %vm2635_vm2 = vmor %vm2633_vm1, %vm2634_vm14  ;;  %vm3210_vm10 = vweird.f32 %v8591_v6  ;;  %vm2664_vm11 = vweird.f32 %v8587_v44 }
 0x4ab   : > { %v2630_v54 = vsub.f32 1.0, %v2629_v32  ;;  %v8609_v43 = vpop.f32.mrf.mxu2  ;;  %v8611_v33 = vpop.eup %6093  ;;  %v2625_v32 = vor.u32 1.1754944e-38, %v2624_v18  ;;  %v2646_v13 = vmul.f32 %v8585_v56, %v2645_v51  ;;  %v3228_v51 = vsel %vm8638_vm6, %v8570_v37, %v3224_v48  ;;  %vm8659_vm14 = vmor %vm2648_vm12, %vm2649_vm8 }
 0x4ac   : > { %v2660_v16 = vsub.f32 1.0, %v2659_v8  ;;  %vm2663_vm1 = vweird.f32 %v8563_v49 }
 0x4ad   : > { %v2631_v21 = vmul.f32 %v6088_v1, %v2630_v54  ;;  %3083 = vadd.xlane.f32.xlu2 %v8601_v4  ;;  %v3229_v54 = vand.u32 2147483647, %v8538_v9  ;;  %v2626_v0 = vsel %vm2623_vm15, %v2625_v32, %v2621_v42  ;;  %v3214_v9 = vand.u32 2147483647, %v8591_v6 }
 0x4ae   : > { %2519 = vadd.xlane.f32.xlu0 %v8611_v33  ;;  %v2627_v8 = vmul.f32 %v8087_v38, %v2626_v0  ;;  %v2647_v31 = vadd.f32 %v8585_v56, %v2646_v13  ;;  %v2654_v32 = vand.u32 2147483648, %v8560_v22 }
 0x4af   : > { %v2632_v35 = vadd.f32 %v6088_v1, %v2631_v21  ;;  %v2661_v21 = vmul.f32 %v8587_v44, %v2660_v16  ;;  %vm8630_vm7 = vcmp.eq.f32.partialorder %v3229_v54, 8.507059e+37  ;;  %v3232_v16 = vor.u32 1.1754944e-38, %v3231_v24 }
 0x4b0   : > { %v6096_v60 = vpop.eup %6095  ;;  %v2652_v24 = vand.u32 2147483647, %v8560_v22  ;;  %vm3215_vm15 = vcmp.eq.f32.partialorder %v3214_v9, 8.507059e+37  ;;  %v2667_v22 = vand.u32 2147483647, %v8563_v49 }
 0x4b1   : > { %v3206_v63 = vmul.f32 %v6096_v60, %v8591_v6  ;;  %v2442_v50 = vpop.xlane.xlu2 %2441  ;;  %v2636_v18 = vsel %vm2635_vm2, %v6088_v1, %v2632_v35  ;;  %vm3211_vm9 = vweird.f32 %v6096_v60  ;;  %v2662_v37 = vadd.f32 %v8587_v44, %v2661_v21  ;;  %vm2665_vm2 = vmor %vm2663_vm1, %vm2664_vm11 }
 0x4b2   : > { %v2458_v11 = vsub.f32 %v8269_v57, %v2442_v50  ;;  %v2641_v45 = vsel %vm2638_vm3, %v2640_v20, %v2636_v18  ;;  %v8636_v57 = vpop.f32.mrf.mxu0  ;;  %vm3212_vm13 = vmor %vm3210_vm10, %vm3211_vm9  ;;  %v3233_v50 = vsel %vm8630_vm7, %v3232_v16, %v3228_v51  ;;  %vm2653_vm3 = vcmp.eq.f32.partialorder %v2652_v24, 8.507059e+37 }
 0x4b3   : > { %v3207_v41 = vsub.f32 1.0, %v3206_v63  ;;  %v2642_v47 = vmul.f32 %v8222_v10, %v2641_v45  ;;  %v8634_v46 = vpop.f32.mrf.mxu2  ;;  %v3216_v10 = vand.u32 2147483648, %v8591_v6  ;;  %v2669_v6 = vand.u32 2147483648, %v8563_v49 }
 0x4b4   : > { %v2489_v1 = vmul.f32 1.442695, %v2458_v11  ;;  %v2651_v11 = vsel %vm8659_vm14, %v8585_v56, %v2647_v31  ;;  %v2655_v45 = vor.u32 1.1754944e-38, %v2654_v32  ;;  %v2666_v49 = vsel %vm2665_vm2, %v8587_v44, %v2662_v37 }
 0x4b5   : > { %v3208_v38 = vmul.f32 %v6096_v60, %v3207_v41  ;;  %v2766_v0 = vpack.c.bf16 %v2642_v47, %v2627_v8  ;;  %v3217_v54 = vor.u32 1.1754944e-38, %v3216_v10  ;;  %v3234_v8 = vmul.f32 %v8154_v17, %v3233_v50 }
 0x4b6   : > { %6097 = vpow2.f32 %v2489_v1  ;;  %v2670_v47 = vor.u32 1.1754944e-38, %v2669_v6  ;;  %v2656_v56 = vsel %vm2653_vm3, %v2655_v45, %v2651_v11  ;;  %vm2668_vm4 = vcmp.eq.f32.partialorder %v2667_v22, 8.507059e+37 }
 0x4b7   : > { %v3209_v42 = vadd.f32 %v6096_v60, %v3208_v38  ;;  %2818 = vmatmul.bf16.gmra.mxu0 %v2766_v0  ;;  %v2657_v20 = vmul.f32 %v8183_v52, %v2656_v56  ;;  %v10146_v38 = vld [vmem:[#allocation5_spill] sm:$0xff]  ;;  %v5756_v37 = vpack.i.bf16 %v8444_v26, %v8413_v62  ;;  %v5771_v22 = vpack.i.bf16 %v8507_v12, %v8482_v58 }
 0x4b8   : > { %v2671_v1 = vsel %vm2668_vm4, %v2670_v47, %v2666_v49  ;;  %v5786_v58 = vpack.i.bf16 %v8531_v3, %v8514_v5 }
 0x4b9   : > { %v3213_v63 = vsel %vm3212_vm13, %v6096_v60, %v3209_v42  ;;  %v2672_v17 = vmul.f32 %v10146_v38, %v2671_v1 }
 0x4ba   : > { %v3218_v48 = vsel %vm3215_vm15, %v3217_v54, %v3213_v63  ;;  %v8678_v35 = vpop.f32.mrf.mxu0 }
 0x4bb   : > { %v8672_v13 = vpop.f32.mrf.mxu2  ;;  %v3219_v41 = vmul.f32 %v8243_v61, %v3218_v48  ;;  %v5741_v61 = vpack.i.bf16 %v8393_v39, %v8371_v23  ;;  %v2767_v44 = vpack.c.bf16 %v2672_v17, %v2657_v20  ;;  %v8693_v23 = vpop.xlane.xlu2 %3073 }
 0x4bc   : > { %v8668_v60 = vpop.eup %6097  ;;  %vm3240_vm14 = vweird.f32 %v8693_v23 }
 0x4bd   : > { %2521 = vadd.xlane.f32.xlu1 %v8668_v60  ;;  %v3329_v21 = vpack.c.bf16 %v3234_v8, %v3219_v41 }
 0x4bf   : > { %3385 = vmatmul.bf16.gmra.mxu2 %v3329_v21 }
 0x4c1   : > { %v2512_v51 = vpop.xlane.xlu1 %2511 }
 0x4c2   : > { %v8687_v0 = vpop.f32.mrf.mxu0  ;;  %6099 = vrcp.f32 %v2512_v51  ;;  %v2684_v62 = vand.u32 2147483648, %v2512_v51  ;;  %vm2678_vm7 = vweird.f32 %v2512_v51  ;;  %v2682_v26 = vand.u32 2147483647, %v2512_v51 }
 0x4c3   : > { %v8684_v10 = vpop.f32.mrf.mxu2 }
 0x4c4   : > { %v2685_v1 = vor.u32 1.1754944e-38, %v2684_v62  ;;  %vm2683_vm8 = vcmp.eq.f32.partialorder %v2682_v26, 8.507059e+37 }
 0x4c5   : > { %5742 = vrot.lane.b32.xlu2 %v5741_v61, %s6293_s17 }
 0x4c7   : > { %2823 = vmatmul.bf16.gmra.mxu0 %v2767_v44 }
 0x4c8   : > { %v6100_v24 = vpop.eup %6099 }
 0x4c9   : > { %v2674_v32 = vmul.f32 %v6100_v24, %v2512_v51  ;;  %vm2679_vm5 = vweird.f32 %v6100_v24 }
 0x4ca   : > { %vm2680_vm6 = vmor %vm2678_vm7, %vm2679_vm5 }
 0x4cb   : > { %v8689_v16 = vpop.f32.mrf.mxu2  ;;  %v2675_v54 = vsub.f32 1.0, %v2674_v32 }
 0x4cd   : > { %v2676_v18 = vmul.f32 %v6100_v24, %v2675_v54 }
 0x4cf   : > { %v2677_v11 = vadd.f32 %v6100_v24, %v2676_v18  ;;  %v5831_v18 = vpack.i.bf16 %v8684_v10, %v8672_v13  ;;  %v5684_v10 = vld [vmem:[%s9962_s5 + $0x30] sm:$0xff] }
 0x4d1   : > { %v2804_v9 = vpop.f32.mrf.mxu0  ;;  %v2681_v56 = vsel %vm2680_vm6, %v6100_v24, %v2677_v11 }
 0x4d2   : > { %v2686_v38 = vsel %vm2683_vm8, %v2685_v1, %v2681_v56 }
 0x4d3   : > { %v8691_v31 = vpop.f32.mrf.mxu2 }
 0x4d4   : > { %v5846_v62 = vpack.i.bf16 %v8691_v31, %v8689_v16 }
 0x4d9   : > { %v2806_v52 = vpop.f32.mrf.mxu0 }
 0x4da   : > { %v5746_v42 = vpack.i.bf16 %v2806_v52, %v2804_v9  ;;  %v2687_v52 = vmul.f32 %v8359_v34, %v2686_v38  ;;  %v5816_v34 = vpack.i.bf16 %v8634_v46, %v8609_v43 }
 0x4db   : > { %v3366_v39 = vpop.f32.mrf.mxu2 }
 0x4dc   : > { %5747 = vrot.lane.b32.xlu0 %v5746_v42, %s6294_s18 }
 0x4e3   : > { %v3368_v63 = vpop.f32.mrf.mxu2 }
 0x4e4   : > { %v2514_v50 = vpop.xlane.xlu2 %2513  ;;  %5757 = vrot.lane.b32.xlu0 %v5756_v37, %s6293_s17  ;;  %v5751_v6 = vpack.i.bf16 %v3368_v63, %v3366_v39  ;;  %v5801_v39 = vpack.i.bf16 %v8575_v29, %v8547_v25 }
 0x4e5   : > { %6101 = vrcp.f32 %v2514_v50  ;;  %v2699_v49 = vand.u32 2147483648, %v2514_v50  ;;  %v2697_v21 = vand.u32 2147483647, %v2514_v50  ;;  %vm2693_vm10 = vweird.f32 %v2514_v50 }
 0x4e6   : > { %5752 = vrot.lane.b32.xlu1 %v5751_v6, %s6292_s16  ;;  %6103 = vrcp.f32 %v8693_v23  ;;  %v5685_v6 = vld [vmem:[%s9962_s5 + $0x38] sm:$0xff] }
 0x4e7   : > { %v2700_v61 = vor.u32 1.1754944e-38, %v2699_v49  ;;  %vm2698_vm12 = vcmp.eq.f32.partialorder %v2697_v21, 8.507059e+37  ;;  %3724 = vmatpush.bf16.msra.mxu3 %v5685_v6 }
 0x4eb   : > { %v6102_v48 = vpop.eup %6101  ;;  %v3371_v41 = vpop.f32.mrf.mxu2  ;;  %3725 = vmatpush.bf16.msra.mxu3 %v5684_v10 }
 0x4ec   : > { %v2689_v45 = vmul.f32 %v6102_v48, %v2514_v50  ;;  %5772 = vrot.lane.b32.xlu0 %v5771_v22, %s6293_s17  ;;  %vm2694_vm9 = vweird.f32 %v6102_v48 }
 0x4ed   : > { %vm2695_vm11 = vmor %vm2693_vm10, %vm2694_vm9 }
 0x4ee   : > { %v2690_v8 = vsub.f32 1.0, %v2689_v45 }
 0x4f0   : > { %v2691_v47 = vmul.f32 %v6102_v48, %v2690_v8  ;;  %v2809_v20 = vpop.f32.mrf.mxu0  ;;  %v3246_v8 = vand.u32 2147483648, %v8693_v23 }
 0x4f2   : > { %v2692_v12 = vadd.f32 %v6102_v48, %v2691_v47  ;;  %v3244_v47 = vand.u32 2147483647, %v8693_v23 }
 0x4f3   : > { %v3373_v17 = vpop.f32.mrf.mxu2 }
 0x4f4   : > { %5787 = vrot.lane.b32.xlu0 %v5786_v58, %s6293_s17  ;;  %v2696_v44 = vsel %vm2695_vm11, %v6102_v48, %v2692_v12  ;;  %v5766_v9 = vpack.i.bf16 %v3373_v17, %v3371_v41  ;;  %vm3245_vm3 = vcmp.eq.f32.partialorder %v3244_v47, 8.507059e+37 }
 0x4f5   : > { %v2701_v51 = vsel %vm2698_vm12, %v2700_v61, %v2696_v44 }
 0x4f6   : > { %v2702_v42 = vmul.f32 %v8469_v55, %v2701_v51  ;;  %5767 = vrot.lane.b32.xlu1 %v5766_v9, %s6292_s16  ;;  %v6104_v55 = vpop.eup %6103 }
 0x4f7   : > { %v3236_v25 = vmul.f32 %v6104_v55, %v8693_v23  ;;  %vm3241_vm13 = vweird.f32 %v6104_v55 }
 0x4f8   : > { %v2768_v5 = vpack.c.bf16 %v2702_v42, %v2687_v52  ;;  %v2811_v3 = vpop.f32.mrf.mxu0  ;;  %vm8743_vm15 = vmor %vm3240_vm14, %vm3241_vm13 }
 0x4f9   : > { %v5761_v24 = vpack.i.bf16 %v2811_v3, %v2809_v20  ;;  %v3237_v46 = vsub.f32 1.0, %v3236_v25  ;;  %v3247_v20 = vor.u32 1.1754944e-38, %v3246_v8 }
 0x4fa   : > { %2828 = vmatmul.bf16.gmra.mxu0 %v2768_v5 }
 0x4fb   : > { %5762 = vrot.lane.b32.xlu2 %v5761_v24, %s6294_s18  ;;  %v3376_v32 = vpop.f32.mrf.mxu2  ;;  %v3238_v48 = vmul.f32 %v6104_v55, %v3237_v46 }
 0x4fc   : > { %5802 = vrot.lane.b32.xlu0 %v5801_v39, %s6293_s17 }
 0x4fd   : > { %v3239_v26 = vadd.f32 %v6104_v55, %v3238_v48 }
 0x4ff   : > { %v3243_v23 = vsel %vm8743_vm15, %v6104_v55, %v3239_v26  ;;  %v5683_v26 = vld [vmem:[%s9962_s5 + $0x28] sm:$0xff] }
 0x500   : > { %v2814_v37 = vpop.f32.mrf.mxu0  ;;  %v3248_v52 = vsel %vm3245_vm3, %v3247_v20, %v3243_v23  ;;  %3726 = vmatpush.bf16.msra.mxu3 %v5683_v26 }
 0x501   : > { %v3249_v24 = vmul.f32 %v8309_v40, %v3248_v52 }
 0x503   : > { %v3378_v54 = vpop.f32.mrf.mxu2 }
 0x504   : > { %5817 = vrot.lane.b32.xlu0 %v5816_v34, %s6293_s17  ;;  %v5781_v63 = vpack.i.bf16 %v3378_v54, %v3376_v32 }
 0x506   : > { %5782 = vrot.lane.b32.xlu1 %v5781_v63, %s6292_s16 }
 0x508   : > { %v3076_v29 = vpop.xlane.xlu0 %3075  ;;  %v2816_v50 = vpop.f32.mrf.mxu0 }
 0x509   : > { %6105 = vrcp.f32 %v3076_v29  ;;  %v5776_v43 = vpack.i.bf16 %v2816_v50, %v2814_v37  ;;  %v3261_v58 = vand.u32 2147483648, %v3076_v29  ;;  %vm3255_vm2 = vweird.f32 %v3076_v29 }
 0x50a   : > { %v3259_v38 = vand.u32 2147483647, %v3076_v29 }
 0x50b   : > { %5777 = vrot.lane.b32.xlu2 %v5776_v43, %s6294_s18  ;;  %v3262_v5 = vor.u32 1.1754944e-38, %v3261_v58 }
 0x50c   : > { %5832 = vrot.lane.b32.xlu0 %v5831_v18, %s6293_s17  ;;  %vm3260_vm5 = vcmp.eq.f32.partialorder %v3259_v38, 8.507059e+37 }
 0x50f   : > { %v6106_v22 = vpop.eup %6105 }
 0x510   : > { %v3251_v11 = vmul.f32 %v6106_v22, %v3076_v29  ;;  %v8726_v45 = vpop.xlane.xlu0 %3077  ;;  %v8728_v41 = vpop.xlane.xlu1 %3079  ;;  %vm3256_vm1 = vweird.f32 %v6106_v22 }
 0x511   : > { %6107 = vrcp.f32 %v8726_v45  ;;  %vm3257_vm4 = vmor %vm3255_vm2, %vm3256_vm1  ;;  %v3274_v39 = vand.u32 2147483647, %v8726_v45  ;;  %vm3270_vm7 = vweird.f32 %v8726_v45  ;;  %v3276_v29 = vand.u32 2147483648, %v8726_v45 }
 0x512   : > { %v3252_v13 = vsub.f32 1.0, %v3251_v11  ;;  %6109 = vrcp.f32 %v8728_v41  ;;  %vm3285_vm6 = vweird.f32 %v8728_v41  ;;  %v3289_v50 = vand.u32 2147483647, %v8728_v41 }
 0x513   : > { %vm8778_vm9 = vcmp.eq.f32.partialorder %v3274_v39, 8.507059e+37  ;;  %v3291_v48 = vand.u32 2147483648, %v8728_v41 }
 0x514   : > { %v3253_v49 = vmul.f32 %v6106_v22, %v3252_v13  ;;  %5847 = vrot.lane.b32.xlu0 %v5846_v62, %s6293_s17  ;;  %vm3290_vm3 = vcmp.eq.f32.partialorder %v3289_v50, 8.507059e+37  ;;  %v5682_v50 = vld [vmem:[%s9962_s5 + $0x20] sm:$0xff] }
 0x515   : > { %3727 = vmatpush.bf16.msra.mxu3 %v5682_v50 }
 0x516   : > { %v3254_v21 = vadd.f32 %v6106_v22, %v3253_v49  ;;  %v3381_v56 = vpop.f32.mrf.mxu2 }
 0x517   : > { %v8741_v16 = vpop.eup %6107 }
 0x518   : > { %v8747_v1 = vpop.eup %6109  ;;  %v3266_v12 = vmul.f32 %v8741_v16, %v8726_v45  ;;  %v8751_v61 = vpop.xlane.xlu2 %2515  ;;  %v3258_v42 = vsel %vm3257_vm4, %v6106_v22, %v3254_v21  ;;  %vm3271_vm8 = vweird.f32 %v8741_v16  ;;  %v3277_v21 = vor.u32 1.1754944e-38, %v3276_v29 }
 0x519   : > { %v3281_v17 = vmul.f32 %v8747_v1, %v8728_v41  ;;  %6111 = vrcp.f32 %v8751_v61  ;;  %v8758_v44 = vpop.xlane.xlu0 %2517  ;;  %v8761_v3 = vpop.xlane.xlu1 %3081  ;;  %v3263_v32 = vsel %vm3260_vm5, %v3262_v5, %v3258_v42  ;;  %vm3286_vm10 = vweird.f32 %v8747_v1  ;;  %vm8804_vm12 = vmor %vm3270_vm7, %vm3271_vm8 }
 0x51a   : > { %6113 = vrcp.f32 %v8758_v44  ;;  %v3267_v9 = vsub.f32 1.0, %v3266_v12  ;;  %v3264_v63 = vmul.f32 %v8534_v36, %v3263_v32  ;;  %v2714_v49 = vand.u32 2147483648, %v8751_v61  ;;  %vm8815_vm13 = vmor %vm3285_vm6, %vm3286_vm10 }
 0x51b   : > { %v3282_v51 = vsub.f32 1.0, %v3281_v17  ;;  %6115 = vrcp.f32 %v8761_v3  ;;  %v2729_v58 = vand.u32 2147483648, %v8758_v44  ;;  %v3292_v45 = vor.u32 1.1754944e-38, %v3291_v48 }
 0x51c   : > { %v3268_v34 = vmul.f32 %v8741_v16, %v3267_v9  ;;  %v3330_v46 = vpack.c.bf16 %v3264_v63, %v3249_v24  ;;  %vm2708_vm14 = vweird.f32 %v8751_v61  ;;  %v2727_v9 = vand.u32 2147483647, %v8758_v44 }
 0x51d   : > { %v3283_v55 = vmul.f32 %v8747_v1, %v3282_v51  ;;  %v2715_v52 = vor.u32 1.1754944e-38, %v2714_v49  ;;  %vm2723_vm2 = vweird.f32 %v8758_v44  ;;  %v2730_v39 = vor.u32 1.1754944e-38, %v2729_v58 }
 0x51e   : > { %v3383_v54 = vpop.f32.mrf.mxu2  ;;  %v3269_v62 = vadd.f32 %v8741_v16, %v3268_v34  ;;  %3390 = vmatmul.bf16.gmra.mxu2 %v3330_v46  ;;  %vm2728_vm7 = vcmp.eq.f32.partialorder %v2727_v9, 8.507059e+37  ;;  %v3306_v49 = vand.u32 2147483648, %v8761_v3  ;;  %vm3300_vm10 = vweird.f32 %v8761_v3 }
 0x51f   : > { %v6112_v37 = vpop.eup %6111  ;;  %v5796_v36 = vpack.i.bf16 %v3383_v54, %v3381_v56  ;;  %v3284_v13 = vadd.f32 %v8747_v1, %v3283_v55  ;;  %v2712_v56 = vand.u32 2147483647, %v8751_v61 }
 0x520   : > { %v8770_v25 = vpop.eup %6113  ;;  %v2704_v40 = vmul.f32 %v6112_v37, %v8751_v61  ;;  %v8776_v6 = vpop.xlane.xlu2 %3083  ;;  %vm2709_vm11 = vweird.f32 %v6112_v37  ;;  %v3273_v41 = vsel %vm8804_vm12, %v8741_v16, %v3269_v62  ;;  %v5681_v62 = vld [vmem:[%s9962_s5 + $0x18] sm:$0xff] }
 0x521   : > { %v2719_v43 = vmul.f32 %v8770_v25, %v8758_v44  ;;  %v8784_v22 = vpop.xlane.xlu0 %2519  ;;  %6117 = vrcp.f32 %v8776_v6  ;;  %5797 = vrot.lane.b32.xlu1 %v5796_v36, %s6292_s16  ;;  %v8798_v47 = vpop.eup %6115  ;;  %vm2724_vm15 = vweird.f32 %v8770_v25  ;;  %vm8822_vm1 = vmor %vm2708_vm14, %vm2709_vm11  ;;  %v3288_v51 = vsel %vm8815_vm13, %v8747_v1, %v3284_v13  ;;  %3728 = vmatpush.bf16.msra.mxu3 %v5681_v62 }
 0x522   : > { %v2705_v11 = vsub.f32 1.0, %v2704_v40  ;;  %6119 = vrcp.f32 %v8784_v22  ;;  %v3296_v42 = vmul.f32 %v8798_v47, %v8761_v3  ;;  %vm2713_vm4 = vcmp.eq.f32.partialorder %v2712_v56, 8.507059e+37  ;;  %vm2725_vm5 = vmor %vm2723_vm2, %vm2724_vm15 }
 0x523   : > { %v2720_v10 = vsub.f32 1.0, %v2719_v43  ;;  %v3278_v44 = vsel %vm8778_vm9, %v3277_v21, %v3273_v41  ;;  %v3293_v34 = vsel %vm3290_vm3, %v3292_v45, %v3288_v51  ;;  %vm3301_vm9 = vweird.f32 %v8798_v47 }
 0x524   : > { %v2706_v8 = vmul.f32 %v6112_v37, %v2705_v11  ;;  %v3297_v54 = vsub.f32 1.0, %v3296_v42  ;;  %v3294_v18 = vmul.f32 %v8552_v27, %v3293_v34  ;;  %v5680_v27 = vld [vmem:[%s9962_s5 + $0x10] sm:$0xff]  ;;  %vm3315_vm8 = vweird.f32 %v8776_v6  ;;  %vm8880_vm12 = vmor %vm3300_vm10, %vm3301_vm9 }
 0x525   : > { %v2721_v20 = vmul.f32 %v8770_v25, %v2720_v10  ;;  %v3319_v31 = vand.u32 2147483647, %v8776_v6  ;;  %3729 = vmatpush.bf16.msra.mxu3 %v5680_v27  ;;  %v2744_v38 = vand.u32 2147483648, %v8784_v22  ;;  %v2742_v9 = vand.u32 2147483647, %v8784_v22 }
 0x526   : > { %v2707_v23 = vadd.f32 %v6112_v37, %v2706_v8  ;;  %v3298_v46 = vmul.f32 %v8798_v47, %v3297_v54  ;;  %v3304_v8 = vand.u32 2147483647, %v8761_v3  ;;  %vm3614_vm9 = vcmask 523264  }
 0x527   : > { %v2722_v17 = vadd.f32 %v8770_v25, %v2721_v20  ;;  %v8834_v61 = vpop.eup %6117  ;;  %vm3320_vm15 = vcmp.eq.f32.partialorder %v3319_v31, 8.507059e+37 }
 0x528   : > { %v2711_v5 = vsel %vm8822_vm1, %v6112_v37, %v2707_v23  ;;  %v3311_v16 = vmul.f32 %v8834_v61, %v8776_v6  ;;  %v8843_v24 = vpop.eup %6119  ;;  %vm3316_vm6 = vweird.f32 %v8834_v61  ;;  %v3299_v13 = vadd.f32 %v8798_v47, %v3298_v46 }
 0x529   : > { %v2716_v1 = vsel %vm2713_vm4, %v2715_v52, %v2711_v5  ;;  %v2726_v32 = vsel %vm2725_vm5, %v8770_v25, %v2722_v17  ;;  %v2734_v37 = vmul.f32 %v8843_v24, %v8784_v22  ;;  %v3279_v25 = vmul.f32 %v8550_v53, %v3278_v44  ;;  %vm8876_vm11 = vmor %vm3315_vm8, %vm3316_vm6  ;;  %v5679_v17 = vld [vmem:[%s9962_s5 + $0x8] sm:$0xff]  ;;  %v5678_v44 = vld [vmem:[%s9962_s5] sm:$0xff] }
 0x52a   : > { %v3312_v55 = vsub.f32 1.0, %v3311_v16  ;;  %v2717_v63 = vmul.f32 %v8573_v30, %v2716_v1  ;;  %v2731_v29 = vsel %vm2728_vm7, %v2730_v39, %v2726_v32  ;;  %v3321_v53 = vand.u32 2147483648, %v8776_v6  ;;  %3730 = vmatpush.bf16.msra.mxu3 %v5679_v17 }
 0x52b   : > { %v2732_v40 = vmul.f32 %v8577_v19, %v2731_v29  ;;  %v2735_v48 = vsub.f32 1.0, %v2734_v37  ;;  %v3331_v30 = vpack.c.bf16 %v3294_v18, %v3279_v25  ;;  %vm2739_vm13 = vweird.f32 %v8843_v24 }
 0x52c   : > { %v3313_v43 = vmul.f32 %v8834_v61, %v3312_v55  ;;  %v3322_v58 = vor.u32 1.1754944e-38, %v3321_v53  ;;  %v3303_v6 = vsel %vm8880_vm12, %v8798_v47, %v3299_v13  ;;  %vm3305_vm14 = vcmp.eq.f32.partialorder %v3304_v8, 8.507059e+37 }
 0x52d   : > { %v2769_v36 = vpack.c.bf16 %v2732_v40, %v2717_v63  ;;  %v2736_v10 = vmul.f32 %v8843_v24, %v2735_v48  ;;  %v3307_v23 = vor.u32 1.1754944e-38, %v3306_v49  ;;  %vm2738_vm1 = vweird.f32 %v8784_v22  ;;  %v5743_v48 = vpop.permute.xlu2 %5742 }
 0x52e   : > { %v3314_v19 = vadd.f32 %v8834_v61, %v3313_v43  ;;  %3395 = vmatmul.bf16.gmra.mxu2 %v3331_v30  ;;  %vm8898_vm2 = vmor %vm2738_vm1, %vm2739_vm13  ;;  %v2745_v1 = vor.u32 1.1754944e-38, %v2744_v38  ;;  %vm2743_vm4 = vcmp.eq.f32.partialorder %v2742_v9, 8.507059e+37  ;;  %3731 = vmatpush.bf16.msra.mxu3 %v5678_v44  ;;  %v5745_v30 = vunpack.i.h.bf16 %v5743_v48 }
 0x52f   : > { %2833 = vmatmul.bf16.gmra.mxu0 %v2769_v36  ;;  %v2737_v45 = vadd.f32 %v8843_v24, %v2736_v10  ;;  %v3308_v52 = vsel %vm3305_vm14, %v3307_v23, %v3303_v6  ;;  %v5744_v62 = vunpack.i.l.bf16 %v5743_v48  ;;  %vm3631_vm8 = vcmask 785408   ;;  %v10165_v48 = vld [vmem:[#allocation6_spill] sm:$0xff] }
 0x530   : > { %v2522_v11 = vpop.xlane.xlu1 %2521  ;;  %v3318_v12 = vsel %vm8876_vm11, %v8834_v61, %v3314_v19  ;;  %v3309_v54 = vmul.f32 %v8568_v7, %v3308_v52  ;;  %v3599_v53 = vsel %vm1165_vm0, %v8293_v2, %v5745_v30 }
 0x531   : > { %6121 = vrcp.f32 %v2522_v11  ;;  %v3323_v51 = vsel %vm3320_vm15, %v3322_v58, %v3318_v12  ;;  %v2759_v47 = vand.u32 2147483648, %v2522_v11  ;;  %v2757_v5 = vand.u32 2147483647, %v2522_v11 }
 0x532   : > { %v2741_v16 = vsel %vm8898_vm2, %v8843_v24, %v2737_v45  ;;  %v3324_v22 = vmul.f32 %v8601_v4, %v3323_v51  ;;  %vm2753_vm5 = vweird.f32 %v2522_v11  ;;  %v3598_v27 = vsel %vm1165_vm0, %v8245_v28, %v5744_v62 }
 0x533   : > { %v2760_v55 = vor.u32 1.1754944e-38, %v2759_v47  ;;  %v2746_v37 = vsel %vm2743_vm4, %v2745_v1, %v2741_v16  ;;  %vm2758_vm6 = vcmp.eq.f32.partialorder %v2757_v5, 8.507059e+37 }
 0x534   : > { %v2819_v26 = vpop.f32.mrf.mxu0  ;;  %v3332_v63 = vpack.c.bf16 %v3324_v22, %v3309_v54  ;;  %v2747_v4 = vmul.f32 %v8611_v33, %v2746_v37 }
 0x537   : > { %v6122_v56 = vpop.eup %6121 }
 0x538   : > { %v2749_v3 = vmul.f32 %v6122_v56, %v2522_v11  ;;  %vm2754_vm3 = vweird.f32 %v6122_v56 }
 0x539   : > { %vm2755_vm7 = vmor %vm2753_vm5, %vm2754_vm3 }
 0x53a   : > { %v2750_v41 = vsub.f32 1.0, %v2749_v3 }
 0x53c   : > { %v2751_v42 = vmul.f32 %v6122_v56, %v2750_v41  ;;  %v2821_v39 = vpop.f32.mrf.mxu0 }
 0x53d   : > { %v5791_v32 = vpack.i.bf16 %v2821_v39, %v2819_v26 }
 0x53e   : > { %v2752_v34 = vadd.f32 %v6122_v56, %v2751_v42  ;;  %3400 = vmatmul.bf16.gmra.mxu2 %v3332_v63 }
 0x53f   : > { %5792 = vrot.lane.b32.xlu2 %v5791_v32, %s6294_s18  ;;  %v10163_v32 = vld [vmem:[#allocation17_spill] sm:$0xff] }
 0x540   : > { %v2756_v24 = vsel %vm2755_vm7, %v6122_v56, %v2752_v34 }
 0x541   : > { %v2761_v29 = vsel %vm2758_vm6, %v2760_v55, %v2756_v24 }
 0x542   : > { %v2762_v50 = vmul.f32 %v8668_v60, %v2761_v29  ;;  %v3386_v40 = vpop.f32.mrf.mxu2 }
 0x544   : > { %v2824_v25 = vpop.f32.mrf.mxu0  ;;  %v2770_v18 = vpack.c.bf16 %v2762_v50, %v2747_v4 }
 0x546   : > { %2838 = vmatmul.bf16.gmra.mxu0 %v2770_v18 }
 0x54a   : > { %v3388_v43 = vpop.f32.mrf.mxu2 }
 0x54b   : > { %v5811_v36 = vpack.i.bf16 %v3388_v43, %v3386_v40 }
 0x54c   : > { %v2826_v7 = vpop.f32.mrf.mxu0 }
 0x54d   : > { %v5806_v46 = vpack.i.bf16 %v2826_v7, %v2824_v25  ;;  %5812 = vrot.lane.b32.xlu1 %v5811_v36, %s6292_s16  ;;  %v10164_v7 = vld [vmem:[#allocation18_spill] sm:$0xff] }
 0x54e   : > { %v5748_v11 = vpop.permute.xlu0 %5747 }
 0x54f   : > { %5807 = vrot.lane.b32.xlu2 %v5806_v46, %s6294_s18  ;;  %v5750_v33 = vunpack.i.h.bf16 %v5748_v11  ;;  %v5749_v19 = vunpack.i.l.bf16 %v5748_v11 }
 0x551   : > { %v3616_v26 = vsel %vm3614_vm9, %v3599_v53, %v5750_v33  ;;  %v3615_v8 = vsel %vm3614_vm9, %v3598_v27, %v5749_v19 }
 0x555   : > { %v5763_v12 = vpop.permute.xlu2 %5762 }
 0x556   : > { %v5758_v56 = vpop.permute.xlu0 %5757  ;;  %v5765_v45 = vunpack.i.h.bf16 %v5763_v12  ;;  %v5764_v3 = vunpack.i.l.bf16 %v5763_v12 }
 0x557   : > { %v5760_v20 = vunpack.i.h.bf16 %v5758_v56  ;;  %v5759_v58 = vunpack.i.l.bf16 %v5758_v56 }
 0x558   : > { %v5753_v60 = vpop.permute.xlu1 %5752 }
 0x559   : > { %v5755_v13 = vunpack.i.h.bf16 %v5753_v60  ;;  %v5754_v10 = vunpack.i.l.bf16 %v5753_v60  ;;  %v3601_v2 = vsel %vm1165_vm0, %v8386_v59, %v5760_v20  ;;  %v3600_v28 = vsel %vm1165_vm0, %v8338_v15, %v5759_v58 }
 0x55a   : > { %v3617_v17 = vsel %vm3614_vm9, %v3600_v28, %v5764_v3  ;;  %v3618_v9 = vsel %vm3614_vm9, %v3601_v2, %v5765_v45 }
 0x55b   : > { %v3633_v49 = vsel %vm3631_vm8, %v3616_v26, %v5755_v13  ;;  %v3632_v31 = vsel %vm3631_vm8, %v3615_v8, %v5754_v10 }
 0x55c   : > { %v3648_v21 = vpack.c.bf16 %v3633_v49, %v3632_v31 }
 0x55e   : > { %3732 = vmatmul.bf16.vlgmr.msra.gmra.mxu3 %v3648_v21  ;;  %v5773_v47 = vpop.permute.xlu0 %5772 }
 0x55f   : > { %v5775_v52 = vunpack.i.h.bf16 %v5773_v47  ;;  %v5774_v42 = vunpack.i.l.bf16 %v5773_v47 }
 0x561   : > { %v3603_v1 = vsel %vm1165_vm0, %v8429_v14, %v5775_v52  ;;  %v3602_v22 = vsel %vm1165_vm0, %v10163_v32, %v5774_v42 }
 0x565   : > { %v5778_v59 = vpop.permute.xlu2 %5777 }
 0x566   : > { %v5780_v5 = vunpack.i.h.bf16 %v5778_v59  ;;  %v5779_v39 = vunpack.i.l.bf16 %v5778_v59  ;;  %v5788_v14 = vpop.permute.xlu0 %5787 }
 0x567   : > { %v5790_v50 = vunpack.i.h.bf16 %v5788_v14  ;;  %v5789_v40 = vunpack.i.l.bf16 %v5788_v14 }
 0x568   : > { %v5768_v6 = vpop.permute.xlu1 %5767  ;;  %v3619_v55 = vsel %vm3614_vm9, %v3602_v22, %v5779_v39  ;;  %v3620_v54 = vsel %vm3614_vm9, %v3603_v1, %v5780_v5  ;;  %v8964_v22 = vld [vmem:[%s9963_s6] ss:$0 sm:$0xff] }
 0x569   : > { %v5770_v23 = vunpack.i.h.bf16 %v5768_v6  ;;  %v5769_v38 = vunpack.i.l.bf16 %v5768_v6  ;;  %v3605_v46 = vsel %vm1165_vm0, %v10164_v7, %v5790_v50  ;;  %v3604_v11 = vsel %vm1165_vm0, %v10165_v48, %v5789_v40  ;;  %v6255_v50 = vld [vmem:[%s6535_s19 + $0x10] sm:$0xff]  ;;  %v6257_v48 = vld [vmem:[%s6535_s19 + $0x20] sm:$0xff] }
 0x56b   : > { %v3634_v41 = vsel %vm3631_vm8, %v3617_v17, %v5769_v38  ;;  %v3635_v51 = vsel %vm3631_vm8, %v3618_v9, %v5770_v23  ;;  %v10166_v23 = vld [vmem:[#allocation19_spill] sm:$0xff]  ;;  %v10167_v17 = vld [vmem:[#allocation13_spill] sm:$0xff] }
 0x56c   : > { %v3649_v61 = vpack.c.bf16 %v3635_v51, %v3634_v41 }
 0x56e   : > { %3737 = vmatmul.bf16.gmra.mxu3 %v3649_v61  ;;  %v5803_v56 = vpop.permute.xlu0 %5802 }
 0x56f   : > { %v5805_v58 = vunpack.i.h.bf16 %v5803_v56  ;;  %v5804_v12 = vunpack.i.l.bf16 %v5803_v56  ;;  %v10169_v56 = vld [vmem:[#allocation23_spill] sm:$0xff] }
 0x571   : > { %v3607_v38 = vsel %vm1165_vm0, %v10166_v23, %v5805_v58  ;;  %v3606_v9 = vsel %vm1165_vm0, %v10167_v17, %v5804_v12 }
 0x577   : > { %v2829_v15 = vpop.f32.mrf.mxu0 }
 0x578   : > { %v5783_v16 = vpop.permute.xlu1 %5782 }
 0x579   : > { %v5785_v44 = vunpack.i.h.bf16 %v5783_v16  ;;  %v5784_v34 = vunpack.i.l.bf16 %v5783_v16 }
 0x57b   : > { %v3636_v37 = vsel %vm3631_vm8, %v3619_v55, %v5784_v34  ;;  %v3637_v24 = vsel %vm3631_vm8, %v3620_v54, %v5785_v44  ;;  %v6253_v55 = vld [vmem:[%s6535_s19] sm:$0xff] }
 0x57c   : > { %v3650_v63 = vpack.c.bf16 %v3637_v24, %v3636_v37 }
 0x57e   : > { %3742 = vmatmul.bf16.gmra.mxu3 %v3650_v63 }
 0x57f   : > { %v2831_v29 = vpop.f32.mrf.mxu0 }
 0x580   : > { %v5821_v4 = vpack.i.bf16 %v2831_v29, %v2829_v15 }
 0x582   : > { %5822 = vrot.lane.b32.xlu2 %v5821_v4, %s6294_s18  ;;  %v6254_v4 = vld [vmem:[%s6535_s19 + $0x8] sm:$0xff] }
 0x593   : > { %v5798_v25 = vpop.permute.xlu1 %5797 }
 0x594   : > { %v5800_v30 = vunpack.i.h.bf16 %v5798_v25  ;;  %v5799_v62 = vunpack.i.l.bf16 %v5798_v25 }
 0x599   : > { %v5793_v18 = vpop.permute.xlu2 %5792 }
 0x59a   : > { %v5795_v43 = vunpack.i.h.bf16 %v5793_v18  ;;  %v5794_v36 = vunpack.i.l.bf16 %v5793_v18 }
 0x59c   : > { %v3621_v33 = vsel %vm3614_vm9, %v3604_v11, %v5794_v36  ;;  %v3622_v19 = vsel %vm3614_vm9, %v3605_v46, %v5795_v43  ;;  %v6256_v43 = vld [vmem:[%s6535_s19 + $0x18] sm:$0xff] }
 0x59d   : > { %v3638_v60 = vsel %vm3631_vm8, %v3621_v33, %v5799_v62  ;;  %v3639_v53 = vsel %vm3631_vm8, %v3622_v19, %v5800_v30  ;;  %v6258_v33 = vld [vmem:[%s6535_s19 + $0x28] sm:$0xff] }
 0x59e   : > { %v3651_v27 = vpack.c.bf16 %v3639_v53, %v3638_v60  ;;  %v5818_v60 = vpop.permute.xlu0 %5817 }
 0x5a0   : > { %3747 = vmatmul.bf16.gmra.mxu3 %v3651_v27  ;;  %v5820_v27 = vunpack.i.h.bf16 %v5818_v60 }
 0x5a1   : > { %v3391_v13 = vpop.f32.mrf.mxu2 }
 0x5a9   : > { %v3393_v10 = vpop.f32.mrf.mxu2  ;;  %v5808_v20 = vpop.permute.xlu2 %5807 }
 0x5aa   : > { %v5826_v8 = vpack.i.bf16 %v3393_v10, %v3391_v13  ;;  %v5810_v2 = vunpack.i.h.bf16 %v5808_v20  ;;  %v5809_v28 = vunpack.i.l.bf16 %v5808_v20  ;;  %v5819_v13 = vunpack.i.l.bf16 %v5818_v60 }
 0x5ac   : > { %v2834_v26 = vpop.f32.mrf.mxu0  ;;  %5827 = vrot.lane.b32.xlu1 %v5826_v8, %s6292_s16  ;;  %v3624_v61 = vsel %vm3614_vm9, %v3607_v38, %v5810_v2  ;;  %v3623_v47 = vsel %vm3614_vm9, %v3606_v9, %v5809_v28  ;;  %v10168_v8 = vld [vmem:[#allocation24_spill] sm:$0xff]  ;;  %v3608_v20 = vsel %vm1165_vm0, %v10169_v56, %v5819_v13  ;;  %v5833_v9 = vpop.permute.xlu0 %5832 }
 0x5b1   : > { %v3396_v49 = vpop.f32.mrf.mxu2 }
 0x5b4   : > { %v2836_v31 = vpop.f32.mrf.mxu0 }
 0x5b5   : > { %v5836_v21 = vpack.i.bf16 %v2836_v31, %v2834_v26 }
 0x5b7   : > { %5837 = vrot.lane.b32.xlu2 %v5836_v21, %s6294_s18 }
 0x5b9   : > { %v3398_v45 = vpop.f32.mrf.mxu2 }
 0x5ba   : > { %v5841_v3 = vpack.i.bf16 %v3398_v45, %v3396_v49  ;;  %v3609_v49 = vsel %vm1165_vm0, %v10168_v8, %v5820_v27 }
 0x5bc   : > { %5842 = vrot.lane.b32.xlu1 %v5841_v3, %s6292_s16  ;;  %v6259_v3 = vld [vmem:[%s6535_s19 + $0x30] sm:$0xff] }
 0x5bf   : > { %v5813_v6 = vpop.permute.xlu1 %5812 }
 0x5c0   : > { %v5815_v41 = vunpack.i.h.bf16 %v5813_v6  ;;  %v5814_v51 = vunpack.i.l.bf16 %v5813_v6 }
 0x5c1   : > { %v3401_v5 = vpop.f32.mrf.mxu2 }
 0x5c2   : > { %v3640_v52 = vsel %vm3631_vm8, %v3623_v47, %v5814_v51  ;;  %v3641_v42 = vsel %vm3631_vm8, %v3624_v61, %v5815_v41  ;;  %v5835_v51 = vunpack.i.h.bf16 %v5833_v9  ;;  %v5834_v61 = vunpack.i.l.bf16 %v5833_v9 }
 0x5c3   : > { %v2839_v59 = vpop.f32.mrf.mxu0  ;;  %v3652_v15 = vpack.c.bf16 %v3641_v42, %v3640_v52 }
 0x5c4   : > { %v3611_v42 = vsel %vm1165_vm0, %v8636_v57, %v5835_v51 }
 0x5c5   : > { %3752 = vmatmul.bf16.gmra.mxu3 %v3652_v15  ;;  %v10170_v15 = vld [vmem:[#allocation21_spill] sm:$0xff] }
 0x5c9   : > { %v3403_v1 = vpop.f32.mrf.mxu2 }
 0x5ca   : > { %v5856_v32 = vpack.i.bf16 %v3403_v1, %v3401_v5  ;;  %v3610_v5 = vsel %vm1165_vm0, %v10170_v15, %v5834_v61 }
 0x5cb   : > { %v2841_v39 = vpop.f32.mrf.mxu0 }
 0x5cc   : > { %v5851_v16 = vpack.i.bf16 %v2841_v39, %v2839_v59  ;;  %5857 = vrot.lane.b32.xlu1 %v5856_v32, %s6292_s16 }
 0x5ce   : > { %5852 = vrot.lane.b32.xlu2 %v5851_v16, %s6294_s18 }
 0x5dc   : > { %v5823_v53 = vpop.permute.xlu2 %5822 }
 0x5dd   : > { %v5825_v10 = vunpack.i.h.bf16 %v5823_v53  ;;  %v5824_v26 = vunpack.i.l.bf16 %v5823_v53 }
 0x5df   : > { %v3626_v28 = vsel %vm3614_vm9, %v3609_v49, %v5825_v10  ;;  %v3625_v45 = vsel %vm3614_vm9, %v3608_v20, %v5824_v26  ;;  %v6260_v20 = vld [vmem:[%s6535_s19 + $0x38] sm:$0xff] }
 0x5e1   : > { %v3733_v44 = vpop.f32.mrf.mxu3 }
 0x5e2   : > { %v3734_v34 = vadd.f32 %v8964_v22, %v3733_v44 }
 0x5e4   : > { %v8968_v54 = vadd.f32 %v6253_v55, %v3734_v34 }
 0x5e6   : > { %3789 = vadd.xlane.f32.xlu0 %v8968_v54 }
 0x5e9   : > { %v3735_v37 = vpop.f32.mrf.mxu3 }
 0x5ea   : > { %v3736_v24 = vadd.f32 %v8964_v22, %v3735_v37  ;;  %v5848_v37 = vpop.permute.xlu0 %5847 }
 0x5eb   : > { %v5850_v57 = vunpack.i.h.bf16 %v5848_v37 }
 0x5ec   : > { %v8974_v14 = vadd.f32 %v6254_v4, %v3736_v24 }
 0x5f1   : > { %v3738_v63 = vpop.f32.mrf.mxu3 }
 0x5f2   : > { %v3739_v29 = vadd.f32 %v8964_v22, %v3738_v63  ;;  %v6297_v63 = vmov 128.0  }
 0x5f3   : > { %6123 = vrcp.f32 %v6297_v63 }
 0x5f4   : > { %v8977_v40 = vadd.f32 %v6255_v50, %v3739_v29  ;;  %v5849_v29 = vunpack.i.l.bf16 %v5848_v37 }
 0x5f6   : > { %3793 = vadd.xlane.f32.xlu1 %v8977_v40 }
 0x5f7   : > { %3791 = vadd.xlane.f32.xlu2 %v8974_v14 }
 0x5f9   : > { %v3740_v25 = vpop.f32.mrf.mxu3 }
 0x5fa   : > { %v3741_v18 = vadd.f32 %v8964_v22, %v3740_v25 }
 0x5fc   : > { %v8983_v36 = vadd.f32 %v6256_v43, %v3741_v18  ;;  %v3613_v18 = vsel %vm1165_vm0, %v8687_v0, %v5850_v57  ;;  %v3612_v43 = vsel %vm1165_vm0, %v8678_v35, %v5849_v29 }
 0x5ff   : > { %3795 = vadd.xlane.f32.xlu2 %v8983_v36 }
 0x601   : > { %v3743_v7 = vpop.f32.mrf.mxu3 }
 0x602   : > { %v3744_v46 = vadd.f32 %v8964_v22, %v3743_v7 }
 0x604   : > { %v8988_v11 = vadd.f32 %v6257_v48, %v3744_v46  ;;  %v6124_v48 = vpop.eup %6123 }
 0x605   : > { %v3822_v27 = vmul.f32 128.0, %v6124_v48  ;;  %vm3826_vm10 = vweird.f32 %v6124_v48 }
 0x606   : > { %3797 = vadd.xlane.f32.xlu0 %v8988_v11 }
 0x607   : > { %v3823_v13 = vsub.f32 1.0, %v3822_v27  ;;  %v5700_v27 = vld [vmem:[%s9966_s9 + $0x74] sm:$0xf] }
 0x609   : > { %v3745_v30 = vpop.f32.mrf.mxu3  ;;  %v3824_v0 = vmul.f32 %v6124_v48, %v3823_v13 }
 0x60a   : > { %v3746_v62 = vadd.f32 %v8964_v22, %v3745_v30 }
 0x60b   : > { %v3825_v10 = vadd.f32 %v6124_v48, %v3824_v0  ;;  %v5584_v0 = vld [vmem:[%s9966_s9 + $0x78] sm:$0xf0] }
 0x60c   : > { %v8993_v19 = vadd.f32 %v6258_v33, %v3746_v62 }
 0x60d   : > { %v9025_v35 = vsel %vm3826_vm10, %v6124_v48, %v3825_v10  ;;  %v5587_v10 = vor.u32 %v5700_v27, %v5584_v0  ;;  %v5689_v27 = vld [vmem:[%s9966_s9 + $0x14] sm:$0xf0]  ;;  %v5536_v0 = vld [vmem:[%s9966_s9 + $0x18] sm:$0xf0] }
 0x60e   : > { %3799 = vadd.xlane.f32.xlu1 %v8993_v19 }
 0x60f   : > { %4315 = vmatpush.bf16.msrb.mxu1 %v5587_v10 }
 0x611   : > { %v5838_v41 = vpop.permute.xlu2 %5837 }
 0x612   : > { %v5840_v47 = vunpack.i.h.bf16 %v5838_v41  ;;  %v5839_v59 = vunpack.i.l.bf16 %v5838_v41 }
 0x614   : > { %v3628_v1 = vsel %vm3614_vm9, %v3611_v42, %v5840_v47  ;;  %v3627_v32 = vsel %vm3614_vm9, %v3610_v5, %v5839_v59 }
 0x61e   : > { %v5828_v31 = vpop.permute.xlu1 %5827 }
 0x61f   : > { %v5830_v58 = vunpack.i.h.bf16 %v5828_v31  ;;  %v5829_v12 = vunpack.i.l.bf16 %v5828_v31 }
 0x621   : > { %v3642_v23 = vsel %vm3631_vm8, %v3625_v45, %v5829_v12  ;;  %v3643_v38 = vsel %vm3631_vm8, %v3626_v28, %v5830_v58 }
 0x622   : > { %v3653_v17 = vpack.c.bf16 %v3643_v38, %v3642_v23  ;;  %v6261_v23 = vld [vmem:[%s6535_s19 + $0x40] sm:$0xff] }
 0x623   : > { %v3748_v21 = vpop.f32.mrf.mxu3 }
 0x624   : > { %v3749_v2 = vadd.f32 %v8964_v22, %v3748_v21  ;;  %3757 = vmatmul.bf16.gmra.mxu3 %v3653_v17 }
 0x626   : > { %v9004_v6 = vadd.f32 %v6259_v3, %v3749_v2 }
 0x628   : > { %3801 = vadd.xlane.f32.xlu1 %v9004_v6  ;;  %v5853_v24 = vpop.permute.xlu2 %5852 }
 0x629   : > { %v5855_v4 = vunpack.i.h.bf16 %v5853_v24  ;;  %v5854_v50 = vunpack.i.l.bf16 %v5853_v24 }
 0x62b   : > { %v3630_v30 = vsel %vm3614_vm9, %v3613_v18, %v5855_v4  ;;  %v3629_v62 = vsel %vm3614_vm9, %v3612_v43, %v5854_v50  ;;  %v3750_v21 = vpop.f32.mrf.mxu3 }
 0x62c   : > { %v3751_v56 = vadd.f32 %v8964_v22, %v3750_v21  ;;  %v5699_v21 = vld [vmem:[%s9966_s9 + $0x64] sm:$0xf0] }
 0x62e   : > { %v5843_v52 = vpop.permute.xlu1 %5842  ;;  %v9035_v58 = vadd.f32 %v6260_v20, %v3751_v56  ;;  %v5698_v56 = vld [vmem:[%s9966_s9 + $0x64] sm:$0xf] }
 0x62f   : > { %v5845_v39 = vunpack.i.h.bf16 %v5843_v52  ;;  %v5844_v16 = vunpack.i.l.bf16 %v5843_v52 }
 0x631   : > { %v3644_v44 = vsel %vm3631_vm8, %v3627_v32, %v5844_v16  ;;  %v3645_v34 = vsel %vm3631_vm8, %v3628_v1, %v5845_v39  ;;  %v6262_v39 = vld [vmem:[%s6535_s19 + $0x48] sm:$0xff] }
 0x632   : > { %v3654_v55 = vpack.c.bf16 %v3645_v34, %v3644_v44 }
 0x634   : > { %3762 = vmatmul.bf16.gmra.mxu3 %v3654_v55 }
 0x63e   : > { %v5858_v25 = vpop.permute.xlu1 %5857 }
 0x63f   : > { %v5860_v7 = vunpack.i.h.bf16 %v5858_v25  ;;  %v5859_v46 = vunpack.i.l.bf16 %v5858_v25  ;;  %v6264_v25 = vld [vmem:[%s6535_s19 + $0x58] sm:$0xff] }
 0x641   : > { %v3646_v33 = vsel %vm3631_vm8, %v3629_v62, %v5859_v46  ;;  %v3647_v60 = vsel %vm3631_vm8, %v3630_v30, %v5860_v7  ;;  %v6265_v7 = vld [vmem:[%s6535_s19 + $0x60] sm:$0xff]  ;;  %v6266_v62 = vld [vmem:[%s6535_s19 + $0x68] sm:$0xff] }
 0x642   : > { %v3655_v53 = vpack.c.bf16 %v3647_v60, %v3646_v33  ;;  %v5582_v60 = vld [vmem:[%s9966_s9 + $0x70] sm:$0xf] }
 0x644   : > { %3767 = vmatmul.bf16.gmra.mxu3 %v3655_v53  ;;  %v5701_v53 = vld [vmem:[%s9966_s9 + $0x74] sm:$0xf0] }
 0x645   : > { %v5583_v13 = vor.u32 %v5701_v53, %v5582_v60  ;;  %v5534_v53 = vld [vmem:[%s9966_s9 + $0x10] sm:$0xf] }
 0x647   : > { %4266 = vmatpush.bf16.msrb.mxu0 %v5583_v13  ;;  %v5535_v13 = vor.u32 %v5689_v27, %v5534_v53 }
 0x648   : > { %v3753_v12 = vpop.f32.mrf.mxu3 }
 0x649   : > { %v3754_v28 = vadd.f32 %v8964_v22, %v3753_v12  ;;  %v5576_v12 = vld [vmem:[%s9966_s9 + $0x68] sm:$0xf0] }
 0x64b   : > { %v9044_v38 = vadd.f32 %v6261_v23, %v3754_v28  ;;  %v5697_v23 = vld [vmem:[%s9966_s9 + $0x54] sm:$0xf0] }
 0x650   : > { %v3755_v52 = vpop.f32.mrf.mxu3 }
 0x651   : > { %v3756_v42 = vadd.f32 %v8964_v22, %v3755_v52  ;;  %v5558_v52 = vld [vmem:[%s9966_s9 + $0x40] sm:$0xf] }
 0x659   : > { %v3790_v26 = vpop.xlane.xlu0 %3789 }
 0x65a   : > { %v3828_v8 = vmul.f32 %v9025_v35, %v3790_v26 }
 0x65c   : > { %v9029_v49 = vsub.f32 %v8968_v54, %v3828_v8 }
 0x65e   : > { %v3860_v31 = vmul.f32 %v9029_v49, %v9029_v49 }
 0x660   : > { %3876 = vadd.xlane.f32.xlu2 %v3860_v31  ;;  %v5574_v31 = vld [vmem:[%s9966_s9 + $0x60] sm:$0xf] }
 0x661   : > { %v5575_v20 = vor.u32 %v5699_v21, %v5574_v31 }
 0x663   : > { %4267 = vmatpush.bf16.msrb.mxu0 %v5575_v20  ;;  %v5526_v20 = vld [vmem:[%s9966_s9] sm:$0xf] }
 0x668   : > { %3803 = vadd.xlane.f32.xlu2 %v9035_v58 }
 0x669   : > { %v3794_v3 = vpop.xlane.xlu1 %3793 }
 0x66a   : > { %v3792_v2 = vpop.xlane.xlu2 %3791  ;;  %v3830_v17 = vmul.f32 %v9025_v35, %v3794_v3  ;;  %v5566_v3 = vld [vmem:[%s9966_s9 + $0x50] sm:$0xf] }
 0x66b   : > { %v3829_v45 = vmul.f32 %v9025_v35, %v3792_v2  ;;  %v6267_v2 = vld [vmem:[%s6535_s19 + $0x70] sm:$0xff] }
 0x66c   : > { %v9051_v51 = vsub.f32 %v8977_v40, %v3830_v17  ;;  %v5696_v17 = vld [vmem:[%s9966_s9 + $0x54] sm:$0xf] }
 0x66d   : > { %v9041_v54 = vsub.f32 %v8974_v14, %v3829_v45  ;;  %v5579_v45 = vor.u32 %v5698_v56, %v5576_v12  ;;  %v5687_v12 = vld [vmem:[%s9966_s9 + $0x4] sm:$0xf0] }
 0x66e   : > { %v3862_v59 = vmul.f32 %v9051_v51, %v9051_v51 }
 0x66f   : > { %v3861_v9 = vmul.f32 %v9041_v54, %v9041_v54  ;;  %4316 = vmatpush.bf16.msrb.mxu1 %v5579_v45  ;;  %v5527_v45 = vor.u32 %v5687_v12, %v5526_v20 }
 0x670   : > { %3805 = vadd.xlane.f32.xlu2 %v9044_v38 }
 0x671   : > { %3878 = vadd.xlane.f32.xlu0 %v3861_v9  ;;  %v5567_v9 = vor.u32 %v5697_v23, %v5566_v3  ;;  %v5528_v3 = vld [vmem:[%s9966_s9 + $0x8] sm:$0xf0] }
 0x672   : > { %v3796_v41 = vpop.xlane.xlu2 %3795 }
 0x673   : > { %v3831_v14 = vmul.f32 %v9025_v35, %v3796_v41  ;;  %v5568_v41 = vld [vmem:[%s9966_s9 + $0x58] sm:$0xf0]  ;;  %4268 = vmatpush.bf16.msrb.mxu0 %v5567_v9 }
 0x675   : > { %v9055_v61 = vsub.f32 %v8983_v36, %v3831_v14  ;;  %v9067_v36 = vadd.f32 %v6262_v39, %v3756_v42  ;;  %v5571_v14 = vor.u32 %v5696_v17, %v5568_v41  ;;  %v5695_v42 = vld [vmem:[%s9966_s9 + $0x44] sm:$0xf0]  ;;  %v5560_v39 = vld [vmem:[%s9966_s9 + $0x48] sm:$0xf0] }
 0x677   : > { %v3863_v47 = vmul.f32 %v9055_v61, %v9055_v61  ;;  %4317 = vmatpush.bf16.msrb.mxu1 %v5571_v14 }
 0x679   : > { %3882 = vadd.xlane.f32.xlu1 %v3863_v47  ;;  %3880 = vadd.xlane.f32.xlu0 %v3862_v59  ;;  %v3798_v15 = vpop.xlane.xlu0 %3797 }
 0x67a   : > { %v3832_v40 = vmul.f32 %v9025_v35, %v3798_v15  ;;  %v5694_v15 = vld [vmem:[%s9966_s9 + $0x44] sm:$0xf] }
 0x67c   : > { %v9064_v5 = vsub.f32 %v8988_v11, %v3832_v40  ;;  %v5559_v40 = vor.u32 %v5695_v42, %v5558_v52 }
 0x67e   : > { %v3864_v16 = vmul.f32 %v9064_v5, %v9064_v5  ;;  %4269 = vmatpush.bf16.msrb.mxu0 %v5559_v40 }
 0x681   : > { %3807 = vadd.xlane.f32.xlu0 %v9067_v36  ;;  %3884 = vadd.xlane.f32.xlu1 %v3864_v16  ;;  %v3800_v1 = vpop.xlane.xlu1 %3799 }
 0x682   : > { %v3833_v32 = vmul.f32 %v9025_v35, %v3800_v1  ;;  %v5563_v1 = vor.u32 %v5694_v15, %v5560_v39 }
 0x684   : > { %v9074_v44 = vsub.f32 %v8993_v19, %v3833_v32  ;;  %v6263_v19 = vld [vmem:[%s6535_s19 + $0x50] sm:$0xff]  ;;  %4318 = vmatpush.bf16.msrb.mxu1 %v5563_v1 }
 0x685   : > { %v5550_v32 = vld [vmem:[%s9966_s9 + $0x30] sm:$0xf] }
 0x686   : > { %v3865_v11 = vmul.f32 %v9074_v44, %v9074_v44 }
 0x688   : > { %3886 = vadd.xlane.f32.xlu2 %v3865_v11  ;;  %v5693_v11 = vld [vmem:[%s9966_s9 + $0x34] sm:$0xf0] }
 0x69b   : > { %v3802_v34 = vpop.xlane.xlu1 %3801 }
 0x69c   : > { %v3834_v55 = vmul.f32 %v9025_v35, %v3802_v34  ;;  %v5692_v34 = vld [vmem:[%s9966_s9 + $0x34] sm:$0xf] }
 0x69e   : > { %v9080_v37 = vsub.f32 %v9004_v6, %v3834_v55  ;;  %v5551_v55 = vor.u32 %v5693_v11, %v5550_v32 }
 0x6a0   : > { %v3866_v24 = vmul.f32 %v9080_v37, %v9080_v37  ;;  %4270 = vmatpush.bf16.msrb.mxu0 %v5551_v55  ;;  %v6268_v55 = vld [vmem:[%s6535_s19 + $0x78] sm:$0xff] }
 0x6a2   : > { %3888 = vadd.xlane.f32.xlu2 %v3866_v24  ;;  %v5552_v24 = vld [vmem:[%s9966_s9 + $0x38] sm:$0xf0] }
 0x6a7   : > { %v3758_v63 = vpop.f32.mrf.mxu3 }
 0x6a8   : > { %v3759_v57 = vadd.f32 %v8964_v22, %v3758_v63  ;;  %v5555_v63 = vor.u32 %v5692_v34, %v5552_v24 }
 0x6aa   : > { %v9086_v29 = vadd.f32 %v6263_v19, %v3759_v57  ;;  %4319 = vmatpush.bf16.msrb.mxu1 %v5555_v63 }
 0x6ac   : > { %3809 = vadd.xlane.f32.xlu0 %v9086_v29 }
 0x6af   : > { %v3760_v4 = vpop.f32.mrf.mxu3 }
 0x6b0   : > { %v3761_v50 = vadd.f32 %v8964_v22, %v3760_v4  ;;  %v5542_v4 = vld [vmem:[%s9966_s9 + $0x20] sm:$0xf] }
 0x6b2   : > { %v9091_v18 = vadd.f32 %v6264_v25, %v3761_v50  ;;  %v5691_v50 = vld [vmem:[%s9966_s9 + $0x24] sm:$0xf0]  ;;  %v5690_v25 = vld [vmem:[%s9966_s9 + $0x24] sm:$0xf] }
 0x6b4   : > { %3811 = vadd.xlane.f32.xlu1 %v9091_v18 }
 0x6b7   : > { %v3763_v6 = vpop.f32.mrf.mxu3 }
 0x6b8   : > { %v3764_v43 = vadd.f32 %v8964_v22, %v3763_v6  ;;  %v5543_v6 = vor.u32 %v5691_v50, %v5542_v4 }
 0x6ba   : > { %v9096_v46 = vadd.f32 %v6265_v7, %v3764_v43  ;;  %v5544_v43 = vld [vmem:[%s9966_s9 + $0x28] sm:$0xf0]  ;;  %4271 = vmatpush.bf16.msrb.mxu0 %v5543_v6 }
 0x6bc   : > { %3813 = vadd.xlane.f32.xlu1 %v9096_v46 }
 0x6be   : > { %4272 = vmatpush.bf16.msrb.mxu0 %v5535_v13 }
 0x6bf   : > { %v3765_v48 = vpop.f32.mrf.mxu3 }
 0x6c0   : > { %v3766_v30 = vadd.f32 %v8964_v22, %v3765_v48 }
 0x6c2   : > { %v9101_v33 = vadd.f32 %v6266_v62, %v3766_v30  ;;  %v5547_v30 = vor.u32 %v5690_v25, %v5544_v43  ;;  %4273 = vmatpush.bf16.msrb.mxu0 %v5527_v45 }
 0x6c4   : > { %3815 = vadd.xlane.f32.xlu2 %v9101_v33  ;;  %4320 = vmatpush.bf16.msrb.mxu1 %v5547_v30 }
 0x6c7   : > { %v3768_v26 = vpop.f32.mrf.mxu3 }
 0x6c8   : > { %v3769_v8 = vadd.f32 %v8964_v22, %v3768_v26 }
 0x6ca   : > { %v9130_v28 = vadd.f32 %v6267_v2, %v3769_v8  ;;  %v5686_v2 = vld [vmem:[%s9966_s9 + $0x4] sm:$0xf] }
 0x6cb   : > { %v5531_v9 = vor.u32 %v5686_v2, %v5528_v3 }
 0x6cc   : > { %3817 = vadd.xlane.f32.xlu2 %v9130_v28 }
 0x6d3   : > { %v3877_v47 = vpop.xlane.xlu2 %3876 }
 0x6d4   : > { %v3908_v59 = vmul.f32 %v3877_v47, %v9025_v35  ;;  %v3770_v47 = vpop.f32.mrf.mxu3 }
 0x6d5   : > { %v3771_v15 = vadd.f32 %v8964_v22, %v3770_v47 }
 0x6d6   : > { %v9158_v16 = vadd.f32 1e-05, %v3908_v59 }
 0x6d7   : > { %v9233_v24 = vadd.f32 %v6268_v55, %v3771_v15 }
 0x6d8   : > { %6125 = vrsqrt.f32 %v9158_v16  ;;  %vm3946_vm11 = vweird.f32 %v9158_v16 }
 0x6db   : > { %v3804_v57 = vpop.xlane.xlu2 %3803 }
 0x6dc   : > { %v3835_v19 = vmul.f32 %v9025_v35, %v3804_v57 }
 0x6de   : > { %v9186_v7 = vpop.eup %6125  ;;  %v9189_v48 = vsub.f32 %v9035_v58, %v3835_v19  ;;  %v5688_v58 = vld [vmem:[%s9966_s9 + $0x14] sm:$0xf] }
 0x6df   : > { %v3941_v62 = vmul.f32 %v9186_v7, %v9158_v16  ;;  %v5539_v10 = vor.u32 %v5688_v58, %v5536_v0  ;;  %vm3947_vm0 = vweird.f32 %v9186_v7  ;;  %v9243_v16 = vld [vmem:[%s9964_s7] ss:$0 sm:$0xff] }
 0x6e0   : > { %v3867_v60 = vmul.f32 %v9189_v48, %v9189_v48  ;;  %vm3948_vm12 = vmor %vm3946_vm11, %vm3947_vm0 }
 0x6e1   : > { %v3942_v26 = vmul.f32 %v9186_v7, %v3941_v62  ;;  %4321 = vmatpush.bf16.msrb.mxu1 %v5539_v10 }
 0x6e2   : > { %3890 = vadd.xlane.f32.xlu0 %v3867_v60 }
 0x6e3   : > { %v3806_v8 = vpop.xlane.xlu2 %3805  ;;  %v3943_v41 = vmul.f32 0.5, %v3942_v26 }
 0x6e4   : > { %v3879_v31 = vpop.xlane.xlu0 %3878  ;;  %v3836_v21 = vmul.f32 %v9025_v35, %v3806_v8 }
 0x6e5   : > { %v3909_v56 = vmul.f32 %v3879_v31, %v9025_v35  ;;  %4322 = vmatpush.bf16.msrb.mxu1 %v5531_v9  ;;  %v3944_v59 = vsub.f32 1.5, %v3943_v41 }
 0x6e6   : > { %v9223_v23 = vsub.f32 %v9044_v38, %v3836_v21 }
 0x6e7   : > { %v3925_v17 = vadd.f32 1e-05, %v3909_v56  ;;  %v3945_v11 = vmul.f32 %v9186_v7, %v3944_v59 }
 0x6e8   : > { %v3868_v14 = vmul.f32 %v9223_v23, %v9223_v23 }
 0x6e9   : > { %6127 = vrsqrt.f32 %v3925_v17  ;;  %v3949_v22 = vsel %vm3948_vm12, %v9186_v7, %v3945_v11  ;;  %vm3956_vm14 = vweird.f32 %v3925_v17 }
 0x6ea   : > { %3892 = vadd.xlane.f32.xlu0 %v3868_v14  ;;  %v4100_v30 = vmul.f32 %v3949_v22, %v9029_v49  ;;  %v9254_v49 = vld [vmem:[%s9965_s8] ss:$0 sm:$0xff] }
 0x6ec   : > { %v3883_v52 = vpop.xlane.xlu1 %3882  ;;  %v3881_v42 = vpop.xlane.xlu0 %3880 }
 0x6ed   : > { %v3911_v38 = vmul.f32 %v3883_v52, %v9025_v35  ;;  %v3910_v40 = vmul.f32 %v3881_v42, %v9025_v35 }
 0x6ef   : > { %v6128_v39 = vpop.eup %6127  ;;  %v3927_v1 = vadd.f32 1e-05, %v3911_v38  ;;  %v3926_v32 = vadd.f32 1e-05, %v3910_v40 }
 0x6f0   : > { %v3951_v34 = vmul.f32 %v6128_v39, %v3925_v17  ;;  %vm3957_vm13 = vweird.f32 %v6128_v39 }
 0x6f1   : > { %6129 = vrsqrt.f32 %v3927_v1  ;;  %vm3958_vm15 = vmor %vm3956_vm14, %vm3957_vm13  ;;  %vm3976_vm3 = vweird.f32 %v3927_v1  ;;  %vm3966_vm5 = vweird.f32 %v3926_v32 }
 0x6f2   : > { %v3952_v63 = vmul.f32 %v6128_v39, %v3951_v34  ;;  %6131 = vrsqrt.f32 %v3926_v32  ;;  %3819 = vadd.xlane.f32.xlu0 %v9233_v24 }
 0x6f4   : > { %v3953_v57 = vmul.f32 0.5, %v3952_v63  ;;  %v3808_v19 = vpop.xlane.xlu0 %3807  ;;  %v3885_v4 = vpop.xlane.xlu1 %3884 }
 0x6f5   : > { %v3837_v50 = vmul.f32 %v9025_v35, %v3808_v19  ;;  %v3912_v6 = vmul.f32 %v3885_v4, %v9025_v35 }
 0x6f6   : > { %v3954_v25 = vsub.f32 1.5, %v3953_v57 }
 0x6f7   : > { %v6130_v43 = vpop.eup %6129  ;;  %v9247_v62 = vsub.f32 %v9067_v36, %v3837_v50  ;;  %v3928_v27 = vadd.f32 1e-05, %v3912_v6  ;;  %v4120_v36 = vmul.f32 %v9243_v16, %v4100_v30 }
 0x6f8   : > { %v6132_v7 = vpop.eup %6131  ;;  %v3955_v60 = vmul.f32 %v6128_v39, %v3954_v25  ;;  %v3971_v53 = vmul.f32 %v6130_v43, %v3927_v1  ;;  %vm3977_vm1 = vweird.f32 %v6130_v43 }
 0x6f9   : > { %v3961_v13 = vmul.f32 %v6132_v7, %v3926_v32  ;;  %v3869_v58 = vmul.f32 %v9247_v62, %v9247_v62  ;;  %6133 = vrsqrt.f32 %v3928_v27  ;;  %v9261_v45 = vadd.f32 %v9254_v49, %v4120_v36  ;;  %vm3978_vm4 = vmor %vm3976_vm3, %vm3977_vm1 }
 0x6fa   : > { %v3959_v0 = vsel %vm3958_vm15, %v6128_v39, %v3955_v60  ;;  %v3972_v10 = vmul.f32 %v6130_v43, %v3971_v53  ;;  %vm3967_vm2 = vweird.f32 %v6132_v7  ;;  %vm3986_vm10 = vweird.f32 %v3928_v27 }
 0x6fb   : > { %v4101_v26 = vmul.f32 %v3959_v0, %v9041_v54  ;;  %v3962_v8 = vmul.f32 %v6132_v7, %v3961_v13  ;;  %3894 = vadd.xlane.f32.xlu1 %v3869_v58  ;;  %v3887_v20 = vpop.xlane.xlu2 %3886  ;;  %vm3968_vm7 = vmor %vm3966_vm5, %vm3967_vm2 }
 0x6fc   : > { %v3973_v31 = vmul.f32 0.5, %v3972_v10  ;;  %v3913_v2 = vmul.f32 %v3887_v20, %v9025_v35 }
 0x6fd   : > { %v4121_v21 = vmul.f32 %v9243_v16, %v4101_v26  ;;  %v3963_v56 = vmul.f32 0.5, %v3962_v8 }
 0x6fe   : > { %v3974_v12 = vsub.f32 1.5, %v3973_v31  ;;  %v3929_v41 = vadd.f32 1e-05, %v3913_v2 }
 0x6ff   : > { %v9264_v3 = vadd.f32 %v9254_v49, %v4121_v21  ;;  %v3964_v17 = vsub.f32 1.5, %v3963_v56  ;;  %v6134_v54 = vpop.eup %6133 }
 0x700   : > { %v3975_v9 = vmul.f32 %v6130_v43, %v3974_v12  ;;  %v3981_v47 = vmul.f32 %v6134_v54, %v3928_v27  ;;  %6135 = vrsqrt.f32 %v3929_v41  ;;  %vm3987_vm9 = vweird.f32 %v6134_v54 }
 0x701   : > { %v3965_v14 = vmul.f32 %v6132_v7, %v3964_v17  ;;  %v4156_v59 = vpack.c.bf16 %v9264_v3, %v9261_v45  ;;  %vm3996_vm8 = vweird.f32 %v3929_v41  ;;  %vm3988_vm11 = vmor %vm3986_vm10, %vm3987_vm9 }
 0x702   : > { %v3979_v52 = vsel %vm3978_vm4, %v6130_v43, %v3975_v9  ;;  %v3982_v15 = vmul.f32 %v6134_v54, %v3981_v47 }
 0x703   : > { %v3969_v42 = vsel %vm3968_vm7, %v6132_v7, %v3965_v14  ;;  %4274 = vmatmul.bf16.vlgmr.msrb.gmra.mxu0 %v4156_v59  ;;  %4323 = vmatmul.bf16.vlgmr.msrb.gmra.mxu1 %v4156_v59  ;;  %v4103_v38 = vmul.f32 %v3979_v52, %v9055_v61 }
 0x704   : > { %v4102_v40 = vmul.f32 %v3969_v42, %v9051_v51  ;;  %v3983_v1 = vmul.f32 0.5, %v3982_v15 }
 0x705   : > { %v4123_v34 = vmul.f32 %v9243_v16, %v4103_v38 }
 0x706   : > { %v6136_v39 = vpop.eup %6135  ;;  %v4122_v32 = vmul.f32 %v9243_v16, %v4102_v40  ;;  %v3984_v63 = vsub.f32 1.5, %v3983_v1 }
 0x707   : > { %v3991_v11 = vmul.f32 %v6136_v39, %v3929_v41  ;;  %v9276_v19 = vadd.f32 %v9254_v49, %v4123_v34  ;;  %vm3997_vm6 = vweird.f32 %v6136_v39 }
 0x708   : > { %v9273_v57 = vadd.f32 %v9254_v49, %v4122_v32  ;;  %v3985_v61 = vmul.f32 %v6134_v54, %v3984_v63  ;;  %vm3998_vm0 = vmor %vm3996_vm8, %vm3997_vm6 }
 0x709   : > { %v3992_v55 = vmul.f32 %v6136_v39, %v3991_v11 }
 0x70a   : > { %v4157_v50 = vpack.c.bf16 %v9276_v19, %v9273_v57  ;;  %v3989_v6 = vsel %vm3988_vm11, %v6134_v54, %v3985_v61 }
 0x70b   : > { %v3993_v22 = vmul.f32 0.5, %v3992_v55  ;;  %v4104_v30 = vmul.f32 %v3989_v6, %v9064_v5 }
 0x70d   : > { %v3994_v4 = vsub.f32 1.5, %v3993_v22  ;;  %v4124_v60 = vmul.f32 %v9243_v16, %v4104_v30 }
 0x70f   : > { %v3995_v51 = vmul.f32 %v6136_v39, %v3994_v4  ;;  %v9288_v13 = vadd.f32 %v9254_v49, %v4124_v60 }
 0x711   : > { %v3999_v25 = vsel %vm3998_vm0, %v6136_v39, %v3995_v51 }
 0x712   : > { %v4105_v43 = vmul.f32 %v3999_v25, %v9074_v44 }
 0x713   : > { %4279 = vmatmul.bf16.gmra.mxu0 %v4157_v50  ;;  %4328 = vmatmul.bf16.gmra.mxu1 %v4157_v50 }
 0x714   : > { %v4125_v7 = vmul.f32 %v9243_v16, %v4105_v43 }
 0x715   : > { %v3889_v31 = vpop.xlane.xlu2 %3888 }
 0x716   : > { %v9285_v53 = vadd.f32 %v9254_v49, %v4125_v7  ;;  %v3914_v17 = vmul.f32 %v3889_v31, %v9025_v35 }
 0x718   : > { %v4158_v27 = vpack.c.bf16 %v9285_v53, %v9288_v13  ;;  %v3930_v41 = vadd.f32 1e-05, %v3914_v17  ;;  %v5706_v17 = vld [vmem:[%s9968_s11 + $0x20] sm:$0xff] }
 0x71a   : > { %6137 = vrsqrt.f32 %v3930_v41  ;;  %vm4006_vm13 = vweird.f32 %v3930_v41 }
 0x71f   : > { %v3810_v58 = vpop.xlane.xlu0 %3809 }
 0x720   : > { %v3838_v44 = vmul.f32 %v9025_v35, %v3810_v58 }
 0x722   : > { %v9294_v5 = vsub.f32 %v9086_v29, %v3838_v44 }
 0x723   : > { %4284 = vmatmul.bf16.gmra.mxu0 %v4158_v27  ;;  %4333 = vmatmul.bf16.gmra.mxu1 %v4158_v27  ;;  %v5709_v27 = vld [vmem:[%s9968_s11 + $0x38] sm:$0xff] }
 0x724   : > { %v3870_v0 = vmul.f32 %v9294_v5, %v9294_v5  ;;  %4800 = vmatpush.bf16.msrb.mxu2 %v5709_v27 }
 0x726   : > { %3896 = vadd.xlane.f32.xlu1 %v3870_v0 }
 0x727   : > { %v3812_v10 = vpop.xlane.xlu1 %3811 }
 0x728   : > { %v3839_v36 = vmul.f32 %v9025_v35, %v3812_v10 }
 0x72a   : > { %v9300_v26 = vsub.f32 %v9091_v18, %v3839_v36 }
 0x72c   : > { %v3871_v8 = vmul.f32 %v9300_v26, %v9300_v26 }
 0x72e   : > { %3898 = vadd.xlane.f32.xlu2 %v3871_v8  ;;  %v5708_v8 = vld [vmem:[%s9968_s11 + $0x30] sm:$0xff] }
 0x72f   : > { %v3814_v21 = vpop.xlane.xlu1 %3813  ;;  %4801 = vmatpush.bf16.msrb.mxu2 %v5708_v8 }
 0x730   : > { %v3840_v56 = vmul.f32 %v9025_v35, %v3814_v21 }
 0x732   : > { %v9306_v29 = vsub.f32 %v9096_v46, %v3840_v56 }
 0x734   : > { %v3872_v20 = vmul.f32 %v9306_v29, %v9306_v29 }
 0x736   : > { %3900 = vadd.xlane.f32.xlu0 %v3872_v20 }
 0x737   : > { %v3816_v12 = vpop.xlane.xlu2 %3815 }
 0x738   : > { %v3841_v2 = vmul.f32 %v9025_v35, %v3816_v12  ;;  %v5707_v12 = vld [vmem:[%s9968_s11 + $0x28] sm:$0xff] }
 0x739   : > { %4802 = vmatpush.bf16.msrb.mxu2 %v5707_v12 }
 0x73a   : > { %v9312_v18 = vsub.f32 %v9101_v33, %v3841_v2  ;;  %v6138_v33 = vpop.eup %6137 }
 0x73b   : > { %v4001_v59 = vmul.f32 %v6138_v33, %v3930_v41  ;;  %vm4007_vm12 = vweird.f32 %v6138_v33  ;;  %v4180_v41 = vld [vmem:[%s9967_s10] sm:$0x3] }
 0x73c   : > { %v3873_v54 = vmul.f32 %v9312_v18, %v9312_v18  ;;  %vm4008_vm14 = vmor %vm4006_vm13, %vm4007_vm12 }
 0x73d   : > { %v4002_v52 = vmul.f32 %v6138_v33, %v4001_v59  ;;  %4803 = vmatpush.bf16.msrb.mxu2 %v5706_v17  ;;  %v5713_v17 = vld [vmem:[%s9968_s11 + $0x58] sm:$0xff] }
 0x73e   : > { %3902 = vadd.xlane.f32.xlu1 %v3873_v54 }
 0x73f   : > { %v3818_v9 = vpop.xlane.xlu2 %3817  ;;  %v4003_v40 = vmul.f32 0.5, %v4002_v52  ;;  %v9365_v52 = vperm.slane %v4180_v41, 0 }
 0x740   : > { %v3842_v46 = vmul.f32 %v9025_v35, %v3818_v9 }
 0x741   : > { %v4004_v39 = vsub.f32 1.5, %v4003_v40  ;;  %v5704_v40 = vld [vmem:[%s9968_s11 + $0x10] sm:$0xff] }
 0x742   : > { %v9319_v14 = vsub.f32 %v9130_v28, %v3842_v46 }
 0x743   : > { %v4005_v34 = vmul.f32 %v6138_v33, %v4004_v39  ;;  %v5716_v39 = vld [vmem:[%s9968_s11 + $0x70] sm:$0xff] }
 0x744   : > { %v3874_v47 = vmul.f32 %v9319_v14, %v9319_v14 }
 0x745   : > { %v4009_v22 = vsel %vm4008_vm14, %v6138_v33, %v4005_v34  ;;  %v5717_v33 = vld [vmem:[%s9968_s11 + $0x78] sm:$0xff] }
 0x746   : > { %3904 = vadd.xlane.f32.xlu2 %v3874_v47  ;;  %v4106_v6 = vmul.f32 %v4009_v22, %v9080_v37  ;;  %v5705_v47 = vld [vmem:[%s9968_s11 + $0x18] sm:$0xff]  ;;  %5718 = vmatpush.bf16.msrb.mxu3 %v5717_v33 }
 0x747   : > { %4849 = vmatpush.bf16.msra.mxu0 %v5717_v33  ;;  %4804 = vmatpush.bf16.msrb.mxu2 %v5705_v47  ;;  %v5712_v33 = vld [vmem:[%s9968_s11 + $0x50] sm:$0xff] }
 0x748   : > { %v4126_v37 = vmul.f32 %v9243_v16, %v4106_v6 }
 0x74a   : > { %v9343_v21 = vadd.f32 %v9254_v49, %v4126_v37  ;;  %5719 = vmatpush.bf16.msrb.mxu3 %v5716_v39 }
 0x74b   : > { %4850 = vmatpush.bf16.msra.mxu0 %v5716_v39  ;;  %4805 = vmatpush.bf16.msrb.mxu2 %v5704_v40 }
 0x755   : > { %v3891_v42 = vpop.xlane.xlu0 %3890 }
 0x756   : > { %v3915_v15 = vmul.f32 %v3891_v42, %v9025_v35  ;;  %v9367_v42 = vperm.slane %v4180_v41, 1 }
 0x758   : > { %v3931_v38 = vadd.f32 1e-05, %v3915_v15 }
 0x75a   : > { %6139 = vrsqrt.f32 %v3931_v38  ;;  %vm4016_vm1 = vweird.f32 %v3931_v38 }
 0x75d   : > { %v3893_v1 = vpop.xlane.xlu0 %3892 }
 0x75e   : > { %v3916_v11 = vmul.f32 %v3893_v1, %v9025_v35 }
 0x760   : > { %v6140_v28 = vpop.eup %6139  ;;  %v3932_v32 = vadd.f32 1e-05, %v3916_v11 }
 0x761   : > { %v4011_v55 = vmul.f32 %v6140_v28, %v3931_v38  ;;  %vm4017_vm15 = vweird.f32 %v6140_v28 }
 0x762   : > { %6141 = vrsqrt.f32 %v3932_v32  ;;  %vm4018_vm2 = vmor %vm4016_vm1, %vm4017_vm15  ;;  %vm4026_vm4 = vweird.f32 %v3932_v32 }
 0x763   : > { %v4012_v63 = vmul.f32 %v6140_v28, %v4011_v55 }
 0x765   : > { %v4013_v4 = vmul.f32 0.5, %v4012_v63  ;;  %v3820_v61 = vpop.xlane.xlu0 %3819 }
 0x766   : > { %v3843_v51 = vmul.f32 %v9025_v35, %v3820_v61  ;;  %v5703_v61 = vld [vmem:[%s9968_s11 + $0x8] sm:$0xff] }
 0x767   : > { %v4014_v50 = vsub.f32 1.5, %v4013_v4  ;;  %4806 = vmatpush.bf16.msrb.mxu2 %v5703_v61 }
 0x768   : > { %v6142_v25 = vpop.eup %6141  ;;  %v9328_v43 = vsub.f32 %v9233_v24, %v3843_v51  ;;  %v5715_v51 = vld [vmem:[%s9968_s11 + $0x68] sm:$0xff] }
 0x769   : > { %v4015_v30 = vmul.f32 %v6140_v28, %v4014_v50  ;;  %v4021_v7 = vmul.f32 %v6142_v25, %v3932_v32  ;;  %vm4027_vm3 = vweird.f32 %v6142_v25  ;;  %5720 = vmatpush.bf16.msrb.mxu3 %v5715_v51  ;;  %4851 = vmatpush.bf16.msra.mxu0 %v5715_v51 }
 0x76a   : > { %v3875_v60 = vmul.f32 %v9328_v43, %v9328_v43  ;;  %vm4028_vm5 = vmor %vm4026_vm4, %vm4027_vm3 }
 0x76b   : > { %v4019_v58 = vsel %vm4018_vm2, %v6140_v28, %v4015_v30  ;;  %v4022_v0 = vmul.f32 %v6142_v25, %v4021_v7 }
 0x76c   : > { %v4107_v44 = vmul.f32 %v4019_v58, %v9189_v48  ;;  %3906 = vadd.xlane.f32.xlu0 %v3875_v60  ;;  %v5702_v58 = vld [vmem:[%s9968_s11] sm:$0xff] }
 0x76d   : > { %v4023_v56 = vmul.f32 0.5, %v4022_v0  ;;  %4807 = vmatpush.bf16.msrb.mxu2 %v5702_v58 }
 0x76e   : > { %v3895_v24 = vpop.xlane.xlu1 %3894  ;;  %v4127_v36 = vmul.f32 %v9243_v16, %v4107_v44 }
 0x76f   : > { %v3917_v10 = vmul.f32 %v3895_v24, %v9025_v35  ;;  %v4024_v2 = vsub.f32 1.5, %v4023_v56 }
 0x770   : > { %v9346_v48 = vadd.f32 %v9254_v49, %v4127_v36 }
 0x771   : > { %v3933_v31 = vadd.f32 1e-05, %v3917_v10  ;;  %v4025_v46 = vmul.f32 %v6142_v25, %v4024_v2 }
 0x772   : > { %v4159_v20 = vpack.c.bf16 %v9346_v48, %v9343_v21 }
 0x773   : > { %6143 = vrsqrt.f32 %v3933_v31  ;;  %v4029_v38 = vsel %vm4028_vm5, %v6142_v25, %v4025_v46  ;;  %vm4036_vm6 = vweird.f32 %v3933_v31 }
 0x774   : > { %4289 = vmatmul.bf16.gmra.mxu0 %v4159_v20  ;;  %4338 = vmatmul.bf16.gmra.mxu1 %v4159_v20  ;;  %v4108_v55 = vmul.f32 %v4029_v38, %v9223_v23 }
 0x776   : > { %v4128_v30 = vmul.f32 %v9243_v16, %v4108_v55 }
 0x778   : > { %v9412_v8 = vadd.f32 %v9254_v49, %v4128_v30 }
 0x779   : > { %v6144_v54 = vpop.eup %6143 }
 0x77a   : > { %v4031_v9 = vmul.f32 %v6144_v54, %v3933_v31  ;;  %vm4037_vm7 = vweird.f32 %v6144_v54 }
 0x77b   : > { %vm4038_vm9 = vmor %vm4036_vm6, %vm4037_vm7 }
 0x77c   : > { %v4032_v59 = vmul.f32 %v6144_v54, %v4031_v9 }
 0x77e   : > { %v4033_v15 = vmul.f32 0.5, %v4032_v59 }
 0x780   : > { %v4034_v1 = vsub.f32 1.5, %v4033_v15  ;;  %v4275_v11 = vpop.f32.mrf.mxu0  ;;  %v4324_v28 = vpop.f32.mrf.mxu1 }
 0x781   : > { %v9376_v32 = vadd.f32 %v4275_v11, %v9365_v52  ;;  %v9379_v34 = vadd.f32 %v4324_v28, %v9367_v42 }
 0x782   : > { %v4035_v63 = vmul.f32 %v6144_v54, %v4034_v1 }
 0x783   : > { %v4364_v22 = vmul.f32 %v9376_v32, %v9376_v32  ;;  %v4365_v4 = vmul.f32 %v9379_v34, %v9379_v34 }
 0x784   : > { %v4039_v50 = vsel %vm4038_vm9, %v6144_v54, %v4035_v63 }
 0x785   : > { %v4109_v23 = vmul.f32 %v4039_v50, %v9247_v62  ;;  %v4396_v25 = vmul.f32 %v4364_v22, %v9376_v32  ;;  %v4397_v6 = vmul.f32 %v4365_v4, %v9379_v34  ;;  %v5714_v62 = vld [vmem:[%s9968_s11 + $0x60] sm:$0xff]  ;;  %v5711_v22 = vld [vmem:[%s9968_s11 + $0x48] sm:$0xff] }
 0x786   : > { %5721 = vmatpush.bf16.msrb.mxu3 %v5714_v62  ;;  %4852 = vmatpush.bf16.msra.mxu0 %v5714_v62 }
 0x787   : > { %v4428_v7 = vmul.f32 0.044715, %v4396_v25  ;;  %v4429_v60 = vmul.f32 0.044715, %v4397_v6  ;;  %v4129_v27 = vmul.f32 %v9243_v16, %v4109_v23  ;;  %v5710_v6 = vld [vmem:[%s9968_s11 + $0x40] sm:$0xff] }
 0x788   : > { %v4277_v44 = vpop.f32.mrf.mxu0  ;;  %v4326_v37 = vpop.f32.mrf.mxu1 }
 0x789   : > { %v4460_v24 = vadd.f32 %v4428_v7, %v9376_v32  ;;  %v4461_v0 = vadd.f32 %v4429_v60, %v9379_v34  ;;  %v9406_v10 = vadd.f32 %v4277_v44, %v9365_v52  ;;  %v9409_v36 = vadd.f32 %v4326_v37, %v9367_v42 }
 0x78a   : > { %v9415_v31 = vadd.f32 %v9254_v49, %v4129_v27  ;;  %5722 = vmatpush.bf16.msrb.mxu3 %v5713_v17  ;;  %4853 = vmatpush.bf16.msra.mxu0 %v5713_v17 }
 0x78b   : > { %v4492_v56 = vmul.f32 0.7978846, %v4460_v24  ;;  %v4493_v20 = vmul.f32 0.7978846, %v4461_v0  ;;  %v4366_v12 = vmul.f32 %v9406_v10, %v9406_v10  ;;  %v4367_v2 = vmul.f32 %v9409_v36, %v9409_v36 }
 0x78c   : > { %v4160_v54 = vpack.c.bf16 %v9415_v31, %v9412_v8 }
 0x78d   : > { %v4398_v9 = vmul.f32 %v4366_v12, %v9406_v10  ;;  %v4399_v41 = vmul.f32 %v4367_v2, %v9409_v36  ;;  %6145 = vtanh.f32 %v4492_v56 }
 0x78e   : > { %4294 = vmatmul.bf16.gmra.mxu0 %v4160_v54  ;;  %4343 = vmatmul.bf16.gmra.mxu1 %v4160_v54  ;;  %6147 = vtanh.f32 %v4493_v20 }
 0x78f   : > { %v4430_v46 = vmul.f32 0.044715, %v4398_v9  ;;  %v4431_v47 = vmul.f32 0.044715, %v4399_v41  ;;  %5723 = vmatpush.bf16.msrb.mxu3 %v5712_v33  ;;  %4854 = vmatpush.bf16.msra.mxu0 %v5712_v33 }
 0x790   : > { %v4280_v59 = vpop.f32.mrf.mxu0  ;;  %v4329_v15 = vpop.f32.mrf.mxu1 }
 0x791   : > { %v4462_v38 = vadd.f32 %v4430_v46, %v9406_v10  ;;  %v4463_v40 = vadd.f32 %v4431_v47, %v9409_v36  ;;  %v9434_v39 = vadd.f32 %v4280_v59, %v9365_v52  ;;  %v9437_v1 = vadd.f32 %v4329_v15, %v9367_v42 }
 0x793   : > { %v4494_v11 = vmul.f32 0.7978846, %v4462_v38  ;;  %v4495_v28 = vmul.f32 0.7978846, %v4463_v40  ;;  %v4368_v55 = vmul.f32 %v9434_v39, %v9434_v39  ;;  %v4369_v63 = vmul.f32 %v9437_v1, %v9437_v1  ;;  %v6146_v4 = vpop.eup %6145  ;;  %5724 = vmatpush.bf16.msrb.mxu3 %v5711_v22  ;;  %4855 = vmatpush.bf16.msra.mxu0 %v5711_v22 }
 0x794   : > { %v6148_v61 = vpop.eup %6147  ;;  %v4556_v30 = vadd.f32 1.0, %v6146_v4 }
 0x795   : > { %6149 = vtanh.f32 %v4494_v11  ;;  %v4400_v51 = vmul.f32 %v4368_v55, %v9434_v39  ;;  %v4401_v50 = vmul.f32 %v4369_v63, %v9437_v1  ;;  %v4557_v7 = vadd.f32 1.0, %v6148_v61 }
 0x796   : > { %6151 = vtanh.f32 %v4495_v28  ;;  %v4588_v2 = vmul.f32 0.5, %v4556_v30 }
 0x797   : > { %v4432_v23 = vmul.f32 0.044715, %v4400_v51  ;;  %v4433_v25 = vmul.f32 0.044715, %v4401_v50  ;;  %5725 = vmatpush.bf16.msrb.mxu3 %v5710_v6  ;;  %4856 = vmatpush.bf16.msra.mxu0 %v5710_v6  ;;  %v4589_v17 = vmul.f32 0.5, %v4557_v7 }
 0x798   : > { %v4282_v60 = vpop.f32.mrf.mxu0  ;;  %v4331_v27 = vpop.f32.mrf.mxu1  ;;  %v4620_v11 = vmul.f32 %v4588_v2, %v9376_v32 }
 0x799   : > { %v4464_v58 = vadd.f32 %v4432_v23, %v9434_v39  ;;  %v4465_v62 = vadd.f32 %v4433_v25, %v9437_v1  ;;  %v9454_v44 = vadd.f32 %v4282_v60, %v9365_v52  ;;  %v9457_v37 = vadd.f32 %v4331_v27, %v9367_v42  ;;  %v3897_v59 = vpop.xlane.xlu1 %3896 }
 0x79a   : > { %v3918_v40 = vmul.f32 %v3897_v59, %v9025_v35  ;;  %v9468_v28 = vmul.f32 %v4589_v17, %v9379_v34 }
 0x79b   : > { %v6150_v24 = vpop.eup %6149  ;;  %v4496_v0 = vmul.f32 0.7978846, %v4464_v58  ;;  %v4497_v56 = vmul.f32 0.7978846, %v4465_v62  ;;  %v4370_v20 = vmul.f32 %v9454_v44, %v9454_v44  ;;  %v4371_v9 = vmul.f32 %v9457_v37, %v9457_v37 }
 0x79c   : > { %v6152_v12 = vpop.eup %6151  ;;  %v4558_v54 = vadd.f32 1.0, %v6150_v24  ;;  %v9475_v50 = vadd.f32 1e-05, %v3918_v40 }
 0x79d   : > { %v4559_v41 = vadd.f32 1.0, %v6152_v12  ;;  %6153 = vtanh.f32 %v4496_v0  ;;  %v4402_v46 = vmul.f32 %v4370_v20, %v9454_v44  ;;  %v4403_v33 = vmul.f32 %v4371_v9, %v9457_v37 }
 0x79e   : > { %v4590_v47 = vmul.f32 0.5, %v4558_v54  ;;  %6155 = vtanh.f32 %v4497_v56  ;;  %vm4046_vm10 = vweird.f32 %v9475_v50 }
 0x79f   : > { %v4591_v15 = vmul.f32 0.5, %v4559_v41  ;;  %v4434_v38 = vmul.f32 0.044715, %v4402_v46  ;;  %v4435_v63 = vmul.f32 0.044715, %v4403_v33  ;;  %6157 = vrsqrt.f32 %v9475_v50 }
 0x7a0   : > { %v4622_v55 = vmul.f32 %v4590_v47, %v9406_v10  ;;  %v4285_v22 = vpop.f32.mrf.mxu0  ;;  %v4334_v4 = vpop.f32.mrf.mxu1 }
 0x7a1   : > { %v9472_v61 = vmul.f32 %v4591_v15, %v9409_v36  ;;  %v4466_v51 = vadd.f32 %v4434_v38, %v9454_v44  ;;  %v9478_v23 = vadd.f32 %v4285_v22, %v9365_v52  ;;  %v4467_v32 = vadd.f32 %v4435_v63, %v9457_v37  ;;  %v3899_v24 = vpop.xlane.xlu2 %3898 }
 0x7a2   : > { %v4652_v25 = vpack.c.bf16 %v4622_v55, %v4620_v11  ;;  %v9482_v34 = vadd.f32 %v4334_v4, %v9367_v42  ;;  %v3919_v56 = vmul.f32 %v3899_v24, %v9025_v35 }
 0x7a3   : > { %v6154_v10 = vpop.eup %6153  ;;  %v4653_v6 = vpack.c.bf16 %v9472_v61, %v9468_v28  ;;  %v4498_v30 = vmul.f32 0.7978846, %v4466_v51  ;;  %v4499_v36 = vmul.f32 0.7978846, %v4467_v32  ;;  %v4372_v7 = vmul.f32 %v9478_v23, %v9478_v23 }
 0x7a4   : > { %v4373_v60 = vmul.f32 %v9482_v34, %v9482_v34  ;;  %4808 = vmatmul.bf16.vlgmr.msrb.gmra.mxu2 %v4652_v25  ;;  %v6156_v27 = vpop.eup %6155  ;;  %v4560_v0 = vadd.f32 1.0, %v6154_v10  ;;  %v9496_v41 = vadd.f32 1e-05, %v3919_v56 }
 0x7a5   : > { %6159 = vtanh.f32 %v4498_v30  ;;  %v4404_v58 = vmul.f32 %v4372_v7, %v9478_v23  ;;  %v4561_v20 = vadd.f32 1.0, %v6156_v27  ;;  %v9494_v9 = vpop.eup %6157 }
 0x7a6   : > { %6161 = vtanh.f32 %v4499_v36  ;;  %v4405_v62 = vmul.f32 %v4373_v60, %v9482_v34  ;;  %v4041_v33 = vmul.f32 %v9494_v9, %v9475_v50  ;;  %v4592_v38 = vmul.f32 0.5, %v4560_v0 }
 0x7a7   : > { %v4436_v12 = vmul.f32 0.044715, %v4404_v58  ;;  %6163 = vrsqrt.f32 %v9496_v41  ;;  %v4593_v22 = vmul.f32 0.5, %v4561_v20  ;;  %vm4047_vm8 = vweird.f32 %v9494_v9 }
 0x7a8   : > { %v4437_v2 = vmul.f32 0.044715, %v4405_v62  ;;  %v4287_v17 = vpop.f32.mrf.mxu0  ;;  %v4336_v54 = vpop.f32.mrf.mxu1  ;;  %v4042_v4 = vmul.f32 %v9494_v9, %v4041_v33  ;;  %v4624_v58 = vmul.f32 %v4592_v38, %v9434_v39  ;;  %vm4048_vm0 = vmor %vm4046_vm10, %vm4047_vm8  ;;  %vm4056_vm12 = vweird.f32 %v9496_v41 }
 0x7a9   : > { %v9499_v46 = vadd.f32 %v4287_v17, %v9365_v52  ;;  %v9502_v47 = vadd.f32 %v4336_v54, %v9367_v42  ;;  %v4468_v59 = vadd.f32 %v4436_v12, %v9478_v23  ;;  %v3901_v60 = vpop.xlane.xlu0 %3900  ;;  %v4625_v56 = vmul.f32 %v4593_v22, %v9437_v1 }
 0x7aa   : > { %v4469_v15 = vadd.f32 %v4437_v2, %v9482_v34  ;;  %v4043_v7 = vmul.f32 0.5, %v4042_v4  ;;  %v3920_v12 = vmul.f32 %v3901_v60, %v9025_v35 }
 0x7ab   : > { %v6160_v40 = vpop.eup %6159  ;;  %v4374_v11 = vmul.f32 %v9499_v46, %v9499_v46  ;;  %v4375_v55 = vmul.f32 %v9502_v47, %v9502_v47  ;;  %v4500_v51 = vmul.f32 0.7978846, %v4468_v59 }
 0x7ac   : > { %v6162_v63 = vpop.eup %6161  ;;  %v4562_v25 = vadd.f32 1.0, %v6160_v40  ;;  %v4501_v10 = vmul.f32 0.7978846, %v4469_v15  ;;  %v4044_v20 = vsub.f32 1.5, %v4043_v7  ;;  %v3936_v1 = vadd.f32 1e-05, %v3920_v12 }
 0x7ad   : > { %v4563_v32 = vadd.f32 1.0, %v6162_v63  ;;  %v4406_v30 = vmul.f32 %v4374_v11, %v9499_v46  ;;  %v4407_v36 = vmul.f32 %v4375_v55, %v9502_v47  ;;  %6165 = vtanh.f32 %v4500_v51  ;;  %v6164_v17 = vpop.eup %6163 }
 0x7ae   : > { %v4594_v27 = vmul.f32 0.5, %v4562_v25  ;;  %6167 = vtanh.f32 %v4501_v10  ;;  %v4045_v39 = vmul.f32 %v9494_v9, %v4044_v20  ;;  %v4051_v15 = vmul.f32 %v6164_v17, %v9496_v41 }
 0x7af   : > { %v4595_v62 = vmul.f32 0.5, %v4563_v32  ;;  %v4438_v24 = vmul.f32 0.044715, %v4406_v30  ;;  %v4439_v0 = vmul.f32 0.044715, %v4407_v36  ;;  %6169 = vrsqrt.f32 %v3936_v1 }
 0x7b0   : > { %v4626_v2 = vmul.f32 %v4594_v27, %v9454_v44  ;;  %v4052_v44 = vmul.f32 %v6164_v17, %v4051_v15  ;;  %v4049_v63 = vsel %vm4048_vm0, %v9494_v9, %v4045_v39  ;;  %vm4057_vm11 = vweird.f32 %v6164_v17 }
 0x7b1   : > { %v4627_v54 = vmul.f32 %v4595_v62, %v9457_v37  ;;  %v4470_v33 = vadd.f32 %v4438_v24, %v9499_v46  ;;  %v4471_v59 = vadd.f32 %v4439_v0, %v9502_v47  ;;  %v3903_v4 = vpop.xlane.xlu1 %3902  ;;  %v4110_v50 = vmul.f32 %v4049_v63, %v9294_v5  ;;  %vm4058_vm13 = vmor %vm4056_vm12, %vm4057_vm11 }
 0x7b2   : > { %v4654_v55 = vpack.c.bf16 %v4626_v2, %v4624_v58  ;;  %v4053_v22 = vmul.f32 0.5, %v4052_v44  ;;  %v3921_v25 = vmul.f32 %v3903_v4, %v9025_v35  ;;  %vm4066_vm15 = vweird.f32 %v3936_v1 }
 0x7b3   : > { %v4655_v38 = vpack.c.bf16 %v4627_v54, %v4625_v56  ;;  %v4502_v40 = vmul.f32 0.7978846, %v4470_v33  ;;  %v4503_v11 = vmul.f32 0.7978846, %v4471_v59  ;;  %v6166_v37 = vpop.eup %6165  ;;  %v4130_v12 = vmul.f32 %v9243_v16, %v4110_v50 }
 0x7b4   : > { %4813 = vmatmul.bf16.gmra.mxu2 %v4654_v55  ;;  %v6168_v51 = vpop.eup %6167  ;;  %v4054_v32 = vsub.f32 1.5, %v4053_v22  ;;  %v4564_v10 = vadd.f32 1.0, %v6166_v37  ;;  %v3937_v30 = vadd.f32 1e-05, %v3921_v25 }
 0x7b5   : > { %6171 = vtanh.f32 %v4502_v40  ;;  %4862 = vmatmul.bf16.vlgmr.msrb.gmra.mxu3 %v4655_v38  ;;  %v6170_v36 = vpop.eup %6169  ;;  %v4565_v60 = vadd.f32 1.0, %v6168_v51  ;;  %v9537_v40 = vadd.f32 %v9254_v49, %v4130_v12 }
 0x7b6   : > { %6173 = vtanh.f32 %v4503_v11  ;;  %v4055_v7 = vmul.f32 %v6164_v17, %v4054_v32  ;;  %v4061_v9 = vmul.f32 %v6170_v36, %v3936_v1  ;;  %v4596_v0 = vmul.f32 0.5, %v4564_v10 }
 0x7b7   : > { %6175 = vrsqrt.f32 %v3937_v30  ;;  %v4597_v54 = vmul.f32 0.5, %v4565_v60  ;;  %vm4067_vm14 = vweird.f32 %v6170_v36  ;;  %vm4076_vm3 = vweird.f32 %v3937_v30 }
 0x7b8   : > { %v4059_v62 = vsel %vm4058_vm13, %v6164_v17, %v4055_v7  ;;  %v4062_v20 = vmul.f32 %v6170_v36, %v4061_v9  ;;  %v4628_v39 = vmul.f32 %v4596_v0, %v9478_v23  ;;  %vm4068_vm1 = vmor %vm4066_vm15, %vm4067_vm14 }
 0x7b9   : > { %v4111_v56 = vmul.f32 %v4059_v62, %v9300_v26  ;;  %v4629_v37 = vmul.f32 %v4597_v54, %v9482_v34  ;;  %v3905_v32 = vpop.xlane.xlu2 %3904 }
 0x7ba   : > { %v4063_v33 = vmul.f32 0.5, %v4062_v20  ;;  %v3922_v1 = vmul.f32 %v3905_v32, %v9025_v35 }
 0x7bb   : > { %v6172_v27 = vpop.eup %6171  ;;  %v4131_v41 = vmul.f32 %v9243_v16, %v4111_v56 }
 0x7bc   : > { %v6174_v58 = vpop.eup %6173  ;;  %v4566_v24 = vadd.f32 1.0, %v6172_v27  ;;  %v4064_v17 = vsub.f32 1.5, %v4063_v33  ;;  %v3938_v60 = vadd.f32 1e-05, %v3922_v1 }
 0x7bd   : > { %v4567_v5 = vadd.f32 1.0, %v6174_v58  ;;  %v6176_v38 = vpop.eup %6175  ;;  %v9540_v26 = vadd.f32 %v9254_v49, %v4131_v41 }
 0x7be   : > { %v4598_v2 = vmul.f32 0.5, %v4566_v24  ;;  %v4071_v55 = vmul.f32 %v6176_v38, %v3937_v30  ;;  %v4065_v63 = vmul.f32 %v6170_v36, %v4064_v17  ;;  %vm4077_vm2 = vweird.f32 %v6176_v38 }
 0x7bf   : > { %v4599_v59 = vmul.f32 0.5, %v4567_v5  ;;  %v4161_v23 = vpack.c.bf16 %v9540_v26, %v9537_v40  ;;  %vm4078_vm4 = vmor %vm4076_vm3, %vm4077_vm2  ;;  %6177 = vrsqrt.f32 %v3938_v60  ;;  %vm4086_vm7 = vweird.f32 %v3938_v60 }
 0x7c0   : > { %v4630_v15 = vmul.f32 %v4598_v2, %v9499_v46  ;;  %v4072_v46 = vmul.f32 %v6176_v38, %v4071_v55  ;;  %v4069_v4 = vsel %vm4068_vm1, %v6170_v36, %v4065_v63 }
 0x7c1   : > { %v4631_v11 = vmul.f32 %v4599_v59, %v9502_v47  ;;  %4299 = vmatmul.bf16.gmra.mxu0 %v4161_v23  ;;  %4348 = vmatmul.bf16.gmra.mxu1 %v4161_v23  ;;  %v4112_v25 = vmul.f32 %v4069_v4, %v9306_v29 }
 0x7c2   : > { %v4656_v44 = vpack.c.bf16 %v4630_v15, %v4628_v39  ;;  %v4073_v51 = vmul.f32 0.5, %v4072_v46 }
 0x7c3   : > { %v4657_v22 = vpack.c.bf16 %v4631_v11, %v4629_v37  ;;  %v4132_v7 = vmul.f32 %v9243_v16, %v4112_v25 }
 0x7c4   : > { %4818 = vmatmul.bf16.gmra.mxu2 %v4656_v44  ;;  %v4074_v47 = vsub.f32 1.5, %v4073_v51 }
 0x7c5   : > { %4867 = vmatmul.bf16.gmra.mxu3 %v4657_v22  ;;  %v9552_v27 = vadd.f32 %v9254_v49, %v4132_v7  ;;  %v6178_v30 = vpop.eup %6177 }
 0x7c6   : > { %v4075_v34 = vmul.f32 %v6176_v38, %v4074_v47  ;;  %v4081_v58 = vmul.f32 %v6178_v30, %v3938_v60  ;;  %vm4087_vm5 = vweird.f32 %v6178_v30 }
 0x7c7   : > { %vm4088_vm6 = vmor %vm4086_vm7, %vm4087_vm5 }
 0x7c8   : > { %v4079_v10 = vsel %vm4078_vm4, %v6176_v38, %v4075_v34  ;;  %v4082_v62 = vmul.f32 %v6178_v30, %v4081_v58 }
 0x7c9   : > { %v4113_v50 = vmul.f32 %v4079_v10, %v9312_v18 }
 0x7ca   : > { %v4083_v56 = vmul.f32 0.5, %v4082_v62 }
 0x7cb   : > { %v4133_v36 = vmul.f32 %v9243_v16, %v4113_v50 }
 0x7cc   : > { %v4084_v20 = vsub.f32 1.5, %v4083_v56 }
 0x7cd   : > { %v9555_v9 = vadd.f32 %v9254_v49, %v4133_v36 }
 0x7ce   : > { %v4085_v2 = vmul.f32 %v6178_v30, %v4084_v20 }
 0x7cf   : > { %v4162_v29 = vpack.c.bf16 %v9555_v9, %v9552_v27 }
 0x7d0   : > { %v4089_v41 = vsel %vm4088_vm6, %v6178_v30, %v4085_v2 }
 0x7d1   : > { %4304 = vmatmul.bf16.gmra.mxu0 %v4162_v29  ;;  %4353 = vmatmul.bf16.gmra.mxu1 %v4162_v29  ;;  %v4114_v11 = vmul.f32 %v4089_v41, %v9319_v14 }
 0x7d3   : > { %v4134_v4 = vmul.f32 %v9243_v16, %v4114_v11 }
 0x7d5   : > { %v9581_v50 = vadd.f32 %v9254_v49, %v4134_v4 }
 0x7df   : > { %v3907_v18 = vpop.xlane.xlu0 %3906 }
 0x7e0   : > { %v3923_v24 = vmul.f32 %v3907_v18, %v9025_v35 }
 0x7e2   : > { %v3939_v0 = vadd.f32 1e-05, %v3923_v24 }
 0x7e4   : > { %6179 = vrsqrt.f32 %v3939_v0  ;;  %vm4096_vm8 = vweird.f32 %v3939_v0 }
 0x7ea   : > { %v6180_v12 = vpop.eup %6179 }
 0x7eb   : > { %v4091_v5 = vmul.f32 %v6180_v12, %v3939_v0  ;;  %vm4097_vm9 = vweird.f32 %v6180_v12 }
 0x7ec   : > { %vm4098_vm10 = vmor %vm4096_vm8, %vm4097_vm9 }
 0x7ed   : > { %v4092_v54 = vmul.f32 %v6180_v12, %v4091_v5 }
 0x7ef   : > { %v4093_v33 = vmul.f32 0.5, %v4092_v54 }
 0x7f1   : > { %v4094_v59 = vsub.f32 1.5, %v4093_v33  ;;  %v4290_v39 = vpop.f32.mrf.mxu0  ;;  %v4339_v15 = vpop.f32.mrf.mxu1 }
 0x7f2   : > { %v9561_v38 = vadd.f32 %v4290_v39, %v9365_v52  ;;  %v9564_v17 = vadd.f32 %v4339_v15, %v9367_v42 }
 0x7f3   : > { %v4095_v55 = vmul.f32 %v6180_v12, %v4094_v59 }
 0x7f4   : > { %v4376_v44 = vmul.f32 %v9561_v38, %v9561_v38  ;;  %v4377_v37 = vmul.f32 %v9564_v17, %v9564_v17 }
 0x7f5   : > { %v4099_v63 = vsel %vm4098_vm10, %v6180_v12, %v4095_v55 }
 0x7f6   : > { %v4115_v23 = vmul.f32 %v4099_v63, %v9328_v43  ;;  %v4408_v46 = vmul.f32 %v4376_v44, %v9561_v38  ;;  %v4409_v22 = vmul.f32 %v4377_v37, %v9564_v17 }
 0x7f8   : > { %v4440_v51 = vmul.f32 0.044715, %v4408_v46  ;;  %v4441_v14 = vmul.f32 0.044715, %v4409_v22  ;;  %v4135_v47 = vmul.f32 %v9243_v16, %v4115_v23 }
 0x7f9   : > { %v4292_v25 = vpop.f32.mrf.mxu0  ;;  %v4341_v32 = vpop.f32.mrf.mxu1 }
 0x7fa   : > { %v4472_v34 = vadd.f32 %v4440_v51, %v9561_v38  ;;  %v4473_v10 = vadd.f32 %v4441_v14, %v9564_v17  ;;  %v4293_v1 = vadd.f32 %v4292_v25, %v9365_v52  ;;  %v4342_v43 = vadd.f32 %v4341_v32, %v9367_v42 }
 0x7fb   : > { %v9584_v7 = vadd.f32 %v9254_v49, %v4135_v47 }
 0x7fc   : > { %v4504_v36 = vmul.f32 0.7978846, %v4472_v34  ;;  %v4378_v60 = vmul.f32 %v4293_v1, %v4293_v1  ;;  %v4379_v29 = vmul.f32 %v4342_v43, %v4342_v43  ;;  %v4505_v16 = vmul.f32 0.7978846, %v4473_v10 }
 0x7fd   : > { %v4163_v30 = vpack.c.bf16 %v9584_v7, %v9581_v50 }
 0x7fe   : > { %v4410_v58 = vmul.f32 %v4378_v60, %v4293_v1  ;;  %v4411_v18 = vmul.f32 %v4379_v29, %v4342_v43  ;;  %6181 = vtanh.f32 %v4504_v36 }
 0x7ff   : > { %4309 = vmatmul.bf16.gmra.mxu0 %v4163_v30  ;;  %4358 = vmatmul.bf16.gmra.mxu1 %v4163_v30  ;;  %6183 = vtanh.f32 %v4505_v16 }
 0x800   : > { %v4442_v62 = vmul.f32 0.044715, %v4410_v58  ;;  %v4443_v24 = vmul.f32 0.044715, %v4411_v18 }
 0x802   : > { %v4474_v0 = vadd.f32 %v4442_v62, %v4293_v1  ;;  %v4475_v56 = vadd.f32 %v4443_v24, %v4342_v43 }
 0x804   : > { %v4506_v20 = vmul.f32 0.7978846, %v4474_v0  ;;  %v4507_v49 = vmul.f32 0.7978846, %v4475_v56  ;;  %v6182_v12 = vpop.eup %6181 }
 0x805   : > { %v6184_v5 = vpop.eup %6183  ;;  %v4568_v33 = vadd.f32 1.0, %v6182_v12 }
 0x806   : > { %6185 = vtanh.f32 %v4506_v20  ;;  %v4569_v41 = vadd.f32 1.0, %v6184_v5 }
 0x807   : > { %6187 = vtanh.f32 %v4507_v49  ;;  %v4600_v63 = vmul.f32 0.5, %v4568_v33 }
 0x808   : > { %v4601_v46 = vmul.f32 0.5, %v4569_v41 }
 0x809   : > { %v4632_v36 = vmul.f32 %v4600_v63, %v9561_v38 }
 0x80a   : > { %v4633_v60 = vmul.f32 %v4601_v46, %v9564_v17 }
 0x80b   : > { %v4295_v2 = vpop.f32.mrf.mxu0  ;;  %v4344_v54 = vpop.f32.mrf.mxu1 }
 0x80c   : > { %v4296_v59 = vadd.f32 %v4295_v2, %v9365_v52  ;;  %v4345_v39 = vadd.f32 %v4344_v54, %v9367_v42  ;;  %v6186_v15 = vpop.eup %6185 }
 0x80d   : > { %v6188_v11 = vpop.eup %6187  ;;  %v4570_v37 = vadd.f32 1.0, %v6186_v15 }
 0x80e   : > { %v4380_v55 = vmul.f32 %v4296_v59, %v4296_v59  ;;  %v4381_v44 = vmul.f32 %v4345_v39, %v4345_v39  ;;  %v4571_v23 = vadd.f32 1.0, %v6188_v11 }
 0x80f   : > { %4857 = vmatmul.bf16.vlgmr.msra.gmra.mxu0 %v4653_v6  ;;  %v4602_v51 = vmul.f32 0.5, %v4570_v37 }
 0x810   : > { %v4412_v22 = vmul.f32 %v4380_v55, %v4296_v59  ;;  %v4413_v4 = vmul.f32 %v4381_v44, %v4345_v39  ;;  %v4603_v14 = vmul.f32 0.5, %v4571_v23 }
 0x811   : > { %v4634_v32 = vmul.f32 %v4602_v51, %v4293_v1 }
 0x812   : > { %v4444_v47 = vmul.f32 0.044715, %v4412_v22  ;;  %v4445_v25 = vmul.f32 0.044715, %v4413_v4  ;;  %v4635_v29 = vmul.f32 %v4603_v14, %v4342_v43 }
 0x813   : > { %v4297_v34 = vpop.f32.mrf.mxu0  ;;  %v4346_v10 = vpop.f32.mrf.mxu1  ;;  %v4658_v28 = vpack.c.bf16 %v4634_v32, %v4632_v36 }
 0x814   : > { %v4476_v16 = vadd.f32 %v4444_v47, %v4296_v59  ;;  %v4477_v30 = vadd.f32 %v4445_v25, %v4345_v39  ;;  %v4298_v58 = vadd.f32 %v4297_v34, %v9365_v52  ;;  %v4347_v18 = vadd.f32 %v4346_v10, %v9367_v42  ;;  %v9604_v34 = vld [vmem:[%s9969_s12] ss:$0 sm:$0xff] }
 0x815   : > { %v4659_v61 = vpack.c.bf16 %v4635_v29, %v4633_v60  ;;  %4823 = vmatmul.bf16.gmra.mxu2 %v4658_v28 }
 0x816   : > { %v4508_v6 = vmul.f32 0.7978846, %v4476_v16  ;;  %v4382_v62 = vmul.f32 %v4298_v58, %v4298_v58  ;;  %v4383_v24 = vmul.f32 %v4347_v18, %v4347_v18  ;;  %v4509_v0 = vmul.f32 0.7978846, %v4477_v30 }
 0x817   : > { %4872 = vmatmul.bf16.gmra.mxu3 %v4659_v61 }
 0x818   : > { %v4414_v1 = vmul.f32 %v4382_v62, %v4298_v58  ;;  %v4415_v56 = vmul.f32 %v4383_v24, %v4347_v18  ;;  %6189 = vtanh.f32 %v4508_v6 }
 0x819   : > { %6191 = vtanh.f32 %v4509_v0 }
 0x81a   : > { %v4446_v38 = vmul.f32 0.044715, %v4414_v1  ;;  %v4447_v17 = vmul.f32 0.044715, %v4415_v56 }
 0x81c   : > { %v4478_v43 = vadd.f32 %v4446_v38, %v4298_v58  ;;  %v4479_v20 = vadd.f32 %v4447_v17, %v4347_v18 }
 0x81e   : > { %v4510_v49 = vmul.f32 0.7978846, %v4478_v43  ;;  %v4511_v12 = vmul.f32 0.7978846, %v4479_v20  ;;  %v6190_v5 = vpop.eup %6189 }
 0x81f   : > { %v6192_v2 = vpop.eup %6191  ;;  %v4572_v54 = vadd.f32 1.0, %v6190_v5 }
 0x820   : > { %6193 = vtanh.f32 %v4510_v49  ;;  %v4573_v33 = vadd.f32 1.0, %v6192_v2 }
 0x821   : > { %6195 = vtanh.f32 %v4511_v12  ;;  %v4604_v44 = vmul.f32 0.5, %v4572_v54 }
 0x822   : > { %v4605_v63 = vmul.f32 0.5, %v4573_v33 }
 0x823   : > { %v4636_v22 = vmul.f32 %v4604_v44, %v4296_v59 }
 0x824   : > { %v4637_v51 = vmul.f32 %v4605_v63, %v4345_v39 }
 0x826   : > { %v6194_v41 = vpop.eup %6193 }
 0x827   : > { %v6196_v15 = vpop.eup %6195  ;;  %v9597_v11 = vpop.f32.mrf.mxu2  ;;  %v4574_v55 = vadd.f32 1.0, %v6194_v41 }
 0x828   : > { %v4575_v37 = vadd.f32 1.0, %v6196_v15 }
 0x829   : > { %v4606_v23 = vmul.f32 0.5, %v4574_v55 }
 0x82a   : > { %v4607_v46 = vmul.f32 0.5, %v4575_v37 }
 0x82b   : > { %v4638_v4 = vmul.f32 %v4606_v23, %v4298_v58 }
 0x82c   : > { %v4639_v14 = vmul.f32 %v4607_v46, %v4347_v18 }
 0x82d   : > { %v4660_v47 = vpack.c.bf16 %v4638_v4, %v4636_v22 }
 0x82e   : > { %v4661_v25 = vpack.c.bf16 %v4639_v14, %v4637_v51 }
 0x82f   : > { %4828 = vmatmul.bf16.gmra.mxu2 %v4660_v47  ;;  %v9599_v32 = vpop.f32.mrf.mxu2 }
 0x830   : > { %4877 = vmatmul.bf16.gmra.mxu3 %v4661_v25 }
 0x837   : > { %v4814_v10 = vpop.f32.mrf.mxu2 }
 0x838   : > { %v4863_v36 = vpop.f32.mrf.mxu3  ;;  %v4815_v60 = vadd.f32 %v9604_v34, %v4814_v10 }
 0x83a   : > { %v4864_v29 = vadd.f32 %v4863_v36, %v4815_v60 }
 0x83c   : > { %v9608_v59 = vadd.f32 %v4864_v29, %v9273_v57 }
 0x83e   : > { %4918 = vadd.xlane.f32.xlu0 %v9608_v59  ;;  %v4300_v58 = vpop.f32.mrf.mxu0  ;;  %v4349_v18 = vpop.f32.mrf.mxu1 }
 0x83f   : > { %v4816_v39 = vpop.f32.mrf.mxu2  ;;  %v9613_v28 = vadd.f32 %v4300_v58, %v9365_v52  ;;  %v9616_v61 = vadd.f32 %v4349_v18, %v9367_v42 }
 0x840   : > { %v4865_v16 = vpop.f32.mrf.mxu3  ;;  %v4817_v30 = vadd.f32 %v9604_v34, %v4816_v39 }
 0x841   : > { %v4384_v57 = vmul.f32 %v9613_v28, %v9613_v28  ;;  %v4385_v62 = vmul.f32 %v9616_v61, %v9616_v61 }
 0x842   : > { %v9618_v6 = vadd.f32 %v4865_v16, %v4817_v30 }
 0x843   : > { %v4416_v24 = vmul.f32 %v4384_v57, %v9613_v28  ;;  %v4417_v0 = vmul.f32 %v4385_v62, %v9616_v61 }
 0x845   : > { %v4448_v1 = vmul.f32 0.044715, %v4416_v24  ;;  %v4449_v56 = vmul.f32 0.044715, %v4417_v0 }
 0x846   : > { %v4302_v43 = vpop.f32.mrf.mxu0  ;;  %v4351_v20 = vpop.f32.mrf.mxu1 }
 0x847   : > { %v4819_v38 = vpop.f32.mrf.mxu2  ;;  %v4480_v12 = vadd.f32 %v4448_v1, %v9613_v28  ;;  %v4481_v5 = vadd.f32 %v4449_v56, %v9616_v61  ;;  %v9630_v2 = vadd.f32 %v4302_v43, %v9365_v52  ;;  %v9633_v54 = vadd.f32 %v4351_v20, %v9367_v42 }
 0x848   : > { %v4868_v17 = vpop.f32.mrf.mxu3  ;;  %v4820_v49 = vadd.f32 %v9604_v34, %v4819_v38 }
 0x849   : > { %v4512_v41 = vmul.f32 0.7978846, %v4480_v12  ;;  %v4513_v15 = vmul.f32 0.7978846, %v4481_v5  ;;  %v4386_v55 = vmul.f32 %v9630_v2, %v9630_v2  ;;  %v4387_v44 = vmul.f32 %v9633_v54, %v9633_v54 }
 0x84a   : > { %v9635_v33 = vadd.f32 %v4868_v17, %v4820_v49 }
 0x84b   : > { %v4418_v37 = vmul.f32 %v4386_v55, %v9630_v2  ;;  %v4419_v63 = vmul.f32 %v4387_v44, %v9633_v54  ;;  %6197 = vtanh.f32 %v4512_v41 }
 0x84c   : > { %6199 = vtanh.f32 %v4513_v15 }
 0x84d   : > { %v4450_v23 = vmul.f32 0.044715, %v4418_v37  ;;  %v4451_v46 = vmul.f32 0.044715, %v4419_v63 }
 0x84e   : > { %v4305_v4 = vpop.f32.mrf.mxu0  ;;  %v4354_v51 = vpop.f32.mrf.mxu1 }
 0x84f   : > { %v4821_v22 = vpop.f32.mrf.mxu2  ;;  %v4482_v47 = vadd.f32 %v4450_v23, %v9630_v2  ;;  %v4483_v25 = vadd.f32 %v4451_v46, %v9633_v54  ;;  %v9647_v10 = vadd.f32 %v4305_v4, %v9365_v52  ;;  %v9650_v36 = vadd.f32 %v4354_v51, %v9367_v42 }
 0x850   : > { %v4822_v14 = vadd.f32 %v9604_v34, %v4821_v22  ;;  %v4870_v60 = vpop.f32.mrf.mxu3 }
 0x851   : > { %v4514_v39 = vmul.f32 0.7978846, %v4482_v47  ;;  %v4515_v16 = vmul.f32 0.7978846, %v4483_v25  ;;  %v4388_v30 = vmul.f32 %v9647_v10, %v9647_v10  ;;  %v4389_v58 = vmul.f32 %v9650_v36, %v9650_v36  ;;  %v6198_v18 = vpop.eup %6197 }
 0x852   : > { %v4871_v29 = vadd.f32 %v4870_v60, %v4822_v14  ;;  %v6200_v62 = vpop.eup %6199  ;;  %v4576_v43 = vadd.f32 1.0, %v6198_v18 }
 0x853   : > { %6201 = vtanh.f32 %v4514_v39  ;;  %v4420_v24 = vmul.f32 %v4388_v30, %v9647_v10  ;;  %v4421_v0 = vmul.f32 %v4389_v58, %v9650_v36  ;;  %v4577_v20 = vadd.f32 1.0, %v6200_v62 }
 0x854   : > { %v9657_v57 = vadd.f32 %v4871_v29, %v9285_v53  ;;  %6203 = vtanh.f32 %v4515_v16  ;;  %v4608_v46 = vmul.f32 0.5, %v4576_v43 }
 0x855   : > { %v4452_v1 = vmul.f32 0.044715, %v4420_v24  ;;  %v4453_v56 = vmul.f32 0.044715, %v4421_v0  ;;  %v4609_v14 = vmul.f32 0.5, %v4577_v20 }
 0x856   : > { %4924 = vadd.xlane.f32.xlu0 %v9657_v57  ;;  %v4307_v38 = vpop.f32.mrf.mxu0  ;;  %v4356_v17 = vpop.f32.mrf.mxu1  ;;  %v4640_v39 = vmul.f32 %v4608_v46, %v9613_v28 }
 0x857   : > { %v4484_v49 = vadd.f32 %v4452_v1, %v9647_v10  ;;  %v4485_v53 = vadd.f32 %v4453_v56, %v9650_v36  ;;  %v4308_v12 = vadd.f32 %v4307_v38, %v9365_v52  ;;  %v4357_v5 = vadd.f32 %v4356_v17, %v9367_v42 }
 0x858   : > { %v4641_v18 = vmul.f32 %v4609_v14, %v9616_v61 }
 0x859   : > { %v6202_v41 = vpop.eup %6201  ;;  %v4516_v15 = vmul.f32 0.7978846, %v4484_v49  ;;  %v4390_v55 = vmul.f32 %v4308_v12, %v4308_v12  ;;  %v4391_v44 = vmul.f32 %v4357_v5, %v4357_v5  ;;  %v4517_v63 = vmul.f32 0.7978846, %v4485_v53 }
 0x85a   : > { %v6204_v37 = vpop.eup %6203  ;;  %v4578_v23 = vadd.f32 1.0, %v6202_v41 }
 0x85b   : > { %v4422_v22 = vmul.f32 %v4390_v55, %v4308_v12  ;;  %v4423_v4 = vmul.f32 %v4391_v44, %v4357_v5  ;;  %v4579_v51 = vadd.f32 1.0, %v6204_v37  ;;  %6205 = vtanh.f32 %v4516_v15 }
 0x85c   : > { %v4610_v47 = vmul.f32 0.5, %v4578_v23  ;;  %6207 = vtanh.f32 %v4517_v63 }
 0x85d   : > { %v4454_v25 = vmul.f32 0.044715, %v4422_v22  ;;  %v4455_v60 = vmul.f32 0.044715, %v4423_v4  ;;  %v4611_v29 = vmul.f32 0.5, %v4579_v51 }
 0x85e   : > { %v4642_v16 = vmul.f32 %v4610_v47, %v9630_v2 }
 0x85f   : > { %v4486_v30 = vadd.f32 %v4454_v25, %v4308_v12  ;;  %v4487_v58 = vadd.f32 %v4455_v60, %v4357_v5  ;;  %v4643_v62 = vmul.f32 %v4611_v29, %v9633_v54 }
 0x860   : > { %v4662_v24 = vpack.c.bf16 %v4642_v16, %v4640_v39 }
 0x861   : > { %v4518_v0 = vmul.f32 0.7978846, %v4486_v30  ;;  %v4519_v1 = vmul.f32 0.7978846, %v4487_v58  ;;  %v4663_v56 = vpack.c.bf16 %v4643_v62, %v4641_v18  ;;  %v6206_v38 = vpop.eup %6205 }
 0x862   : > { %4833 = vmatmul.bf16.gmra.mxu2 %v4662_v24  ;;  %v6208_v17 = vpop.eup %6207  ;;  %v4580_v43 = vadd.f32 1.0, %v6206_v38  ;;  %v4810_v38 = vadd.f32 %v9604_v34, %v9597_v11  ;;  %v4812_v11 = vadd.f32 %v9604_v34, %v9599_v32 }
 0x863   : > { %6209 = vtanh.f32 %v4518_v0  ;;  %4882 = vmatmul.bf16.gmra.mxu3 %v4663_v56  ;;  %v4581_v28 = vadd.f32 1.0, %v6208_v17 }
 0x864   : > { %6211 = vtanh.f32 %v4519_v1  ;;  %v4612_v53 = vmul.f32 0.5, %v4580_v43 }
 0x865   : > { %v4613_v61 = vmul.f32 0.5, %v4581_v28 }
 0x866   : > { %v4644_v55 = vmul.f32 %v4612_v53, %v9647_v10 }
 0x867   : > { %v4645_v37 = vmul.f32 %v4613_v61, %v9650_v36 }
 0x869   : > { %v6210_v20 = vpop.eup %6209 }
 0x86a   : > { %v6212_v2 = vpop.eup %6211  ;;  %v4582_v49 = vadd.f32 1.0, %v6210_v20 }
 0x86b   : > { %v4583_v41 = vadd.f32 1.0, %v6212_v2 }
 0x86c   : > { %v4614_v15 = vmul.f32 0.5, %v4582_v49 }
 0x86d   : > { %v4615_v54 = vmul.f32 0.5, %v4583_v41 }
 0x86e   : > { %v4646_v44 = vmul.f32 %v4614_v15, %v4308_v12 }
 0x86f   : > { %v4647_v63 = vmul.f32 %v4615_v54, %v4357_v5 }
 0x870   : > { %v4664_v23 = vpack.c.bf16 %v4646_v44, %v4644_v55 }
 0x871   : > { %v4665_v46 = vpack.c.bf16 %v4647_v63, %v4645_v37  ;;  %v9686_v63 = vadd.f32 %v9618_v6, %v9276_v19 }
 0x872   : > { %4838 = vmatmul.bf16.gmra.mxu2 %v4664_v23 }
 0x873   : > { %4887 = vmatmul.bf16.gmra.mxu3 %v4665_v46 }
 0x87c   : > { %v4310_v22 = vpop.f32.mrf.mxu0  ;;  %v4359_v4 = vpop.f32.mrf.mxu1 }
 0x87d   : > { %v4311_v51 = vadd.f32 %v4310_v22, %v9365_v52  ;;  %v4360_v14 = vadd.f32 %v4359_v4, %v9367_v42 }
 0x87f   : > { %v4392_v47 = vmul.f32 %v4311_v51, %v4311_v51  ;;  %v4393_v25 = vmul.f32 %v4360_v14, %v4360_v14 }
 0x881   : > { %v4424_v60 = vmul.f32 %v4392_v47, %v4311_v51  ;;  %v4425_v29 = vmul.f32 %v4393_v25, %v4360_v14 }
 0x883   : > { %v4456_v39 = vmul.f32 0.044715, %v4424_v60  ;;  %v4457_v10 = vmul.f32 0.044715, %v4425_v29 }
 0x884   : > { %v4312_v12 = vpop.f32.mrf.mxu0  ;;  %v4361_v16 = vpop.f32.mrf.mxu1 }
 0x885   : > { %v4488_v36 = vadd.f32 %v4456_v39, %v4311_v51  ;;  %v4489_v5 = vadd.f32 %v4457_v10, %v4360_v14  ;;  %v4313_v30 = vadd.f32 %v4312_v12, %v9365_v52  ;;  %v4362_v58 = vadd.f32 %v4361_v16, %v9367_v42 }
 0x887   : > { %v4520_v18 = vmul.f32 0.7978846, %v4488_v36  ;;  %v4394_v62 = vmul.f32 %v4313_v30, %v4313_v30  ;;  %v4395_v24 = vmul.f32 %v4362_v58, %v4362_v58  ;;  %v4521_v0 = vmul.f32 0.7978846, %v4489_v5 }
 0x888   : > { %v9697_v5 = vadd.f32 %v9635_v33, %v9288_v13 }
 0x889   : > { %v4426_v1 = vmul.f32 %v4394_v62, %v4313_v30  ;;  %v4427_v56 = vmul.f32 %v4395_v24, %v4362_v58  ;;  %6213 = vtanh.f32 %v4520_v18 }
 0x88a   : > { %6215 = vtanh.f32 %v4521_v0 }
 0x88b   : > { %v4458_v17 = vmul.f32 0.044715, %v4426_v1  ;;  %v4459_v43 = vmul.f32 0.044715, %v4427_v56 }
 0x88c   : > { %v4858_v28 = vpop.f32.mrf.mxu0 }
 0x88d   : > { %v4490_v20 = vadd.f32 %v4458_v17, %v4313_v30  ;;  %v4491_v2 = vadd.f32 %v4459_v43, %v4362_v58  ;;  %v4859_v49 = vadd.f32 %v4858_v28, %v4810_v38 }
 0x88f   : > { %v4522_v52 = vmul.f32 0.7978846, %v4490_v20  ;;  %v4523_v53 = vmul.f32 0.7978846, %v4491_v2  ;;  %v9679_v42 = vadd.f32 %v4859_v49, %v9261_v45  ;;  %v6214_v41 = vpop.eup %6213 }
 0x890   : > { %v6216_v61 = vpop.eup %6215  ;;  %v4584_v54 = vadd.f32 1.0, %v6214_v41 }
 0x891   : > { %6217 = vtanh.f32 %v4522_v52  ;;  %4914 = vadd.xlane.f32.xlu1 %v9679_v42  ;;  %v4585_v44 = vadd.f32 1.0, %v6216_v61 }
 0x892   : > { %6219 = vtanh.f32 %v4523_v53  ;;  %v4616_v22 = vmul.f32 0.5, %v4584_v54 }
 0x893   : > { %v4617_v25 = vmul.f32 0.5, %v4585_v44 }
 0x894   : > { %v4860_v15 = vpop.f32.mrf.mxu0  ;;  %v4648_v6 = vmul.f32 %v4616_v22, %v4311_v51 }
 0x895   : > { %v4861_v55 = vadd.f32 %v4860_v15, %v4812_v11 }
 0x897   : > { %v6218_v37 = vpop.eup %6217  ;;  %v9689_v45 = vadd.f32 %v4861_v55, %v9264_v3  ;;  %v4649_v3 = vmul.f32 %v4617_v25, %v4360_v14 }
 0x898   : > { %v6220_v23 = vpop.eup %6219  ;;  %v4586_v46 = vadd.f32 1.0, %v6218_v37  ;;  %v4824_v4 = vpop.f32.mrf.mxu2 }
 0x899   : > { %4916 = vadd.xlane.f32.xlu2 %v9689_v45  ;;  %4920 = vadd.xlane.f32.xlu1 %v9686_v63  ;;  %v4587_v32 = vadd.f32 1.0, %v6220_v23  ;;  %v4825_v60 = vadd.f32 %v9604_v34, %v4824_v4 }
 0x89a   : > { %v4873_v47 = vpop.f32.mrf.mxu3  ;;  %v4618_v29 = vmul.f32 0.5, %v4586_v46 }
 0x89b   : > { %v4619_v39 = vmul.f32 0.5, %v4587_v32  ;;  %v4874_v19 = vadd.f32 %v4873_v47, %v4825_v60 }
 0x89c   : > { %v4650_v10 = vmul.f32 %v4618_v29, %v4313_v30 }
 0x89d   : > { %v4651_v12 = vmul.f32 %v4619_v39, %v4362_v58  ;;  %v4904_v16 = vadd.f32 %v4874_v19, %v9343_v21 }
 0x89e   : > { %v4666_v36 = vpack.c.bf16 %v4650_v10, %v4648_v6 }
 0x89f   : > { %v4667_v18 = vpack.c.bf16 %v4651_v12, %v4649_v3 }
 0x8a0   : > { %4843 = vmatmul.bf16.gmra.mxu2 %v4666_v36  ;;  %v4826_v62 = vpop.f32.mrf.mxu2 }
 0x8a1   : > { %4892 = vmatmul.bf16.gmra.mxu3 %v4667_v18  ;;  %4922 = vadd.xlane.f32.xlu2 %v9697_v5  ;;  %v4827_v24 = vadd.f32 %v9604_v34, %v4826_v62 }
 0x8a2   : > { %4926 = vadd.xlane.f32.xlu1 %v4904_v16  ;;  %v4875_v51 = vpop.f32.mrf.mxu3 }
 0x8a3   : > { %v4876_v30 = vadd.f32 %v4875_v51, %v4827_v24 }
 0x8a5   : > { %v9702_v14 = vadd.f32 %v4876_v30, %v9346_v48 }
 0x8a9   : > { %4928 = vadd.xlane.f32.xlu2 %v9702_v14 }
 0x8b1   : > { %v4919_v62 = vpop.xlane.xlu0 %4918 }
 0x8b2   : > { %v4829_v21 = vpop.f32.mrf.mxu2 }
 0x8b3   : > { %v4830_v13 = vadd.f32 %v9604_v34, %v4829_v21  ;;  %v4878_v33 = vpop.f32.mrf.mxu3 }
 0x8b5   : > { %v4879_v58 = vadd.f32 %v4878_v33, %v4830_v13  ;;  %v4948_v13 = vmul.f32 %v4919_v62, %v9025_v35 }
 0x8b7   : > { %v9707_v0 = vadd.f32 %v4879_v58, %v9412_v8 }
 0x8b9   : > { %4930 = vadd.xlane.f32.xlu0 %v9707_v0 }
 0x8ba   : > { %v4831_v1 = vpop.f32.mrf.mxu2 }
 0x8bb   : > { %v4832_v56 = vadd.f32 %v9604_v34, %v4831_v1  ;;  %v4880_v38 = vpop.f32.mrf.mxu3 }
 0x8bd   : > { %v4881_v17 = vadd.f32 %v4880_v38, %v4832_v56 }
 0x8bf   : > { %v9712_v48 = vadd.f32 %v4881_v17, %v9415_v31 }
 0x8c1   : > { %4932 = vadd.xlane.f32.xlu1 %v9712_v48 }
 0x8c9   : > { %v4925_v38 = vpop.xlane.xlu0 %4924 }
 0x8e5   : > { %v4834_v43 = vpop.f32.mrf.mxu2 }
 0x8e6   : > { %v4835_v28 = vadd.f32 %v9604_v34, %v4834_v43  ;;  %v4883_v20 = vpop.f32.mrf.mxu3 }
 0x8e8   : > { %v4884_v2 = vadd.f32 %v4883_v20, %v4835_v28  ;;  %v4951_v28 = vmul.f32 %v4925_v38, %v9025_v35 }
 0x8ea   : > { %v9717_v8 = vadd.f32 %v4884_v2, %v9537_v40  ;;  %v9789_v2 = vsub.f32 %v9657_v57, %v4951_v28 }
 0x8ec   : > { %4934 = vadd.xlane.f32.xlu2 %v9717_v8 }
 0x8ed   : > { %v4836_v49 = vpop.f32.mrf.mxu2 }
 0x8ee   : > { %v4837_v52 = vadd.f32 %v9604_v34, %v4836_v49  ;;  %v4885_v53 = vpop.f32.mrf.mxu3 }
 0x8f0   : > { %v4886_v41 = vadd.f32 %v4885_v53, %v4837_v52 }
 0x8f2   : > { %v9722_v31 = vadd.f32 %v4886_v41, %v9540_v26  ;;  %v4983_v41 = vmul.f32 %v9789_v2, %v9789_v2 }
 0x8f4   : > { %4936 = vadd.xlane.f32.xlu0 %v9722_v31 }
 0x8f5   : > { %v4839_v61 = vpop.f32.mrf.mxu2 }
 0x8f6   : > { %v4840_v11 = vadd.f32 %v9604_v34, %v4839_v61  ;;  %v4888_v15 = vpop.f32.mrf.mxu3 }
 0x8f8   : > { %v4889_v54 = vadd.f32 %v4888_v15, %v4840_v11 }
 0x8fa   : > { %v9727_v40 = vadd.f32 %v4889_v54, %v9552_v27 }
 0x8fc   : > { %4938 = vadd.xlane.f32.xlu1 %v9727_v40 }
 0x8fd   : > { %v4841_v55 = vpop.f32.mrf.mxu2 }
 0x8fe   : > { %v4842_v44 = vadd.f32 %v9604_v34, %v4841_v55  ;;  %v4890_v37 = vpop.f32.mrf.mxu3 }
 0x900   : > { %v4891_v23 = vadd.f32 %v4890_v37, %v4842_v44 }
 0x902   : > { %v9732_v26 = vadd.f32 %v4891_v23, %v9555_v9 }
 0x904   : > { %v4915_v46 = vpop.xlane.xlu1 %4914  ;;  %4940 = vadd.xlane.f32.xlu2 %v9732_v26 }
 0x905   : > { %v4946_v22 = vmul.f32 %v4915_v46, %v9025_v35 }
 0x907   : > { %v9737_v4 = vsub.f32 %v9679_v42, %v4946_v22 }
 0x909   : > { %v4978_v27 = vmul.f32 %v9737_v4, %v9737_v4 }
 0x90c   : > { %v4921_v47 = vpop.xlane.xlu1 %4920  ;;  %4994 = vadd.xlane.f32.xlu2 %v4978_v27  ;;  %v4917_v19 = vpop.xlane.xlu2 %4916 }
 0x90d   : > { %v4949_v32 = vmul.f32 %v4921_v47, %v9025_v35  ;;  %v4947_v12 = vmul.f32 %v4917_v19, %v9025_v35 }
 0x90f   : > { %v9743_v25 = vsub.f32 %v9686_v63, %v4949_v32  ;;  %v9759_v24 = vsub.f32 %v9689_v45, %v4947_v12  ;;  %v9771_v45 = vsub.f32 %v9608_v59, %v4948_v13 }
 0x911   : > { %v4981_v9 = vmul.f32 %v9743_v25, %v9743_v25  ;;  %v4980_v43 = vmul.f32 %v9771_v45, %v9771_v45 }
 0x914   : > { %5000 = vadd.xlane.f32.xlu2 %v4981_v9  ;;  %v4923_v18 = vpop.xlane.xlu2 %4922 }
 0x915   : > { %v4927_v60 = vpop.xlane.xlu1 %4926  ;;  %v4950_v33 = vmul.f32 %v4923_v18, %v9025_v35 }
 0x916   : > { %v4952_v29 = vmul.f32 %v4927_v60, %v9025_v35 }
 0x918   : > { %v9748_v39 = vsub.f32 %v4904_v16, %v4952_v29 }
 0x91a   : > { %v4984_v42 = vmul.f32 %v9748_v39, %v9748_v39 }
 0x91c   : > { %5006 = vadd.xlane.f32.xlu2 %v4984_v42  ;;  %v4929_v17 = vpop.xlane.xlu2 %4928 }
 0x91d   : > { %v4953_v20 = vmul.f32 %v4929_v17, %v9025_v35 }
 0x923   : > { %v4844_v6 = vpop.f32.mrf.mxu2 }
 0x924   : > { %v4845_v10 = vadd.f32 %v9604_v34, %v4844_v6  ;;  %v4893_v3 = vpop.f32.mrf.mxu3 }
 0x926   : > { %v4894_v63 = vadd.f32 %v4893_v3, %v4845_v10 }
 0x928   : > { %v9755_v36 = vadd.f32 %v4894_v63, %v9581_v50  ;;  %v4979_v50 = vmul.f32 %v9759_v24, %v9759_v24 }
 0x92a   : > { %4942 = vadd.xlane.f32.xlu0 %v9755_v36 }
 0x92b   : > { %v4846_v16 = vpop.f32.mrf.mxu2 }
 0x92c   : > { %v4847_v51 = vadd.f32 %v9604_v34, %v4846_v16  ;;  %v4895_v30 = vpop.f32.mrf.mxu3  ;;  %v9774_v34 = vsub.f32 %v9697_v5, %v4950_v33  ;;  %v4931_v49 = vpop.xlane.xlu0 %4930 }
 0x92d   : > { %v4954_v52 = vmul.f32 %v4931_v49, %v9025_v35 }
 0x92e   : > { %v4896_v21 = vadd.f32 %v4895_v30, %v4847_v51  ;;  %v4982_v59 = vmul.f32 %v9774_v34, %v9774_v34 }
 0x92f   : > { %v9800_v61 = vsub.f32 %v9707_v0, %v4954_v52 }
 0x930   : > { %v9765_v58 = vadd.f32 %v4896_v21, %v9584_v7  ;;  %v9834_v21 = vld [vmem:[%s9970_s13] ss:$0 sm:$0xff] }
 0x931   : > { %v4986_v57 = vmul.f32 %v9800_v61, %v9800_v61 }
 0x932   : > { %4944 = vadd.xlane.f32.xlu1 %v9765_v58  ;;  %4996 = vadd.xlane.f32.xlu0 %v4979_v50  ;;  %v9839_v50 = vld [vmem:[%s9971_s14] ss:$0 sm:$0xff] }
 0x934   : > { %v4933_v1 = vpop.xlane.xlu1 %4932 }
 0x935   : > { %v4955_v56 = vmul.f32 %v4933_v1, %v9025_v35 }
 0x937   : > { %v9778_v7 = vsub.f32 %v9712_v48, %v4955_v56  ;;  %v9792_v48 = vsub.f32 %v9702_v14, %v4953_v20 }
 0x939   : > { %v4987_v5 = vmul.f32 %v9778_v7, %v9778_v7  ;;  %v4985_v53 = vmul.f32 %v9792_v48, %v9792_v48 }
 0x93a   : > { %5002 = vadd.xlane.f32.xlu0 %v4982_v59  ;;  %4998 = vadd.xlane.f32.xlu1 %v4980_v43 }
 0x93b   : > { %5012 = vadd.xlane.f32.xlu2 %v4987_v5 }
 0x942   : > { %5008 = vadd.xlane.f32.xlu0 %v4985_v53  ;;  %5004 = vadd.xlane.f32.xlu1 %v4983_v41 }
 0x94a   : > { %5010 = vadd.xlane.f32.xlu1 %v4986_v57 }
 0x95f   : > { %v4935_v14 = vpop.xlane.xlu2 %4934 }
 0x960   : > { %v4956_v11 = vmul.f32 %v4935_v14, %v9025_v35 }
 0x962   : > { %v9806_v15 = vsub.f32 %v9717_v8, %v4956_v11 }
 0x964   : > { %v4988_v54 = vmul.f32 %v9806_v15, %v9806_v15 }
 0x966   : > { %5014 = vadd.xlane.f32.xlu0 %v4988_v54 }
 0x967   : > { %v4937_v55 = vpop.xlane.xlu0 %4936 }
 0x968   : > { %v4957_v44 = vmul.f32 %v4937_v55, %v9025_v35 }
 0x96a   : > { %v9812_v0 = vsub.f32 %v9722_v31, %v4957_v44 }
 0x96c   : > { %v4989_v37 = vmul.f32 %v9812_v0, %v9812_v0 }
 0x96e   : > { %5016 = vadd.xlane.f32.xlu1 %v4989_v37 }
 0x96f   : > { %v4939_v23 = vpop.xlane.xlu1 %4938 }
 0x970   : > { %v4958_v46 = vmul.f32 %v4939_v23, %v9025_v35 }
 0x972   : > { %v9818_v8 = vsub.f32 %v9727_v40, %v4958_v46 }
 0x974   : > { %v4990_v22 = vmul.f32 %v9818_v8, %v9818_v8 }
 0x976   : > { %5018 = vadd.xlane.f32.xlu2 %v4990_v22 }
 0x977   : > { %v4941_v27 = vpop.xlane.xlu2 %4940 }
 0x978   : > { %v4959_v47 = vmul.f32 %v4941_v27, %v9025_v35 }
 0x97a   : > { %v9824_v31 = vsub.f32 %v9732_v26, %v4959_v47 }
 0x97c   : > { %v4991_v32 = vmul.f32 %v9824_v31, %v9824_v31 }
 0x97e   : > { %5020 = vadd.xlane.f32.xlu0 %v4991_v32 }
 0x97f   : > { %v4995_v9 = vpop.xlane.xlu2 %4994 }
 0x980   : > { %v5026_v60 = vmul.f32 %v4995_v9, %v9025_v35 }
 0x982   : > { %v5042_v29 = vadd.f32 1e-05, %v5026_v60 }
 0x984   : > { %6221 = vrsqrt.f32 %v5042_v29  ;;  %vm5064_vm11 = vweird.f32 %v5042_v29 }
 0x987   : > { %v5001_v40 = vpop.xlane.xlu2 %5000 }
 0x988   : > { %v5029_v42 = vmul.f32 %v5001_v40, %v9025_v35 }
 0x98a   : > { %v6222_v19 = vpop.eup %6221  ;;  %v5045_v6 = vadd.f32 1e-05, %v5029_v42 }
 0x98b   : > { %v5059_v10 = vmul.f32 %v6222_v19, %v5042_v29  ;;  %vm5065_vm0 = vweird.f32 %v6222_v19 }
 0x98c   : > { %6223 = vrsqrt.f32 %v5045_v6  ;;  %vm5066_vm12 = vmor %vm5064_vm11, %vm5065_vm0  ;;  %vm5094_vm14 = vweird.f32 %v5045_v6 }
 0x98d   : > { %v5060_v3 = vmul.f32 %v6222_v19, %v5059_v10 }
 0x98f   : > { %v5061_v63 = vmul.f32 0.5, %v5060_v3  ;;  %v5007_v26 = vpop.xlane.xlu2 %5006 }
 0x990   : > { %v5032_v12 = vmul.f32 %v5007_v26, %v9025_v35 }
 0x991   : > { %v5062_v18 = vsub.f32 1.5, %v5061_v63 }
 0x992   : > { %v6224_v16 = vpop.eup %6223  ;;  %v5048_v62 = vadd.f32 1e-05, %v5032_v12 }
 0x993   : > { %v5063_v51 = vmul.f32 %v6222_v19, %v5062_v18  ;;  %v5089_v30 = vmul.f32 %v6224_v16, %v5045_v6  ;;  %vm5095_vm13 = vweird.f32 %v6224_v16 }
 0x994   : > { %6225 = vrsqrt.f32 %v5048_v62  ;;  %vm5096_vm15 = vmor %vm5094_vm14, %vm5095_vm13  ;;  %vm5124_vm2 = vweird.f32 %v5048_v62 }
 0x995   : > { %v5067_v13 = vsel %vm5066_vm12, %v6222_v19, %v5063_v51  ;;  %v5090_v33 = vmul.f32 %v6224_v16, %v5089_v30 }
 0x996   : > { %v5218_v1 = vmul.f32 %v5067_v13, %v9737_v4 }
 0x997   : > { %v5091_v56 = vmul.f32 0.5, %v5090_v33 }
 0x998   : > { %v5238_v38 = vmul.f32 %v9834_v21, %v5218_v1 }
 0x999   : > { %v5092_v17 = vsub.f32 1.5, %v5091_v56 }
 0x99a   : > { %v6226_v43 = vpop.eup %6225  ;;  %v5258_v28 = vadd.f32 %v9839_v50, %v5238_v38 }
 0x99b   : > { %v5093_v59 = vmul.f32 %v6224_v16, %v5092_v17  ;;  %v5119_v5 = vmul.f32 %v6226_v43, %v5048_v62  ;;  %vm5125_vm1 = vweird.f32 %v6226_v43 }
 0x99c   : > { %5274 = vst [vmem:[%s9848_s21] sm:$0xff] %v5258_v28  ;;  %vm5126_vm3 = vmor %vm5124_vm2, %vm5125_vm1 }
 0x99d   : > { %v4943_v20 = vpop.xlane.xlu0 %4942  ;;  %v5097_v49 = vsel %vm5096_vm15, %v6224_v16, %v5093_v59  ;;  %v5120_v52 = vmul.f32 %v6226_v43, %v5119_v5 }
 0x99e   : > { %v4960_v4 = vmul.f32 %v4943_v20, %v9025_v35  ;;  %v5221_v41 = vmul.f32 %v5097_v49, %v9743_v25 }
 0x99f   : > { %v5121_v57 = vmul.f32 0.5, %v5120_v52 }
 0x9a0   : > { %v9854_v53 = vsub.f32 %v9755_v36, %v4960_v4  ;;  %v5241_v11 = vmul.f32 %v9834_v21, %v5221_v41 }
 0x9a1   : > { %v5122_v54 = vsub.f32 1.5, %v5121_v57 }
 0x9a2   : > { %v4992_v14 = vmul.f32 %v9854_v53, %v9854_v53  ;;  %v5261_v55 = vadd.f32 %v9839_v50, %v5241_v11 }
 0x9a3   : > { %v5123_v23 = vmul.f32 %v6226_v43, %v5122_v54 }
 0x9a4   : > { %5022 = vadd.xlane.f32.xlu1 %v4992_v14  ;;  %5277 = vst [vmem:[%s9848_s21 + $0x18] sm:$0xff] %v5261_v55 }
 0x9a5   : > { %v4945_v44 = vpop.xlane.xlu1 %4944  ;;  %v4997_v37 = vpop.xlane.xlu0 %4996  ;;  %v5127_v25 = vsel %vm5126_vm3, %v6226_v43, %v5123_v23 }
 0x9a6   : > { %v4961_v36 = vmul.f32 %v4945_v44, %v9025_v35  ;;  %v5027_v46 = vmul.f32 %v4997_v37, %v9025_v35  ;;  %v5224_v47 = vmul.f32 %v5127_v25, %v9748_v39 }
 0x9a8   : > { %v9865_v22 = vsub.f32 %v9765_v58, %v4961_v36  ;;  %v5043_v27 = vadd.f32 1e-05, %v5027_v46  ;;  %v5244_v9 = vmul.f32 %v9834_v21, %v5224_v47 }
 0x9aa   : > { %6227 = vrsqrt.f32 %v5043_v27  ;;  %v4993_v32 = vmul.f32 %v9865_v22, %v9865_v22  ;;  %v5264_v60 = vadd.f32 %v9839_v50, %v5244_v9  ;;  %vm5074_vm5 = vweird.f32 %v5043_v27 }
 0x9ac   : > { %5024 = vadd.xlane.f32.xlu2 %v4993_v32  ;;  %5280 = vst [vmem:[%s9848_s21 + $0x30] sm:$0xff] %v5264_v60 }
 0x9ad   : > { %v4999_v29 = vpop.xlane.xlu1 %4998  ;;  %v5003_v40 = vpop.xlane.xlu0 %5002 }
 0x9ae   : > { %v5028_v42 = vmul.f32 %v4999_v29, %v9025_v35  ;;  %v5030_v19 = vmul.f32 %v5003_v40, %v9025_v35  ;;  %v5013_v58 = vpop.xlane.xlu2 %5012 }
 0x9af   : > { %v5035_v6 = vmul.f32 %v5013_v58, %v9025_v35 }
 0x9b0   : > { %v6228_v39 = vpop.eup %6227  ;;  %v5044_v10 = vadd.f32 1e-05, %v5028_v42  ;;  %v5046_v3 = vadd.f32 1e-05, %v5030_v19 }
 0x9b1   : > { %v5069_v63 = vmul.f32 %v6228_v39, %v5043_v27  ;;  %v9876_v26 = vadd.f32 1e-05, %v5035_v6  ;;  %vm5075_vm4 = vweird.f32 %v6228_v39 }
 0x9b2   : > { %6229 = vrsqrt.f32 %v5044_v10  ;;  %vm5076_vm7 = vmor %vm5074_vm5, %vm5075_vm4  ;;  %vm5084_vm6 = vweird.f32 %v5044_v10  ;;  %vm5104_vm11 = vweird.f32 %v5046_v3 }
 0x9b3   : > { %v5070_v12 = vmul.f32 %v6228_v39, %v5069_v63  ;;  %6231 = vrsqrt.f32 %v5046_v3  ;;  %vm5154_vm12 = vweird.f32 %v9876_v26 }
 0x9b4   : > { %6233 = vrsqrt.f32 %v9876_v26 }
 0x9b5   : > { %v5071_v18 = vmul.f32 0.5, %v5070_v12  ;;  %v5005_v16 = vpop.xlane.xlu1 %5004  ;;  %v5009_v62 = vpop.xlane.xlu0 %5008 }
 0x9b6   : > { %v5031_v51 = vmul.f32 %v5005_v16, %v9025_v35  ;;  %v5033_v30 = vmul.f32 %v5009_v62, %v9025_v35 }
 0x9b7   : > { %v5072_v13 = vsub.f32 1.5, %v5071_v18 }
 0x9b8   : > { %v6230_v33 = vpop.eup %6229  ;;  %v9881_v1 = vadd.f32 1e-05, %v5031_v51  ;;  %v9883_v56 = vadd.f32 1e-05, %v5033_v30 }
 0x9b9   : > { %v6232_v38 = vpop.eup %6231  ;;  %v5073_v17 = vmul.f32 %v6228_v39, %v5072_v13  ;;  %v5079_v43 = vmul.f32 %v6230_v33, %v5044_v10  ;;  %vm5085_vm9 = vweird.f32 %v6230_v33 }
 0x9ba   : > { %v6234_v28 = vpop.eup %6233  ;;  %v5099_v20 = vmul.f32 %v6232_v38, %v5046_v3  ;;  %6235 = vrsqrt.f32 %v9881_v1  ;;  %vm5105_vm8 = vweird.f32 %v6232_v38  ;;  %vm5086_vm0 = vmor %vm5084_vm6, %vm5085_vm9  ;;  %vm5114_vm1 = vweird.f32 %v9881_v1 }
 0x9bb   : > { %v5077_v59 = vsel %vm5076_vm7, %v6228_v39, %v5073_v17  ;;  %v5080_v5 = vmul.f32 %v6230_v33, %v5079_v43  ;;  %v5149_v4 = vmul.f32 %v6234_v28, %v9876_v26  ;;  %6237 = vrsqrt.f32 %v9883_v56  ;;  %vm5106_vm13 = vmor %vm5104_vm11, %vm5105_vm8 }
 0x9bc   : > { %v5219_v49 = vmul.f32 %v5077_v59, %v9759_v24  ;;  %v5100_v52 = vmul.f32 %v6232_v38, %v5099_v20  ;;  %vm5155_vm10 = vweird.f32 %v6234_v28  ;;  %vm5134_vm4 = vweird.f32 %v9883_v56 }
 0x9bd   : > { %v5081_v41 = vmul.f32 0.5, %v5080_v5  ;;  %v5150_v57 = vmul.f32 %v6234_v28, %v5149_v4  ;;  %v5011_v14 = vpop.xlane.xlu1 %5010  ;;  %vm5156_vm14 = vmor %vm5154_vm12, %vm5155_vm10 }
 0x9be   : > { %v5239_v11 = vmul.f32 %v9834_v21, %v5219_v49  ;;  %v5101_v54 = vmul.f32 0.5, %v5100_v52  ;;  %v5034_v55 = vmul.f32 %v5011_v14, %v9025_v35 }
 0x9bf   : > { %v5082_v44 = vsub.f32 1.5, %v5081_v41  ;;  %v5151_v37 = vmul.f32 0.5, %v5150_v57 }
 0x9c0   : > { %v6236_v23 = vpop.eup %6235  ;;  %v5259_v36 = vadd.f32 %v9839_v50, %v5239_v11  ;;  %v5102_v24 = vsub.f32 1.5, %v5101_v54  ;;  %v5050_v46 = vadd.f32 1e-05, %v5034_v55 }
 0x9c1   : > { %v5083_v25 = vmul.f32 %v6230_v33, %v5082_v44  ;;  %v5152_v27 = vsub.f32 1.5, %v5151_v37  ;;  %v5109_v47 = vmul.f32 %v6236_v23, %v9881_v1  ;;  %v6238_v32 = vpop.eup %6237  ;;  %vm5115_vm15 = vweird.f32 %v6236_v23 }
 0x9c2   : > { %5275 = vst [vmem:[%s9848_s21 + $0x8] sm:$0xff] %v5259_v36  ;;  %v5103_v9 = vmul.f32 %v6232_v38, %v5102_v24  ;;  %6239 = vrsqrt.f32 %v5050_v46  ;;  %v5129_v42 = vmul.f32 %v6238_v32, %v9883_v56  ;;  %vm5135_vm2 = vweird.f32 %v6238_v32  ;;  %vm5116_vm3 = vmor %vm5114_vm1, %vm5115_vm15 }
 0x9c3   : > { %v5087_v60 = vsel %vm5086_vm0, %v6230_v33, %v5083_v25  ;;  %v5153_v29 = vmul.f32 %v6234_v28, %v5152_v27  ;;  %v5110_v40 = vmul.f32 %v6236_v23, %v5109_v47  ;;  %vm5136_vm5 = vmor %vm5134_vm4, %vm5135_vm2  ;;  %vm5144_vm6 = vweird.f32 %v5050_v46 }
 0x9c4   : > { %v5220_v19 = vmul.f32 %v5087_v60, %v9771_v45  ;;  %v5107_v58 = vsel %vm5106_vm13, %v6232_v38, %v5103_v9  ;;  %v5130_v63 = vmul.f32 %v6238_v32, %v5129_v42 }
 0x9c5   : > { %v5222_v6 = vmul.f32 %v5107_v58, %v9774_v34  ;;  %v5157_v39 = vsel %vm5156_vm14, %v6234_v28, %v5153_v29  ;;  %v5111_v10 = vmul.f32 0.5, %v5110_v40 }
 0x9c6   : > { %v5240_v3 = vmul.f32 %v9834_v21, %v5220_v19  ;;  %v5227_v26 = vmul.f32 %v5157_v39, %v9778_v7  ;;  %v5131_v16 = vmul.f32 0.5, %v5130_v63 }
 0x9c7   : > { %v5242_v12 = vmul.f32 %v9834_v21, %v5222_v6  ;;  %v5112_v18 = vsub.f32 1.5, %v5111_v10 }
 0x9c8   : > { %v6240_v45 = vpop.eup %6239  ;;  %v5260_v62 = vadd.f32 %v9839_v50, %v5240_v3  ;;  %v5247_v34 = vmul.f32 %v9834_v21, %v5227_v26  ;;  %v5132_v13 = vsub.f32 1.5, %v5131_v16 }
 0x9c9   : > { %v5262_v51 = vadd.f32 %v9839_v50, %v5242_v12  ;;  %v5113_v30 = vmul.f32 %v6236_v23, %v5112_v18  ;;  %v5139_v7 = vmul.f32 %v6240_v45, %v5050_v46  ;;  %vm5145_vm7 = vweird.f32 %v6240_v45 }
 0x9ca   : > { %5276 = vst [vmem:[%s9848_s21 + $0x10] sm:$0xff] %v5260_v62  ;;  %v5267_v33 = vadd.f32 %v9839_v50, %v5247_v34  ;;  %v5133_v17 = vmul.f32 %v6238_v32, %v5132_v13  ;;  %vm5146_vm9 = vmor %vm5144_vm6, %vm5145_vm7 }
 0x9cb   : > { %5278 = vst [vmem:[%s9848_s21 + $0x20] sm:$0xff] %v5262_v51  ;;  %v5117_v38 = vsel %vm5116_vm3, %v6236_v23, %v5113_v30  ;;  %v5140_v43 = vmul.f32 %v6240_v45, %v5139_v7 }
 0x9cc   : > { %5283 = vst [vmem:[%s9848_s21 + $0x48] sm:$0xff] %v5267_v33  ;;  %v5223_v1 = vmul.f32 %v5117_v38, %v9789_v2  ;;  %v5137_v28 = vsel %vm5136_vm5, %v6238_v32, %v5133_v17 }
 0x9cd   : > { %v5141_v20 = vmul.f32 0.5, %v5140_v43  ;;  %v5225_v5 = vmul.f32 %v5137_v28, %v9792_v48 }
 0x9ce   : > { %v5243_v59 = vmul.f32 %v9834_v21, %v5223_v1 }
 0x9cf   : > { %v5142_v4 = vsub.f32 1.5, %v5141_v20  ;;  %v5245_v56 = vmul.f32 %v9834_v21, %v5225_v5 }
 0x9d0   : > { %v5263_v49 = vadd.f32 %v9839_v50, %v5243_v59 }
 0x9d1   : > { %v5143_v52 = vmul.f32 %v6240_v45, %v5142_v4  ;;  %v5265_v2 = vadd.f32 %v9839_v50, %v5245_v56 }
 0x9d2   : > { %5279 = vst [vmem:[%s9848_s21 + $0x28] sm:$0xff] %v5263_v49 }
 0x9d3   : > { %v5147_v41 = vsel %vm5146_vm9, %v6240_v45, %v5143_v52  ;;  %5281 = vst [vmem:[%s9848_s21 + $0x38] sm:$0xff] %v5265_v2 }
 0x9d4   : > { %v5226_v57 = vmul.f32 %v5147_v41, %v9800_v61 }
 0x9d6   : > { %v5246_v14 = vmul.f32 %v9834_v21, %v5226_v57 }
 0x9d8   : > { %v5266_v48 = vadd.f32 %v9839_v50, %v5246_v14 }
 0x9d9   : > { %v5015_v11 = vpop.xlane.xlu0 %5014 }
 0x9da   : > { %5282 = vst [vmem:[%s9848_s21 + $0x40] sm:$0xff] %v5266_v48  ;;  %v5036_v54 = vmul.f32 %v5015_v11, %v9025_v35 }
 0x9dc   : > { %v5052_v55 = vadd.f32 1e-05, %v5036_v54 }
 0x9de   : > { %6241 = vrsqrt.f32 %v5052_v55  ;;  %vm5164_vm10 = vweird.f32 %v5052_v55 }
 0x9e1   : > { %v5017_v44 = vpop.xlane.xlu1 %5016 }
 0x9e2   : > { %v5037_v37 = vmul.f32 %v5017_v44, %v9025_v35 }
 0x9e4   : > { %v6242_v23 = vpop.eup %6241  ;;  %v5053_v36 = vadd.f32 1e-05, %v5037_v37 }
 0x9e5   : > { %v5159_v24 = vmul.f32 %v6242_v23, %v5052_v55  ;;  %vm5165_vm8 = vweird.f32 %v6242_v23 }
 0x9e6   : > { %6243 = vrsqrt.f32 %v5053_v36  ;;  %vm5166_vm0 = vmor %vm5164_vm10, %vm5165_vm8  ;;  %vm5174_vm12 = vweird.f32 %v5053_v36 }
 0x9e7   : > { %v5160_v46 = vmul.f32 %v6242_v23, %v5159_v24 }
 0x9e9   : > { %v5161_v25 = vmul.f32 0.5, %v5160_v46  ;;  %v5019_v61 = vpop.xlane.xlu2 %5018 }
 0x9ea   : > { %v5038_v27 = vmul.f32 %v5019_v61, %v9025_v35 }
 0x9eb   : > { %v5162_v47 = vsub.f32 1.5, %v5161_v25 }
 0x9ec   : > { %v6244_v32 = vpop.eup %6243  ;;  %v5054_v9 = vadd.f32 1e-05, %v5038_v27 }
 0x9ed   : > { %v5163_v60 = vmul.f32 %v6242_v23, %v5162_v47  ;;  %v5169_v29 = vmul.f32 %v6244_v32, %v5053_v36  ;;  %vm5175_vm11 = vweird.f32 %v6244_v32 }
 0x9ee   : > { %6245 = vrsqrt.f32 %v5054_v9  ;;  %vm5176_vm13 = vmor %vm5174_vm12, %vm5175_vm11  ;;  %vm5184_vm15 = vweird.f32 %v5054_v9 }
 0x9ef   : > { %v5167_v40 = vsel %vm5166_vm0, %v6242_v23, %v5163_v60  ;;  %v5170_v42 = vmul.f32 %v6244_v32, %v5169_v29 }
 0x9f0   : > { %v5228_v19 = vmul.f32 %v5167_v40, %v9806_v15 }
 0x9f1   : > { %v5171_v58 = vmul.f32 0.5, %v5170_v42  ;;  %v5021_v6 = vpop.xlane.xlu0 %5020 }
 0x9f2   : > { %v5248_v39 = vmul.f32 %v9834_v21, %v5228_v19  ;;  %v5039_v10 = vmul.f32 %v5021_v6, %v9025_v35 }
 0x9f3   : > { %v5172_v63 = vsub.f32 1.5, %v5171_v58 }
 0x9f4   : > { %v6246_v3 = vpop.eup %6245  ;;  %v5268_v26 = vadd.f32 %v9839_v50, %v5248_v39  ;;  %v5055_v12 = vadd.f32 1e-05, %v5039_v10 }
 0x9f5   : > { %v5173_v18 = vmul.f32 %v6244_v32, %v5172_v63  ;;  %v5179_v16 = vmul.f32 %v6246_v3, %v5054_v9  ;;  %vm5185_vm14 = vweird.f32 %v6246_v3 }
 0x9f6   : > { %5284 = vst [vmem:[%s9848_s21 + $0x50] sm:$0xff] %v5268_v26  ;;  %6247 = vrsqrt.f32 %v5055_v12  ;;  %vm5186_vm1 = vmor %vm5184_vm15, %vm5185_vm14  ;;  %vm5194_vm3 = vweird.f32 %v5055_v12 }
 0x9f7   : > { %v5177_v15 = vsel %vm5176_vm13, %v6244_v32, %v5173_v18  ;;  %v5180_v45 = vmul.f32 %v6246_v3, %v5179_v16 }
 0x9f8   : > { %v5229_v62 = vmul.f32 %v5177_v15, %v9812_v0 }
 0x9f9   : > { %v5181_v34 = vmul.f32 0.5, %v5180_v45 }
 0x9fa   : > { %v5249_v51 = vmul.f32 %v9834_v21, %v5229_v62 }
 0x9fb   : > { %v5182_v30 = vsub.f32 1.5, %v5181_v34 }
 0x9fc   : > { %v6248_v13 = vpop.eup %6247  ;;  %v5269_v7 = vadd.f32 %v9839_v50, %v5249_v51 }
 0x9fd   : > { %v5183_v33 = vmul.f32 %v6246_v3, %v5182_v30  ;;  %v5189_v38 = vmul.f32 %v6248_v13, %v5055_v12  ;;  %vm5195_vm2 = vweird.f32 %v6248_v13 }
 0x9fe   : > { %5285 = vst [vmem:[%s9848_s21 + $0x58] sm:$0xff] %v5269_v7  ;;  %vm5196_vm4 = vmor %vm5194_vm3, %vm5195_vm2 }
 0x9ff   : > { %v5187_v17 = vsel %vm5186_vm1, %v6246_v3, %v5183_v33  ;;  %v5190_v43 = vmul.f32 %v6248_v13, %v5189_v38 }
 0xa00   : > { %v5230_v1 = vmul.f32 %v5187_v17, %v9818_v8 }
 0xa01   : > { %v5191_v0 = vmul.f32 0.5, %v5190_v43 }
 0xa02   : > { %v5250_v28 = vmul.f32 %v9834_v21, %v5230_v1 }
 0xa03   : > { %v5192_v20 = vsub.f32 1.5, %v5191_v0 }
 0xa04   : > { %v5270_v59 = vadd.f32 %v9839_v50, %v5250_v28 }
 0xa05   : > { %v5193_v5 = vmul.f32 %v6248_v13, %v5192_v20 }
 0xa06   : > { %5286 = vst [vmem:[%s9848_s21 + $0x60] sm:$0xff] %v5270_v59 }
 0xa07   : > { %v5197_v4 = vsel %vm5196_vm4, %v6248_v13, %v5193_v5 }
 0xa08   : > { %v5231_v49 = vmul.f32 %v5197_v4, %v9824_v31 }
 0xa0a   : > { %v5251_v56 = vmul.f32 %v9834_v21, %v5231_v49 }
 0xa0c   : > { %v5271_v52 = vadd.f32 %v9839_v50, %v5251_v56 }
 0xa0e   : > { %5287 = vst [vmem:[%s9848_s21 + $0x68] sm:$0xff] %v5271_v52 }
 0xa17   : > { %v5023_v8 = vpop.xlane.xlu1 %5022 }
 0xa18   : > { %v5040_v2 = vmul.f32 %v5023_v8, %v9025_v35 }
 0xa1a   : > { %v5056_v41 = vadd.f32 1e-05, %v5040_v2 }
 0xa1c   : > { %6249 = vrsqrt.f32 %v5056_v41  ;;  %vm5204_vm7 = vweird.f32 %v5056_v41 }
 0xa1f   : > { %v5025_v57 = vpop.xlane.xlu2 %5024 }
 0xa20   : > { %v5041_v14 = vmul.f32 %v5025_v57, %v9025_v35 }
 0xa22   : > { %v6250_v48 = vpop.eup %6249  ;;  %v5057_v11 = vadd.f32 1e-05, %v5041_v14 }
 0xa23   : > { %v5199_v54 = vmul.f32 %v6250_v48, %v5056_v41  ;;  %vm5205_vm5 = vweird.f32 %v6250_v48 }
 0xa24   : > { %6251 = vrsqrt.f32 %v5057_v11  ;;  %vm5206_vm6 = vmor %vm5204_vm7, %vm5205_vm5  ;;  %vm5214_vm8 = vweird.f32 %v5057_v11 }
 0xa25   : > { %v5200_v55 = vmul.f32 %v6250_v48, %v5199_v54 }
 0xa27   : > { %v5201_v44 = vmul.f32 0.5, %v5200_v55 }
 0xa29   : > { %v5202_v31 = vsub.f32 1.5, %v5201_v44 }
 0xa2a   : > { %v6252_v37 = vpop.eup %6251 }
 0xa2b   : > { %v5203_v23 = vmul.f32 %v6250_v48, %v5202_v31  ;;  %v5209_v36 = vmul.f32 %v6252_v37, %v5057_v11  ;;  %vm5215_vm9 = vweird.f32 %v6252_v37 }
 0xa2c   : > { %vm5216_vm10 = vmor %vm5214_vm8, %vm5215_vm9 }
 0xa2d   : > { %v5207_v24 = vsel %vm5206_vm6, %v6250_v48, %v5203_v23  ;;  %v5210_v46 = vmul.f32 %v6252_v37, %v5209_v36 }
 0xa2e   : > { %v5232_v25 = vmul.f32 %v5207_v24, %v9854_v53 }
 0xa2f   : > { %v5211_v35 = vmul.f32 0.5, %v5210_v46 }
 0xa30   : > { %v5252_v61 = vmul.f32 %v9834_v21, %v5232_v25 }
 0xa31   : > { %v5212_v27 = vsub.f32 1.5, %v5211_v35 }
 0xa32   : > { %v5272_v47 = vadd.f32 %v9839_v50, %v5252_v61 }
 0xa33   : > { %v5213_v32 = vmul.f32 %v6252_v37, %v5212_v27 }
 0xa34   : > { %5288 = vst [vmem:[%s9848_s21 + $0x70] sm:$0xff] %v5272_v47 }
 0xa35   : > { %v5217_v9 = vsel %vm5216_vm10, %v6252_v37, %v5213_v32 }
 0xa36   : > { %v5233_v60 = vmul.f32 %v5217_v9, %v9865_v22 }
 0xa38   : > { %v5253_v29 = vmul.f32 %v9834_v21, %v5233_v60 }
 0xa3a   : > { %v5273_v40 = vadd.f32 %v9839_v50, %v5253_v29 }
 0xa3c   : > { %5289 = vst [vmem:[%s9848_s21 + $0x78] sm:$0xff] %v5273_v40 }
 0xa3d PF: > { %s33_s22 = sadd.s32 1, %s6289_s22  }
 0xa3e   : > { %p30_p5 = scmp.ge.s32.totalorder %s33_s22, 6  }
 0xa40   :  { %32 = sbr.rel (!%p30_p5) target bundleno = 7 (0x7), region = 109 }

</bundles_post_ra>
